<compile_context>
chip_gen: v7x
topology: tpu7x:2x2x1
jax: 0.10.0
libtpu: 0.0.40
codegen_flags: <defaults>
</compile_context>

<pallas_src>
import functools

import jax
import jax.numpy as jnp
import numpy as np
from jax import lax
from jax.experimental import pallas as pl
from jax.experimental.pallas import tpu as pltpu

# ----------------------------------------------------------------------------
# Static geometry (spec: 32x32x3 input so that fc1 sees 36*6*6 = 1296 features)
# ----------------------------------------------------------------------------
H = W = 32
C0, K1, C1 = 3, 5, 16            # conv1: 3 -> 16, k=5 (valid)
K2, C2 = 3, 36                   # conv2: 16 -> 36, k=3 (valid)
F1, F2, F2P = 128, 10, 128       # fc1 width, fc2 width, fc2 padded to 128 lanes

H1 = W1 = H - K1 + 1             # 28   conv1 output extent
P1 = H1 // 2                     # 14   pool1 output extent
H2 = P1 - K2 + 1                 # 12   conv2 output extent
P2 = H2 // 2                     # 6    pool2 output extent
R1 = H1 * W1                     # 784  dense conv1 rows (row = 28*i + j)
RQ = P1 * P1                     # 196  dense pool1 rows (row = 14*p + q)
R2 = P1 * (H2 - 1) + H2          # 166  conv2 rows on the 14-wide grid (row = 14*s + t)
NPOS = P2 * P2                   # 36   pool2 positions
KCOL1 = K1 * K1 * C0             # 75   conv1 im2col contraction depth
KG2 = K2 * C1                    # 48   conv2 per-kh-group contraction depth
CH1 = 196                        # conv1 row chunk (accumulator = 25 f32 vregs)

assert R1 % CH1 == 0 and R1 == 784 and RQ == 196 and R2 == 166 and NPOS == 36


# ----------------------------------------------------------------------------
# The fused Pallas kernel (one grid step == TB samples)
# ----------------------------------------------------------------------------
def _cnn_fused_kernel(tb,
                      x_ref, w1_ref, b1_ref, w2_ref, b2_ref,
                      fc1w_ref, fc1b_ref, fc2w_ref, fc2b_ref,
                      out_ref,
                      a_scr, qd_scr, b_scr, q2_scr):
    f32, bf16 = jnp.float32, jnp.bfloat16

    for s in range(tb):                      # static unroll over the sample block
        # ---- conv1 + bias + ReLU: one fat-K (75) matmul per 196-row chunk ----------
        # LHS is the wrapper-built dense im2col, so there are no tap loops, no staging
        # and no large register accumulator (chunk result is 25 f32 vregs).
        for c in range(R1 // CH1):
            lhs = x_ref[s, pl.ds(c * CH1, CH1), :]                      # (196, 75) bf16
            acc = jnp.dot(lhs, w1_ref[...], preferred_element_type=f32)  # (196, 16) f32
            a_scr[pl.ds(c * CH1, CH1), :] = jnp.maximum(acc + b1_ref[...], 0.0)

        # ---- pool1 (2x2 / stride 2) fused with compaction to a DENSE 14x14 grid ----
        # qd[14p + q] = max over conv1 rows {56p+2q, +1, +28, +29}  (strided reads).
        for p in range(P1):
            r0 = a_scr[pl.ds(2 * W1 * p,          P1, stride=2), :]
            r1 = a_scr[pl.ds(2 * W1 * p + 1,      P1, stride=2), :]
            r2 = a_scr[pl.ds(2 * W1 * p + W1,     P1, stride=2), :]
            r3 = a_scr[pl.ds(2 * W1 * p + W1 + 1, P1, stride=2), :]
            qd_scr[pl.ds(P1 * p, P1), :] = jnp.maximum(jnp.maximum(r0, r1),
                                                       jnp.maximum(r2, r3))

        # ---- conv2 + bias + ReLU: 3 fat-K (=48) groups on the dense grid ------------
        # For each kh, lane-concatenate the 3 kw-shifted slices -> (166, 48) LHS and do
        # ONE matmul.  Accumulator is (166, 36) f32 = 21 vregs (no spill).
        acc2 = None
        for kh in range(K2):
            parts = [qd_scr[pl.ds(P1 * kh + kw, R2), :] for kw in range(K2)]
            lhs = jnp.concatenate(parts, axis=1).astype(bf16)           # (166, 48)
            d = jnp.dot(lhs, w2_ref[kh], preferred_element_type=f32)    # (166, 36)
            acc2 = d if acc2 is None else acc2 + d
        b_scr[...] = jnp.maximum(acc2 + b2_ref[...], 0.0)
        # Rows with t >= 12 of the 14-wide grid are garbage; pool2 below never reads
        # them (column index 2t+dw <= 11).

        # ---- pool2 fused with compaction to a dense (36, 36) tile per sample --------
        # q2[36*s + 6*sp + t] = max over conv2 rows {28sp+2t, +1, +14, +15}.
        for sp in range(P2):
            r0 = b_scr[pl.ds(2 * P1 * sp,          P2, stride=2), :]
            r1 = b_scr[pl.ds(2 * P1 * sp + 1,      P2, stride=2), :]
            r2 = b_scr[pl.ds(2 * P1 * sp + P1,     P2, stride=2), :]
            r3 = b_scr[pl.ds(2 * P1 * sp + P1 + 1, P2, stride=2), :]
            q2_scr[pl.ds(NPOS * s + P2 * sp, P2), :] = jnp.maximum(
                jnp.maximum(r0, r1), jnp.maximum(r2, r3))

    # ---- fc1 + ReLU, batched over the TB samples ------------------------------------
    # q2 is already a contiguous dense gather; each position contributes a
    # (TB, 36) x (36, 128) dot (RHS reload amortized over the batch, never M=1).
    acc = jnp.zeros((tb, F1), jnp.float32)
    for pos in range(NPOS):
        rows = q2_scr[pl.ds(pos, tb, stride=NPOS), :].astype(jnp.bfloat16)   # (tb, 36)
        acc = acc + jnp.dot(rows, fc1w_ref[pos], preferred_element_type=f32)
    h = jnp.maximum(acc + fc1b_ref[...], 0.0).astype(jnp.bfloat16)           # (tb, 128)

    # ---- fc2 + ReLU (final ReLU is in the PyTorch spec); lane-dense (tb,128) store --
    logits = jnp.dot(h, fc2w_ref[...], preferred_element_type=f32) + fc2b_ref[...]
    out_ref[...] = jnp.maximum(logits, 0.0)


# ----------------------------------------------------------------------------
# Wrapper: one pallas_call for the whole network, TB samples per grid step
# ----------------------------------------------------------------------------
def cnn_forward(x, kp):
    """x: (N, 3, 32, 32) f32, kp: kernel-layout params (see prepare_kernel_params)."""
    n = x.shape[0]
    # TB=8 amortizes per-grid-step overhead and keeps grid>=2 for the v7x 2-TC split on
    # real batches; odd small batches fall back to a single grid step (block = full dim).
    tb = 8 if n % 8 == 0 else n

    # Wrapper-side dense im2col for conv1 (layout plumbing only, ~150 KB bf16/sample):
    # row = 28*i + j, column = (kh*5 + kw)*3 + c  ==  x[i+kh, j+kw, c].
    x_nhwc = jnp.transpose(x, (0, 2, 3, 1))                              # (N,32,32,3)
    taps = [x_nhwc[:, kh:kh + H1, kw:kw + W1, :]
            for kh in range(K1) for kw in range(K1)]
    x_cols = jnp.stack(taps, axis=3).reshape(n, R1, KCOL1).astype(jnp.bfloat16)

    kernel = functools.partial(_cnn_fused_kernel, tb)
    out = pl.pallas_call(
        kernel,
        out_shape=jax.ShapeDtypeStruct((n, F2P), jnp.float32),
        grid=(n // tb,),
        in_specs=[
            pl.BlockSpec((tb, R1, KCOL1), lambda i: (i, 0, 0)),          # im2col input
            pl.BlockSpec((KCOL1, C1), lambda i: (0, 0)),                 # conv1 w (75,16)
            pl.BlockSpec((1, C1), lambda i: (0, 0)),                     # conv1 b
            pl.BlockSpec((K2, KG2, C2), lambda i: (0, 0, 0)),            # conv2 w (3,48,36)
            pl.BlockSpec((1, C2), lambda i: (0, 0)),                     # conv2 b
            pl.BlockSpec((NPOS, C2, F1), lambda i: (0, 0, 0)),           # fc1 w (permuted)
            pl.BlockSpec((1, F1), lambda i: (0, 0)),                     # fc1 b
            pl.BlockSpec((F1, F2P), lambda i: (0, 0)),                   # fc2 w (padded)
            pl.BlockSpec((1, F2P), lambda i: (0, 0)),                    # fc2 b (padded)
        ],
        out_specs=pl.BlockSpec((tb, F2P), lambda i: (i, 0)),
        scratch_shapes=[
            pltpu.VMEM((R1, C1), jnp.float32),        # conv1 out (dense 28x28 grid)
            pltpu.VMEM((RQ, C1), jnp.float32),        # pool1 out (dense 14x14 grid)
            pltpu.VMEM((R2, C2), jnp.float32),        # conv2 out (14-wide grid)
            pltpu.VMEM((NPOS * tb, C2), jnp.float32), # pool2 out, all TB samples
        ],
        compiler_params=pltpu.CompilerParams(
            dimension_semantics=("parallel",),
            vmem_limit_bytes=32 * 1024 * 1024),       # ~2.5 MiB used; safe on 64 MiB v7x
    )(x_cols, kp["w1"], kp["b1"], kp["w2"], kp["b2"],
      kp["fc1_w"], kp["fc1_b"], kp["fc2_w"], kp["fc2_b"])

    return out[:, :F2]


# ----------------------------------------------------------------------------
# One-time weight layout conversion (torch layout -> kernel layout)
# ----------------------------------------------------------------------------
def prepare_kernel_params(params):
    bf16, f32 = jnp.bfloat16, jnp.float32
    # conv1: (16,3,5,5) -> (75,16), row = (kh*5+kw)*3 + cin  (matches im2col columns).
    w1 = params["w1"].transpose(2, 3, 1, 0).reshape(KCOL1, C1).astype(bf16)
    # conv2: (36,16,3,3) -> (3, 48, 36), [kh, kw*16 + cin, cout]  (matches lane concat).
    w2 = params["w2"].transpose(2, 3, 1, 0).reshape(K2, KG2, C2).astype(bf16)
    # fc1: torch feature index is c*36 + 6s + t (NCHW flatten).  Permute once into
    # per-spatial-position slices [(6s+t), c, j] matching the dense pool2 tile.
    fc1_w = (params["fc1_w"].reshape(F1, C2, P2, P2)
             .transpose(2, 3, 1, 0).reshape(NPOS, C2, F1).astype(bf16))
    # fc2: transpose and zero-pad 10 -> 128 output columns (lane-dense store).
    fc2_w = jnp.zeros((F1, F2P), f32).at[:, :F2].set(params["fc2_w"].T).astype(bf16)
    fc2_b = jnp.zeros((1, F2P), f32).at[0, :F2].set(params["fc2_b"])
    return {
        "w1": w1, "b1": params["b1"].reshape(1, C1).astype(f32),
        "w2": w2, "b2": params["b2"].reshape(1, C2).astype(f32),
        "fc1_w": fc1_w, "fc1_b": params["fc1_b"].reshape(1, F1).astype(f32),
        "fc2_w": fc2_w, "fc2_b": fc2_b,
    }


# ----------------------------------------------------------------------------
# Deterministic parameter init (PyTorch-style uniform(-1/sqrt(fan_in), +)), torch layout
# ----------------------------------------------------------------------------
def init_params(key):
    def uni(k, shape, fan_in):
        bound = 1.0 / jnp.sqrt(fan_in)
        return jax.random.uniform(k, shape, jnp.float32, -bound, bound)

    ks = jax.random.split(key, 8)
    return {
        "w1": uni(ks[0], (C1, C0, K1, K1), C0 * K1 * K1),
        "b1": uni(ks[1], (C1,), C0 * K1 * K1),
        "w2": uni(ks[2], (C2, C1, K2, K2), C1 * K2 * K2),
        "b2": uni(ks[3], (C2,), C1 * K2 * K2),
        "fc1_w": uni(ks[4], (F1, 1296), 1296),
        "fc1_b": uni(ks[5], (F1,), 1296),
        "fc2_w": uni(ks[6], (F2, F1), F1),
        "fc2_b": uni(ks[7], (F2,), F1),
    }


# ----------------------------------------------------------------------------
# Pure-XLA reference (PyTorch semantics) -- used only for the self-check below
# ----------------------------------------------------------------------------
def reference_forward(x, params):
    dn = ("NCHW", "OIHW", "NCHW")
    y = lax.conv_general_dilated(x, params["w1"], (1, 1), "VALID", dimension_numbers=dn)
    y = jnp.maximum(y + params["b1"][None, :, None, None], 0.0)
    y = lax.reduce_window(y, -jnp.inf, lax.max, (1, 1, 2, 2), (1, 1, 2, 2), "VALID")
    y = lax.conv_general_dilated(y, params["w2"], (1, 1), "VALID", dimension_numbers=dn)
    y = jnp.maximum(y + params["b2"][None, :, None, None], 0.0)
    y = lax.reduce_window(y, -jnp.inf, lax.max, (1, 1, 2, 2), (1, 1, 2, 2), "VALID")
    y = y.reshape(y.shape[0], -1)                       # == torch x.view(-1, 36*6*6)
    y = jnp.maximum(y @ params["fc1_w"].T + params["fc1_b"], 0.0)
    y = jnp.maximum(y @ params["fc2_w"].T + params["fc2_b"], 0.0)
    return y


if __name__ == "__main__":
    key = jax.random.PRNGKey(0)
    k_x, k_p = jax.random.split(key)
    # 32x32 spatial / 3 channels are required by the module (fc1 expects 36*6*6 = 1296).
    x = jax.random.normal(k_x, (2, 3, 32, 32), dtype=jnp.float32)
    params = init_params(k_p)
    kparams = prepare_kernel_params(params)   # one-time layout permutation of the weights

    fwd = jax.jit(cnn_forward)
    out = jax.block_until_ready(fwd(x, kparams))
    assert out.shape == (2, 10) and out.dtype == jnp.float32

    # Self-check against the pure-XLA reference (bf16 MXU operands -> loose tolerance).
    ref = jax.block_until_ready(jax.jit(reference_forward)(x, params))
    np.testing.assert_allclose(np.asarray(out), np.asarray(ref), rtol=1e-1, atol=1e-1)

    print("KERNEL_OK")
</pallas_src>

<mosaic_0001>
module attributes {stable_mosaic.version = 11 : i64} {
  func.func @_cnn_fused_kernel(%arg0: i32, %arg1: memref<2x784x75xbf16, #tpu.memory_space<vmem>>, %arg2: memref<75x16xbf16, #tpu.memory_space<vmem>>, %arg3: memref<1x16xf32, #tpu.memory_space<vmem>>, %arg4: memref<3x48x36xbf16, #tpu.memory_space<vmem>>, %arg5: memref<1x36xf32, #tpu.memory_space<vmem>>, %arg6: memref<36x36x128xbf16, #tpu.memory_space<vmem>>, %arg7: memref<1x128xf32, #tpu.memory_space<vmem>>, %arg8: memref<128x128xbf16, #tpu.memory_space<vmem>>, %arg9: memref<1x128xf32, #tpu.memory_space<vmem>>, %arg10: memref<2x128xf32, #tpu.memory_space<vmem>>, %arg11: memref<784x16xf32, #tpu.memory_space<vmem>>, %arg12: memref<196x16xf32, #tpu.memory_space<vmem>>, %arg13: memref<166x36xf32, #tpu.memory_space<vmem>>, %arg14: memref<72x36xf32, #tpu.memory_space<vmem>>) attributes {dimension_semantics = [#tpu.dimension_semantics<parallel>], iteration_bounds = array<i64: 1>, scalar_prefetch = 0 : i64, scratch_operands = 4 : i64, tpu.core_type = #tpu.core_type<tc>, window_params = [{transform_indices = @transform_0, window_bounds = array<i64: 2, 784, 75>}, {pipeline_mode = #tpu.pipeline_mode<synchronous>, transform_indices = @transform_1, window_bounds = array<i64: 75, 16>}, {pipeline_mode = #tpu.pipeline_mode<synchronous>, transform_indices = @transform_2, window_bounds = array<i64: 1, 16>}, {pipeline_mode = #tpu.pipeline_mode<synchronous>, transform_indices = @transform_3, window_bounds = array<i64: 3, 48, 36>}, {pipeline_mode = #tpu.pipeline_mode<synchronous>, transform_indices = @transform_4, window_bounds = array<i64: 1, 36>}, {pipeline_mode = #tpu.pipeline_mode<synchronous>, transform_indices = @transform_5, window_bounds = array<i64: 36, 36, 128>}, {pipeline_mode = #tpu.pipeline_mode<synchronous>, transform_indices = @transform_6, window_bounds = array<i64: 1, 128>}, {pipeline_mode = #tpu.pipeline_mode<synchronous>, transform_indices = @transform_7, window_bounds = array<i64: 128, 128>}, {pipeline_mode = #tpu.pipeline_mode<synchronous>, transform_indices = @transform_8, window_bounds = array<i64: 1, 128>}, {transform_indices = @transform_9, window_bounds = array<i64: 2, 128>}]} {
    %c0 = arith.constant 0 : index
    %c0_0 = arith.constant 0 : index
    %c0_1 = arith.constant 0 : index
    %0 = vector.load %arg1[%c0, %c0_0, %c0_1] : memref<2x784x75xbf16, #tpu.memory_space<vmem>>, vector<1x196x75xbf16>
    %1 = vector.shape_cast %0 : vector<1x196x75xbf16> to vector<196x75xbf16>
    %c0_2 = arith.constant 0 : index
    %c0_3 = arith.constant 0 : index
    %2 = vector.load %arg2[%c0_2, %c0_3] : memref<75x16xbf16, #tpu.memory_space<vmem>>, vector<75x16xbf16>
    %cst = arith.constant dense<0.000000e+00> : vector<196x16xf32>
    %3 = tpu.matmul %1, %2, %cst {dimension_numbers = #tpu.dot_dimension_numbers<[1], [0], [0], [1], [0, 0, 1, 1], [], []>} : vector<196x75xbf16>, vector<75x16xbf16>, vector<196x16xf32> -> vector<196x16xf32>
    %c0_4 = arith.constant 0 : index
    %c0_5 = arith.constant 0 : index
    %4 = vector.load %arg3[%c0_4, %c0_5] : memref<1x16xf32, #tpu.memory_space<vmem>>, vector<1x16xf32>
    %5 = vector.broadcast %4 : vector<1x16xf32> to vector<196x16xf32>
    %6 = arith.addf %3, %5 : vector<196x16xf32>
    %cst_6 = arith.constant 0.000000e+00 : f32
    %7 = vector.broadcast %cst_6 : f32 to vector<196x16xf32>
    %8 = arith.maximumf %6, %7 : vector<196x16xf32>
    %c0_7 = arith.constant 0 : index
    %c0_8 = arith.constant 0 : index
    %9 = vector.load %arg11[%c0_7, %c0_8] : memref<784x16xf32, #tpu.memory_space<vmem>>, vector<196x16xf32>
    tpu.vector_store %arg11[%c0_7, %c0_8], %8 {strides = array<i32>} : memref<784x16xf32, #tpu.memory_space<vmem>>, vector<196x16xf32>,
    %c0_9 = arith.constant 0 : index
    %c196 = arith.constant 196 : index
    %c0_10 = arith.constant 0 : index
    %10 = vector.load %arg1[%c0_9, %c196, %c0_10] : memref<2x784x75xbf16, #tpu.memory_space<vmem>>, vector<1x196x75xbf16>
    %11 = vector.shape_cast %10 : vector<1x196x75xbf16> to vector<196x75xbf16>
    %c0_11 = arith.constant 0 : index
    %c0_12 = arith.constant 0 : index
    %12 = vector.load %arg2[%c0_11, %c0_12] : memref<75x16xbf16, #tpu.memory_space<vmem>>, vector<75x16xbf16>
    %cst_13 = arith.constant dense<0.000000e+00> : vector<196x16xf32>
    %13 = tpu.matmul %11, %12, %cst_13 {dimension_numbers = #tpu.dot_dimension_numbers<[1], [0], [0], [1], [0, 0, 1, 1], [], []>} : vector<196x75xbf16>, vector<75x16xbf16>, vector<196x16xf32> -> vector<196x16xf32>
    %c0_14 = arith.constant 0 : index
    %c0_15 = arith.constant 0 : index
    %14 = vector.load %arg3[%c0_14, %c0_15] : memref<1x16xf32, #tpu.memory_space<vmem>>, vector<1x16xf32>
    %15 = vector.broadcast %14 : vector<1x16xf32> to vector<196x16xf32>
    %16 = arith.addf %13, %15 : vector<196x16xf32>
    %cst_16 = arith.constant 0.000000e+00 : f32
    %17 = vector.broadcast %cst_16 : f32 to vector<196x16xf32>
    %18 = arith.maximumf %16, %17 : vector<196x16xf32>
    %c196_17 = arith.constant 196 : index
    %c0_18 = arith.constant 0 : index
    %19 = vector.load %arg11[%c196_17, %c0_18] : memref<784x16xf32, #tpu.memory_space<vmem>>, vector<196x16xf32>
    tpu.vector_store %arg11[%c196_17, %c0_18], %18 {strides = array<i32>} : memref<784x16xf32, #tpu.memory_space<vmem>>, vector<196x16xf32>,
    %c0_19 = arith.constant 0 : index
    %c392 = arith.constant 392 : index
    %c0_20 = arith.constant 0 : index
    %20 = vector.load %arg1[%c0_19, %c392, %c0_20] : memref<2x784x75xbf16, #tpu.memory_space<vmem>>, vector<1x196x75xbf16>
    %21 = vector.shape_cast %20 : vector<1x196x75xbf16> to vector<196x75xbf16>
    %c0_21 = arith.constant 0 : index
    %c0_22 = arith.constant 0 : index
    %22 = vector.load %arg2[%c0_21, %c0_22] : memref<75x16xbf16, #tpu.memory_space<vmem>>, vector<75x16xbf16>
    %cst_23 = arith.constant dense<0.000000e+00> : vector<196x16xf32>
    %23 = tpu.matmul %21, %22, %cst_23 {dimension_numbers = #tpu.dot_dimension_numbers<[1], [0], [0], [1], [0, 0, 1, 1], [], []>} : vector<196x75xbf16>, vector<75x16xbf16>, vector<196x16xf32> -> vector<196x16xf32>
    %c0_24 = arith.constant 0 : index
    %c0_25 = arith.constant 0 : index
    %24 = vector.load %arg3[%c0_24, %c0_25] : memref<1x16xf32, #tpu.memory_space<vmem>>, vector<1x16xf32>
    %25 = vector.broadcast %24 : vector<1x16xf32> to vector<196x16xf32>
    %26 = arith.addf %23, %25 : vector<196x16xf32>
    %cst_26 = arith.constant 0.000000e+00 : f32
    %27 = vector.broadcast %cst_26 : f32 to vector<196x16xf32>
    %28 = arith.maximumf %26, %27 : vector<196x16xf32>
    %c392_27 = arith.constant 392 : index
    %c0_28 = arith.constant 0 : index
    %29 = vector.load %arg11[%c392_27, %c0_28] : memref<784x16xf32, #tpu.memory_space<vmem>>, vector<196x16xf32>
    tpu.vector_store %arg11[%c392_27, %c0_28], %28 {strides = array<i32>} : memref<784x16xf32, #tpu.memory_space<vmem>>, vector<196x16xf32>,
    %c0_29 = arith.constant 0 : index
    %c588 = arith.constant 588 : index
    %c0_30 = arith.constant 0 : index
    %30 = vector.load %arg1[%c0_29, %c588, %c0_30] : memref<2x784x75xbf16, #tpu.memory_space<vmem>>, vector<1x196x75xbf16>
    %31 = vector.shape_cast %30 : vector<1x196x75xbf16> to vector<196x75xbf16>
    %c0_31 = arith.constant 0 : index
    %c0_32 = arith.constant 0 : index
    %32 = vector.load %arg2[%c0_31, %c0_32] : memref<75x16xbf16, #tpu.memory_space<vmem>>, vector<75x16xbf16>
    %cst_33 = arith.constant dense<0.000000e+00> : vector<196x16xf32>
    %33 = tpu.matmul %31, %32, %cst_33 {dimension_numbers = #tpu.dot_dimension_numbers<[1], [0], [0], [1], [0, 0, 1, 1], [], []>} : vector<196x75xbf16>, vector<75x16xbf16>, vector<196x16xf32> -> vector<196x16xf32>
    %c0_34 = arith.constant 0 : index
    %c0_35 = arith.constant 0 : index
    %34 = vector.load %arg3[%c0_34, %c0_35] : memref<1x16xf32, #tpu.memory_space<vmem>>, vector<1x16xf32>
    %35 = vector.broadcast %34 : vector<1x16xf32> to vector<196x16xf32>
    %36 = arith.addf %33, %35 : vector<196x16xf32>
    %cst_36 = arith.constant 0.000000e+00 : f32
    %37 = vector.broadcast %cst_36 : f32 to vector<196x16xf32>
    %38 = arith.maximumf %36, %37 : vector<196x16xf32>
    %c588_37 = arith.constant 588 : index
    %c0_38 = arith.constant 0 : index
    %39 = vector.load %arg11[%c588_37, %c0_38] : memref<784x16xf32, #tpu.memory_space<vmem>>, vector<196x16xf32>
    tpu.vector_store %arg11[%c588_37, %c0_38], %38 {strides = array<i32>} : memref<784x16xf32, #tpu.memory_space<vmem>>, vector<196x16xf32>,
    %c0_39 = arith.constant 0 : index
    %c0_40 = arith.constant 0 : index
    %40 = tpu.strided_load %arg11[%c0_39, %c0_40] {strides = array<i32: 2, 1>} : memref<784x16xf32, #tpu.memory_space<vmem>>, vector<14x16xf32>
    %c1 = arith.constant 1 : index
    %c0_41 = arith.constant 0 : index
    %41 = tpu.strided_load %arg11[%c1, %c0_41] {strides = array<i32: 2, 1>} : memref<784x16xf32, #tpu.memory_space<vmem>>, vector<14x16xf32>
    %c28 = arith.constant 28 : index
    %c0_42 = arith.constant 0 : index
    %42 = tpu.strided_load %arg11[%c28, %c0_42] {strides = array<i32: 2, 1>} : memref<784x16xf32, #tpu.memory_space<vmem>>, vector<14x16xf32>
    %c29 = arith.constant 29 : index
    %c0_43 = arith.constant 0 : index
    %43 = tpu.strided_load %arg11[%c29, %c0_43] {strides = array<i32: 2, 1>} : memref<784x16xf32, #tpu.memory_space<vmem>>, vector<14x16xf32>
    %44 = arith.maximumf %40, %41 : vector<14x16xf32>
    %45 = arith.maximumf %42, %43 : vector<14x16xf32>
    %46 = arith.maximumf %44, %45 : vector<14x16xf32>
    %c0_44 = arith.constant 0 : index
    %c0_45 = arith.constant 0 : index
    %47 = vector.load %arg12[%c0_44, %c0_45] : memref<196x16xf32, #tpu.memory_space<vmem>>, vector<14x16xf32>
    tpu.vector_store %arg12[%c0_44, %c0_45], %46 {strides = array<i32>} : memref<196x16xf32, #tpu.memory_space<vmem>>, vector<14x16xf32>,
    %c56 = arith.constant 56 : index
    %c0_46 = arith.constant 0 : index
    %48 = tpu.strided_load %arg11[%c56, %c0_46] {strides = array<i32: 2, 1>} : memref<784x16xf32, #tpu.memory_space<vmem>>, vector<14x16xf32>
    %c57 = arith.constant 57 : index
    %c0_47 = arith.constant 0 : index
    %49 = tpu.strided_load %arg11[%c57, %c0_47] {strides = array<i32: 2, 1>} : memref<784x16xf32, #tpu.memory_space<vmem>>, vector<14x16xf32>
    %c84 = arith.constant 84 : index
    %c0_48 = arith.constant 0 : index
    %50 = tpu.strided_load %arg11[%c84, %c0_48] {strides = array<i32: 2, 1>} : memref<784x16xf32, #tpu.memory_space<vmem>>, vector<14x16xf32>
    %c85 = arith.constant 85 : index
    %c0_49 = arith.constant 0 : index
    %51 = tpu.strided_load %arg11[%c85, %c0_49] {strides = array<i32: 2, 1>} : memref<784x16xf32, #tpu.memory_space<vmem>>, vector<14x16xf32>
    %52 = arith.maximumf %48, %49 : vector<14x16xf32>
    %53 = arith.maximumf %50, %51 : vector<14x16xf32>
    %54 = arith.maximumf %52, %53 : vector<14x16xf32>
    %c14 = arith.constant 14 : index
    %c0_50 = arith.constant 0 : index
    %55 = vector.load %arg12[%c14, %c0_50] : memref<196x16xf32, #tpu.memory_space<vmem>>, vector<14x16xf32>
    tpu.vector_store %arg12[%c14, %c0_50], %54 {strides = array<i32>} : memref<196x16xf32, #tpu.memory_space<vmem>>, vector<14x16xf32>,
    %c112 = arith.constant 112 : index
    %c0_51 = arith.constant 0 : index
    %56 = tpu.strided_load %arg11[%c112, %c0_51] {strides = array<i32: 2, 1>} : memref<784x16xf32, #tpu.memory_space<vmem>>, vector<14x16xf32>
    %c113 = arith.constant 113 : index
    %c0_52 = arith.constant 0 : index
    %57 = tpu.strided_load %arg11[%c113, %c0_52] {strides = array<i32: 2, 1>} : memref<784x16xf32, #tpu.memory_space<vmem>>, vector<14x16xf32>
    %c140 = arith.constant 140 : index
    %c0_53 = arith.constant 0 : index
    %58 = tpu.strided_load %arg11[%c140, %c0_53] {strides = array<i32: 2, 1>} : memref<784x16xf32, #tpu.memory_space<vmem>>, vector<14x16xf32>
    %c141 = arith.constant 141 : index
    %c0_54 = arith.constant 0 : index
    %59 = tpu.strided_load %arg11[%c141, %c0_54] {strides = array<i32: 2, 1>} : memref<784x16xf32, #tpu.memory_space<vmem>>, vector<14x16xf32>
    %60 = arith.maximumf %56, %57 : vector<14x16xf32>
    %61 = arith.maximumf %58, %59 : vector<14x16xf32>
    %62 = arith.maximumf %60, %61 : vector<14x16xf32>
    %c28_55 = arith.constant 28 : index
    %c0_56 = arith.constant 0 : index
    %63 = vector.load %arg12[%c28_55, %c0_56] : memref<196x16xf32, #tpu.memory_space<vmem>>, vector<14x16xf32>
    tpu.vector_store %arg12[%c28_55, %c0_56], %62 {strides = array<i32>} : memref<196x16xf32, #tpu.memory_space<vmem>>, vector<14x16xf32>,
    %c168 = arith.constant 168 : index
    %c0_57 = arith.constant 0 : index
    %64 = tpu.strided_load %arg11[%c168, %c0_57] {strides = array<i32: 2, 1>} : memref<784x16xf32, #tpu.memory_space<vmem>>, vector<14x16xf32>
    %c169 = arith.constant 169 : index
    %c0_58 = arith.constant 0 : index
    %65 = tpu.strided_load %arg11[%c169, %c0_58] {strides = array<i32: 2, 1>} : memref<784x16xf32, #tpu.memory_space<vmem>>, vector<14x16xf32>
    %c196_59 = arith.constant 196 : index
    %c0_60 = arith.constant 0 : index
    %66 = tpu.strided_load %arg11[%c196_59, %c0_60] {strides = array<i32: 2, 1>} : memref<784x16xf32, #tpu.memory_space<vmem>>, vector<14x16xf32>
    %c197 = arith.constant 197 : index
    %c0_61 = arith.constant 0 : index
    %67 = tpu.strided_load %arg11[%c197, %c0_61] {strides = array<i32: 2, 1>} : memref<784x16xf32, #tpu.memory_space<vmem>>, vector<14x16xf32>
    %68 = arith.maximumf %64, %65 : vector<14x16xf32>
    %69 = arith.maximumf %66, %67 : vector<14x16xf32>
    %70 = arith.maximumf %68, %69 : vector<14x16xf32>
    %c42 = arith.constant 42 : index
    %c0_62 = arith.constant 0 : index
    %71 = vector.load %arg12[%c42, %c0_62] : memref<196x16xf32, #tpu.memory_space<vmem>>, vector<14x16xf32>
    tpu.vector_store %arg12[%c42, %c0_62], %70 {strides = array<i32>} : memref<196x16xf32, #tpu.memory_space<vmem>>, vector<14x16xf32>,
    %c224 = arith.constant 224 : index
    %c0_63 = arith.constant 0 : index
    %72 = tpu.strided_load %arg11[%c224, %c0_63] {strides = array<i32: 2, 1>} : memref<784x16xf32, #tpu.memory_space<vmem>>, vector<14x16xf32>
    %c225 = arith.constant 225 : index
    %c0_64 = arith.constant 0 : index
    %73 = tpu.strided_load %arg11[%c225, %c0_64] {strides = array<i32: 2, 1>} : memref<784x16xf32, #tpu.memory_space<vmem>>, vector<14x16xf32>
    %c252 = arith.constant 252 : index
    %c0_65 = arith.constant 0 : index
    %74 = tpu.strided_load %arg11[%c252, %c0_65] {strides = array<i32: 2, 1>} : memref<784x16xf32, #tpu.memory_space<vmem>>, vector<14x16xf32>
    %c253 = arith.constant 253 : index
    %c0_66 = arith.constant 0 : index
    %75 = tpu.strided_load %arg11[%c253, %c0_66] {strides = array<i32: 2, 1>} : memref<784x16xf32, #tpu.memory_space<vmem>>, vector<14x16xf32>
    %76 = arith.maximumf %72, %73 : vector<14x16xf32>
    %77 = arith.maximumf %74, %75 : vector<14x16xf32>
    %78 = arith.maximumf %76, %77 : vector<14x16xf32>
    %c56_67 = arith.constant 56 : index
    %c0_68 = arith.constant 0 : index
    %79 = vector.load %arg12[%c56_67, %c0_68] : memref<196x16xf32, #tpu.memory_space<vmem>>, vector<14x16xf32>
    tpu.vector_store %arg12[%c56_67, %c0_68], %78 {strides = array<i32>} : memref<196x16xf32, #tpu.memory_space<vmem>>, vector<14x16xf32>,
    %c280 = arith.constant 280 : index
    %c0_69 = arith.constant 0 : index
    %80 = tpu.strided_load %arg11[%c280, %c0_69] {strides = array<i32: 2, 1>} : memref<784x16xf32, #tpu.memory_space<vmem>>, vector<14x16xf32>
    %c281 = arith.constant 281 : index
    %c0_70 = arith.constant 0 : index
    %81 = tpu.strided_load %arg11[%c281, %c0_70] {strides = array<i32: 2, 1>} : memref<784x16xf32, #tpu.memory_space<vmem>>, vector<14x16xf32>
    %c308 = arith.constant 308 : index
    %c0_71 = arith.constant 0 : index
    %82 = tpu.strided_load %arg11[%c308, %c0_71] {strides = array<i32: 2, 1>} : memref<784x16xf32, #tpu.memory_space<vmem>>, vector<14x16xf32>
    %c309 = arith.constant 309 : index
    %c0_72 = arith.constant 0 : index
    %83 = tpu.strided_load %arg11[%c309, %c0_72] {strides = array<i32: 2, 1>} : memref<784x16xf32, #tpu.memory_space<vmem>>, vector<14x16xf32>
    %84 = arith.maximumf %80, %81 : vector<14x16xf32>
    %85 = arith.maximumf %82, %83 : vector<14x16xf32>
    %86 = arith.maximumf %84, %85 : vector<14x16xf32>
    %c70 = arith.constant 70 : index
    %c0_73 = arith.constant 0 : index
    %87 = vector.load %arg12[%c70, %c0_73] : memref<196x16xf32, #tpu.memory_space<vmem>>, vector<14x16xf32>
    tpu.vector_store %arg12[%c70, %c0_73], %86 {strides = array<i32>} : memref<196x16xf32, #tpu.memory_space<vmem>>, vector<14x16xf32>,
    %c336 = arith.constant 336 : index
    %c0_74 = arith.constant 0 : index
    %88 = tpu.strided_load %arg11[%c336, %c0_74] {strides = array<i32: 2, 1>} : memref<784x16xf32, #tpu.memory_space<vmem>>, vector<14x16xf32>
    %c337 = arith.constant 337 : index
    %c0_75 = arith.constant 0 : index
    %89 = tpu.strided_load %arg11[%c337, %c0_75] {strides = array<i32: 2, 1>} : memref<784x16xf32, #tpu.memory_space<vmem>>, vector<14x16xf32>
    %c364 = arith.constant 364 : index
    %c0_76 = arith.constant 0 : index
    %90 = tpu.strided_load %arg11[%c364, %c0_76] {strides = array<i32: 2, 1>} : memref<784x16xf32, #tpu.memory_space<vmem>>, vector<14x16xf32>
    %c365 = arith.constant 365 : index
    %c0_77 = arith.constant 0 : index
    %91 = tpu.strided_load %arg11[%c365, %c0_77] {strides = array<i32: 2, 1>} : memref<784x16xf32, #tpu.memory_space<vmem>>, vector<14x16xf32>
    %92 = arith.maximumf %88, %89 : vector<14x16xf32>
    %93 = arith.maximumf %90, %91 : vector<14x16xf32>
    %94 = arith.maximumf %92, %93 : vector<14x16xf32>
    %c84_78 = arith.constant 84 : index
    %c0_79 = arith.constant 0 : index
    %95 = vector.load %arg12[%c84_78, %c0_79] : memref<196x16xf32, #tpu.memory_space<vmem>>, vector<14x16xf32>
    tpu.vector_store %arg12[%c84_78, %c0_79], %94 {strides = array<i32>} : memref<196x16xf32, #tpu.memory_space<vmem>>, vector<14x16xf32>,
    %c392_80 = arith.constant 392 : index
    %c0_81 = arith.constant 0 : index
    %96 = tpu.strided_load %arg11[%c392_80, %c0_81] {strides = array<i32: 2, 1>} : memref<784x16xf32, #tpu.memory_space<vmem>>, vector<14x16xf32>
    %c393 = arith.constant 393 : index
    %c0_82 = arith.constant 0 : index
    %97 = tpu.strided_load %arg11[%c393, %c0_82] {strides = array<i32: 2, 1>} : memref<784x16xf32, #tpu.memory_space<vmem>>, vector<14x16xf32>
    %c420 = arith.constant 420 : index
    %c0_83 = arith.constant 0 : index
    %98 = tpu.strided_load %arg11[%c420, %c0_83] {strides = array<i32: 2, 1>} : memref<784x16xf32, #tpu.memory_space<vmem>>, vector<14x16xf32>
    %c421 = arith.constant 421 : index
    %c0_84 = arith.constant 0 : index
    %99 = tpu.strided_load %arg11[%c421, %c0_84] {strides = array<i32: 2, 1>} : memref<784x16xf32, #tpu.memory_space<vmem>>, vector<14x16xf32>
    %100 = arith.maximumf %96, %97 : vector<14x16xf32>
    %101 = arith.maximumf %98, %99 : vector<14x16xf32>
    %102 = arith.maximumf %100, %101 : vector<14x16xf32>
    %c98 = arith.constant 98 : index
    %c0_85 = arith.constant 0 : index
    %103 = vector.load %arg12[%c98, %c0_85] : memref<196x16xf32, #tpu.memory_space<vmem>>, vector<14x16xf32>
    tpu.vector_store %arg12[%c98, %c0_85], %102 {strides = array<i32>} : memref<196x16xf32, #tpu.memory_space<vmem>>, vector<14x16xf32>,
    %c448 = arith.constant 448 : index
    %c0_86 = arith.constant 0 : index
    %104 = tpu.strided_load %arg11[%c448, %c0_86] {strides = array<i32: 2, 1>} : memref<784x16xf32, #tpu.memory_space<vmem>>, vector<14x16xf32>
    %c449 = arith.constant 449 : index
    %c0_87 = arith.constant 0 : index
    %105 = tpu.strided_load %arg11[%c449, %c0_87] {strides = array<i32: 2, 1>} : memref<784x16xf32, #tpu.memory_space<vmem>>, vector<14x16xf32>
    %c476 = arith.constant 476 : index
    %c0_88 = arith.constant 0 : index
    %106 = tpu.strided_load %arg11[%c476, %c0_88] {strides = array<i32: 2, 1>} : memref<784x16xf32, #tpu.memory_space<vmem>>, vector<14x16xf32>
    %c477 = arith.constant 477 : index
    %c0_89 = arith.constant 0 : index
    %107 = tpu.strided_load %arg11[%c477, %c0_89] {strides = array<i32: 2, 1>} : memref<784x16xf32, #tpu.memory_space<vmem>>, vector<14x16xf32>
    %108 = arith.maximumf %104, %105 : vector<14x16xf32>
    %109 = arith.maximumf %106, %107 : vector<14x16xf32>
    %110 = arith.maximumf %108, %109 : vector<14x16xf32>
    %c112_90 = arith.constant 112 : index
    %c0_91 = arith.constant 0 : index
    %111 = vector.load %arg12[%c112_90, %c0_91] : memref<196x16xf32, #tpu.memory_space<vmem>>, vector<14x16xf32>
    tpu.vector_store %arg12[%c112_90, %c0_91], %110 {strides = array<i32>} : memref<196x16xf32, #tpu.memory_space<vmem>>, vector<14x16xf32>,
    %c504 = arith.constant 504 : index
    %c0_92 = arith.constant 0 : index
    %112 = tpu.strided_load %arg11[%c504, %c0_92] {strides = array<i32: 2, 1>} : memref<784x16xf32, #tpu.memory_space<vmem>>, vector<14x16xf32>
    %c505 = arith.constant 505 : index
    %c0_93 = arith.constant 0 : index
    %113 = tpu.strided_load %arg11[%c505, %c0_93] {strides = array<i32: 2, 1>} : memref<784x16xf32, #tpu.memory_space<vmem>>, vector<14x16xf32>
    %c532 = arith.constant 532 : index
    %c0_94 = arith.constant 0 : index
    %114 = tpu.strided_load %arg11[%c532, %c0_94] {strides = array<i32: 2, 1>} : memref<784x16xf32, #tpu.memory_space<vmem>>, vector<14x16xf32>
    %c533 = arith.constant 533 : index
    %c0_95 = arith.constant 0 : index
    %115 = tpu.strided_load %arg11[%c533, %c0_95] {strides = array<i32: 2, 1>} : memref<784x16xf32, #tpu.memory_space<vmem>>, vector<14x16xf32>
    %116 = arith.maximumf %112, %113 : vector<14x16xf32>
    %117 = arith.maximumf %114, %115 : vector<14x16xf32>
    %118 = arith.maximumf %116, %117 : vector<14x16xf32>
    %c126 = arith.constant 126 : index
    %c0_96 = arith.constant 0 : index
    %119 = vector.load %arg12[%c126, %c0_96] : memref<196x16xf32, #tpu.memory_space<vmem>>, vector<14x16xf32>
    tpu.vector_store %arg12[%c126, %c0_96], %118 {strides = array<i32>} : memref<196x16xf32, #tpu.memory_space<vmem>>, vector<14x16xf32>,
    %c560 = arith.constant 560 : index
    %c0_97 = arith.constant 0 : index
    %120 = tpu.strided_load %arg11[%c560, %c0_97] {strides = array<i32: 2, 1>} : memref<784x16xf32, #tpu.memory_space<vmem>>, vector<14x16xf32>
    %c561 = arith.constant 561 : index
    %c0_98 = arith.constant 0 : index
    %121 = tpu.strided_load %arg11[%c561, %c0_98] {strides = array<i32: 2, 1>} : memref<784x16xf32, #tpu.memory_space<vmem>>, vector<14x16xf32>
    %c588_99 = arith.constant 588 : index
    %c0_100 = arith.constant 0 : index
    %122 = tpu.strided_load %arg11[%c588_99, %c0_100] {strides = array<i32: 2, 1>} : memref<784x16xf32, #tpu.memory_space<vmem>>, vector<14x16xf32>
    %c589 = arith.constant 589 : index
    %c0_101 = arith.constant 0 : index
    %123 = tpu.strided_load %arg11[%c589, %c0_101] {strides = array<i32: 2, 1>} : memref<784x16xf32, #tpu.memory_space<vmem>>, vector<14x16xf32>
    %124 = arith.maximumf %120, %121 : vector<14x16xf32>
    %125 = arith.maximumf %122, %123 : vector<14x16xf32>
    %126 = arith.maximumf %124, %125 : vector<14x16xf32>
    %c140_102 = arith.constant 140 : index
    %c0_103 = arith.constant 0 : index
    %127 = vector.load %arg12[%c140_102, %c0_103] : memref<196x16xf32, #tpu.memory_space<vmem>>, vector<14x16xf32>
    tpu.vector_store %arg12[%c140_102, %c0_103], %126 {strides = array<i32>} : memref<196x16xf32, #tpu.memory_space<vmem>>, vector<14x16xf32>,
    %c616 = arith.constant 616 : index
    %c0_104 = arith.constant 0 : index
    %128 = tpu.strided_load %arg11[%c616, %c0_104] {strides = array<i32: 2, 1>} : memref<784x16xf32, #tpu.memory_space<vmem>>, vector<14x16xf32>
    %c617 = arith.constant 617 : index
    %c0_105 = arith.constant 0 : index
    %129 = tpu.strided_load %arg11[%c617, %c0_105] {strides = array<i32: 2, 1>} : memref<784x16xf32, #tpu.memory_space<vmem>>, vector<14x16xf32>
    %c644 = arith.constant 644 : index
    %c0_106 = arith.constant 0 : index
    %130 = tpu.strided_load %arg11[%c644, %c0_106] {strides = array<i32: 2, 1>} : memref<784x16xf32, #tpu.memory_space<vmem>>, vector<14x16xf32>
    %c645 = arith.constant 645 : index
    %c0_107 = arith.constant 0 : index
    %131 = tpu.strided_load %arg11[%c645, %c0_107] {strides = array<i32: 2, 1>} : memref<784x16xf32, #tpu.memory_space<vmem>>, vector<14x16xf32>
    %132 = arith.maximumf %128, %129 : vector<14x16xf32>
    %133 = arith.maximumf %130, %131 : vector<14x16xf32>
    %134 = arith.maximumf %132, %133 : vector<14x16xf32>
    %c154 = arith.constant 154 : index
    %c0_108 = arith.constant 0 : index
    %135 = vector.load %arg12[%c154, %c0_108] : memref<196x16xf32, #tpu.memory_space<vmem>>, vector<14x16xf32>
    tpu.vector_store %arg12[%c154, %c0_108], %134 {strides = array<i32>} : memref<196x16xf32, #tpu.memory_space<vmem>>, vector<14x16xf32>,
    %c672 = arith.constant 672 : index
    %c0_109 = arith.constant 0 : index
    %136 = tpu.strided_load %arg11[%c672, %c0_109] {strides = array<i32: 2, 1>} : memref<784x16xf32, #tpu.memory_space<vmem>>, vector<14x16xf32>
    %c673 = arith.constant 673 : index
    %c0_110 = arith.constant 0 : index
    %137 = tpu.strided_load %arg11[%c673, %c0_110] {strides = array<i32: 2, 1>} : memref<784x16xf32, #tpu.memory_space<vmem>>, vector<14x16xf32>
    %c700 = arith.constant 700 : index
    %c0_111 = arith.constant 0 : index
    %138 = tpu.strided_load %arg11[%c700, %c0_111] {strides = array<i32: 2, 1>} : memref<784x16xf32, #tpu.memory_space<vmem>>, vector<14x16xf32>
    %c701 = arith.constant 701 : index
    %c0_112 = arith.constant 0 : index
    %139 = tpu.strided_load %arg11[%c701, %c0_112] {strides = array<i32: 2, 1>} : memref<784x16xf32, #tpu.memory_space<vmem>>, vector<14x16xf32>
    %140 = arith.maximumf %136, %137 : vector<14x16xf32>
    %141 = arith.maximumf %138, %139 : vector<14x16xf32>
    %142 = arith.maximumf %140, %141 : vector<14x16xf32>
    %c168_113 = arith.constant 168 : index
    %c0_114 = arith.constant 0 : index
    %143 = vector.load %arg12[%c168_113, %c0_114] : memref<196x16xf32, #tpu.memory_space<vmem>>, vector<14x16xf32>
    tpu.vector_store %arg12[%c168_113, %c0_114], %142 {strides = array<i32>} : memref<196x16xf32, #tpu.memory_space<vmem>>, vector<14x16xf32>,
    %c728 = arith.constant 728 : index
    %c0_115 = arith.constant 0 : index
    %144 = tpu.strided_load %arg11[%c728, %c0_115] {strides = array<i32: 2, 1>} : memref<784x16xf32, #tpu.memory_space<vmem>>, vector<14x16xf32>
    %c729 = arith.constant 729 : index
    %c0_116 = arith.constant 0 : index
    %145 = tpu.strided_load %arg11[%c729, %c0_116] {strides = array<i32: 2, 1>} : memref<784x16xf32, #tpu.memory_space<vmem>>, vector<14x16xf32>
    %c756 = arith.constant 756 : index
    %c0_117 = arith.constant 0 : index
    %146 = tpu.strided_load %arg11[%c756, %c0_117] {strides = array<i32: 2, 1>} : memref<784x16xf32, #tpu.memory_space<vmem>>, vector<14x16xf32>
    %c757 = arith.constant 757 : index
    %c0_118 = arith.constant 0 : index
    %147 = tpu.strided_load %arg11[%c757, %c0_118] {strides = array<i32: 2, 1>} : memref<784x16xf32, #tpu.memory_space<vmem>>, vector<14x16xf32>
    %148 = arith.maximumf %144, %145 : vector<14x16xf32>
    %149 = arith.maximumf %146, %147 : vector<14x16xf32>
    %150 = arith.maximumf %148, %149 : vector<14x16xf32>
    %c182 = arith.constant 182 : index
    %c0_119 = arith.constant 0 : index
    %151 = vector.load %arg12[%c182, %c0_119] : memref<196x16xf32, #tpu.memory_space<vmem>>, vector<14x16xf32>
    tpu.vector_store %arg12[%c182, %c0_119], %150 {strides = array<i32>} : memref<196x16xf32, #tpu.memory_space<vmem>>, vector<14x16xf32>,
    %c0_120 = arith.constant 0 : index
    %c0_121 = arith.constant 0 : index
    %152 = vector.load %arg12[%c0_120, %c0_121] : memref<196x16xf32, #tpu.memory_space<vmem>>, vector<166x16xf32>
    %c1_122 = arith.constant 1 : index
    %c0_123 = arith.constant 0 : index
    %153 = vector.load %arg12[%c1_122, %c0_123] : memref<196x16xf32, #tpu.memory_space<vmem>>, vector<166x16xf32>
    %c2 = arith.constant 2 : index
    %c0_124 = arith.constant 0 : index
    %154 = vector.load %arg12[%c2, %c0_124] : memref<196x16xf32, #tpu.memory_space<vmem>>, vector<166x16xf32>
    %155 = tpu.concatenate %152, %153, %154 in 1 : vector<166x16xf32>, vector<166x16xf32>, vector<166x16xf32> -> vector<166x48xf32>
    %156 = arith.truncf %155 : vector<166x48xf32> to vector<166x48xbf16>
    %c0_125 = arith.constant 0 : index
    %c0_126 = arith.constant 0 : index
    %c0_127 = arith.constant 0 : index
    %157 = vector.load %arg4[%c0_125, %c0_126, %c0_127] : memref<3x48x36xbf16, #tpu.memory_space<vmem>>, vector<1x48x36xbf16>
    %158 = vector.shape_cast %157 : vector<1x48x36xbf16> to vector<48x36xbf16>
    %cst_128 = arith.constant dense<0.000000e+00> : vector<166x36xf32>
    %159 = tpu.matmul %156, %158, %cst_128 {dimension_numbers = #tpu.dot_dimension_numbers<[1], [0], [0], [1], [0, 0, 1, 1], [], []>} : vector<166x48xbf16>, vector<48x36xbf16>, vector<166x36xf32> -> vector<166x36xf32>
    %c14_129 = arith.constant 14 : index
    %c0_130 = arith.constant 0 : index
    %160 = vector.load %arg12[%c14_129, %c0_130] : memref<196x16xf32, #tpu.memory_space<vmem>>, vector<166x16xf32>
    %c15 = arith.constant 15 : index
    %c0_131 = arith.constant 0 : index
    %161 = vector.load %arg12[%c15, %c0_131] : memref<196x16xf32, #tpu.memory_space<vmem>>, vector<166x16xf32>
    %c16 = arith.constant 16 : index
    %c0_132 = arith.constant 0 : index
    %162 = vector.load %arg12[%c16, %c0_132] : memref<196x16xf32, #tpu.memory_space<vmem>>, vector<166x16xf32>
    %163 = tpu.concatenate %160, %161, %162 in 1 : vector<166x16xf32>, vector<166x16xf32>, vector<166x16xf32> -> vector<166x48xf32>
    %164 = arith.truncf %163 : vector<166x48xf32> to vector<166x48xbf16>
    %c1_133 = arith.constant 1 : index
    %c0_134 = arith.constant 0 : index
    %c0_135 = arith.constant 0 : index
    %165 = vector.load %arg4[%c1_133, %c0_134, %c0_135] : memref<3x48x36xbf16, #tpu.memory_space<vmem>>, vector<1x48x36xbf16>
    %166 = vector.shape_cast %165 : vector<1x48x36xbf16> to vector<48x36xbf16>
    %cst_136 = arith.constant dense<0.000000e+00> : vector<166x36xf32>
    %167 = tpu.matmul %164, %166, %cst_136 {dimension_numbers = #tpu.dot_dimension_numbers<[1], [0], [0], [1], [0, 0, 1, 1], [], []>} : vector<166x48xbf16>, vector<48x36xbf16>, vector<166x36xf32> -> vector<166x36xf32>
    %168 = arith.addf %159, %167 : vector<166x36xf32>
    %c28_137 = arith.constant 28 : index
    %c0_138 = arith.constant 0 : index
    %169 = vector.load %arg12[%c28_137, %c0_138] : memref<196x16xf32, #tpu.memory_space<vmem>>, vector<166x16xf32>
    %c29_139 = arith.constant 29 : index
    %c0_140 = arith.constant 0 : index
    %170 = vector.load %arg12[%c29_139, %c0_140] : memref<196x16xf32, #tpu.memory_space<vmem>>, vector<166x16xf32>
    %c30 = arith.constant 30 : index
    %c0_141 = arith.constant 0 : index
    %171 = vector.load %arg12[%c30, %c0_141] : memref<196x16xf32, #tpu.memory_space<vmem>>, vector<166x16xf32>
    %172 = tpu.concatenate %169, %170, %171 in 1 : vector<166x16xf32>, vector<166x16xf32>, vector<166x16xf32> -> vector<166x48xf32>
    %173 = arith.truncf %172 : vector<166x48xf32> to vector<166x48xbf16>
    %c2_142 = arith.constant 2 : index
    %c0_143 = arith.constant 0 : index
    %c0_144 = arith.constant 0 : index
    %174 = vector.load %arg4[%c2_142, %c0_143, %c0_144] : memref<3x48x36xbf16, #tpu.memory_space<vmem>>, vector<1x48x36xbf16>
    %175 = vector.shape_cast %174 : vector<1x48x36xbf16> to vector<48x36xbf16>
    %cst_145 = arith.constant dense<0.000000e+00> : vector<166x36xf32>
    %176 = tpu.matmul %173, %175, %cst_145 {dimension_numbers = #tpu.dot_dimension_numbers<[1], [0], [0], [1], [0, 0, 1, 1], [], []>} : vector<166x48xbf16>, vector<48x36xbf16>, vector<166x36xf32> -> vector<166x36xf32>
    %177 = arith.addf %168, %176 : vector<166x36xf32>
    %c0_146 = arith.constant 0 : index
    %c0_147 = arith.constant 0 : index
    %178 = vector.load %arg5[%c0_146, %c0_147] : memref<1x36xf32, #tpu.memory_space<vmem>>, vector<1x36xf32>
    %179 = vector.broadcast %178 : vector<1x36xf32> to vector<166x36xf32>
    %180 = arith.addf %177, %179 : vector<166x36xf32>
    %cst_148 = arith.constant 0.000000e+00 : f32
    %181 = vector.broadcast %cst_148 : f32 to vector<166x36xf32>
    %182 = arith.maximumf %180, %181 : vector<166x36xf32>
    %c0_149 = arith.constant 0 : index
    %c0_150 = arith.constant 0 : index
    %183 = vector.load %arg13[%c0_149, %c0_150] : memref<166x36xf32, #tpu.memory_space<vmem>>, vector<166x36xf32>
    tpu.vector_store %arg13[%c0_149, %c0_150], %182 {strides = array<i32>} : memref<166x36xf32, #tpu.memory_space<vmem>>, vector<166x36xf32>,
    %c0_151 = arith.constant 0 : index
    %c0_152 = arith.constant 0 : index
    %184 = tpu.strided_load %arg13[%c0_151, %c0_152] {strides = array<i32: 2, 1>} : memref<166x36xf32, #tpu.memory_space<vmem>>, vector<6x36xf32>
    %c1_153 = arith.constant 1 : index
    %c0_154 = arith.constant 0 : index
    %185 = tpu.strided_load %arg13[%c1_153, %c0_154] {strides = array<i32: 2, 1>} : memref<166x36xf32, #tpu.memory_space<vmem>>, vector<6x36xf32>
    %c14_155 = arith.constant 14 : index
    %c0_156 = arith.constant 0 : index
    %186 = tpu.strided_load %arg13[%c14_155, %c0_156] {strides = array<i32: 2, 1>} : memref<166x36xf32, #tpu.memory_space<vmem>>, vector<6x36xf32>
    %c15_157 = arith.constant 15 : index
    %c0_158 = arith.constant 0 : index
    %187 = tpu.strided_load %arg13[%c15_157, %c0_158] {strides = array<i32: 2, 1>} : memref<166x36xf32, #tpu.memory_space<vmem>>, vector<6x36xf32>
    %188 = arith.maximumf %184, %185 : vector<6x36xf32>
    %189 = arith.maximumf %186, %187 : vector<6x36xf32>
    %190 = arith.maximumf %188, %189 : vector<6x36xf32>
    %c0_159 = arith.constant 0 : index
    %c0_160 = arith.constant 0 : index
    %191 = vector.load %arg14[%c0_159, %c0_160] : memref<72x36xf32, #tpu.memory_space<vmem>>, vector<6x36xf32>
    tpu.vector_store %arg14[%c0_159, %c0_160], %190 {strides = array<i32>} : memref<72x36xf32, #tpu.memory_space<vmem>>, vector<6x36xf32>,
    %c28_161 = arith.constant 28 : index
    %c0_162 = arith.constant 0 : index
    %192 = tpu.strided_load %arg13[%c28_161, %c0_162] {strides = array<i32: 2, 1>} : memref<166x36xf32, #tpu.memory_space<vmem>>, vector<6x36xf32>
    %c29_163 = arith.constant 29 : index
    %c0_164 = arith.constant 0 : index
    %193 = tpu.strided_load %arg13[%c29_163, %c0_164] {strides = array<i32: 2, 1>} : memref<166x36xf32, #tpu.memory_space<vmem>>, vector<6x36xf32>
    %c42_165 = arith.constant 42 : index
    %c0_166 = arith.constant 0 : index
    %194 = tpu.strided_load %arg13[%c42_165, %c0_166] {strides = array<i32: 2, 1>} : memref<166x36xf32, #tpu.memory_space<vmem>>, vector<6x36xf32>
    %c43 = arith.constant 43 : index
    %c0_167 = arith.constant 0 : index
    %195 = tpu.strided_load %arg13[%c43, %c0_167] {strides = array<i32: 2, 1>} : memref<166x36xf32, #tpu.memory_space<vmem>>, vector<6x36xf32>
    %196 = arith.maximumf %192, %193 : vector<6x36xf32>
    %197 = arith.maximumf %194, %195 : vector<6x36xf32>
    %198 = arith.maximumf %196, %197 : vector<6x36xf32>
    %c6 = arith.constant 6 : index
    %c0_168 = arith.constant 0 : index
    %199 = vector.load %arg14[%c6, %c0_168] : memref<72x36xf32, #tpu.memory_space<vmem>>, vector<6x36xf32>
    tpu.vector_store %arg14[%c6, %c0_168], %198 {strides = array<i32>} : memref<72x36xf32, #tpu.memory_space<vmem>>, vector<6x36xf32>,
    %c56_169 = arith.constant 56 : index
    %c0_170 = arith.constant 0 : index
    %200 = tpu.strided_load %arg13[%c56_169, %c0_170] {strides = array<i32: 2, 1>} : memref<166x36xf32, #tpu.memory_space<vmem>>, vector<6x36xf32>
    %c57_171 = arith.constant 57 : index
    %c0_172 = arith.constant 0 : index
    %201 = tpu.strided_load %arg13[%c57_171, %c0_172] {strides = array<i32: 2, 1>} : memref<166x36xf32, #tpu.memory_space<vmem>>, vector<6x36xf32>
    %c70_173 = arith.constant 70 : index
    %c0_174 = arith.constant 0 : index
    %202 = tpu.strided_load %arg13[%c70_173, %c0_174] {strides = array<i32: 2, 1>} : memref<166x36xf32, #tpu.memory_space<vmem>>, vector<6x36xf32>
    %c71 = arith.constant 71 : index
    %c0_175 = arith.constant 0 : index
    %203 = tpu.strided_load %arg13[%c71, %c0_175] {strides = array<i32: 2, 1>} : memref<166x36xf32, #tpu.memory_space<vmem>>, vector<6x36xf32>
    %204 = arith.maximumf %200, %201 : vector<6x36xf32>
    %205 = arith.maximumf %202, %203 : vector<6x36xf32>
    %206 = arith.maximumf %204, %205 : vector<6x36xf32>
    %c12 = arith.constant 12 : index
    %c0_176 = arith.constant 0 : index
    %207 = vector.load %arg14[%c12, %c0_176] : memref<72x36xf32, #tpu.memory_space<vmem>>, vector<6x36xf32>
    tpu.vector_store %arg14[%c12, %c0_176], %206 {strides = array<i32>} : memref<72x36xf32, #tpu.memory_space<vmem>>, vector<6x36xf32>,
    %c84_177 = arith.constant 84 : index
    %c0_178 = arith.constant 0 : index
    %208 = tpu.strided_load %arg13[%c84_177, %c0_178] {strides = array<i32: 2, 1>} : memref<166x36xf32, #tpu.memory_space<vmem>>, vector<6x36xf32>
    %c85_179 = arith.constant 85 : index
    %c0_180 = arith.constant 0 : index
    %209 = tpu.strided_load %arg13[%c85_179, %c0_180] {strides = array<i32: 2, 1>} : memref<166x36xf32, #tpu.memory_space<vmem>>, vector<6x36xf32>
    %c98_181 = arith.constant 98 : index
    %c0_182 = arith.constant 0 : index
    %210 = tpu.strided_load %arg13[%c98_181, %c0_182] {strides = array<i32: 2, 1>} : memref<166x36xf32, #tpu.memory_space<vmem>>, vector<6x36xf32>
    %c99 = arith.constant 99 : index
    %c0_183 = arith.constant 0 : index
    %211 = tpu.strided_load %arg13[%c99, %c0_183] {strides = array<i32: 2, 1>} : memref<166x36xf32, #tpu.memory_space<vmem>>, vector<6x36xf32>
    %212 = arith.maximumf %208, %209 : vector<6x36xf32>
    %213 = arith.maximumf %210, %211 : vector<6x36xf32>
    %214 = arith.maximumf %212, %213 : vector<6x36xf32>
    %c18 = arith.constant 18 : index
    %c0_184 = arith.constant 0 : index
    %215 = vector.load %arg14[%c18, %c0_184] : memref<72x36xf32, #tpu.memory_space<vmem>>, vector<6x36xf32>
    tpu.vector_store %arg14[%c18, %c0_184], %214 {strides = array<i32>} : memref<72x36xf32, #tpu.memory_space<vmem>>, vector<6x36xf32>,
    %c112_185 = arith.constant 112 : index
    %c0_186 = arith.constant 0 : index
    %216 = tpu.strided_load %arg13[%c112_185, %c0_186] {strides = array<i32: 2, 1>} : memref<166x36xf32, #tpu.memory_space<vmem>>, vector<6x36xf32>
    %c113_187 = arith.constant 113 : index
    %c0_188 = arith.constant 0 : index
    %217 = tpu.strided_load %arg13[%c113_187, %c0_188] {strides = array<i32: 2, 1>} : memref<166x36xf32, #tpu.memory_space<vmem>>, vector<6x36xf32>
    %c126_189 = arith.constant 126 : index
    %c0_190 = arith.constant 0 : index
    %218 = tpu.strided_load %arg13[%c126_189, %c0_190] {strides = array<i32: 2, 1>} : memref<166x36xf32, #tpu.memory_space<vmem>>, vector<6x36xf32>
    %c127 = arith.constant 127 : index
    %c0_191 = arith.constant 0 : index
    %219 = tpu.strided_load %arg13[%c127, %c0_191] {strides = array<i32: 2, 1>} : memref<166x36xf32, #tpu.memory_space<vmem>>, vector<6x36xf32>
    %220 = arith.maximumf %216, %217 : vector<6x36xf32>
    %221 = arith.maximumf %218, %219 : vector<6x36xf32>
    %222 = arith.maximumf %220, %221 : vector<6x36xf32>
    %c24 = arith.constant 24 : index
    %c0_192 = arith.constant 0 : index
    %223 = vector.load %arg14[%c24, %c0_192] : memref<72x36xf32, #tpu.memory_space<vmem>>, vector<6x36xf32>
    tpu.vector_store %arg14[%c24, %c0_192], %222 {strides = array<i32>} : memref<72x36xf32, #tpu.memory_space<vmem>>, vector<6x36xf32>,
    %c140_193 = arith.constant 140 : index
    %c0_194 = arith.constant 0 : index
    %224 = tpu.strided_load %arg13[%c140_193, %c0_194] {strides = array<i32: 2, 1>} : memref<166x36xf32, #tpu.memory_space<vmem>>, vector<6x36xf32>
    %c141_195 = arith.constant 141 : index
    %c0_196 = arith.constant 0 : index
    %225 = tpu.strided_load %arg13[%c141_195, %c0_196] {strides = array<i32: 2, 1>} : memref<166x36xf32, #tpu.memory_space<vmem>>, vector<6x36xf32>
    %c154_197 = arith.constant 154 : index
    %c0_198 = arith.constant 0 : index
    %226 = tpu.strided_load %arg13[%c154_197, %c0_198] {strides = array<i32: 2, 1>} : memref<166x36xf32, #tpu.memory_space<vmem>>, vector<6x36xf32>
    %c155 = arith.constant 155 : index
    %c0_199 = arith.constant 0 : index
    %227 = tpu.strided_load %arg13[%c155, %c0_199] {strides = array<i32: 2, 1>} : memref<166x36xf32, #tpu.memory_space<vmem>>, vector<6x36xf32>
    %228 = arith.maximumf %224, %225 : vector<6x36xf32>
    %229 = arith.maximumf %226, %227 : vector<6x36xf32>
    %230 = arith.maximumf %228, %229 : vector<6x36xf32>
    %c30_200 = arith.constant 30 : index
    %c0_201 = arith.constant 0 : index
    %231 = vector.load %arg14[%c30_200, %c0_201] : memref<72x36xf32, #tpu.memory_space<vmem>>, vector<6x36xf32>
    tpu.vector_store %arg14[%c30_200, %c0_201], %230 {strides = array<i32>} : memref<72x36xf32, #tpu.memory_space<vmem>>, vector<6x36xf32>,
    %c1_202 = arith.constant 1 : index
    %c0_203 = arith.constant 0 : index
    %c0_204 = arith.constant 0 : index
    %232 = vector.load %arg1[%c1_202, %c0_203, %c0_204] : memref<2x784x75xbf16, #tpu.memory_space<vmem>>, vector<1x196x75xbf16>
    %233 = vector.shape_cast %232 : vector<1x196x75xbf16> to vector<196x75xbf16>
    %c0_205 = arith.constant 0 : index
    %c0_206 = arith.constant 0 : index
    %234 = vector.load %arg2[%c0_205, %c0_206] : memref<75x16xbf16, #tpu.memory_space<vmem>>, vector<75x16xbf16>
    %cst_207 = arith.constant dense<0.000000e+00> : vector<196x16xf32>
    %235 = tpu.matmul %233, %234, %cst_207 {dimension_numbers = #tpu.dot_dimension_numbers<[1], [0], [0], [1], [0, 0, 1, 1], [], []>} : vector<196x75xbf16>, vector<75x16xbf16>, vector<196x16xf32> -> vector<196x16xf32>
    %c0_208 = arith.constant 0 : index
    %c0_209 = arith.constant 0 : index
    %236 = vector.load %arg3[%c0_208, %c0_209] : memref<1x16xf32, #tpu.memory_space<vmem>>, vector<1x16xf32>
    %237 = vector.broadcast %236 : vector<1x16xf32> to vector<196x16xf32>
    %238 = arith.addf %235, %237 : vector<196x16xf32>
    %cst_210 = arith.constant 0.000000e+00 : f32
    %239 = vector.broadcast %cst_210 : f32 to vector<196x16xf32>
    %240 = arith.maximumf %238, %239 : vector<196x16xf32>
    %c0_211 = arith.constant 0 : index
    %c0_212 = arith.constant 0 : index
    %241 = vector.load %arg11[%c0_211, %c0_212] : memref<784x16xf32, #tpu.memory_space<vmem>>, vector<196x16xf32>
    tpu.vector_store %arg11[%c0_211, %c0_212], %240 {strides = array<i32>} : memref<784x16xf32, #tpu.memory_space<vmem>>, vector<196x16xf32>,
    %c1_213 = arith.constant 1 : index
    %c196_214 = arith.constant 196 : index
    %c0_215 = arith.constant 0 : index
    %242 = vector.load %arg1[%c1_213, %c196_214, %c0_215] : memref<2x784x75xbf16, #tpu.memory_space<vmem>>, vector<1x196x75xbf16>
    %243 = vector.shape_cast %242 : vector<1x196x75xbf16> to vector<196x75xbf16>
    %c0_216 = arith.constant 0 : index
    %c0_217 = arith.constant 0 : index
    %244 = vector.load %arg2[%c0_216, %c0_217] : memref<75x16xbf16, #tpu.memory_space<vmem>>, vector<75x16xbf16>
    %cst_218 = arith.constant dense<0.000000e+00> : vector<196x16xf32>
    %245 = tpu.matmul %243, %244, %cst_218 {dimension_numbers = #tpu.dot_dimension_numbers<[1], [0], [0], [1], [0, 0, 1, 1], [], []>} : vector<196x75xbf16>, vector<75x16xbf16>, vector<196x16xf32> -> vector<196x16xf32>
    %c0_219 = arith.constant 0 : index
    %c0_220 = arith.constant 0 : index
    %246 = vector.load %arg3[%c0_219, %c0_220] : memref<1x16xf32, #tpu.memory_space<vmem>>, vector<1x16xf32>
    %247 = vector.broadcast %246 : vector<1x16xf32> to vector<196x16xf32>
    %248 = arith.addf %245, %247 : vector<196x16xf32>
    %cst_221 = arith.constant 0.000000e+00 : f32
    %249 = vector.broadcast %cst_221 : f32 to vector<196x16xf32>
    %250 = arith.maximumf %248, %249 : vector<196x16xf32>
    %c196_222 = arith.constant 196 : index
    %c0_223 = arith.constant 0 : index
    %251 = vector.load %arg11[%c196_222, %c0_223] : memref<784x16xf32, #tpu.memory_space<vmem>>, vector<196x16xf32>
    tpu.vector_store %arg11[%c196_222, %c0_223], %250 {strides = array<i32>} : memref<784x16xf32, #tpu.memory_space<vmem>>, vector<196x16xf32>,
    %c1_224 = arith.constant 1 : index
    %c392_225 = arith.constant 392 : index
    %c0_226 = arith.constant 0 : index
    %252 = vector.load %arg1[%c1_224, %c392_225, %c0_226] : memref<2x784x75xbf16, #tpu.memory_space<vmem>>, vector<1x196x75xbf16>
    %253 = vector.shape_cast %252 : vector<1x196x75xbf16> to vector<196x75xbf16>
    %c0_227 = arith.constant 0 : index
    %c0_228 = arith.constant 0 : index
    %254 = vector.load %arg2[%c0_227, %c0_228] : memref<75x16xbf16, #tpu.memory_space<vmem>>, vector<75x16xbf16>
    %cst_229 = arith.constant dense<0.000000e+00> : vector<196x16xf32>
    %255 = tpu.matmul %253, %254, %cst_229 {dimension_numbers = #tpu.dot_dimension_numbers<[1], [0], [0], [1], [0, 0, 1, 1], [], []>} : vector<196x75xbf16>, vector<75x16xbf16>, vector<196x16xf32> -> vector<196x16xf32>
    %c0_230 = arith.constant 0 : index
    %c0_231 = arith.constant 0 : index
    %256 = vector.load %arg3[%c0_230, %c0_231] : memref<1x16xf32, #tpu.memory_space<vmem>>, vector<1x16xf32>
    %257 = vector.broadcast %256 : vector<1x16xf32> to vector<196x16xf32>
    %258 = arith.addf %255, %257 : vector<196x16xf32>
    %cst_232 = arith.constant 0.000000e+00 : f32
    %259 = vector.broadcast %cst_232 : f32 to vector<196x16xf32>
    %260 = arith.maximumf %258, %259 : vector<196x16xf32>
    %c392_233 = arith.constant 392 : index
    %c0_234 = arith.constant 0 : index
    %261 = vector.load %arg11[%c392_233, %c0_234] : memref<784x16xf32, #tpu.memory_space<vmem>>, vector<196x16xf32>
    tpu.vector_store %arg11[%c392_233, %c0_234], %260 {strides = array<i32>} : memref<784x16xf32, #tpu.memory_space<vmem>>, vector<196x16xf32>,
    %c1_235 = arith.constant 1 : index
    %c588_236 = arith.constant 588 : index
    %c0_237 = arith.constant 0 : index
    %262 = vector.load %arg1[%c1_235, %c588_236, %c0_237] : memref<2x784x75xbf16, #tpu.memory_space<vmem>>, vector<1x196x75xbf16>
    %263 = vector.shape_cast %262 : vector<1x196x75xbf16> to vector<196x75xbf16>
    %c0_238 = arith.constant 0 : index
    %c0_239 = arith.constant 0 : index
    %264 = vector.load %arg2[%c0_238, %c0_239] : memref<75x16xbf16, #tpu.memory_space<vmem>>, vector<75x16xbf16>
    %cst_240 = arith.constant dense<0.000000e+00> : vector<196x16xf32>
    %265 = tpu.matmul %263, %264, %cst_240 {dimension_numbers = #tpu.dot_dimension_numbers<[1], [0], [0], [1], [0, 0, 1, 1], [], []>} : vector<196x75xbf16>, vector<75x16xbf16>, vector<196x16xf32> -> vector<196x16xf32>
    %c0_241 = arith.constant 0 : index
    %c0_242 = arith.constant 0 : index
    %266 = vector.load %arg3[%c0_241, %c0_242] : memref<1x16xf32, #tpu.memory_space<vmem>>, vector<1x16xf32>
    %267 = vector.broadcast %266 : vector<1x16xf32> to vector<196x16xf32>
    %268 = arith.addf %265, %267 : vector<196x16xf32>
    %cst_243 = arith.constant 0.000000e+00 : f32
    %269 = vector.broadcast %cst_243 : f32 to vector<196x16xf32>
    %270 = arith.maximumf %268, %269 : vector<196x16xf32>
    %c588_244 = arith.constant 588 : index
    %c0_245 = arith.constant 0 : index
    %271 = vector.load %arg11[%c588_244, %c0_245] : memref<784x16xf32, #tpu.memory_space<vmem>>, vector<196x16xf32>
    tpu.vector_store %arg11[%c588_244, %c0_245], %270 {strides = array<i32>} : memref<784x16xf32, #tpu.memory_space<vmem>>, vector<196x16xf32>,
    %c0_246 = arith.constant 0 : index
    %c0_247 = arith.constant 0 : index
    %272 = tpu.strided_load %arg11[%c0_246, %c0_247] {strides = array<i32: 2, 1>} : memref<784x16xf32, #tpu.memory_space<vmem>>, vector<14x16xf32>
    %c1_248 = arith.constant 1 : index
    %c0_249 = arith.constant 0 : index
    %273 = tpu.strided_load %arg11[%c1_248, %c0_249] {strides = array<i32: 2, 1>} : memref<784x16xf32, #tpu.memory_space<vmem>>, vector<14x16xf32>
    %c28_250 = arith.constant 28 : index
    %c0_251 = arith.constant 0 : index
    %274 = tpu.strided_load %arg11[%c28_250, %c0_251] {strides = array<i32: 2, 1>} : memref<784x16xf32, #tpu.memory_space<vmem>>, vector<14x16xf32>
    %c29_252 = arith.constant 29 : index
    %c0_253 = arith.constant 0 : index
    %275 = tpu.strided_load %arg11[%c29_252, %c0_253] {strides = array<i32: 2, 1>} : memref<784x16xf32, #tpu.memory_space<vmem>>, vector<14x16xf32>
    %276 = arith.maximumf %272, %273 : vector<14x16xf32>
    %277 = arith.maximumf %274, %275 : vector<14x16xf32>
    %278 = arith.maximumf %276, %277 : vector<14x16xf32>
    %c0_254 = arith.constant 0 : index
    %c0_255 = arith.constant 0 : index
    %279 = vector.load %arg12[%c0_254, %c0_255] : memref<196x16xf32, #tpu.memory_space<vmem>>, vector<14x16xf32>
    tpu.vector_store %arg12[%c0_254, %c0_255], %278 {strides = array<i32>} : memref<196x16xf32, #tpu.memory_space<vmem>>, vector<14x16xf32>,
    %c56_256 = arith.constant 56 : index
    %c0_257 = arith.constant 0 : index
    %280 = tpu.strided_load %arg11[%c56_256, %c0_257] {strides = array<i32: 2, 1>} : memref<784x16xf32, #tpu.memory_space<vmem>>, vector<14x16xf32>
    %c57_258 = arith.constant 57 : index
    %c0_259 = arith.constant 0 : index
    %281 = tpu.strided_load %arg11[%c57_258, %c0_259] {strides = array<i32: 2, 1>} : memref<784x16xf32, #tpu.memory_space<vmem>>, vector<14x16xf32>
    %c84_260 = arith.constant 84 : index
    %c0_261 = arith.constant 0 : index
    %282 = tpu.strided_load %arg11[%c84_260, %c0_261] {strides = array<i32: 2, 1>} : memref<784x16xf32, #tpu.memory_space<vmem>>, vector<14x16xf32>
    %c85_262 = arith.constant 85 : index
    %c0_263 = arith.constant 0 : index
    %283 = tpu.strided_load %arg11[%c85_262, %c0_263] {strides = array<i32: 2, 1>} : memref<784x16xf32, #tpu.memory_space<vmem>>, vector<14x16xf32>
    %284 = arith.maximumf %280, %281 : vector<14x16xf32>
    %285 = arith.maximumf %282, %283 : vector<14x16xf32>
    %286 = arith.maximumf %284, %285 : vector<14x16xf32>
    %c14_264 = arith.constant 14 : index
    %c0_265 = arith.constant 0 : index
    %287 = vector.load %arg12[%c14_264, %c0_265] : memref<196x16xf32, #tpu.memory_space<vmem>>, vector<14x16xf32>
    tpu.vector_store %arg12[%c14_264, %c0_265], %286 {strides = array<i32>} : memref<196x16xf32, #tpu.memory_space<vmem>>, vector<14x16xf32>,
    %c112_266 = arith.constant 112 : index
    %c0_267 = arith.constant 0 : index
    %288 = tpu.strided_load %arg11[%c112_266, %c0_267] {strides = array<i32: 2, 1>} : memref<784x16xf32, #tpu.memory_space<vmem>>, vector<14x16xf32>
    %c113_268 = arith.constant 113 : index
    %c0_269 = arith.constant 0 : index
    %289 = tpu.strided_load %arg11[%c113_268, %c0_269] {strides = array<i32: 2, 1>} : memref<784x16xf32, #tpu.memory_space<vmem>>, vector<14x16xf32>
    %c140_270 = arith.constant 140 : index
    %c0_271 = arith.constant 0 : index
    %290 = tpu.strided_load %arg11[%c140_270, %c0_271] {strides = array<i32: 2, 1>} : memref<784x16xf32, #tpu.memory_space<vmem>>, vector<14x16xf32>
    %c141_272 = arith.constant 141 : index
    %c0_273 = arith.constant 0 : index
    %291 = tpu.strided_load %arg11[%c141_272, %c0_273] {strides = array<i32: 2, 1>} : memref<784x16xf32, #tpu.memory_space<vmem>>, vector<14x16xf32>
    %292 = arith.maximumf %288, %289 : vector<14x16xf32>
    %293 = arith.maximumf %290, %291 : vector<14x16xf32>
    %294 = arith.maximumf %292, %293 : vector<14x16xf32>
    %c28_274 = arith.constant 28 : index
    %c0_275 = arith.constant 0 : index
    %295 = vector.load %arg12[%c28_274, %c0_275] : memref<196x16xf32, #tpu.memory_space<vmem>>, vector<14x16xf32>
    tpu.vector_store %arg12[%c28_274, %c0_275], %294 {strides = array<i32>} : memref<196x16xf32, #tpu.memory_space<vmem>>, vector<14x16xf32>,
    %c168_276 = arith.constant 168 : index
    %c0_277 = arith.constant 0 : index
    %296 = tpu.strided_load %arg11[%c168_276, %c0_277] {strides = array<i32: 2, 1>} : memref<784x16xf32, #tpu.memory_space<vmem>>, vector<14x16xf32>
    %c169_278 = arith.constant 169 : index
    %c0_279 = arith.constant 0 : index
    %297 = tpu.strided_load %arg11[%c169_278, %c0_279] {strides = array<i32: 2, 1>} : memref<784x16xf32, #tpu.memory_space<vmem>>, vector<14x16xf32>
    %c196_280 = arith.constant 196 : index
    %c0_281 = arith.constant 0 : index
    %298 = tpu.strided_load %arg11[%c196_280, %c0_281] {strides = array<i32: 2, 1>} : memref<784x16xf32, #tpu.memory_space<vmem>>, vector<14x16xf32>
    %c197_282 = arith.constant 197 : index
    %c0_283 = arith.constant 0 : index
    %299 = tpu.strided_load %arg11[%c197_282, %c0_283] {strides = array<i32: 2, 1>} : memref<784x16xf32, #tpu.memory_space<vmem>>, vector<14x16xf32>
    %300 = arith.maximumf %296, %297 : vector<14x16xf32>
    %301 = arith.maximumf %298, %299 : vector<14x16xf32>
    %302 = arith.maximumf %300, %301 : vector<14x16xf32>
    %c42_284 = arith.constant 42 : index
    %c0_285 = arith.constant 0 : index
    %303 = vector.load %arg12[%c42_284, %c0_285] : memref<196x16xf32, #tpu.memory_space<vmem>>, vector<14x16xf32>
    tpu.vector_store %arg12[%c42_284, %c0_285], %302 {strides = array<i32>} : memref<196x16xf32, #tpu.memory_space<vmem>>, vector<14x16xf32>,
    %c224_286 = arith.constant 224 : index
    %c0_287 = arith.constant 0 : index
    %304 = tpu.strided_load %arg11[%c224_286, %c0_287] {strides = array<i32: 2, 1>} : memref<784x16xf32, #tpu.memory_space<vmem>>, vector<14x16xf32>
    %c225_288 = arith.constant 225 : index
    %c0_289 = arith.constant 0 : index
    %305 = tpu.strided_load %arg11[%c225_288, %c0_289] {strides = array<i32: 2, 1>} : memref<784x16xf32, #tpu.memory_space<vmem>>, vector<14x16xf32>
    %c252_290 = arith.constant 252 : index
    %c0_291 = arith.constant 0 : index
    %306 = tpu.strided_load %arg11[%c252_290, %c0_291] {strides = array<i32: 2, 1>} : memref<784x16xf32, #tpu.memory_space<vmem>>, vector<14x16xf32>
    %c253_292 = arith.constant 253 : index
    %c0_293 = arith.constant 0 : index
    %307 = tpu.strided_load %arg11[%c253_292, %c0_293] {strides = array<i32: 2, 1>} : memref<784x16xf32, #tpu.memory_space<vmem>>, vector<14x16xf32>
    %308 = arith.maximumf %304, %305 : vector<14x16xf32>
    %309 = arith.maximumf %306, %307 : vector<14x16xf32>
    %310 = arith.maximumf %308, %309 : vector<14x16xf32>
    %c56_294 = arith.constant 56 : index
    %c0_295 = arith.constant 0 : index
    %311 = vector.load %arg12[%c56_294, %c0_295] : memref<196x16xf32, #tpu.memory_space<vmem>>, vector<14x16xf32>
    tpu.vector_store %arg12[%c56_294, %c0_295], %310 {strides = array<i32>} : memref<196x16xf32, #tpu.memory_space<vmem>>, vector<14x16xf32>,
    %c280_296 = arith.constant 280 : index
    %c0_297 = arith.constant 0 : index
    %312 = tpu.strided_load %arg11[%c280_296, %c0_297] {strides = array<i32: 2, 1>} : memref<784x16xf32, #tpu.memory_space<vmem>>, vector<14x16xf32>
    %c281_298 = arith.constant 281 : index
    %c0_299 = arith.constant 0 : index
    %313 = tpu.strided_load %arg11[%c281_298, %c0_299] {strides = array<i32: 2, 1>} : memref<784x16xf32, #tpu.memory_space<vmem>>, vector<14x16xf32>
    %c308_300 = arith.constant 308 : index
    %c0_301 = arith.constant 0 : index
    %314 = tpu.strided_load %arg11[%c308_300, %c0_301] {strides = array<i32: 2, 1>} : memref<784x16xf32, #tpu.memory_space<vmem>>, vector<14x16xf32>
    %c309_302 = arith.constant 309 : index
    %c0_303 = arith.constant 0 : index
    %315 = tpu.strided_load %arg11[%c309_302, %c0_303] {strides = array<i32: 2, 1>} : memref<784x16xf32, #tpu.memory_space<vmem>>, vector<14x16xf32>
    %316 = arith.maximumf %312, %313 : vector<14x16xf32>
    %317 = arith.maximumf %314, %315 : vector<14x16xf32>
    %318 = arith.maximumf %316, %317 : vector<14x16xf32>
    %c70_304 = arith.constant 70 : index
    %c0_305 = arith.constant 0 : index
    %319 = vector.load %arg12[%c70_304, %c0_305] : memref<196x16xf32, #tpu.memory_space<vmem>>, vector<14x16xf32>
    tpu.vector_store %arg12[%c70_304, %c0_305], %318 {strides = array<i32>} : memref<196x16xf32, #tpu.memory_space<vmem>>, vector<14x16xf32>,
    %c336_306 = arith.constant 336 : index
    %c0_307 = arith.constant 0 : index
    %320 = tpu.strided_load %arg11[%c336_306, %c0_307] {strides = array<i32: 2, 1>} : memref<784x16xf32, #tpu.memory_space<vmem>>, vector<14x16xf32>
    %c337_308 = arith.constant 337 : index
    %c0_309 = arith.constant 0 : index
    %321 = tpu.strided_load %arg11[%c337_308, %c0_309] {strides = array<i32: 2, 1>} : memref<784x16xf32, #tpu.memory_space<vmem>>, vector<14x16xf32>
    %c364_310 = arith.constant 364 : index
    %c0_311 = arith.constant 0 : index
    %322 = tpu.strided_load %arg11[%c364_310, %c0_311] {strides = array<i32: 2, 1>} : memref<784x16xf32, #tpu.memory_space<vmem>>, vector<14x16xf32>
    %c365_312 = arith.constant 365 : index
    %c0_313 = arith.constant 0 : index
    %323 = tpu.strided_load %arg11[%c365_312, %c0_313] {strides = array<i32: 2, 1>} : memref<784x16xf32, #tpu.memory_space<vmem>>, vector<14x16xf32>
    %324 = arith.maximumf %320, %321 : vector<14x16xf32>
    %325 = arith.maximumf %322, %323 : vector<14x16xf32>
    %326 = arith.maximumf %324, %325 : vector<14x16xf32>
    %c84_314 = arith.constant 84 : index
    %c0_315 = arith.constant 0 : index
    %327 = vector.load %arg12[%c84_314, %c0_315] : memref<196x16xf32, #tpu.memory_space<vmem>>, vector<14x16xf32>
    tpu.vector_store %arg12[%c84_314, %c0_315], %326 {strides = array<i32>} : memref<196x16xf32, #tpu.memory_space<vmem>>, vector<14x16xf32>,
    %c392_316 = arith.constant 392 : index
    %c0_317 = arith.constant 0 : index
    %328 = tpu.strided_load %arg11[%c392_316, %c0_317] {strides = array<i32: 2, 1>} : memref<784x16xf32, #tpu.memory_space<vmem>>, vector<14x16xf32>
    %c393_318 = arith.constant 393 : index
    %c0_319 = arith.constant 0 : index
    %329 = tpu.strided_load %arg11[%c393_318, %c0_319] {strides = array<i32: 2, 1>} : memref<784x16xf32, #tpu.memory_space<vmem>>, vector<14x16xf32>
    %c420_320 = arith.constant 420 : index
    %c0_321 = arith.constant 0 : index
    %330 = tpu.strided_load %arg11[%c420_320, %c0_321] {strides = array<i32: 2, 1>} : memref<784x16xf32, #tpu.memory_space<vmem>>, vector<14x16xf32>
    %c421_322 = arith.constant 421 : index
    %c0_323 = arith.constant 0 : index
    %331 = tpu.strided_load %arg11[%c421_322, %c0_323] {strides = array<i32: 2, 1>} : memref<784x16xf32, #tpu.memory_space<vmem>>, vector<14x16xf32>
    %332 = arith.maximumf %328, %329 : vector<14x16xf32>
    %333 = arith.maximumf %330, %331 : vector<14x16xf32>
    %334 = arith.maximumf %332, %333 : vector<14x16xf32>
    %c98_324 = arith.constant 98 : index
    %c0_325 = arith.constant 0 : index
    %335 = vector.load %arg12[%c98_324, %c0_325] : memref<196x16xf32, #tpu.memory_space<vmem>>, vector<14x16xf32>
    tpu.vector_store %arg12[%c98_324, %c0_325], %334 {strides = array<i32>} : memref<196x16xf32, #tpu.memory_space<vmem>>, vector<14x16xf32>,
    %c448_326 = arith.constant 448 : index
    %c0_327 = arith.constant 0 : index
    %336 = tpu.strided_load %arg11[%c448_326, %c0_327] {strides = array<i32: 2, 1>} : memref<784x16xf32, #tpu.memory_space<vmem>>, vector<14x16xf32>
    %c449_328 = arith.constant 449 : index
    %c0_329 = arith.constant 0 : index
    %337 = tpu.strided_load %arg11[%c449_328, %c0_329] {strides = array<i32: 2, 1>} : memref<784x16xf32, #tpu.memory_space<vmem>>, vector<14x16xf32>
    %c476_330 = arith.constant 476 : index
    %c0_331 = arith.constant 0 : index
    %338 = tpu.strided_load %arg11[%c476_330, %c0_331] {strides = array<i32: 2, 1>} : memref<784x16xf32, #tpu.memory_space<vmem>>, vector<14x16xf32>
    %c477_332 = arith.constant 477 : index
    %c0_333 = arith.constant 0 : index
    %339 = tpu.strided_load %arg11[%c477_332, %c0_333] {strides = array<i32: 2, 1>} : memref<784x16xf32, #tpu.memory_space<vmem>>, vector<14x16xf32>
    %340 = arith.maximumf %336, %337 : vector<14x16xf32>
    %341 = arith.maximumf %338, %339 : vector<14x16xf32>
    %342 = arith.maximumf %340, %341 : vector<14x16xf32>
    %c112_334 = arith.constant 112 : index
    %c0_335 = arith.constant 0 : index
    %343 = vector.load %arg12[%c112_334, %c0_335] : memref<196x16xf32, #tpu.memory_space<vmem>>, vector<14x16xf32>
    tpu.vector_store %arg12[%c112_334, %c0_335], %342 {strides = array<i32>} : memref<196x16xf32, #tpu.memory_space<vmem>>, vector<14x16xf32>,
    %c504_336 = arith.constant 504 : index
    %c0_337 = arith.constant 0 : index
    %344 = tpu.strided_load %arg11[%c504_336, %c0_337] {strides = array<i32: 2, 1>} : memref<784x16xf32, #tpu.memory_space<vmem>>, vector<14x16xf32>
    %c505_338 = arith.constant 505 : index
    %c0_339 = arith.constant 0 : index
    %345 = tpu.strided_load %arg11[%c505_338, %c0_339] {strides = array<i32: 2, 1>} : memref<784x16xf32, #tpu.memory_space<vmem>>, vector<14x16xf32>
    %c532_340 = arith.constant 532 : index
    %c0_341 = arith.constant 0 : index
    %346 = tpu.strided_load %arg11[%c532_340, %c0_341] {strides = array<i32: 2, 1>} : memref<784x16xf32, #tpu.memory_space<vmem>>, vector<14x16xf32>
    %c533_342 = arith.constant 533 : index
    %c0_343 = arith.constant 0 : index
    %347 = tpu.strided_load %arg11[%c533_342, %c0_343] {strides = array<i32: 2, 1>} : memref<784x16xf32, #tpu.memory_space<vmem>>, vector<14x16xf32>
    %348 = arith.maximumf %344, %345 : vector<14x16xf32>
    %349 = arith.maximumf %346, %347 : vector<14x16xf32>
    %350 = arith.maximumf %348, %349 : vector<14x16xf32>
    %c126_344 = arith.constant 126 : index
    %c0_345 = arith.constant 0 : index
    %351 = vector.load %arg12[%c126_344, %c0_345] : memref<196x16xf32, #tpu.memory_space<vmem>>, vector<14x16xf32>
    tpu.vector_store %arg12[%c126_344, %c0_345], %350 {strides = array<i32>} : memref<196x16xf32, #tpu.memory_space<vmem>>, vector<14x16xf32>,
    %c560_346 = arith.constant 560 : index
    %c0_347 = arith.constant 0 : index
    %352 = tpu.strided_load %arg11[%c560_346, %c0_347] {strides = array<i32: 2, 1>} : memref<784x16xf32, #tpu.memory_space<vmem>>, vector<14x16xf32>
    %c561_348 = arith.constant 561 : index
    %c0_349 = arith.constant 0 : index
    %353 = tpu.strided_load %arg11[%c561_348, %c0_349] {strides = array<i32: 2, 1>} : memref<784x16xf32, #tpu.memory_space<vmem>>, vector<14x16xf32>
    %c588_350 = arith.constant 588 : index
    %c0_351 = arith.constant 0 : index
    %354 = tpu.strided_load %arg11[%c588_350, %c0_351] {strides = array<i32: 2, 1>} : memref<784x16xf32, #tpu.memory_space<vmem>>, vector<14x16xf32>
    %c589_352 = arith.constant 589 : index
    %c0_353 = arith.constant 0 : index
    %355 = tpu.strided_load %arg11[%c589_352, %c0_353] {strides = array<i32: 2, 1>} : memref<784x16xf32, #tpu.memory_space<vmem>>, vector<14x16xf32>
    %356 = arith.maximumf %352, %353 : vector<14x16xf32>
    %357 = arith.maximumf %354, %355 : vector<14x16xf32>
    %358 = arith.maximumf %356, %357 : vector<14x16xf32>
    %c140_354 = arith.constant 140 : index
    %c0_355 = arith.constant 0 : index
    %359 = vector.load %arg12[%c140_354, %c0_355] : memref<196x16xf32, #tpu.memory_space<vmem>>, vector<14x16xf32>
    tpu.vector_store %arg12[%c140_354, %c0_355], %358 {strides = array<i32>} : memref<196x16xf32, #tpu.memory_space<vmem>>, vector<14x16xf32>,
    %c616_356 = arith.constant 616 : index
    %c0_357 = arith.constant 0 : index
    %360 = tpu.strided_load %arg11[%c616_356, %c0_357] {strides = array<i32: 2, 1>} : memref<784x16xf32, #tpu.memory_space<vmem>>, vector<14x16xf32>
    %c617_358 = arith.constant 617 : index
    %c0_359 = arith.constant 0 : index
    %361 = tpu.strided_load %arg11[%c617_358, %c0_359] {strides = array<i32: 2, 1>} : memref<784x16xf32, #tpu.memory_space<vmem>>, vector<14x16xf32>
    %c644_360 = arith.constant 644 : index
    %c0_361 = arith.constant 0 : index
    %362 = tpu.strided_load %arg11[%c644_360, %c0_361] {strides = array<i32: 2, 1>} : memref<784x16xf32, #tpu.memory_space<vmem>>, vector<14x16xf32>
    %c645_362 = arith.constant 645 : index
    %c0_363 = arith.constant 0 : index
    %363 = tpu.strided_load %arg11[%c645_362, %c0_363] {strides = array<i32: 2, 1>} : memref<784x16xf32, #tpu.memory_space<vmem>>, vector<14x16xf32>
    %364 = arith.maximumf %360, %361 : vector<14x16xf32>
    %365 = arith.maximumf %362, %363 : vector<14x16xf32>
    %366 = arith.maximumf %364, %365 : vector<14x16xf32>
    %c154_364 = arith.constant 154 : index
    %c0_365 = arith.constant 0 : index
    %367 = vector.load %arg12[%c154_364, %c0_365] : memref<196x16xf32, #tpu.memory_space<vmem>>, vector<14x16xf32>
    tpu.vector_store %arg12[%c154_364, %c0_365], %366 {strides = array<i32>} : memref<196x16xf32, #tpu.memory_space<vmem>>, vector<14x16xf32>,
    %c672_366 = arith.constant 672 : index
    %c0_367 = arith.constant 0 : index
    %368 = tpu.strided_load %arg11[%c672_366, %c0_367] {strides = array<i32: 2, 1>} : memref<784x16xf32, #tpu.memory_space<vmem>>, vector<14x16xf32>
    %c673_368 = arith.constant 673 : index
    %c0_369 = arith.constant 0 : index
    %369 = tpu.strided_load %arg11[%c673_368, %c0_369] {strides = array<i32: 2, 1>} : memref<784x16xf32, #tpu.memory_space<vmem>>, vector<14x16xf32>
    %c700_370 = arith.constant 700 : index
    %c0_371 = arith.constant 0 : index
    %370 = tpu.strided_load %arg11[%c700_370, %c0_371] {strides = array<i32: 2, 1>} : memref<784x16xf32, #tpu.memory_space<vmem>>, vector<14x16xf32>
    %c701_372 = arith.constant 701 : index
    %c0_373 = arith.constant 0 : index
    %371 = tpu.strided_load %arg11[%c701_372, %c0_373] {strides = array<i32: 2, 1>} : memref<784x16xf32, #tpu.memory_space<vmem>>, vector<14x16xf32>
    %372 = arith.maximumf %368, %369 : vector<14x16xf32>
    %373 = arith.maximumf %370, %371 : vector<14x16xf32>
    %374 = arith.maximumf %372, %373 : vector<14x16xf32>
    %c168_374 = arith.constant 168 : index
    %c0_375 = arith.constant 0 : index
    %375 = vector.load %arg12[%c168_374, %c0_375] : memref<196x16xf32, #tpu.memory_space<vmem>>, vector<14x16xf32>
    tpu.vector_store %arg12[%c168_374, %c0_375], %374 {strides = array<i32>} : memref<196x16xf32, #tpu.memory_space<vmem>>, vector<14x16xf32>,
    %c728_376 = arith.constant 728 : index
    %c0_377 = arith.constant 0 : index
    %376 = tpu.strided_load %arg11[%c728_376, %c0_377] {strides = array<i32: 2, 1>} : memref<784x16xf32, #tpu.memory_space<vmem>>, vector<14x16xf32>
    %c729_378 = arith.constant 729 : index
    %c0_379 = arith.constant 0 : index
    %377 = tpu.strided_load %arg11[%c729_378, %c0_379] {strides = array<i32: 2, 1>} : memref<784x16xf32, #tpu.memory_space<vmem>>, vector<14x16xf32>
    %c756_380 = arith.constant 756 : index
    %c0_381 = arith.constant 0 : index
    %378 = tpu.strided_load %arg11[%c756_380, %c0_381] {strides = array<i32: 2, 1>} : memref<784x16xf32, #tpu.memory_space<vmem>>, vector<14x16xf32>
    %c757_382 = arith.constant 757 : index
    %c0_383 = arith.constant 0 : index
    %379 = tpu.strided_load %arg11[%c757_382, %c0_383] {strides = array<i32: 2, 1>} : memref<784x16xf32, #tpu.memory_space<vmem>>, vector<14x16xf32>
    %380 = arith.maximumf %376, %377 : vector<14x16xf32>
    %381 = arith.maximumf %378, %379 : vector<14x16xf32>
    %382 = arith.maximumf %380, %381 : vector<14x16xf32>
    %c182_384 = arith.constant 182 : index
    %c0_385 = arith.constant 0 : index
    %383 = vector.load %arg12[%c182_384, %c0_385] : memref<196x16xf32, #tpu.memory_space<vmem>>, vector<14x16xf32>
    tpu.vector_store %arg12[%c182_384, %c0_385], %382 {strides = array<i32>} : memref<196x16xf32, #tpu.memory_space<vmem>>, vector<14x16xf32>,
    %c0_386 = arith.constant 0 : index
    %c0_387 = arith.constant 0 : index
    %384 = vector.load %arg12[%c0_386, %c0_387] : memref<196x16xf32, #tpu.memory_space<vmem>>, vector<166x16xf32>
    %c1_388 = arith.constant 1 : index
    %c0_389 = arith.constant 0 : index
    %385 = vector.load %arg12[%c1_388, %c0_389] : memref<196x16xf32, #tpu.memory_space<vmem>>, vector<166x16xf32>
    %c2_390 = arith.constant 2 : index
    %c0_391 = arith.constant 0 : index
    %386 = vector.load %arg12[%c2_390, %c0_391] : memref<196x16xf32, #tpu.memory_space<vmem>>, vector<166x16xf32>
    %387 = tpu.concatenate %384, %385, %386 in 1 : vector<166x16xf32>, vector<166x16xf32>, vector<166x16xf32> -> vector<166x48xf32>
    %388 = arith.truncf %387 : vector<166x48xf32> to vector<166x48xbf16>
    %c0_392 = arith.constant 0 : index
    %c0_393 = arith.constant 0 : index
    %c0_394 = arith.constant 0 : index
    %389 = vector.load %arg4[%c0_392, %c0_393, %c0_394] : memref<3x48x36xbf16, #tpu.memory_space<vmem>>, vector<1x48x36xbf16>
    %390 = vector.shape_cast %389 : vector<1x48x36xbf16> to vector<48x36xbf16>
    %cst_395 = arith.constant dense<0.000000e+00> : vector<166x36xf32>
    %391 = tpu.matmul %388, %390, %cst_395 {dimension_numbers = #tpu.dot_dimension_numbers<[1], [0], [0], [1], [0, 0, 1, 1], [], []>} : vector<166x48xbf16>, vector<48x36xbf16>, vector<166x36xf32> -> vector<166x36xf32>
    %c14_396 = arith.constant 14 : index
    %c0_397 = arith.constant 0 : index
    %392 = vector.load %arg12[%c14_396, %c0_397] : memref<196x16xf32, #tpu.memory_space<vmem>>, vector<166x16xf32>
    %c15_398 = arith.constant 15 : index
    %c0_399 = arith.constant 0 : index
    %393 = vector.load %arg12[%c15_398, %c0_399] : memref<196x16xf32, #tpu.memory_space<vmem>>, vector<166x16xf32>
    %c16_400 = arith.constant 16 : index
    %c0_401 = arith.constant 0 : index
    %394 = vector.load %arg12[%c16_400, %c0_401] : memref<196x16xf32, #tpu.memory_space<vmem>>, vector<166x16xf32>
    %395 = tpu.concatenate %392, %393, %394 in 1 : vector<166x16xf32>, vector<166x16xf32>, vector<166x16xf32> -> vector<166x48xf32>
    %396 = arith.truncf %395 : vector<166x48xf32> to vector<166x48xbf16>
    %c1_402 = arith.constant 1 : index
    %c0_403 = arith.constant 0 : index
    %c0_404 = arith.constant 0 : index
    %397 = vector.load %arg4[%c1_402, %c0_403, %c0_404] : memref<3x48x36xbf16, #tpu.memory_space<vmem>>, vector<1x48x36xbf16>
    %398 = vector.shape_cast %397 : vector<1x48x36xbf16> to vector<48x36xbf16>
    %cst_405 = arith.constant dense<0.000000e+00> : vector<166x36xf32>
    %399 = tpu.matmul %396, %398, %cst_405 {dimension_numbers = #tpu.dot_dimension_numbers<[1], [0], [0], [1], [0, 0, 1, 1], [], []>} : vector<166x48xbf16>, vector<48x36xbf16>, vector<166x36xf32> -> vector<166x36xf32>
    %400 = arith.addf %391, %399 : vector<166x36xf32>
    %c28_406 = arith.constant 28 : index
    %c0_407 = arith.constant 0 : index
    %401 = vector.load %arg12[%c28_406, %c0_407] : memref<196x16xf32, #tpu.memory_space<vmem>>, vector<166x16xf32>
    %c29_408 = arith.constant 29 : index
    %c0_409 = arith.constant 0 : index
    %402 = vector.load %arg12[%c29_408, %c0_409] : memref<196x16xf32, #tpu.memory_space<vmem>>, vector<166x16xf32>
    %c30_410 = arith.constant 30 : index
    %c0_411 = arith.constant 0 : index
    %403 = vector.load %arg12[%c30_410, %c0_411] : memref<196x16xf32, #tpu.memory_space<vmem>>, vector<166x16xf32>
    %404 = tpu.concatenate %401, %402, %403 in 1 : vector<166x16xf32>, vector<166x16xf32>, vector<166x16xf32> -> vector<166x48xf32>
    %405 = arith.truncf %404 : vector<166x48xf32> to vector<166x48xbf16>
    %c2_412 = arith.constant 2 : index
    %c0_413 = arith.constant 0 : index
    %c0_414 = arith.constant 0 : index
    %406 = vector.load %arg4[%c2_412, %c0_413, %c0_414] : memref<3x48x36xbf16, #tpu.memory_space<vmem>>, vector<1x48x36xbf16>
    %407 = vector.shape_cast %406 : vector<1x48x36xbf16> to vector<48x36xbf16>
    %cst_415 = arith.constant dense<0.000000e+00> : vector<166x36xf32>
    %408 = tpu.matmul %405, %407, %cst_415 {dimension_numbers = #tpu.dot_dimension_numbers<[1], [0], [0], [1], [0, 0, 1, 1], [], []>} : vector<166x48xbf16>, vector<48x36xbf16>, vector<166x36xf32> -> vector<166x36xf32>
    %409 = arith.addf %400, %408 : vector<166x36xf32>
    %c0_416 = arith.constant 0 : index
    %c0_417 = arith.constant 0 : index
    %410 = vector.load %arg5[%c0_416, %c0_417] : memref<1x36xf32, #tpu.memory_space<vmem>>, vector<1x36xf32>
    %411 = vector.broadcast %410 : vector<1x36xf32> to vector<166x36xf32>
    %412 = arith.addf %409, %411 : vector<166x36xf32>
    %cst_418 = arith.constant 0.000000e+00 : f32
    %413 = vector.broadcast %cst_418 : f32 to vector<166x36xf32>
    %414 = arith.maximumf %412, %413 : vector<166x36xf32>
    %c0_419 = arith.constant 0 : index
    %c0_420 = arith.constant 0 : index
    %415 = vector.load %arg13[%c0_419, %c0_420] : memref<166x36xf32, #tpu.memory_space<vmem>>, vector<166x36xf32>
    tpu.vector_store %arg13[%c0_419, %c0_420], %414 {strides = array<i32>} : memref<166x36xf32, #tpu.memory_space<vmem>>, vector<166x36xf32>,
    %c0_421 = arith.constant 0 : index
    %c0_422 = arith.constant 0 : index
    %416 = tpu.strided_load %arg13[%c0_421, %c0_422] {strides = array<i32: 2, 1>} : memref<166x36xf32, #tpu.memory_space<vmem>>, vector<6x36xf32>
    %c1_423 = arith.constant 1 : index
    %c0_424 = arith.constant 0 : index
    %417 = tpu.strided_load %arg13[%c1_423, %c0_424] {strides = array<i32: 2, 1>} : memref<166x36xf32, #tpu.memory_space<vmem>>, vector<6x36xf32>
    %c14_425 = arith.constant 14 : index
    %c0_426 = arith.constant 0 : index
    %418 = tpu.strided_load %arg13[%c14_425, %c0_426] {strides = array<i32: 2, 1>} : memref<166x36xf32, #tpu.memory_space<vmem>>, vector<6x36xf32>
    %c15_427 = arith.constant 15 : index
    %c0_428 = arith.constant 0 : index
    %419 = tpu.strided_load %arg13[%c15_427, %c0_428] {strides = array<i32: 2, 1>} : memref<166x36xf32, #tpu.memory_space<vmem>>, vector<6x36xf32>
    %420 = arith.maximumf %416, %417 : vector<6x36xf32>
    %421 = arith.maximumf %418, %419 : vector<6x36xf32>
    %422 = arith.maximumf %420, %421 : vector<6x36xf32>
    %c36 = arith.constant 36 : index
    %c0_429 = arith.constant 0 : index
    %423 = vector.load %arg14[%c36, %c0_429] : memref<72x36xf32, #tpu.memory_space<vmem>>, vector<6x36xf32>
    tpu.vector_store %arg14[%c36, %c0_429], %422 {strides = array<i32>} : memref<72x36xf32, #tpu.memory_space<vmem>>, vector<6x36xf32>,
    %c28_430 = arith.constant 28 : index
    %c0_431 = arith.constant 0 : index
    %424 = tpu.strided_load %arg13[%c28_430, %c0_431] {strides = array<i32: 2, 1>} : memref<166x36xf32, #tpu.memory_space<vmem>>, vector<6x36xf32>
    %c29_432 = arith.constant 29 : index
    %c0_433 = arith.constant 0 : index
    %425 = tpu.strided_load %arg13[%c29_432, %c0_433] {strides = array<i32: 2, 1>} : memref<166x36xf32, #tpu.memory_space<vmem>>, vector<6x36xf32>
    %c42_434 = arith.constant 42 : index
    %c0_435 = arith.constant 0 : index
    %426 = tpu.strided_load %arg13[%c42_434, %c0_435] {strides = array<i32: 2, 1>} : memref<166x36xf32, #tpu.memory_space<vmem>>, vector<6x36xf32>
    %c43_436 = arith.constant 43 : index
    %c0_437 = arith.constant 0 : index
    %427 = tpu.strided_load %arg13[%c43_436, %c0_437] {strides = array<i32: 2, 1>} : memref<166x36xf32, #tpu.memory_space<vmem>>, vector<6x36xf32>
    %428 = arith.maximumf %424, %425 : vector<6x36xf32>
    %429 = arith.maximumf %426, %427 : vector<6x36xf32>
    %430 = arith.maximumf %428, %429 : vector<6x36xf32>
    %c42_438 = arith.constant 42 : index
    %c0_439 = arith.constant 0 : index
    %431 = vector.load %arg14[%c42_438, %c0_439] : memref<72x36xf32, #tpu.memory_space<vmem>>, vector<6x36xf32>
    tpu.vector_store %arg14[%c42_438, %c0_439], %430 {strides = array<i32>} : memref<72x36xf32, #tpu.memory_space<vmem>>, vector<6x36xf32>,
    %c56_440 = arith.constant 56 : index
    %c0_441 = arith.constant 0 : index
    %432 = tpu.strided_load %arg13[%c56_440, %c0_441] {strides = array<i32: 2, 1>} : memref<166x36xf32, #tpu.memory_space<vmem>>, vector<6x36xf32>
    %c57_442 = arith.constant 57 : index
    %c0_443 = arith.constant 0 : index
    %433 = tpu.strided_load %arg13[%c57_442, %c0_443] {strides = array<i32: 2, 1>} : memref<166x36xf32, #tpu.memory_space<vmem>>, vector<6x36xf32>
    %c70_444 = arith.constant 70 : index
    %c0_445 = arith.constant 0 : index
    %434 = tpu.strided_load %arg13[%c70_444, %c0_445] {strides = array<i32: 2, 1>} : memref<166x36xf32, #tpu.memory_space<vmem>>, vector<6x36xf32>
    %c71_446 = arith.constant 71 : index
    %c0_447 = arith.constant 0 : index
    %435 = tpu.strided_load %arg13[%c71_446, %c0_447] {strides = array<i32: 2, 1>} : memref<166x36xf32, #tpu.memory_space<vmem>>, vector<6x36xf32>
    %436 = arith.maximumf %432, %433 : vector<6x36xf32>
    %437 = arith.maximumf %434, %435 : vector<6x36xf32>
    %438 = arith.maximumf %436, %437 : vector<6x36xf32>
    %c48 = arith.constant 48 : index
    %c0_448 = arith.constant 0 : index
    %439 = vector.load %arg14[%c48, %c0_448] : memref<72x36xf32, #tpu.memory_space<vmem>>, vector<6x36xf32>
    tpu.vector_store %arg14[%c48, %c0_448], %438 {strides = array<i32>} : memref<72x36xf32, #tpu.memory_space<vmem>>, vector<6x36xf32>,
    %c84_449 = arith.constant 84 : index
    %c0_450 = arith.constant 0 : index
    %440 = tpu.strided_load %arg13[%c84_449, %c0_450] {strides = array<i32: 2, 1>} : memref<166x36xf32, #tpu.memory_space<vmem>>, vector<6x36xf32>
    %c85_451 = arith.constant 85 : index
    %c0_452 = arith.constant 0 : index
    %441 = tpu.strided_load %arg13[%c85_451, %c0_452] {strides = array<i32: 2, 1>} : memref<166x36xf32, #tpu.memory_space<vmem>>, vector<6x36xf32>
    %c98_453 = arith.constant 98 : index
    %c0_454 = arith.constant 0 : index
    %442 = tpu.strided_load %arg13[%c98_453, %c0_454] {strides = array<i32: 2, 1>} : memref<166x36xf32, #tpu.memory_space<vmem>>, vector<6x36xf32>
    %c99_455 = arith.constant 99 : index
    %c0_456 = arith.constant 0 : index
    %443 = tpu.strided_load %arg13[%c99_455, %c0_456] {strides = array<i32: 2, 1>} : memref<166x36xf32, #tpu.memory_space<vmem>>, vector<6x36xf32>
    %444 = arith.maximumf %440, %441 : vector<6x36xf32>
    %445 = arith.maximumf %442, %443 : vector<6x36xf32>
    %446 = arith.maximumf %444, %445 : vector<6x36xf32>
    %c54 = arith.constant 54 : index
    %c0_457 = arith.constant 0 : index
    %447 = vector.load %arg14[%c54, %c0_457] : memref<72x36xf32, #tpu.memory_space<vmem>>, vector<6x36xf32>
    tpu.vector_store %arg14[%c54, %c0_457], %446 {strides = array<i32>} : memref<72x36xf32, #tpu.memory_space<vmem>>, vector<6x36xf32>,
    %c112_458 = arith.constant 112 : index
    %c0_459 = arith.constant 0 : index
    %448 = tpu.strided_load %arg13[%c112_458, %c0_459] {strides = array<i32: 2, 1>} : memref<166x36xf32, #tpu.memory_space<vmem>>, vector<6x36xf32>
    %c113_460 = arith.constant 113 : index
    %c0_461 = arith.constant 0 : index
    %449 = tpu.strided_load %arg13[%c113_460, %c0_461] {strides = array<i32: 2, 1>} : memref<166x36xf32, #tpu.memory_space<vmem>>, vector<6x36xf32>
    %c126_462 = arith.constant 126 : index
    %c0_463 = arith.constant 0 : index
    %450 = tpu.strided_load %arg13[%c126_462, %c0_463] {strides = array<i32: 2, 1>} : memref<166x36xf32, #tpu.memory_space<vmem>>, vector<6x36xf32>
    %c127_464 = arith.constant 127 : index
    %c0_465 = arith.constant 0 : index
    %451 = tpu.strided_load %arg13[%c127_464, %c0_465] {strides = array<i32: 2, 1>} : memref<166x36xf32, #tpu.memory_space<vmem>>, vector<6x36xf32>
    %452 = arith.maximumf %448, %449 : vector<6x36xf32>
    %453 = arith.maximumf %450, %451 : vector<6x36xf32>
    %454 = arith.maximumf %452, %453 : vector<6x36xf32>
    %c60 = arith.constant 60 : index
    %c0_466 = arith.constant 0 : index
    %455 = vector.load %arg14[%c60, %c0_466] : memref<72x36xf32, #tpu.memory_space<vmem>>, vector<6x36xf32>
    tpu.vector_store %arg14[%c60, %c0_466], %454 {strides = array<i32>} : memref<72x36xf32, #tpu.memory_space<vmem>>, vector<6x36xf32>,
    %c140_467 = arith.constant 140 : index
    %c0_468 = arith.constant 0 : index
    %456 = tpu.strided_load %arg13[%c140_467, %c0_468] {strides = array<i32: 2, 1>} : memref<166x36xf32, #tpu.memory_space<vmem>>, vector<6x36xf32>
    %c141_469 = arith.constant 141 : index
    %c0_470 = arith.constant 0 : index
    %457 = tpu.strided_load %arg13[%c141_469, %c0_470] {strides = array<i32: 2, 1>} : memref<166x36xf32, #tpu.memory_space<vmem>>, vector<6x36xf32>
    %c154_471 = arith.constant 154 : index
    %c0_472 = arith.constant 0 : index
    %458 = tpu.strided_load %arg13[%c154_471, %c0_472] {strides = array<i32: 2, 1>} : memref<166x36xf32, #tpu.memory_space<vmem>>, vector<6x36xf32>
    %c155_473 = arith.constant 155 : index
    %c0_474 = arith.constant 0 : index
    %459 = tpu.strided_load %arg13[%c155_473, %c0_474] {strides = array<i32: 2, 1>} : memref<166x36xf32, #tpu.memory_space<vmem>>, vector<6x36xf32>
    %460 = arith.maximumf %456, %457 : vector<6x36xf32>
    %461 = arith.maximumf %458, %459 : vector<6x36xf32>
    %462 = arith.maximumf %460, %461 : vector<6x36xf32>
    %c66 = arith.constant 66 : index
    %c0_475 = arith.constant 0 : index
    %463 = vector.load %arg14[%c66, %c0_475] : memref<72x36xf32, #tpu.memory_space<vmem>>, vector<6x36xf32>
    tpu.vector_store %arg14[%c66, %c0_475], %462 {strides = array<i32>} : memref<72x36xf32, #tpu.memory_space<vmem>>, vector<6x36xf32>,
    %cst_476 = arith.constant 0.000000e+00 : f32
    %464 = vector.broadcast %cst_476 : f32 to vector<2x128xf32>
    %c0_477 = arith.constant 0 : index
    %c0_478 = arith.constant 0 : index
    %465 = tpu.strided_load %arg14[%c0_477, %c0_478] {strides = array<i32: 36, 1>} : memref<72x36xf32, #tpu.memory_space<vmem>>, vector<2x36xf32>
    %466 = arith.truncf %465 : vector<2x36xf32> to vector<2x36xbf16>
    %c0_479 = arith.constant 0 : index
    %c0_480 = arith.constant 0 : index
    %c0_481 = arith.constant 0 : index
    %467 = vector.load %arg6[%c0_479, %c0_480, %c0_481] : memref<36x36x128xbf16, #tpu.memory_space<vmem>>, vector<1x36x128xbf16>
    %468 = vector.shape_cast %467 : vector<1x36x128xbf16> to vector<36x128xbf16>
    %cst_482 = arith.constant dense<0.000000e+00> : vector<2x128xf32>
    %469 = tpu.matmul %466, %468, %cst_482 {dimension_numbers = #tpu.dot_dimension_numbers<[1], [0], [0], [1], [0, 0, 1, 1], [], []>} : vector<2x36xbf16>, vector<36x128xbf16>, vector<2x128xf32> -> vector<2x128xf32>
    %470 = arith.addf %464, %469 : vector<2x128xf32>
    %c1_483 = arith.constant 1 : index
    %c0_484 = arith.constant 0 : index
    %471 = tpu.strided_load %arg14[%c1_483, %c0_484] {strides = array<i32: 36, 1>} : memref<72x36xf32, #tpu.memory_space<vmem>>, vector<2x36xf32>
    %472 = arith.truncf %471 : vector<2x36xf32> to vector<2x36xbf16>
    %c1_485 = arith.constant 1 : index
    %c0_486 = arith.constant 0 : index
    %c0_487 = arith.constant 0 : index
    %473 = vector.load %arg6[%c1_485, %c0_486, %c0_487] : memref<36x36x128xbf16, #tpu.memory_space<vmem>>, vector<1x36x128xbf16>
    %474 = vector.shape_cast %473 : vector<1x36x128xbf16> to vector<36x128xbf16>
    %cst_488 = arith.constant dense<0.000000e+00> : vector<2x128xf32>
    %475 = tpu.matmul %472, %474, %cst_488 {dimension_numbers = #tpu.dot_dimension_numbers<[1], [0], [0], [1], [0, 0, 1, 1], [], []>} : vector<2x36xbf16>, vector<36x128xbf16>, vector<2x128xf32> -> vector<2x128xf32>
    %476 = arith.addf %470, %475 : vector<2x128xf32>
    %c2_489 = arith.constant 2 : index
    %c0_490 = arith.constant 0 : index
    %477 = tpu.strided_load %arg14[%c2_489, %c0_490] {strides = array<i32: 36, 1>} : memref<72x36xf32, #tpu.memory_space<vmem>>, vector<2x36xf32>
    %478 = arith.truncf %477 : vector<2x36xf32> to vector<2x36xbf16>
    %c2_491 = arith.constant 2 : index
    %c0_492 = arith.constant 0 : index
    %c0_493 = arith.constant 0 : index
    %479 = vector.load %arg6[%c2_491, %c0_492, %c0_493] : memref<36x36x128xbf16, #tpu.memory_space<vmem>>, vector<1x36x128xbf16>
    %480 = vector.shape_cast %479 : vector<1x36x128xbf16> to vector<36x128xbf16>
    %cst_494 = arith.constant dense<0.000000e+00> : vector<2x128xf32>
    %481 = tpu.matmul %478, %480, %cst_494 {dimension_numbers = #tpu.dot_dimension_numbers<[1], [0], [0], [1], [0, 0, 1, 1], [], []>} : vector<2x36xbf16>, vector<36x128xbf16>, vector<2x128xf32> -> vector<2x128xf32>
    %482 = arith.addf %476, %481 : vector<2x128xf32>
    %c3 = arith.constant 3 : index
    %c0_495 = arith.constant 0 : index
    %483 = tpu.strided_load %arg14[%c3, %c0_495] {strides = array<i32: 36, 1>} : memref<72x36xf32, #tpu.memory_space<vmem>>, vector<2x36xf32>
    %484 = arith.truncf %483 : vector<2x36xf32> to vector<2x36xbf16>
    %c3_496 = arith.constant 3 : index
    %c0_497 = arith.constant 0 : index
    %c0_498 = arith.constant 0 : index
    %485 = vector.load %arg6[%c3_496, %c0_497, %c0_498] : memref<36x36x128xbf16, #tpu.memory_space<vmem>>, vector<1x36x128xbf16>
    %486 = vector.shape_cast %485 : vector<1x36x128xbf16> to vector<36x128xbf16>
    %cst_499 = arith.constant dense<0.000000e+00> : vector<2x128xf32>
    %487 = tpu.matmul %484, %486, %cst_499 {dimension_numbers = #tpu.dot_dimension_numbers<[1], [0], [0], [1], [0, 0, 1, 1], [], []>} : vector<2x36xbf16>, vector<36x128xbf16>, vector<2x128xf32> -> vector<2x128xf32>
    %488 = arith.addf %482, %487 : vector<2x128xf32>
    %c4 = arith.constant 4 : index
    %c0_500 = arith.constant 0 : index
    %489 = tpu.strided_load %arg14[%c4, %c0_500] {strides = array<i32: 36, 1>} : memref<72x36xf32, #tpu.memory_space<vmem>>, vector<2x36xf32>
    %490 = arith.truncf %489 : vector<2x36xf32> to vector<2x36xbf16>
    %c4_501 = arith.constant 4 : index
    %c0_502 = arith.constant 0 : index
    %c0_503 = arith.constant 0 : index
    %491 = vector.load %arg6[%c4_501, %c0_502, %c0_503] : memref<36x36x128xbf16, #tpu.memory_space<vmem>>, vector<1x36x128xbf16>
    %492 = vector.shape_cast %491 : vector<1x36x128xbf16> to vector<36x128xbf16>
    %cst_504 = arith.constant dense<0.000000e+00> : vector<2x128xf32>
    %493 = tpu.matmul %490, %492, %cst_504 {dimension_numbers = #tpu.dot_dimension_numbers<[1], [0], [0], [1], [0, 0, 1, 1], [], []>} : vector<2x36xbf16>, vector<36x128xbf16>, vector<2x128xf32> -> vector<2x128xf32>
    %494 = arith.addf %488, %493 : vector<2x128xf32>
    %c5 = arith.constant 5 : index
    %c0_505 = arith.constant 0 : index
    %495 = tpu.strided_load %arg14[%c5, %c0_505] {strides = array<i32: 36, 1>} : memref<72x36xf32, #tpu.memory_space<vmem>>, vector<2x36xf32>
    %496 = arith.truncf %495 : vector<2x36xf32> to vector<2x36xbf16>
    %c5_506 = arith.constant 5 : index
    %c0_507 = arith.constant 0 : index
    %c0_508 = arith.constant 0 : index
    %497 = vector.load %arg6[%c5_506, %c0_507, %c0_508] : memref<36x36x128xbf16, #tpu.memory_space<vmem>>, vector<1x36x128xbf16>
    %498 = vector.shape_cast %497 : vector<1x36x128xbf16> to vector<36x128xbf16>
    %cst_509 = arith.constant dense<0.000000e+00> : vector<2x128xf32>
    %499 = tpu.matmul %496, %498, %cst_509 {dimension_numbers = #tpu.dot_dimension_numbers<[1], [0], [0], [1], [0, 0, 1, 1], [], []>} : vector<2x36xbf16>, vector<36x128xbf16>, vector<2x128xf32> -> vector<2x128xf32>
    %500 = arith.addf %494, %499 : vector<2x128xf32>
    %c6_510 = arith.constant 6 : index
    %c0_511 = arith.constant 0 : index
    %501 = tpu.strided_load %arg14[%c6_510, %c0_511] {strides = array<i32: 36, 1>} : memref<72x36xf32, #tpu.memory_space<vmem>>, vector<2x36xf32>
    %502 = arith.truncf %501 : vector<2x36xf32> to vector<2x36xbf16>
    %c6_512 = arith.constant 6 : index
    %c0_513 = arith.constant 0 : index
    %c0_514 = arith.constant 0 : index
    %503 = vector.load %arg6[%c6_512, %c0_513, %c0_514] : memref<36x36x128xbf16, #tpu.memory_space<vmem>>, vector<1x36x128xbf16>
    %504 = vector.shape_cast %503 : vector<1x36x128xbf16> to vector<36x128xbf16>
    %cst_515 = arith.constant dense<0.000000e+00> : vector<2x128xf32>
    %505 = tpu.matmul %502, %504, %cst_515 {dimension_numbers = #tpu.dot_dimension_numbers<[1], [0], [0], [1], [0, 0, 1, 1], [], []>} : vector<2x36xbf16>, vector<36x128xbf16>, vector<2x128xf32> -> vector<2x128xf32>
    %506 = arith.addf %500, %505 : vector<2x128xf32>
    %c7 = arith.constant 7 : index
    %c0_516 = arith.constant 0 : index
    %507 = tpu.strided_load %arg14[%c7, %c0_516] {strides = array<i32: 36, 1>} : memref<72x36xf32, #tpu.memory_space<vmem>>, vector<2x36xf32>
    %508 = arith.truncf %507 : vector<2x36xf32> to vector<2x36xbf16>
    %c7_517 = arith.constant 7 : index
    %c0_518 = arith.constant 0 : index
    %c0_519 = arith.constant 0 : index
    %509 = vector.load %arg6[%c7_517, %c0_518, %c0_519] : memref<36x36x128xbf16, #tpu.memory_space<vmem>>, vector<1x36x128xbf16>
    %510 = vector.shape_cast %509 : vector<1x36x128xbf16> to vector<36x128xbf16>
    %cst_520 = arith.constant dense<0.000000e+00> : vector<2x128xf32>
    %511 = tpu.matmul %508, %510, %cst_520 {dimension_numbers = #tpu.dot_dimension_numbers<[1], [0], [0], [1], [0, 0, 1, 1], [], []>} : vector<2x36xbf16>, vector<36x128xbf16>, vector<2x128xf32> -> vector<2x128xf32>
    %512 = arith.addf %506, %511 : vector<2x128xf32>
    %c8 = arith.constant 8 : index
    %c0_521 = arith.constant 0 : index
    %513 = tpu.strided_load %arg14[%c8, %c0_521] {strides = array<i32: 36, 1>} : memref<72x36xf32, #tpu.memory_space<vmem>>, vector<2x36xf32>
    %514 = arith.truncf %513 : vector<2x36xf32> to vector<2x36xbf16>
    %c8_522 = arith.constant 8 : index
    %c0_523 = arith.constant 0 : index
    %c0_524 = arith.constant 0 : index
    %515 = vector.load %arg6[%c8_522, %c0_523, %c0_524] : memref<36x36x128xbf16, #tpu.memory_space<vmem>>, vector<1x36x128xbf16>
    %516 = vector.shape_cast %515 : vector<1x36x128xbf16> to vector<36x128xbf16>
    %cst_525 = arith.constant dense<0.000000e+00> : vector<2x128xf32>
    %517 = tpu.matmul %514, %516, %cst_525 {dimension_numbers = #tpu.dot_dimension_numbers<[1], [0], [0], [1], [0, 0, 1, 1], [], []>} : vector<2x36xbf16>, vector<36x128xbf16>, vector<2x128xf32> -> vector<2x128xf32>
    %518 = arith.addf %512, %517 : vector<2x128xf32>
    %c9 = arith.constant 9 : index
    %c0_526 = arith.constant 0 : index
    %519 = tpu.strided_load %arg14[%c9, %c0_526] {strides = array<i32: 36, 1>} : memref<72x36xf32, #tpu.memory_space<vmem>>, vector<2x36xf32>
    %520 = arith.truncf %519 : vector<2x36xf32> to vector<2x36xbf16>
    %c9_527 = arith.constant 9 : index
    %c0_528 = arith.constant 0 : index
    %c0_529 = arith.constant 0 : index
    %521 = vector.load %arg6[%c9_527, %c0_528, %c0_529] : memref<36x36x128xbf16, #tpu.memory_space<vmem>>, vector<1x36x128xbf16>
    %522 = vector.shape_cast %521 : vector<1x36x128xbf16> to vector<36x128xbf16>
    %cst_530 = arith.constant dense<0.000000e+00> : vector<2x128xf32>
    %523 = tpu.matmul %520, %522, %cst_530 {dimension_numbers = #tpu.dot_dimension_numbers<[1], [0], [0], [1], [0, 0, 1, 1], [], []>} : vector<2x36xbf16>, vector<36x128xbf16>, vector<2x128xf32> -> vector<2x128xf32>
    %524 = arith.addf %518, %523 : vector<2x128xf32>
    %c10 = arith.constant 10 : index
    %c0_531 = arith.constant 0 : index
    %525 = tpu.strided_load %arg14[%c10, %c0_531] {strides = array<i32: 36, 1>} : memref<72x36xf32, #tpu.memory_space<vmem>>, vector<2x36xf32>
    %526 = arith.truncf %525 : vector<2x36xf32> to vector<2x36xbf16>
    %c10_532 = arith.constant 10 : index
    %c0_533 = arith.constant 0 : index
    %c0_534 = arith.constant 0 : index
    %527 = vector.load %arg6[%c10_532, %c0_533, %c0_534] : memref<36x36x128xbf16, #tpu.memory_space<vmem>>, vector<1x36x128xbf16>
    %528 = vector.shape_cast %527 : vector<1x36x128xbf16> to vector<36x128xbf16>
    %cst_535 = arith.constant dense<0.000000e+00> : vector<2x128xf32>
    %529 = tpu.matmul %526, %528, %cst_535 {dimension_numbers = #tpu.dot_dimension_numbers<[1], [0], [0], [1], [0, 0, 1, 1], [], []>} : vector<2x36xbf16>, vector<36x128xbf16>, vector<2x128xf32> -> vector<2x128xf32>
    %530 = arith.addf %524, %529 : vector<2x128xf32>
    %c11 = arith.constant 11 : index
    %c0_536 = arith.constant 0 : index
    %531 = tpu.strided_load %arg14[%c11, %c0_536] {strides = array<i32: 36, 1>} : memref<72x36xf32, #tpu.memory_space<vmem>>, vector<2x36xf32>
    %532 = arith.truncf %531 : vector<2x36xf32> to vector<2x36xbf16>
    %c11_537 = arith.constant 11 : index
    %c0_538 = arith.constant 0 : index
    %c0_539 = arith.constant 0 : index
    %533 = vector.load %arg6[%c11_537, %c0_538, %c0_539] : memref<36x36x128xbf16, #tpu.memory_space<vmem>>, vector<1x36x128xbf16>
    %534 = vector.shape_cast %533 : vector<1x36x128xbf16> to vector<36x128xbf16>
    %cst_540 = arith.constant dense<0.000000e+00> : vector<2x128xf32>
    %535 = tpu.matmul %532, %534, %cst_540 {dimension_numbers = #tpu.dot_dimension_numbers<[1], [0], [0], [1], [0, 0, 1, 1], [], []>} : vector<2x36xbf16>, vector<36x128xbf16>, vector<2x128xf32> -> vector<2x128xf32>
    %536 = arith.addf %530, %535 : vector<2x128xf32>
    %c12_541 = arith.constant 12 : index
    %c0_542 = arith.constant 0 : index
    %537 = tpu.strided_load %arg14[%c12_541, %c0_542] {strides = array<i32: 36, 1>} : memref<72x36xf32, #tpu.memory_space<vmem>>, vector<2x36xf32>
    %538 = arith.truncf %537 : vector<2x36xf32> to vector<2x36xbf16>
    %c12_543 = arith.constant 12 : index
    %c0_544 = arith.constant 0 : index
    %c0_545 = arith.constant 0 : index
    %539 = vector.load %arg6[%c12_543, %c0_544, %c0_545] : memref<36x36x128xbf16, #tpu.memory_space<vmem>>, vector<1x36x128xbf16>
    %540 = vector.shape_cast %539 : vector<1x36x128xbf16> to vector<36x128xbf16>
    %cst_546 = arith.constant dense<0.000000e+00> : vector<2x128xf32>
    %541 = tpu.matmul %538, %540, %cst_546 {dimension_numbers = #tpu.dot_dimension_numbers<[1], [0], [0], [1], [0, 0, 1, 1], [], []>} : vector<2x36xbf16>, vector<36x128xbf16>, vector<2x128xf32> -> vector<2x128xf32>
    %542 = arith.addf %536, %541 : vector<2x128xf32>
    %c13 = arith.constant 13 : index
    %c0_547 = arith.constant 0 : index
    %543 = tpu.strided_load %arg14[%c13, %c0_547] {strides = array<i32: 36, 1>} : memref<72x36xf32, #tpu.memory_space<vmem>>, vector<2x36xf32>
    %544 = arith.truncf %543 : vector<2x36xf32> to vector<2x36xbf16>
    %c13_548 = arith.constant 13 : index
    %c0_549 = arith.constant 0 : index
    %c0_550 = arith.constant 0 : index
    %545 = vector.load %arg6[%c13_548, %c0_549, %c0_550] : memref<36x36x128xbf16, #tpu.memory_space<vmem>>, vector<1x36x128xbf16>
    %546 = vector.shape_cast %545 : vector<1x36x128xbf16> to vector<36x128xbf16>
    %cst_551 = arith.constant dense<0.000000e+00> : vector<2x128xf32>
    %547 = tpu.matmul %544, %546, %cst_551 {dimension_numbers = #tpu.dot_dimension_numbers<[1], [0], [0], [1], [0, 0, 1, 1], [], []>} : vector<2x36xbf16>, vector<36x128xbf16>, vector<2x128xf32> -> vector<2x128xf32>
    %548 = arith.addf %542, %547 : vector<2x128xf32>
    %c14_552 = arith.constant 14 : index
    %c0_553 = arith.constant 0 : index
    %549 = tpu.strided_load %arg14[%c14_552, %c0_553] {strides = array<i32: 36, 1>} : memref<72x36xf32, #tpu.memory_space<vmem>>, vector<2x36xf32>
    %550 = arith.truncf %549 : vector<2x36xf32> to vector<2x36xbf16>
    %c14_554 = arith.constant 14 : index
    %c0_555 = arith.constant 0 : index
    %c0_556 = arith.constant 0 : index
    %551 = vector.load %arg6[%c14_554, %c0_555, %c0_556] : memref<36x36x128xbf16, #tpu.memory_space<vmem>>, vector<1x36x128xbf16>
    %552 = vector.shape_cast %551 : vector<1x36x128xbf16> to vector<36x128xbf16>
    %cst_557 = arith.constant dense<0.000000e+00> : vector<2x128xf32>
    %553 = tpu.matmul %550, %552, %cst_557 {dimension_numbers = #tpu.dot_dimension_numbers<[1], [0], [0], [1], [0, 0, 1, 1], [], []>} : vector<2x36xbf16>, vector<36x128xbf16>, vector<2x128xf32> -> vector<2x128xf32>
    %554 = arith.addf %548, %553 : vector<2x128xf32>
    %c15_558 = arith.constant 15 : index
    %c0_559 = arith.constant 0 : index
    %555 = tpu.strided_load %arg14[%c15_558, %c0_559] {strides = array<i32: 36, 1>} : memref<72x36xf32, #tpu.memory_space<vmem>>, vector<2x36xf32>
    %556 = arith.truncf %555 : vector<2x36xf32> to vector<2x36xbf16>
    %c15_560 = arith.constant 15 : index
    %c0_561 = arith.constant 0 : index
    %c0_562 = arith.constant 0 : index
    %557 = vector.load %arg6[%c15_560, %c0_561, %c0_562] : memref<36x36x128xbf16, #tpu.memory_space<vmem>>, vector<1x36x128xbf16>
    %558 = vector.shape_cast %557 : vector<1x36x128xbf16> to vector<36x128xbf16>
    %cst_563 = arith.constant dense<0.000000e+00> : vector<2x128xf32>
    %559 = tpu.matmul %556, %558, %cst_563 {dimension_numbers = #tpu.dot_dimension_numbers<[1], [0], [0], [1], [0, 0, 1, 1], [], []>} : vector<2x36xbf16>, vector<36x128xbf16>, vector<2x128xf32> -> vector<2x128xf32>
    %560 = arith.addf %554, %559 : vector<2x128xf32>
    %c16_564 = arith.constant 16 : index
    %c0_565 = arith.constant 0 : index
    %561 = tpu.strided_load %arg14[%c16_564, %c0_565] {strides = array<i32: 36, 1>} : memref<72x36xf32, #tpu.memory_space<vmem>>, vector<2x36xf32>
    %562 = arith.truncf %561 : vector<2x36xf32> to vector<2x36xbf16>
    %c16_566 = arith.constant 16 : index
    %c0_567 = arith.constant 0 : index
    %c0_568 = arith.constant 0 : index
    %563 = vector.load %arg6[%c16_566, %c0_567, %c0_568] : memref<36x36x128xbf16, #tpu.memory_space<vmem>>, vector<1x36x128xbf16>
    %564 = vector.shape_cast %563 : vector<1x36x128xbf16> to vector<36x128xbf16>
    %cst_569 = arith.constant dense<0.000000e+00> : vector<2x128xf32>
    %565 = tpu.matmul %562, %564, %cst_569 {dimension_numbers = #tpu.dot_dimension_numbers<[1], [0], [0], [1], [0, 0, 1, 1], [], []>} : vector<2x36xbf16>, vector<36x128xbf16>, vector<2x128xf32> -> vector<2x128xf32>
    %566 = arith.addf %560, %565 : vector<2x128xf32>
    %c17 = arith.constant 17 : index
    %c0_570 = arith.constant 0 : index
    %567 = tpu.strided_load %arg14[%c17, %c0_570] {strides = array<i32: 36, 1>} : memref<72x36xf32, #tpu.memory_space<vmem>>, vector<2x36xf32>
    %568 = arith.truncf %567 : vector<2x36xf32> to vector<2x36xbf16>
    %c17_571 = arith.constant 17 : index
    %c0_572 = arith.constant 0 : index
    %c0_573 = arith.constant 0 : index
    %569 = vector.load %arg6[%c17_571, %c0_572, %c0_573] : memref<36x36x128xbf16, #tpu.memory_space<vmem>>, vector<1x36x128xbf16>
    %570 = vector.shape_cast %569 : vector<1x36x128xbf16> to vector<36x128xbf16>
    %cst_574 = arith.constant dense<0.000000e+00> : vector<2x128xf32>
    %571 = tpu.matmul %568, %570, %cst_574 {dimension_numbers = #tpu.dot_dimension_numbers<[1], [0], [0], [1], [0, 0, 1, 1], [], []>} : vector<2x36xbf16>, vector<36x128xbf16>, vector<2x128xf32> -> vector<2x128xf32>
    %572 = arith.addf %566, %571 : vector<2x128xf32>
    %c18_575 = arith.constant 18 : index
    %c0_576 = arith.constant 0 : index
    %573 = tpu.strided_load %arg14[%c18_575, %c0_576] {strides = array<i32: 36, 1>} : memref<72x36xf32, #tpu.memory_space<vmem>>, vector<2x36xf32>
    %574 = arith.truncf %573 : vector<2x36xf32> to vector<2x36xbf16>
    %c18_577 = arith.constant 18 : index
    %c0_578 = arith.constant 0 : index
    %c0_579 = arith.constant 0 : index
    %575 = vector.load %arg6[%c18_577, %c0_578, %c0_579] : memref<36x36x128xbf16, #tpu.memory_space<vmem>>, vector<1x36x128xbf16>
    %576 = vector.shape_cast %575 : vector<1x36x128xbf16> to vector<36x128xbf16>
    %cst_580 = arith.constant dense<0.000000e+00> : vector<2x128xf32>
    %577 = tpu.matmul %574, %576, %cst_580 {dimension_numbers = #tpu.dot_dimension_numbers<[1], [0], [0], [1], [0, 0, 1, 1], [], []>} : vector<2x36xbf16>, vector<36x128xbf16>, vector<2x128xf32> -> vector<2x128xf32>
    %578 = arith.addf %572, %577 : vector<2x128xf32>
    %c19 = arith.constant 19 : index
    %c0_581 = arith.constant 0 : index
    %579 = tpu.strided_load %arg14[%c19, %c0_581] {strides = array<i32: 36, 1>} : memref<72x36xf32, #tpu.memory_space<vmem>>, vector<2x36xf32>
    %580 = arith.truncf %579 : vector<2x36xf32> to vector<2x36xbf16>
    %c19_582 = arith.constant 19 : index
    %c0_583 = arith.constant 0 : index
    %c0_584 = arith.constant 0 : index
    %581 = vector.load %arg6[%c19_582, %c0_583, %c0_584] : memref<36x36x128xbf16, #tpu.memory_space<vmem>>, vector<1x36x128xbf16>
    %582 = vector.shape_cast %581 : vector<1x36x128xbf16> to vector<36x128xbf16>
    %cst_585 = arith.constant dense<0.000000e+00> : vector<2x128xf32>
    %583 = tpu.matmul %580, %582, %cst_585 {dimension_numbers = #tpu.dot_dimension_numbers<[1], [0], [0], [1], [0, 0, 1, 1], [], []>} : vector<2x36xbf16>, vector<36x128xbf16>, vector<2x128xf32> -> vector<2x128xf32>
    %584 = arith.addf %578, %583 : vector<2x128xf32>
    %c20 = arith.constant 20 : index
    %c0_586 = arith.constant 0 : index
    %585 = tpu.strided_load %arg14[%c20, %c0_586] {strides = array<i32: 36, 1>} : memref<72x36xf32, #tpu.memory_space<vmem>>, vector<2x36xf32>
    %586 = arith.truncf %585 : vector<2x36xf32> to vector<2x36xbf16>
    %c20_587 = arith.constant 20 : index
    %c0_588 = arith.constant 0 : index
    %c0_589 = arith.constant 0 : index
    %587 = vector.load %arg6[%c20_587, %c0_588, %c0_589] : memref<36x36x128xbf16, #tpu.memory_space<vmem>>, vector<1x36x128xbf16>
    %588 = vector.shape_cast %587 : vector<1x36x128xbf16> to vector<36x128xbf16>
    %cst_590 = arith.constant dense<0.000000e+00> : vector<2x128xf32>
    %589 = tpu.matmul %586, %588, %cst_590 {dimension_numbers = #tpu.dot_dimension_numbers<[1], [0], [0], [1], [0, 0, 1, 1], [], []>} : vector<2x36xbf16>, vector<36x128xbf16>, vector<2x128xf32> -> vector<2x128xf32>
    %590 = arith.addf %584, %589 : vector<2x128xf32>
    %c21 = arith.constant 21 : index
    %c0_591 = arith.constant 0 : index
    %591 = tpu.strided_load %arg14[%c21, %c0_591] {strides = array<i32: 36, 1>} : memref<72x36xf32, #tpu.memory_space<vmem>>, vector<2x36xf32>
    %592 = arith.truncf %591 : vector<2x36xf32> to vector<2x36xbf16>
    %c21_592 = arith.constant 21 : index
    %c0_593 = arith.constant 0 : index
    %c0_594 = arith.constant 0 : index
    %593 = vector.load %arg6[%c21_592, %c0_593, %c0_594] : memref<36x36x128xbf16, #tpu.memory_space<vmem>>, vector<1x36x128xbf16>
    %594 = vector.shape_cast %593 : vector<1x36x128xbf16> to vector<36x128xbf16>
    %cst_595 = arith.constant dense<0.000000e+00> : vector<2x128xf32>
    %595 = tpu.matmul %592, %594, %cst_595 {dimension_numbers = #tpu.dot_dimension_numbers<[1], [0], [0], [1], [0, 0, 1, 1], [], []>} : vector<2x36xbf16>, vector<36x128xbf16>, vector<2x128xf32> -> vector<2x128xf32>
    %596 = arith.addf %590, %595 : vector<2x128xf32>
    %c22 = arith.constant 22 : index
    %c0_596 = arith.constant 0 : index
    %597 = tpu.strided_load %arg14[%c22, %c0_596] {strides = array<i32: 36, 1>} : memref<72x36xf32, #tpu.memory_space<vmem>>, vector<2x36xf32>
    %598 = arith.truncf %597 : vector<2x36xf32> to vector<2x36xbf16>
    %c22_597 = arith.constant 22 : index
    %c0_598 = arith.constant 0 : index
    %c0_599 = arith.constant 0 : index
    %599 = vector.load %arg6[%c22_597, %c0_598, %c0_599] : memref<36x36x128xbf16, #tpu.memory_space<vmem>>, vector<1x36x128xbf16>
    %600 = vector.shape_cast %599 : vector<1x36x128xbf16> to vector<36x128xbf16>
    %cst_600 = arith.constant dense<0.000000e+00> : vector<2x128xf32>
    %601 = tpu.matmul %598, %600, %cst_600 {dimension_numbers = #tpu.dot_dimension_numbers<[1], [0], [0], [1], [0, 0, 1, 1], [], []>} : vector<2x36xbf16>, vector<36x128xbf16>, vector<2x128xf32> -> vector<2x128xf32>
    %602 = arith.addf %596, %601 : vector<2x128xf32>
    %c23 = arith.constant 23 : index
    %c0_601 = arith.constant 0 : index
    %603 = tpu.strided_load %arg14[%c23, %c0_601] {strides = array<i32: 36, 1>} : memref<72x36xf32, #tpu.memory_space<vmem>>, vector<2x36xf32>
    %604 = arith.truncf %603 : vector<2x36xf32> to vector<2x36xbf16>
    %c23_602 = arith.constant 23 : index
    %c0_603 = arith.constant 0 : index
    %c0_604 = arith.constant 0 : index
    %605 = vector.load %arg6[%c23_602, %c0_603, %c0_604] : memref<36x36x128xbf16, #tpu.memory_space<vmem>>, vector<1x36x128xbf16>
    %606 = vector.shape_cast %605 : vector<1x36x128xbf16> to vector<36x128xbf16>
    %cst_605 = arith.constant dense<0.000000e+00> : vector<2x128xf32>
    %607 = tpu.matmul %604, %606, %cst_605 {dimension_numbers = #tpu.dot_dimension_numbers<[1], [0], [0], [1], [0, 0, 1, 1], [], []>} : vector<2x36xbf16>, vector<36x128xbf16>, vector<2x128xf32> -> vector<2x128xf32>
    %608 = arith.addf %602, %607 : vector<2x128xf32>
    %c24_606 = arith.constant 24 : index
    %c0_607 = arith.constant 0 : index
    %609 = tpu.strided_load %arg14[%c24_606, %c0_607] {strides = array<i32: 36, 1>} : memref<72x36xf32, #tpu.memory_space<vmem>>, vector<2x36xf32>
    %610 = arith.truncf %609 : vector<2x36xf32> to vector<2x36xbf16>
    %c24_608 = arith.constant 24 : index
    %c0_609 = arith.constant 0 : index
    %c0_610 = arith.constant 0 : index
    %611 = vector.load %arg6[%c24_608, %c0_609, %c0_610] : memref<36x36x128xbf16, #tpu.memory_space<vmem>>, vector<1x36x128xbf16>
    %612 = vector.shape_cast %611 : vector<1x36x128xbf16> to vector<36x128xbf16>
    %cst_611 = arith.constant dense<0.000000e+00> : vector<2x128xf32>
    %613 = tpu.matmul %610, %612, %cst_611 {dimension_numbers = #tpu.dot_dimension_numbers<[1], [0], [0], [1], [0, 0, 1, 1], [], []>} : vector<2x36xbf16>, vector<36x128xbf16>, vector<2x128xf32> -> vector<2x128xf32>
    %614 = arith.addf %608, %613 : vector<2x128xf32>
    %c25 = arith.constant 25 : index
    %c0_612 = arith.constant 0 : index
    %615 = tpu.strided_load %arg14[%c25, %c0_612] {strides = array<i32: 36, 1>} : memref<72x36xf32, #tpu.memory_space<vmem>>, vector<2x36xf32>
    %616 = arith.truncf %615 : vector<2x36xf32> to vector<2x36xbf16>
    %c25_613 = arith.constant 25 : index
    %c0_614 = arith.constant 0 : index
    %c0_615 = arith.constant 0 : index
    %617 = vector.load %arg6[%c25_613, %c0_614, %c0_615] : memref<36x36x128xbf16, #tpu.memory_space<vmem>>, vector<1x36x128xbf16>
    %618 = vector.shape_cast %617 : vector<1x36x128xbf16> to vector<36x128xbf16>
    %cst_616 = arith.constant dense<0.000000e+00> : vector<2x128xf32>
    %619 = tpu.matmul %616, %618, %cst_616 {dimension_numbers = #tpu.dot_dimension_numbers<[1], [0], [0], [1], [0, 0, 1, 1], [], []>} : vector<2x36xbf16>, vector<36x128xbf16>, vector<2x128xf32> -> vector<2x128xf32>
    %620 = arith.addf %614, %619 : vector<2x128xf32>
    %c26 = arith.constant 26 : index
    %c0_617 = arith.constant 0 : index
    %621 = tpu.strided_load %arg14[%c26, %c0_617] {strides = array<i32: 36, 1>} : memref<72x36xf32, #tpu.memory_space<vmem>>, vector<2x36xf32>
    %622 = arith.truncf %621 : vector<2x36xf32> to vector<2x36xbf16>
    %c26_618 = arith.constant 26 : index
    %c0_619 = arith.constant 0 : index
    %c0_620 = arith.constant 0 : index
    %623 = vector.load %arg6[%c26_618, %c0_619, %c0_620] : memref<36x36x128xbf16, #tpu.memory_space<vmem>>, vector<1x36x128xbf16>
    %624 = vector.shape_cast %623 : vector<1x36x128xbf16> to vector<36x128xbf16>
    %cst_621 = arith.constant dense<0.000000e+00> : vector<2x128xf32>
    %625 = tpu.matmul %622, %624, %cst_621 {dimension_numbers = #tpu.dot_dimension_numbers<[1], [0], [0], [1], [0, 0, 1, 1], [], []>} : vector<2x36xbf16>, vector<36x128xbf16>, vector<2x128xf32> -> vector<2x128xf32>
    %626 = arith.addf %620, %625 : vector<2x128xf32>
    %c27 = arith.constant 27 : index
    %c0_622 = arith.constant 0 : index
    %627 = tpu.strided_load %arg14[%c27, %c0_622] {strides = array<i32: 36, 1>} : memref<72x36xf32, #tpu.memory_space<vmem>>, vector<2x36xf32>
    %628 = arith.truncf %627 : vector<2x36xf32> to vector<2x36xbf16>
    %c27_623 = arith.constant 27 : index
    %c0_624 = arith.constant 0 : index
    %c0_625 = arith.constant 0 : index
    %629 = vector.load %arg6[%c27_623, %c0_624, %c0_625] : memref<36x36x128xbf16, #tpu.memory_space<vmem>>, vector<1x36x128xbf16>
    %630 = vector.shape_cast %629 : vector<1x36x128xbf16> to vector<36x128xbf16>
    %cst_626 = arith.constant dense<0.000000e+00> : vector<2x128xf32>
    %631 = tpu.matmul %628, %630, %cst_626 {dimension_numbers = #tpu.dot_dimension_numbers<[1], [0], [0], [1], [0, 0, 1, 1], [], []>} : vector<2x36xbf16>, vector<36x128xbf16>, vector<2x128xf32> -> vector<2x128xf32>
    %632 = arith.addf %626, %631 : vector<2x128xf32>
    %c28_627 = arith.constant 28 : index
    %c0_628 = arith.constant 0 : index
    %633 = tpu.strided_load %arg14[%c28_627, %c0_628] {strides = array<i32: 36, 1>} : memref<72x36xf32, #tpu.memory_space<vmem>>, vector<2x36xf32>
    %634 = arith.truncf %633 : vector<2x36xf32> to vector<2x36xbf16>
    %c28_629 = arith.constant 28 : index
    %c0_630 = arith.constant 0 : index
    %c0_631 = arith.constant 0 : index
    %635 = vector.load %arg6[%c28_629, %c0_630, %c0_631] : memref<36x36x128xbf16, #tpu.memory_space<vmem>>, vector<1x36x128xbf16>
    %636 = vector.shape_cast %635 : vector<1x36x128xbf16> to vector<36x128xbf16>
    %cst_632 = arith.constant dense<0.000000e+00> : vector<2x128xf32>
    %637 = tpu.matmul %634, %636, %cst_632 {dimension_numbers = #tpu.dot_dimension_numbers<[1], [0], [0], [1], [0, 0, 1, 1], [], []>} : vector<2x36xbf16>, vector<36x128xbf16>, vector<2x128xf32> -> vector<2x128xf32>
    %638 = arith.addf %632, %637 : vector<2x128xf32>
    %c29_633 = arith.constant 29 : index
    %c0_634 = arith.constant 0 : index
    %639 = tpu.strided_load %arg14[%c29_633, %c0_634] {strides = array<i32: 36, 1>} : memref<72x36xf32, #tpu.memory_space<vmem>>, vector<2x36xf32>
    %640 = arith.truncf %639 : vector<2x36xf32> to vector<2x36xbf16>
    %c29_635 = arith.constant 29 : index
    %c0_636 = arith.constant 0 : index
    %c0_637 = arith.constant 0 : index
    %641 = vector.load %arg6[%c29_635, %c0_636, %c0_637] : memref<36x36x128xbf16, #tpu.memory_space<vmem>>, vector<1x36x128xbf16>
    %642 = vector.shape_cast %641 : vector<1x36x128xbf16> to vector<36x128xbf16>
    %cst_638 = arith.constant dense<0.000000e+00> : vector<2x128xf32>
    %643 = tpu.matmul %640, %642, %cst_638 {dimension_numbers = #tpu.dot_dimension_numbers<[1], [0], [0], [1], [0, 0, 1, 1], [], []>} : vector<2x36xbf16>, vector<36x128xbf16>, vector<2x128xf32> -> vector<2x128xf32>
    %644 = arith.addf %638, %643 : vector<2x128xf32>
    %c30_639 = arith.constant 30 : index
    %c0_640 = arith.constant 0 : index
    %645 = tpu.strided_load %arg14[%c30_639, %c0_640] {strides = array<i32: 36, 1>} : memref<72x36xf32, #tpu.memory_space<vmem>>, vector<2x36xf32>
    %646 = arith.truncf %645 : vector<2x36xf32> to vector<2x36xbf16>
    %c30_641 = arith.constant 30 : index
    %c0_642 = arith.constant 0 : index
    %c0_643 = arith.constant 0 : index
    %647 = vector.load %arg6[%c30_641, %c0_642, %c0_643] : memref<36x36x128xbf16, #tpu.memory_space<vmem>>, vector<1x36x128xbf16>
    %648 = vector.shape_cast %647 : vector<1x36x128xbf16> to vector<36x128xbf16>
    %cst_644 = arith.constant dense<0.000000e+00> : vector<2x128xf32>
    %649 = tpu.matmul %646, %648, %cst_644 {dimension_numbers = #tpu.dot_dimension_numbers<[1], [0], [0], [1], [0, 0, 1, 1], [], []>} : vector<2x36xbf16>, vector<36x128xbf16>, vector<2x128xf32> -> vector<2x128xf32>
    %650 = arith.addf %644, %649 : vector<2x128xf32>
    %c31 = arith.constant 31 : index
    %c0_645 = arith.constant 0 : index
    %651 = tpu.strided_load %arg14[%c31, %c0_645] {strides = array<i32: 36, 1>} : memref<72x36xf32, #tpu.memory_space<vmem>>, vector<2x36xf32>
    %652 = arith.truncf %651 : vector<2x36xf32> to vector<2x36xbf16>
    %c31_646 = arith.constant 31 : index
    %c0_647 = arith.constant 0 : index
    %c0_648 = arith.constant 0 : index
    %653 = vector.load %arg6[%c31_646, %c0_647, %c0_648] : memref<36x36x128xbf16, #tpu.memory_space<vmem>>, vector<1x36x128xbf16>
    %654 = vector.shape_cast %653 : vector<1x36x128xbf16> to vector<36x128xbf16>
    %cst_649 = arith.constant dense<0.000000e+00> : vector<2x128xf32>
    %655 = tpu.matmul %652, %654, %cst_649 {dimension_numbers = #tpu.dot_dimension_numbers<[1], [0], [0], [1], [0, 0, 1, 1], [], []>} : vector<2x36xbf16>, vector<36x128xbf16>, vector<2x128xf32> -> vector<2x128xf32>
    %656 = arith.addf %650, %655 : vector<2x128xf32>
    %c32 = arith.constant 32 : index
    %c0_650 = arith.constant 0 : index
    %657 = tpu.strided_load %arg14[%c32, %c0_650] {strides = array<i32: 36, 1>} : memref<72x36xf32, #tpu.memory_space<vmem>>, vector<2x36xf32>
    %658 = arith.truncf %657 : vector<2x36xf32> to vector<2x36xbf16>
    %c32_651 = arith.constant 32 : index
    %c0_652 = arith.constant 0 : index
    %c0_653 = arith.constant 0 : index
    %659 = vector.load %arg6[%c32_651, %c0_652, %c0_653] : memref<36x36x128xbf16, #tpu.memory_space<vmem>>, vector<1x36x128xbf16>
    %660 = vector.shape_cast %659 : vector<1x36x128xbf16> to vector<36x128xbf16>
    %cst_654 = arith.constant dense<0.000000e+00> : vector<2x128xf32>
    %661 = tpu.matmul %658, %660, %cst_654 {dimension_numbers = #tpu.dot_dimension_numbers<[1], [0], [0], [1], [0, 0, 1, 1], [], []>} : vector<2x36xbf16>, vector<36x128xbf16>, vector<2x128xf32> -> vector<2x128xf32>
    %662 = arith.addf %656, %661 : vector<2x128xf32>
    %c33 = arith.constant 33 : index
    %c0_655 = arith.constant 0 : index
    %663 = tpu.strided_load %arg14[%c33, %c0_655] {strides = array<i32: 36, 1>} : memref<72x36xf32, #tpu.memory_space<vmem>>, vector<2x36xf32>
    %664 = arith.truncf %663 : vector<2x36xf32> to vector<2x36xbf16>
    %c33_656 = arith.constant 33 : index
    %c0_657 = arith.constant 0 : index
    %c0_658 = arith.constant 0 : index
    %665 = vector.load %arg6[%c33_656, %c0_657, %c0_658] : memref<36x36x128xbf16, #tpu.memory_space<vmem>>, vector<1x36x128xbf16>
    %666 = vector.shape_cast %665 : vector<1x36x128xbf16> to vector<36x128xbf16>
    %cst_659 = arith.constant dense<0.000000e+00> : vector<2x128xf32>
    %667 = tpu.matmul %664, %666, %cst_659 {dimension_numbers = #tpu.dot_dimension_numbers<[1], [0], [0], [1], [0, 0, 1, 1], [], []>} : vector<2x36xbf16>, vector<36x128xbf16>, vector<2x128xf32> -> vector<2x128xf32>
    %668 = arith.addf %662, %667 : vector<2x128xf32>
    %c34 = arith.constant 34 : index
    %c0_660 = arith.constant 0 : index
    %669 = tpu.strided_load %arg14[%c34, %c0_660] {strides = array<i32: 36, 1>} : memref<72x36xf32, #tpu.memory_space<vmem>>, vector<2x36xf32>
    %670 = arith.truncf %669 : vector<2x36xf32> to vector<2x36xbf16>
    %c34_661 = arith.constant 34 : index
    %c0_662 = arith.constant 0 : index
    %c0_663 = arith.constant 0 : index
    %671 = vector.load %arg6[%c34_661, %c0_662, %c0_663] : memref<36x36x128xbf16, #tpu.memory_space<vmem>>, vector<1x36x128xbf16>
    %672 = vector.shape_cast %671 : vector<1x36x128xbf16> to vector<36x128xbf16>
    %cst_664 = arith.constant dense<0.000000e+00> : vector<2x128xf32>
    %673 = tpu.matmul %670, %672, %cst_664 {dimension_numbers = #tpu.dot_dimension_numbers<[1], [0], [0], [1], [0, 0, 1, 1], [], []>} : vector<2x36xbf16>, vector<36x128xbf16>, vector<2x128xf32> -> vector<2x128xf32>
    %674 = arith.addf %668, %673 : vector<2x128xf32>
    %c35 = arith.constant 35 : index
    %c0_665 = arith.constant 0 : index
    %675 = tpu.strided_load %arg14[%c35, %c0_665] {strides = array<i32: 36, 1>} : memref<72x36xf32, #tpu.memory_space<vmem>>, vector<2x36xf32>
    %676 = arith.truncf %675 : vector<2x36xf32> to vector<2x36xbf16>
    %c35_666 = arith.constant 35 : index
    %c0_667 = arith.constant 0 : index
    %c0_668 = arith.constant 0 : index
    %677 = vector.load %arg6[%c35_666, %c0_667, %c0_668] : memref<36x36x128xbf16, #tpu.memory_space<vmem>>, vector<1x36x128xbf16>
    %678 = vector.shape_cast %677 : vector<1x36x128xbf16> to vector<36x128xbf16>
    %cst_669 = arith.constant dense<0.000000e+00> : vector<2x128xf32>
    %679 = tpu.matmul %676, %678, %cst_669 {dimension_numbers = #tpu.dot_dimension_numbers<[1], [0], [0], [1], [0, 0, 1, 1], [], []>} : vector<2x36xbf16>, vector<36x128xbf16>, vector<2x128xf32> -> vector<2x128xf32>
    %680 = arith.addf %674, %679 : vector<2x128xf32>
    %c0_670 = arith.constant 0 : index
    %c0_671 = arith.constant 0 : index
    %681 = vector.load %arg7[%c0_670, %c0_671] : memref<1x128xf32, #tpu.memory_space<vmem>>, vector<1x128xf32>
    %682 = vector.broadcast %681 : vector<1x128xf32> to vector<2x128xf32>
    %683 = arith.addf %680, %682 : vector<2x128xf32>
    %cst_672 = arith.constant 0.000000e+00 : f32
    %684 = vector.broadcast %cst_672 : f32 to vector<2x128xf32>
    %685 = arith.maximumf %683, %684 : vector<2x128xf32>
    %686 = arith.truncf %685 : vector<2x128xf32> to vector<2x128xbf16>
    %c0_673 = arith.constant 0 : index
    %c0_674 = arith.constant 0 : index
    %687 = vector.load %arg8[%c0_673, %c0_674] : memref<128x128xbf16, #tpu.memory_space<vmem>>, vector<128x128xbf16>
    %cst_675 = arith.constant dense<0.000000e+00> : vector<2x128xf32>
    %688 = tpu.matmul %686, %687, %cst_675 {dimension_numbers = #tpu.dot_dimension_numbers<[1], [0], [0], [1], [0, 0, 1, 1], [], []>} : vector<2x128xbf16>, vector<128x128xbf16>, vector<2x128xf32> -> vector<2x128xf32>
    %c0_676 = arith.constant 0 : index
    %c0_677 = arith.constant 0 : index
    %689 = vector.load %arg9[%c0_676, %c0_677] : memref<1x128xf32, #tpu.memory_space<vmem>>, vector<1x128xf32>
    %690 = vector.broadcast %689 : vector<1x128xf32> to vector<2x128xf32>
    %691 = arith.addf %688, %690 : vector<2x128xf32>
    %cst_678 = arith.constant 0.000000e+00 : f32
    %692 = vector.broadcast %cst_678 : f32 to vector<2x128xf32>
    %693 = arith.maximumf %691, %692 : vector<2x128xf32>
    %c0_679 = arith.constant 0 : index
    %c0_680 = arith.constant 0 : index
    %694 = vector.load %arg10[%c0_679, %c0_680] : memref<2x128xf32, #tpu.memory_space<vmem>>, vector<2x128xf32>
    tpu.vector_store %arg10[%c0_679, %c0_680], %693 {strides = array<i32>} : memref<2x128xf32, #tpu.memory_space<vmem>>, vector<2x128xf32>,
    return
  }
  func.func @transform_0(%arg0: i32) -> (i32, i32, i32) {
    %c0_i32 = arith.constant 0 : i32
    %c0_i32_0 = arith.constant 0 : i32
    %c0_i32_1 = arith.constant 0 : i32
    return %arg0, %c0_i32, %c0_i32_0 : i32, i32, i32
  }
  func.func @transform_1(%arg0: i32) -> (i32, i32) {
    %c0_i32 = arith.constant 0 : i32
    %c0_i32_0 = arith.constant 0 : i32
    %c0_i32_1 = arith.constant 0 : i32
    return %c0_i32, %c0_i32_0 : i32, i32
  }
  func.func @transform_2(%arg0: i32) -> (i32, i32) {
    %c0_i32 = arith.constant 0 : i32
    %c0_i32_0 = arith.constant 0 : i32
    %c0_i32_1 = arith.constant 0 : i32
    return %c0_i32, %c0_i32_0 : i32, i32
  }
  func.func @transform_3(%arg0: i32) -> (i32, i32, i32) {
    %c0_i32 = arith.constant 0 : i32
    %c0_i32_0 = arith.constant 0 : i32
    %c0_i32_1 = arith.constant 0 : i32
    %c0_i32_2 = arith.constant 0 : i32
    return %c0_i32, %c0_i32_0, %c0_i32_1 : i32, i32, i32
  }
  func.func @transform_4(%arg0: i32) -> (i32, i32) {
    %c0_i32 = arith.constant 0 : i32
    %c0_i32_0 = arith.constant 0 : i32
    %c0_i32_1 = arith.constant 0 : i32
    return %c0_i32, %c0_i32_0 : i32, i32
  }
  func.func @transform_5(%arg0: i32) -> (i32, i32, i32) {
    %c0_i32 = arith.constant 0 : i32
    %c0_i32_0 = arith.constant 0 : i32
    %c0_i32_1 = arith.constant 0 : i32
    %c0_i32_2 = arith.constant 0 : i32
    return %c0_i32, %c0_i32_0, %c0_i32_1 : i32, i32, i32
  }
  func.func @transform_6(%arg0: i32) -> (i32, i32) {
    %c0_i32 = arith.constant 0 : i32
    %c0_i32_0 = arith.constant 0 : i32
    %c0_i32_1 = arith.constant 0 : i32
    return %c0_i32, %c0_i32_0 : i32, i32
  }
  func.func @transform_7(%arg0: i32) -> (i32, i32) {
    %c0_i32 = arith.constant 0 : i32
    %c0_i32_0 = arith.constant 0 : i32
    %c0_i32_1 = arith.constant 0 : i32
    return %c0_i32, %c0_i32_0 : i32, i32
  }
  func.func @transform_8(%arg0: i32) -> (i32, i32) {
    %c0_i32 = arith.constant 0 : i32
    %c0_i32_0 = arith.constant 0 : i32
    %c0_i32_1 = arith.constant 0 : i32
    return %c0_i32, %c0_i32_0 : i32, i32
  }
  func.func @transform_9(%arg0: i32) -> (i32, i32) {
    %c0_i32 = arith.constant 0 : i32
    %c0_i32_0 = arith.constant 0 : i32
    return %arg0, %c0_i32 : i32, i32
  }
}

</mosaic_0001>

<bundles_post_ra>
// kernel: cnn_forward.1
= control target key start
LH: loop header
LB: loop body
LE: loop exit
PB: predicated region body
PF: predicated region fallthrough
CT: control target
= control target key end

     0   :  { %v12631_v1 = vmov 0.0   ;;  %vm208_vm0 = vcmask 1044480   ;;  %vm209_vm1 = vcmask 1045504   ;;  %v12632_v5 = vmov 65535   ;;  %s15785_s0 = inlined_call_operand.vmem [shape: bf16[2,784,75], index: 0, kind: input, shape index: {}]   ;;  %s15786_s1 = inlined_call_operand.vmem [shape: bf16[75,16], index: 1, kind: input, shape index: {}]   ;;  %s15787_s2 = inlined_call_operand.vmem [shape: f32[1,16], index: 2, kind: input, shape index: {}]   ;;  %s15788_s3 = inlined_call_operand.vmem [shape: bf16[3,48,36], index: 3, kind: input, shape index: {}]   ;;  %s15789_s4 = inlined_call_operand.vmem [shape: f32[1,36], index: 4, kind: input, shape index: {}]   ;;  %s15790_s5 = inlined_call_operand.vmem [shape: bf16[36,36,128], index: 5, kind: input, shape index: {}]   ;;  %s15791_s6 = inlined_call_operand.vmem [shape: f32[1,128], index: 6, kind: input, shape index: {}]   ;;  %s15792_s7 = inlined_call_operand.vmem [shape: bf16[128,128], index: 7, kind: input, shape index: {}]   ;;  %s15793_s8 = inlined_call_operand.vmem [shape: f32[1,128], index: 8, kind: input, shape index: {}]   ;;  %s15794_s9 = inlined_call_operand.hbm [shape: f32[2,128], index: 9, kind: output, shape index: {}]  }
   0x1   :  { %v12305_v0 = vld [vmem:[%s15786_s1] sm:$0xff]   ;;  %10502 = vmatprep.subr.bf16.mxu0 %v12631_v1  ;;  %10564 = vmatprep.subr.bf16.mxu1 %v12631_v1  ;;  %v12307_v3 = vld [vmem:[%s15786_s1 + $0x8] sm:$0xff]   ;;  %v210_v6 = vsel %vm208_vm0, 4294967295, %v12632_v5  ;;  %v12309_v7 = vld [vmem:[%s15786_s1 + $0x10] sm:$0xff]   ;;  %vm12633_vm2 = vmmov 0   ;;  %vm168_vm3 = vcmask 613376  }
   0x2   :  { %v12306_v2 = vld [vmem:[%s15786_s1] sm:$0xff]   ;;  %10503 = vmatpush3.bf16.msra.mxu0 %v12305_v0  ;;  %v12308_v4 = vld [vmem:[%s15786_s1 + $0x8] sm:$0xff]   ;;  %v12310_v8 = vld [vmem:[%s15786_s1 + $0x10] sm:$0xff]   ;;  %v12715_v10 = vsel %vm209_vm1, %v210_v6, 0  ;;  %10512 = vmatprep.mubr.msk.bf16.mxu0 %vm12633_vm2, %v12631_v1 }
   0x3   :  { %10565 = vmatpush3.bf16.msra.mxu1 %v12306_v2  ;;  %10504 = vmatprep.subr.bf16.mxu0 %v12631_v1  ;;  %v12311_v9 = vld [vmem:[%s15786_s1 + $0x18] sm:$0xff]   ;;  %v12313_v12 = vld [vmem:[%s15786_s1 + $0x20] sm:$0x3f]   ;;  %v12317_v15 = vld [vmem:[%s15785_s0 + $0x68] sm:$0xff]  }
   0x4   :  { %10566 = vmatprep.subr.bf16.mxu1 %v12631_v1  ;;  %v12312_v11 = vld [vmem:[%s15786_s1 + $0x18] sm:$0xff]   ;;  %10574 = vmatprep.mubr.msk.bf16.mxu1 %vm12633_vm2, %v12631_v1  ;;  %v12314_v13 = vld [vmem:[%s15786_s1 + $0x20] sm:$0x3f]   ;;  %v213_v16 = vand.u32 %v12313_v12, %v12715_v10  ;;  %v510_v19 = vrot.slane %v12317_v15, 2  ;;  %v12320_v23 = vld [vmem:[%s15785_s0 + $0x70] sm:$0xff]  }
   0x5   :  { %v12316_v14 = vld [vmem:[%s15785_s0 + $0x60] sm:$0xfc]   ;;  %v603_v17 = vand.u32 %v12314_v13, %v12715_v10  ;;  %v512_v25 = vrot.slane %v12320_v23, 2  ;;  %v12324_v26 = vld [vmem:[%s15786_s1 + $0x8] sm:$0xff]   ;;  %v12323_v30 = vld [vmem:[%s15785_s0 + $0x78] sm:$0xff]  }
   0x6   :  { %10505 = vmatpush3.bf16.msra.mxu0 %v12307_v3  ;;  %v509_v18 = vrot.slane %v12316_v14, 2  ;;  %v12315_v20 = vld [vmem:[%s15785_s0] sm:$0xff]   ;;  %v12319_v27 = vld [vmem:[%s15785_s0 + $0x8] sm:$0xff]   ;;  %v12332_v31 = vld [vmem:[%s15786_s1 + $0x10] sm:$0xff]   ;;  %v514_v32 = vrot.slane %v12323_v30, 2 }
   0x7   :  { %10567 = vmatpush3.bf16.msra.mxu1 %v12308_v4  ;;  %10506 = vmatprep.subr.bf16.mxu0 %v12631_v1  ;;  %v12318_v21 = vld [vmem:[%s15786_s1] sm:$0xff]   ;;  %v12329_v28 = vld [vmem:[%s15786_s1 + $0x8] sm:$0xff]   ;;  %v513_v29 = vsel %vm209_vm1, %v510_v19, %v512_v25  ;;  %v12335_v33 = vld [vmem:[%s15786_s1 + $0x10] sm:$0xff]  }
   0x8   :  { %10568 = vmatprep.subr.bf16.mxu1 %v12631_v1  ;;  %v511_v22 = vsel %vm209_vm1, %v509_v18, %v510_v19  ;;  %v12321_v24 = vld [vmem:[%s15786_s1] sm:$0xff]   ;;  %v12322_v34 = vld [vmem:[%s15785_s0 + $0x10] sm:$0xff]   ;;  %v515_v35 = vsel %vm209_vm1, %v512_v25, %v514_v32  ;;  %v12340_v37 = vld [vmem:[%s15786_s1 + $0x18] sm:$0xff]  }
   0x9   :  { %v12326_v36 = vld [vmem:[%s15785_s0 + $0x80] sm:$0xff]   ;;  %v12343_v39 = vld [vmem:[%s15786_s1 + $0x18] sm:$0xff]   ;;  %v12328_v41 = vld [vmem:[%s15785_s0 + $0x88] sm:$0xff]  }
   0xa   :  { %10507 = vmatpush3.bf16.msra.mxu0 %v12309_v7  ;;  %v516_v38 = vrot.slane %v12326_v36, 2  ;;  %v12325_v40 = vld [vmem:[%s15785_s0 + $0x18] sm:$0xff]   ;;  %v12346_v42 = vld [vmem:[%s15786_s1 + $0x20] sm:$0x3f]   ;;  %v518_v46 = vrot.slane %v12328_v41, 2  ;;  %v12331_v50 = vld [vmem:[%s15785_s0 + $0x90] sm:$0xff]  }
   0xb   :  { %10569 = vmatpush3.bf16.msra.mxu1 %v12310_v8  ;;  %10508 = vmatprep.subr.bf16.mxu0 %v12631_v1  ;;  %v1352_v44 = vand.u32 %v12346_v42, %v12715_v10  ;;  %v12349_v45 = vld [vmem:[%s15786_s1 + $0x20] sm:$0x3f]   ;;  %v520_v51 = vrot.slane %v12331_v50, 2  ;;  %v12330_v52 = vld [vmem:[%s15785_s0 + $0x28] sm:$0xff]   ;;  %v12334_v54 = vld [vmem:[%s15785_s0 + $0x98] sm:$0xff]  }
   0xc   :  { %10570 = vmatprep.subr.bf16.mxu1 %v12631_v1  ;;  %v517_v43 = vsel %vm209_vm1, %v514_v32, %v516_v38  ;;  %v965_v47 = vand.u32 %v12349_v45, %v12715_v10  ;;  %v12327_v48 = vld [vmem:[%s15785_s0 + $0x20] sm:$0xff]   ;;  %v519_v49 = vsel %vm209_vm1, %v516_v38, %v518_v46  ;;  %v522_v55 = vrot.slane %v12334_v54, 2  ;;  %v12333_v56 = vld [vmem:[%s15785_s0 + $0x30] sm:$0xff]   ;;  %v12339_v58 = vld [vmem:[%s15785_s0 + $0xa8] sm:$0xff]  }
   0xd   :  { %v521_v53 = vsel %vm209_vm1, %v518_v46, %v520_v51  ;;  %v12337_v57 = vld [vmem:[%s15785_s0 + $0xa0] sm:$0xff]   ;;  %v12342_v60 = vld [vmem:[%s15785_s0 + $0xb0] sm:$0xff]   ;;  %v12345_v61 = vld [vmem:[%s15785_s0 + $0xb8] sm:$0xff]   ;;  %v526_v0 = vrot.slane %v12339_v58, 2 }
   0xe   :  { %10509 = vmatpush3.bf16.msra.mxu0 %v12311_v9  ;;  %v523_v59 = vsel %vm209_vm1, %v520_v51, %v522_v55  ;;  %v12336_v62 = vld [vmem:[%s15785_s0 + $0x38] sm:$0xff]   ;;  %v524_v63 = vrot.slane %v12337_v57, 2  ;;  %v528_v2 = vrot.slane %v12342_v60, 2  ;;  %v530_v3 = vrot.slane %v12345_v61, 2  ;;  %v12348_v5 = vld [vmem:[%s15785_s0 + $0xc0] ss:$0 sps:$4 sm:$0xff]  }
   0xf   :  { %10571 = vmatpush3.bf16.msra.mxu1 %v12312_v11  ;;  %10510 = vmatprep.subr.bf16.mxu0 %v12631_v1  ;;  %v12338_v6 = vld [vmem:[%s15785_s0 + $0x40] sm:$0xff]   ;;  %v532_v8 = vrot.slane %v12348_v5, 2  ;;  %v12353_v9 = vld [vmem:[%s15785_s0 + $0x12c] sm:$0xff]   ;;  %v12355_v11 = vld [vmem:[%s15785_s0 + $0x134] sm:$0xff]  }
  0x10   :  { %10572 = vmatprep.subr.bf16.mxu1 %v12631_v1  ;;  %v525_v4 = vsel %vm209_vm1, %v522_v55, %v524_v63  ;;  %v12352_v7 = vld [vmem:[%s15785_s0 + $0x124] sm:$0xfc]   ;;  %v12914_v12 = vld [vmem:[%s15785_s0 + $0x13c] sm:$0xff]   ;;  %v527_v13 = vsel %vm209_vm1, %v524_v63, %v526_v0  ;;  %v1261_v18 = vrot.slane %v12355_v11, 2  ;;  %v529_v25 = vsel %vm209_vm1, %v526_v0, %v528_v2  ;;  %v12344_v30 = vld [vmem:[%s15785_s0 + $0x50] sm:$0xff]  }
  0x11   :  { %v1258_v14 = vrot.slane %v12352_v7, 2  ;;  %v12920_v15 = vld [vmem:[%s15785_s0 + $0x144] sm:$0xff]   ;;  %v1263_v19 = vrot.slane %v12914_v12, 2  ;;  %v12946_v23 = vld [vmem:[%s15785_s0 + $0x15c] sm:$0xff]   ;;  %v12369_v41 = vld [vmem:[%s15785_s0 + $0x16c] sm:$0xff]  }
  0x12   :  { %10511 = vmatpush3.bf16.msra.mxu0 %v213_v16  ;;  %v12341_v16 = vld [vmem:[%s15785_s0 + $0x48] sm:$0xff]   ;;  %v12347_v32 = vld [vmem:[%s15785_s0 + $0x58] sm:$0xff]   ;;  %v1275_v45 = vrot.slane %v12369_v41, 2 }
  0x13   :  { %10573 = vmatpush3.bf16.msra.mxu1 %v603_v17  ;;  %10626 = vmatprep.subr.bf16.mxu0 %v12631_v1  ;;  %v1259_v17 = vrot.slane %v12353_v9, 2  ;;  %v12371_v42 = vld [vmem:[%s15785_s0 + $0x174] sm:$0xff]   ;;  %v12368_v55 = vld [vmem:[%s15785_s0 + $0x104] sm:$0xff]   ;;  %v12370_v57 = vld [vmem:[%s15785_s0 + $0x10c] sm:$0xff]  }
  0x14   :  { %10688 = vmatprep.subr.bf16.mxu1 %v12631_v1  ;;  %v1277_v46 = vrot.slane %v12371_v42, 2  ;;  %v12364_v51 = vld [vmem:[%s15785_s0 + $0xf4] sm:$0xff]   ;;  %v12373_v58 = vld [vmem:[%s15785_s0 + $0x17c] sm:$0xff]  }
  0x15   :  { %10513 = vmatmul.mubr.msk.bf16.vlgmr.msra.gmra.mrb[0].mxu0 %vm168_vm3, %v12315_v20  ;;  %v1265_v20 = vrot.slane %v12920_v15, 2  ;;  %v1260_v36 = vsel %vm209_vm1, %v1258_v14, %v1259_v17  ;;  %v1262_v38 = vsel %vm209_vm1, %v1259_v17, %v1261_v18 }
  0x16   :  { %10575 = vmatmul.mubr.msk.bf16.vlgmr.msra.gmra.mrb[0].mxu1 %vm168_vm3, %v511_v22  ;;  %10516 = vmatprep.mubr.msk.bf16.mxu0 %vm12633_vm2, %v12631_v1  ;;  %v12941_v22 = vld [vmem:[%s15785_s0 + $0x154] sm:$0xff]  }
  0x17   :  { %10689 = vmatpush3.bf16.msra.mxu1 %v12318_v21  ;;  %10578 = vmatprep.mubr.msk.bf16.mxu1 %vm12633_vm2, %v12631_v1  ;;  %v12936_v21 = vld [vmem:[%s15785_s0 + $0x14c] sm:$0xff]  }
  0x18   :  { %10627 = vmatpush3.bf16.msra.mxu0 %v12321_v24  ;;  %10690 = vmatprep.subr.bf16.mxu1 %v12631_v1  ;;  %v12951_v24 = vld [vmem:[%s15785_s0 + $0x164] sm:$0xff]  }
  0x19   :  { %10628 = vmatprep.subr.bf16.mxu0 %v12631_v1 }
  0x1b   :  { %10691 = vmatpush3.bf16.msra.mxu1 %v12324_v26  ;;  %v1267_v26 = vrot.slane %v12936_v21, 2 }
  0x1c   :  { %10629 = vmatpush3.bf16.msra.mxu0 %v12329_v28  ;;  %10692 = vmatprep.subr.bf16.mxu1 %v12631_v1  ;;  %v1271_v28 = vrot.slane %v12946_v23, 2 }
  0x1d   :  { %10517 = vmatmul.mubr.msk.bf16.gmra.mrb[4].mxu0 %vm168_vm3, %v12319_v27  ;;  %10630 = vmatprep.subr.bf16.mxu0 %v12631_v1  ;;  %v1269_v27 = vrot.slane %v12941_v22, 2 }
  0x1e   :  { %10579 = vmatmul.mubr.msk.bf16.gmra.mrb[4].mxu1 %vm168_vm3, %v513_v29  ;;  %10520 = vmatprep.mubr.msk.bf16.mxu0 %vm12633_vm2, %v12631_v1  ;;  %v1273_v29 = vrot.slane %v12951_v24, 2 }
  0x1f   :  { %10582 = vmatprep.mubr.msk.bf16.mxu1 %vm12633_vm2, %v12631_v1  ;;  %10693 = vmatpush3.bf16.msra.mxu1 %v12332_v31  ;;  %v531_v31 = vsel %vm209_vm1, %v528_v2, %v530_v3  ;;  %v1270_v50 = vsel %vm209_vm1, %v1267_v26, %v1269_v27 }
  0x20   :  { %10694 = vmatprep.subr.bf16.mxu1 %v12631_v1  ;;  %10631 = vmatpush3.bf16.msra.mxu0 %v12335_v33  ;;  %v533_v33 = vsel %vm209_vm1, %v530_v3, %v532_v8  ;;  %v1274_v54 = vsel %vm209_vm1, %v1271_v28, %v1273_v29 }
  0x21   :  { %10632 = vmatprep.subr.bf16.mxu0 %v12631_v1 }
  0x23   :  { %10695 = vmatpush3.bf16.msra.mxu1 %v12340_v37  ;;  %v12354_v37 = vld [vmem:[%s15785_s0 + $0xcc] sm:$0xff]  }
  0x24   :  { %10696 = vmatprep.subr.bf16.mxu1 %v12631_v1  ;;  %10633 = vmatpush3.bf16.msra.mxu0 %v12343_v39  ;;  %v12356_v39 = vld [vmem:[%s15785_s0 + $0xd4] sm:$0xff]  }
  0x25   :  { %10521 = vmatmul.mubr.msk.bf16.gmra.mrb[8].mxu0 %vm168_vm3, %v12322_v34  ;;  %10634 = vmatprep.subr.bf16.mxu0 %v12631_v1  ;;  %v12350_v34 = vld [vmem:[%s15785_s0 + $0x60] ss:$0 sps:$4 sm:$0x33]  }
  0x26   :  { %10583 = vmatmul.mubr.msk.bf16.gmra.mrb[8].mxu1 %vm168_vm3, %v515_v35  ;;  %10524 = vmatprep.mubr.msk.bf16.mxu0 %vm12633_vm2, %v12631_v1  ;;  %v12351_v35 = vld [vmem:[%s15785_s0 + $0xc4] sm:$0xff]  }
  0x27   :  { %10586 = vmatprep.mubr.msk.bf16.mxu1 %vm12633_vm2, %v12631_v1  ;;  %10697 = vmatpush3.bf16.msra.mxu1 %v1352_v44  ;;  %v1266_v44 = vsel %vm209_vm1, %v1263_v19, %v1265_v20 }
  0x28   :  { %10635 = vmatpush3.bf16.msra.mxu0 %v965_v47  ;;  %11678 = vmatprep.subr.bf16.mxu1 %v12631_v1  ;;  %v12360_v47 = vld [vmem:[%s15785_s0 + $0xe4] sm:$0xff]  }
  0x29   :  { %10750 = vmatprep.subr.bf16.mxu0 %v12631_v1 }
  0x2d   :  { %10525 = vmatmul.mubr.msk.bf16.gmra.mrb[12].mxu0 %vm168_vm3, %v12325_v40  ;;  %v1264_v40 = vsel %vm209_vm1, %v1261_v18, %v1263_v19 }
  0x2e   :  { %10587 = vmatmul.mubr.msk.bf16.gmra.mrb[12].mxu1 %vm168_vm3, %v517_v43  ;;  %10528 = vmatprep.mubr.msk.bf16.mxu0 %vm12633_vm2, %v12631_v1  ;;  %v12358_v43 = vld [vmem:[%s15785_s0 + $0xdc] sm:$0xff]  }
  0x2f   :  { %10590 = vmatprep.mubr.msk.bf16.mxu1 %vm12633_vm2, %v12631_v1 }
  0x35   :  { %10529 = vmatmul.mubr.msk.bf16.gmra.mrb[16].mxu0 %vm168_vm3, %v12327_v48  ;;  %v1268_v48 = vsel %vm209_vm1, %v1265_v20, %v1267_v26 }
  0x36   :  { %10591 = vmatmul.mubr.msk.bf16.gmra.mrb[16].mxu1 %vm168_vm3, %v519_v49  ;;  %10532 = vmatprep.mubr.msk.bf16.mxu0 %vm12633_vm2, %v12631_v1  ;;  %v12362_v49 = vld [vmem:[%s15785_s0 + $0xec] sm:$0xff]  }
  0x37   :  { %10594 = vmatprep.mubr.msk.bf16.mxu1 %vm12633_vm2, %v12631_v1 }
  0x3d   :  { %10533 = vmatmul.mubr.msk.bf16.gmra.mrb[20].mxu0 %vm168_vm3, %v12330_v52  ;;  %v1272_v52 = vsel %vm209_vm1, %v1269_v27, %v1271_v28 }
  0x3e   :  { %10595 = vmatmul.mubr.msk.bf16.gmra.mrb[20].mxu1 %vm168_vm3, %v521_v53  ;;  %10536 = vmatprep.mubr.msk.bf16.mxu0 %vm12633_vm2, %v12631_v1  ;;  %v12366_v53 = vld [vmem:[%s15785_s0 + $0xfc] sm:$0xff]  }
  0x3f   :  { %10598 = vmatprep.mubr.msk.bf16.mxu1 %vm12633_vm2, %v12631_v1 }
  0x45   :  { %10537 = vmatmul.mubr.msk.bf16.gmra.mrb[24].mxu0 %vm168_vm3, %v12333_v56  ;;  %v1276_v56 = vsel %vm209_vm1, %v1273_v29, %v1275_v45 }
  0x46   :  { %10599 = vmatmul.mubr.msk.bf16.gmra.mrb[24].mxu1 %vm168_vm3, %v523_v59  ;;  %10540 = vmatprep.mubr.msk.bf16.mxu0 %vm12633_vm2, %v12631_v1  ;;  %v1278_v59 = vsel %vm209_vm1, %v1275_v45, %v1277_v46 }
  0x47   :  { %10602 = vmatprep.mubr.msk.bf16.mxu1 %vm12633_vm2, %v12631_v1 }
  0x4d   :  { %10541 = vmatmul.mubr.msk.bf16.gmra.mrb[28].mxu0 %vm168_vm3, %v12336_v62 }
  0x4e   :  { %10603 = vmatmul.mubr.msk.bf16.gmra.mrb[28].mxu1 %vm168_vm3, %v525_v4  ;;  %10544 = vmatprep.mubr.msk.bf16.mxu0 %vm12633_vm2, %v12631_v1 }
  0x4f   :  { %10606 = vmatprep.mubr.msk.bf16.mxu1 %vm12633_vm2, %v12631_v1 }
  0x55   :  { %10545 = vmatmul.mubr.msk.bf16.gmra.mrb[32].mxu0 %vm168_vm3, %v12338_v6 }
  0x56   :  { %10607 = vmatmul.mubr.msk.bf16.gmra.mrb[32].mxu1 %vm168_vm3, %v527_v13  ;;  %10548 = vmatprep.mubr.msk.bf16.mxu0 %vm12633_vm2, %v12631_v1 }
  0x57   :  { %10610 = vmatprep.mubr.msk.bf16.mxu1 %vm12633_vm2, %v12631_v1 }
  0x5d   :  { %10549 = vmatmul.mubr.msk.bf16.gmra.mrb[36].mxu0 %vm168_vm3, %v12341_v16 }
  0x5e   :  { %10611 = vmatmul.mubr.msk.bf16.gmra.mrb[36].mxu1 %vm168_vm3, %v529_v25  ;;  %10552 = vmatprep.mubr.msk.bf16.mxu0 %vm12633_vm2, %v12631_v1 }
  0x5f   :  { %10614 = vmatprep.mubr.msk.bf16.mxu1 %vm12633_vm2, %v12631_v1 }
  0x65   :  { %10553 = vmatmul.mubr.msk.bf16.gmra.mrb[40].mxu0 %vm168_vm3, %v12344_v30 }
  0x66   :  { %10615 = vmatmul.mubr.msk.bf16.gmra.mrb[40].mxu1 %vm168_vm3, %v531_v31  ;;  %10556 = vmatprep.mubr.msk.bf16.mxu0 %vm12633_vm2, %v12631_v1 }
  0x67   :  { %10618 = vmatprep.mubr.msk.bf16.mxu1 %vm12633_vm2, %v12631_v1 }
  0x6d   :  { %10557 = vmatmul.mubr.msk.bf16.gmra.mrb[44].mxu0 %vm168_vm3, %v12347_v32 }
  0x6e   :  { %10619 = vmatmul.mubr.msk.bf16.gmra.mrb[44].mxu1 %vm168_vm3, %v533_v33  ;;  %10560 = vmatprep.mubr.msk.bf16.mxu0 %vm12633_vm2, %v12631_v1 }
  0x6f   :  { %10622 = vmatprep.mubr.msk.bf16.mxu1 %vm12633_vm2, %v12631_v1 }
  0x75   :  { %10561 = vmatmul.mubr.msk.bf16.gmra.mrb[48].mxu0 %vm168_vm3, %v12350_v34 }
  0x76   :  { %10623 = vmatmul.mubr.msk.bf16.gmra.mrb[48].mxu1 %vm168_vm3, %v532_v8  ;;  %10636 = vmatprep.mubr.msk.bf16.mxu0 %vm12633_vm2, %v12631_v1 }
  0x77   :  { %10698 = vmatprep.mubr.msk.bf16.mxu1 %vm12633_vm2, %v12631_v1 }
  0x7d   :  { %10637 = vmatmul.mubr.msk.bf16.vlgmr.msra.gmra.mrb[52].mxu0 %vm168_vm3, %v12351_v35 }
  0x7e   :  { %10699 = vmatmul.mubr.msk.bf16.vlgmr.msra.gmra.mrb[52].mxu1 %vm168_vm3, %v1260_v36  ;;  %10640 = vmatprep.mubr.msk.bf16.mxu0 %vm12633_vm2, %v12631_v1 }
  0x7f   :  { %10702 = vmatprep.mubr.msk.bf16.mxu1 %vm12633_vm2, %v12631_v1 }
  0x85   :  { %10641 = vmatmul.mubr.msk.bf16.gmra.mrb[56].mxu0 %vm168_vm3, %v12354_v37 }
  0x86   :  { %10703 = vmatmul.mubr.msk.bf16.gmra.mrb[56].mxu1 %vm168_vm3, %v1262_v38  ;;  %10644 = vmatprep.mubr.msk.bf16.mxu0 %vm12633_vm2, %v12631_v1 }
  0x87   :  { %10706 = vmatprep.mubr.msk.bf16.mxu1 %vm12633_vm2, %v12631_v1 }
  0x8d   :  { %10645 = vmatmul.mubr.msk.bf16.gmra.mrb[60].mxu0 %vm168_vm3, %v12356_v39 }
  0x8e   :  { %10707 = vmatmul.mubr.msk.bf16.gmra.mrb[60].mxu1 %vm168_vm3, %v1264_v40  ;;  %10648 = vmatprep.mubr.msk.bf16.mxu0 %vm12633_vm2, %v12631_v1 }
  0x8f   :  { %10710 = vmatprep.mubr.msk.bf16.mxu1 %vm12633_vm2, %v12631_v1 }
  0x95   :  { %10649 = vmatmul.mubr.msk.bf16.gmra.mrb[64].mxu0 %vm168_vm3, %v12358_v43 }
  0x96   :  { %10711 = vmatmul.mubr.msk.bf16.gmra.mrb[64].mxu1 %vm168_vm3, %v1266_v44  ;;  %10652 = vmatprep.mubr.msk.bf16.mxu0 %vm12633_vm2, %v12631_v1 }
  0x97   :  { %10714 = vmatprep.mubr.msk.bf16.mxu1 %vm12633_vm2, %v12631_v1 }
  0x9d   :  { %10653 = vmatmul.mubr.msk.bf16.gmra.mrb[68].mxu0 %vm168_vm3, %v12360_v47 }
  0x9e   :  { %10715 = vmatmul.mubr.msk.bf16.gmra.mrb[68].mxu1 %vm168_vm3, %v1268_v48  ;;  %10656 = vmatprep.mubr.msk.bf16.mxu0 %vm12633_vm2, %v12631_v1 }
  0x9f   :  { %10718 = vmatprep.mubr.msk.bf16.mxu1 %vm12633_vm2, %v12631_v1 }
  0xa5   :  { %10657 = vmatmul.mubr.msk.bf16.gmra.mrb[72].mxu0 %vm168_vm3, %v12362_v49 }
  0xa6   :  { %10719 = vmatmul.mubr.msk.bf16.gmra.mrb[72].mxu1 %vm168_vm3, %v1270_v50  ;;  %10660 = vmatprep.mubr.msk.bf16.mxu0 %vm12633_vm2, %v12631_v1 }
  0xa7   :  { %10722 = vmatprep.mubr.msk.bf16.mxu1 %vm12633_vm2, %v12631_v1 }
  0xad   :  { %10661 = vmatmul.mubr.msk.bf16.gmra.mrb[76].mxu0 %vm168_vm3, %v12364_v51 }
  0xae   :  { %10723 = vmatmul.mubr.msk.bf16.gmra.mrb[76].mxu1 %vm168_vm3, %v1272_v52  ;;  %10664 = vmatprep.mubr.msk.bf16.mxu0 %vm12633_vm2, %v12631_v1 }
  0xaf   :  { %10726 = vmatprep.mubr.msk.bf16.mxu1 %vm12633_vm2, %v12631_v1 }
  0xb5   :  { %10665 = vmatmul.mubr.msk.bf16.gmra.mrb[80].mxu0 %vm168_vm3, %v12366_v53 }
  0xb6   :  { %10727 = vmatmul.mubr.msk.bf16.gmra.mrb[80].mxu1 %vm168_vm3, %v1274_v54  ;;  %10668 = vmatprep.mubr.msk.bf16.mxu0 %vm12633_vm2, %v12631_v1 }
  0xb7   :  { %10730 = vmatprep.mubr.msk.bf16.mxu1 %vm12633_vm2, %v12631_v1 }
  0xbd   :  { %10669 = vmatmul.mubr.msk.bf16.gmra.mrb[84].mxu0 %vm168_vm3, %v12368_v55 }
  0xbe   :  { %10731 = vmatmul.mubr.msk.bf16.gmra.mrb[84].mxu1 %vm168_vm3, %v1276_v56  ;;  %10672 = vmatprep.mubr.msk.bf16.mxu0 %vm12633_vm2, %v12631_v1 }
  0xbf   :  { %10734 = vmatprep.mubr.msk.bf16.mxu1 %vm12633_vm2, %v12631_v1 }
  0xc5   :  { %10673 = vmatmul.mubr.msk.bf16.gmra.mrb[88].mxu0 %vm168_vm3, %v12370_v57 }
  0xc6   :  { %10735 = vmatmul.mubr.msk.bf16.gmra.mrb[88].mxu1 %vm168_vm3, %v1278_v59  ;;  %10676 = vmatprep.mubr.msk.bf16.mxu0 %vm12633_vm2, %v12631_v1 }
  0xc7   :  { %14 = vsyncpa [#allocation7], 0  ;;  %10738 = vmatprep.mubr.msk.bf16.mxu1 %vm12633_vm2, %v12631_v1  ;;  %v1279_v60 = vrot.slane %v12373_v58, 2  ;;  %v12372_v61 = vld [vmem:[%s15785_s0 + $0x114] sm:$0xff]   ;;  %v12375_v63 = vld [vmem:[%s15785_s0 + $0x184] ss:$0 sps:$4 sm:$0xff]  }
  0xc8   :  { %v1281_v0 = vrot.slane %v12375_v63, 2  ;;  %v12374_v2 = vld [vmem:[%s15785_s0 + $0x11c] sm:$0xff]   ;;  %v12376_v4 = vld [vmem:[%s15785_s0 + $0x124] ss:$0 sps:$4 sm:$0x33]   ;;  %vm376_vm4 = vcmask 130048  }
  0xc9   :  { %v1280_v62 = vsel %vm209_vm1, %v1277_v46, %v1279_v60  ;;  %v13149_v5 = vld [vmem:[%s15787_s2] ss:$0 sm:$0xff]  ;;  %vm1562_vm5 = vcmask 128000   ;;  %vm401_vm6 = vcmask 125952   ;;  %s12634_s14 = smov 16   ;;  %s12635_s15 = smov 32  }
  0xca   :  { %v1282_v3 = vsel %vm209_vm1, %v1279_v60, %v1281_v0  ;;  %vm2128_vm7 = vcmask 261120   ;;  %vm2458_vm8 = vcmask 392192   ;;  %vm3315_vm9 = vcmask 293888  }
  0xcb   :  { %vm3336_vm10 = vcmask 291840   ;;  %vm6670_vm11 = vcmask 1041408  }
  0xcd   :  { %10677 = vmatmul.mubr.msk.bf16.gmra.mrb[92].mxu0 %vm168_vm3, %v12372_v61 }
  0xce   :  { %10739 = vmatmul.mubr.msk.bf16.gmra.mrb[92].mxu1 %vm168_vm3, %v1280_v62  ;;  %10680 = vmatprep.mubr.msk.bf16.mxu0 %vm12633_vm2, %v12631_v1 }
  0xcf   :  { %10742 = vmatprep.mubr.msk.bf16.mxu1 %vm12633_vm2, %v12631_v1 }
  0xd5   :  { %10681 = vmatmul.mubr.msk.bf16.gmra.mrb[96].mxu0 %vm168_vm3, %v12374_v2 }
  0xd6   :  { %10743 = vmatmul.mubr.msk.bf16.gmra.mrb[96].mxu1 %vm168_vm3, %v1282_v3  ;;  %10684 = vmatprep.mubr.msk.bf16.mxu0 %vm12633_vm2, %v12631_v1 }
  0xd7   :  { %10746 = vmatprep.mubr.msk.bf16.mxu1 %vm12633_vm2, %v12631_v1 }
  0xdd   :  { %10685 = vmatmul.mubr.msk.bf16.gmra.mrb[100].mxu0 %vm168_vm3, %v12376_v4 }
  0xde   :  { %10747 = vmatmul.mubr.msk.bf16.gmra.mrb[100].mxu1 %vm168_vm3, %v1281_v0  ;;  %10756 = vmatprep.mubr.msk.bf16.mxu0 %vm12633_vm2, %v12631_v1 }
  0xdf   :  { %10792 = vmatprep.mubr.msk.bf16.mxu1 %vm12633_vm2, %v12631_v1 }
  0xe8   :  { %v249_v6 = vpop.f32.mrb[0].mxu0 }
  0xe9   :  { %v639_v7 = vpop.f32.mrb[0].mxu1  ;;  %v250_v8 = vadd.f32 %v13149_v5, %v249_v6  ;;  %v10514_v9 = vpop.f32.mrb[1].mxu0 }
  0xea   :  { %v640_v11 = vadd.f32 %v13149_v5, %v639_v7  ;;  %v10576_v12 = vpop.f32.mrb[1].mxu1  ;;  %v252_v13 = vpop.f32.mrb[2].mxu0 }
  0xeb   :  { %v642_v14 = vpop.f32.mrb[2].mxu1  ;;  %v351_v15 = vmax.f32 %v250_v8, 0.0  ;;  %v253_v16 = vadd.f32 %v13149_v5, %v252_v13  ;;  %v10515_v17 = vpop.f32.mrb[3].mxu0 }
  0xec   :  { %v741_v18 = vmax.f32 %v640_v11, 0.0  ;;  %v643_v19 = vadd.f32 %v13149_v5, %v642_v14  ;;  %v10577_v20 = vpop.f32.mrb[3].mxu1 }
  0xed   :  { %377 = vst.msk [vmem:[#allocation2] sm:$0xff] %vm376_vm4, %v351_v15  ;;  %v352_v21 = vmax.f32 %v253_v16, 0.0 }
  0xee   :  { %766 = vst.msk [vmem:[#allocation2 + $0xc4] sm:$0xff] %vm376_vm4, %v741_v18  ;;  %v742_v22 = vmax.f32 %v643_v19, 0.0 }
  0xef   :  { %378 = vst.msk [vmem:[#allocation2 + $0x8] sm:$0xff] %vm376_vm4, %v352_v21 }
  0xf0   :  { %767 = vst.msk [vmem:[#allocation2 + $0xcc] sm:$0xff] %vm376_vm4, %v742_v22  ;;  %v257_v23 = vpop.f32.mrb[4].mxu0 }
  0xf1   :  { %v647_v24 = vpop.f32.mrb[4].mxu1  ;;  %v258_v25 = vadd.f32 %v13149_v5, %v257_v23  ;;  %v10518_v26 = vpop.f32.mrb[5].mxu0 }
  0xf2   :  { %v648_v27 = vadd.f32 %v13149_v5, %v647_v24  ;;  %v10580_v28 = vpop.f32.mrb[5].mxu1  ;;  %v260_v29 = vpop.f32.mrb[6].mxu0 }
  0xf3   :  { %v650_v30 = vpop.f32.mrb[6].mxu1  ;;  %v353_v31 = vmax.f32 %v258_v25, 0.0  ;;  %v261_v32 = vadd.f32 %v13149_v5, %v260_v29  ;;  %v10519_v33 = vpop.f32.mrb[7].mxu0 }
  0xf4   :  { %v743_v34 = vmax.f32 %v648_v27, 0.0  ;;  %v651_v35 = vadd.f32 %v13149_v5, %v650_v30  ;;  %v10581_v36 = vpop.f32.mrb[7].mxu1 }
  0xf5   :  { %379 = vst.msk [vmem:[#allocation2 + $0x10] sm:$0xff] %vm376_vm4, %v353_v31  ;;  %v354_v37 = vmax.f32 %v261_v32, 0.0 }
  0xf6   :  { %768 = vst.msk [vmem:[#allocation2 + $0xd4] sm:$0xff] %vm376_vm4, %v743_v34  ;;  %v744_v38 = vmax.f32 %v651_v35, 0.0  ;;  %v1540_v3 = vld [vmem:[#allocation2] ss:$2 sm:$0xff]  ;;  %v1544_v4 = vld [vmem:[#allocation2 + $0x1] ss:$2 sm:$0xff] }
  0xf7   :  { %380 = vst.msk [vmem:[#allocation2 + $0x18] sm:$0xff] %vm376_vm4, %v354_v37  ;;  %v1555_v14 = vmax.f32 %v1540_v3, %v1544_v4 }
  0xf8   :  { %769 = vst.msk [vmem:[#allocation2 + $0xdc] sm:$0xff] %vm376_vm4, %v744_v38  ;;  %v265_v39 = vpop.f32.mrb[8].mxu0 }
  0xf9   :  { %v266_v40 = vadd.f32 %v13149_v5, %v265_v39  ;;  %v655_v41 = vpop.f32.mrb[8].mxu1  ;;  %v10522_v42 = vpop.f32.mrb[9].mxu0 }
  0xfa   :  { %v656_v43 = vadd.f32 %v13149_v5, %v655_v41  ;;  %v10584_v44 = vpop.f32.mrb[9].mxu1  ;;  %v268_v45 = vpop.f32.mrb[10].mxu0 }
  0xfb   :  { %v355_v46 = vmax.f32 %v266_v40, 0.0  ;;  %v269_v47 = vadd.f32 %v13149_v5, %v268_v45  ;;  %v658_v48 = vpop.f32.mrb[10].mxu1  ;;  %v10523_v49 = vpop.f32.mrb[11].mxu0 }
  0xfc   :  { %v745_v50 = vmax.f32 %v656_v43, 0.0  ;;  %v659_v51 = vadd.f32 %v13149_v5, %v658_v48  ;;  %v10585_v52 = vpop.f32.mrb[11].mxu1 }
  0xfd   :  { %381 = vst.msk [vmem:[#allocation2 + $0x20] sm:$0xff] %vm376_vm4, %v355_v46  ;;  %v356_v53 = vmax.f32 %v269_v47, 0.0 }
  0xfe   :  { %770 = vst.msk [vmem:[#allocation2 + $0xe4] sm:$0xff] %vm376_vm4, %v745_v50  ;;  %v746_v54 = vmax.f32 %v659_v51, 0.0  ;;  %v1542_v17 = vld [vmem:[#allocation2 + $0x10] ss:$2 sm:$0x3f] }
  0xff   :  { %382 = vst.msk [vmem:[#allocation2 + $0x28] sm:$0xff] %vm376_vm4, %v356_v53  ;;  %v1546_v22 = vld [vmem:[#allocation2 + $0x11] ss:$2 sm:$0x3f] }
 0x100   :  { %v273_v55 = vpop.f32.mrb[12].mxu0  ;;  %771 = vst.msk [vmem:[#allocation2 + $0xec] sm:$0xff] %vm376_vm4, %v746_v54  ;;  %v1556_v33 = vmax.f32 %v1542_v17, %v1546_v22 }
 0x101   :  { %v274_v56 = vadd.f32 %v13149_v5, %v273_v55  ;;  %v663_v57 = vpop.f32.mrb[12].mxu1  ;;  %v10526_v58 = vpop.f32.mrb[13].mxu0 }
 0x102   :  { %v664_v59 = vadd.f32 %v13149_v5, %v663_v57  ;;  %v10588_v60 = vpop.f32.mrb[13].mxu1  ;;  %v276_v61 = vpop.f32.mrb[14].mxu0 }
 0x103   :  { %v357_v62 = vmax.f32 %v274_v56, 0.0  ;;  %v666_v63 = vpop.f32.mrb[14].mxu1  ;;  %v277_v0 = vadd.f32 %v13149_v5, %v276_v61  ;;  %v10527_v2 = vpop.f32.mrb[15].mxu0 }
 0x104   :  { %v747_v6 = vmax.f32 %v664_v59, 0.0  ;;  %v667_v7 = vadd.f32 %v13149_v5, %v666_v63  ;;  %v10589_v8 = vpop.f32.mrb[15].mxu1 }
 0x105   :  { %383 = vst.msk [vmem:[#allocation2 + $0x30] sm:$0xff] %vm376_vm4, %v357_v62  ;;  %v358_v9 = vmax.f32 %v277_v0, 0.0 }
 0x106   :  { %v1548_v11 = vld [vmem:[#allocation2 + $0x1c] ss:$2 sm:$0xff]  ;;  %v1552_v12 = vld [vmem:[#allocation2 + $0x1d] ss:$2 sm:$0xff]  ;;  %772 = vst.msk [vmem:[#allocation2 + $0xf4] sm:$0xff] %vm376_vm4, %v747_v6  ;;  %v748_v13 = vmax.f32 %v667_v7, 0.0 }
 0x107   :  { %v1557_v15 = vmax.f32 %v1548_v11, %v1552_v12  ;;  %384 = vst.msk [vmem:[#allocation2 + $0x38] sm:$0xff] %vm376_vm4, %v358_v9  ;;  %v1637_v54 = vld [vmem:[#allocation2 + $0xe0] ss:$2 sm:$0xff]  ;;  %v1641_v55 = vld [vmem:[#allocation2 + $0xe1] ss:$2 sm:$0xff] }
 0x108   :  { %773 = vst.msk [vmem:[#allocation2 + $0xfc] sm:$0xff] %vm376_vm4, %v748_v13  ;;  %v281_v16 = vpop.f32.mrb[16].mxu0  ;;  %v1652_v60 = vmax.f32 %v1637_v54, %v1641_v55 }
 0x109   :  { %v671_v18 = vpop.f32.mrb[16].mxu1  ;;  %v282_v19 = vadd.f32 %v13149_v5, %v281_v16  ;;  %v10530_v20 = vpop.f32.mrb[17].mxu0  ;;  %v1559_v21 = vmax.f32 %v1555_v14, %v1557_v15 }
 0x10a   :  { %v672_v23 = vadd.f32 %v13149_v5, %v671_v18  ;;  %v10592_v24 = vpop.f32.mrb[17].mxu1  ;;  %v284_v25 = vpop.f32.mrb[18].mxu0 }
 0x10b   :  { %v674_v26 = vpop.f32.mrb[18].mxu1  ;;  %v359_v27 = vmax.f32 %v282_v19, 0.0  ;;  %v285_v28 = vadd.f32 %v13149_v5, %v284_v25  ;;  %v10531_v29 = vpop.f32.mrb[19].mxu0  ;;  %1561 = vst.msk [vmem:[#allocation3] sm:$0xff] %vm376_vm4, %v1559_v21 }
 0x10c   :  { %v1550_v30 = vld [vmem:[#allocation2 + $0x2c] ss:$2 sm:$0x3f]  ;;  %v1554_v31 = vld [vmem:[#allocation2 + $0x2d] ss:$2 sm:$0x3f]  ;;  %v675_v32 = vadd.f32 %v13149_v5, %v674_v26 }
 0x10d   :  { %v1558_v34 = vmax.f32 %v1550_v30, %v1554_v31  ;;  %385 = vst.msk [vmem:[#allocation2 + $0x40] sm:$0xff] %vm376_vm4, %v359_v27  ;;  %v749_v35 = vmax.f32 %v672_v23, 0.0  ;;  %v10593_v37 = vpop.f32.mrb[19].mxu1  ;;  %v360_v38 = vmax.f32 %v285_v28, 0.0 }
 0x10e   :  { %v750_v36 = vmax.f32 %v675_v32, 0.0  ;;  %v1639_v63 = vld [vmem:[#allocation2 + $0xf0] ss:$2 sm:$0x3f] }
 0x10f   :  { %v1560_v39 = vmax.f32 %v1556_v33, %v1558_v34  ;;  %774 = vst.msk [vmem:[#allocation2 + $0x104] sm:$0xff] %vm376_vm4, %v749_v35  ;;  %386 = vst.msk [vmem:[#allocation2 + $0x48] sm:$0xff] %vm376_vm4, %v360_v38  ;;  %v1643_v4 = vld [vmem:[#allocation2 + $0xf1] ss:$2 sm:$0x3f] }
 0x110   :  { %775 = vst.msk [vmem:[#allocation2 + $0x10c] sm:$0xff] %vm376_vm4, %v750_v36  ;;  %v289_v40 = vpop.f32.mrb[20].mxu0  ;;  %v1653_v16 = vmax.f32 %v1639_v63, %v1643_v4 }
 0x111   :  { %v679_v41 = vpop.f32.mrb[20].mxu1  ;;  %v290_v42 = vadd.f32 %v13149_v5, %v289_v40  ;;  %v10534_v43 = vpop.f32.mrb[21].mxu0  ;;  %1563 = vst.msk [vmem:[#allocation3 + $0x8] sm:$0x3f] %vm1562_vm5, %v1560_v39 }
 0x112   :  { %v680_v44 = vadd.f32 %v13149_v5, %v679_v41  ;;  %v10596_v45 = vpop.f32.mrb[21].mxu1  ;;  %v292_v46 = vpop.f32.mrb[22].mxu0 }
 0x113   :  { %v682_v47 = vpop.f32.mrb[22].mxu1  ;;  %v361_v48 = vmax.f32 %v290_v42, 0.0  ;;  %v293_v49 = vadd.f32 %v13149_v5, %v292_v46  ;;  %v10535_v50 = vpop.f32.mrb[23].mxu0 }
 0x114   :  { %v751_v51 = vmax.f32 %v680_v44, 0.0  ;;  %v683_v52 = vadd.f32 %v13149_v5, %v682_v47  ;;  %v10597_v53 = vpop.f32.mrb[23].mxu1  ;;  %v1565_v29 = vld [vmem:[#allocation2 + $0x38] ss:$2 sm:$0xff]  ;;  %v1569_v30 = vld [vmem:[#allocation2 + $0x39] ss:$2 sm:$0xff] }
 0x115   :  { %387 = vst.msk [vmem:[#allocation2 + $0x50] sm:$0xff] %vm376_vm4, %v361_v48  ;;  %v362_v56 = vmax.f32 %v293_v49, 0.0  ;;  %v1580_v45 = vmax.f32 %v1565_v29, %v1569_v30 }
 0x116   :  { %776 = vst.msk [vmem:[#allocation2 + $0x114] sm:$0xff] %vm376_vm4, %v751_v51  ;;  %v752_v57 = vmax.f32 %v683_v52, 0.0  ;;  %v1645_v58 = vld [vmem:[#allocation2 + $0xfc] ss:$2 sm:$0xff]  ;;  %v1649_v59 = vld [vmem:[#allocation2 + $0xfd] ss:$2 sm:$0xff] }
 0x117   :  { %388 = vst.msk [vmem:[#allocation2 + $0x58] sm:$0xff] %vm376_vm4, %v362_v56  ;;  %v1654_v61 = vmax.f32 %v1645_v58, %v1649_v59 }
 0x118   :  { %777 = vst.msk [vmem:[#allocation2 + $0x11c] sm:$0xff] %vm376_vm4, %v752_v57  ;;  %v297_v62 = vpop.f32.mrb[24].mxu0 }
 0x119   :  { %v298_v0 = vadd.f32 %v13149_v5, %v297_v62  ;;  %v687_v2 = vpop.f32.mrb[24].mxu1  ;;  %v10538_v3 = vpop.f32.mrb[25].mxu0  ;;  %v1656_v9 = vmax.f32 %v1652_v60, %v1654_v61 }
 0x11a   :  { %v688_v6 = vadd.f32 %v13149_v5, %v687_v2  ;;  %v10600_v7 = vpop.f32.mrb[25].mxu1  ;;  %v300_v8 = vpop.f32.mrb[26].mxu0 }
 0x11b   :  { %v363_v11 = vmax.f32 %v298_v0, 0.0  ;;  %v301_v12 = vadd.f32 %v13149_v5, %v300_v8  ;;  %v690_v13 = vpop.f32.mrb[26].mxu1  ;;  %v10539_v14 = vpop.f32.mrb[27].mxu0  ;;  %1658 = vst.msk [vmem:[#allocation3 + $0x38] sm:$0xff] %vm376_vm4, %v1656_v9 }
 0x11c   :  { %v691_v15 = vadd.f32 %v13149_v5, %v690_v13  ;;  %v753_v20 = vmax.f32 %v688_v6, 0.0  ;;  %v10601_v23 = vpop.f32.mrb[27].mxu1  ;;  %v1567_v43 = vld [vmem:[#allocation2 + $0x48] ss:$2 sm:$0x3f] }
 0x11d   :  { %v1647_v17 = vld [vmem:[#allocation2 + $0x10c] ss:$2 sm:$0x3f]  ;;  %v1651_v18 = vld [vmem:[#allocation2 + $0x10d] ss:$2 sm:$0x3f] }
 0x11e   :  { %389 = vst.msk [vmem:[#allocation2 + $0x60] sm:$0xff] %vm376_vm4, %v363_v11  ;;  %v1655_v19 = vmax.f32 %v1647_v17, %v1651_v18  ;;  %v364_v21 = vmax.f32 %v301_v12, 0.0  ;;  %v754_v22 = vmax.f32 %v691_v15, 0.0  ;;  %778 = vst.msk [vmem:[#allocation2 + $0x124] sm:$0xff] %vm376_vm4, %v753_v20 }
 0x11f   :  { %v1571_v47 = vld [vmem:[#allocation2 + $0x49] ss:$2 sm:$0x3f] }
 0x120   :  { %390 = vst.msk [vmem:[#allocation2 + $0x68] sm:$0xff] %vm376_vm4, %v364_v21  ;;  %779 = vst.msk [vmem:[#allocation2 + $0x12c] sm:$0xff] %vm376_vm4, %v754_v22  ;;  %v305_v24 = vpop.f32.mrb[28].mxu0  ;;  %v1657_v25 = vmax.f32 %v1653_v16, %v1655_v19  ;;  %v1581_v52 = vmax.f32 %v1567_v43, %v1571_v47 }
 0x121   :  { %v695_v26 = vpop.f32.mrb[28].mxu1  ;;  %v306_v27 = vadd.f32 %v13149_v5, %v305_v24  ;;  %v10542_v28 = vpop.f32.mrb[29].mxu0 }
 0x122   :  { %v696_v31 = vadd.f32 %v13149_v5, %v695_v26  ;;  %v10604_v32 = vpop.f32.mrb[29].mxu1  ;;  %v308_v33 = vpop.f32.mrb[30].mxu0  ;;  %1659 = vst.msk [vmem:[#allocation3 + $0x40] sm:$0x3f] %vm1562_vm5, %v1657_v25 }
 0x123   :  { %v698_v34 = vpop.f32.mrb[30].mxu1  ;;  %v365_v35 = vmax.f32 %v306_v27, 0.0  ;;  %v309_v36 = vadd.f32 %v13149_v5, %v308_v33  ;;  %v10543_v37 = vpop.f32.mrb[31].mxu0 }
 0x124   :  { %v755_v40 = vmax.f32 %v696_v31, 0.0  ;;  %v699_v41 = vadd.f32 %v13149_v5, %v698_v34  ;;  %v10605_v42 = vpop.f32.mrb[31].mxu1 }
 0x125   :  { %v1573_v38 = vld [vmem:[#allocation2 + $0x54] ss:$2 sm:$0xff]  ;;  %v1577_v39 = vld [vmem:[#allocation2 + $0x55] ss:$2 sm:$0xff]  ;;  %391 = vst.msk [vmem:[#allocation2 + $0x70] sm:$0xff] %vm376_vm4, %v365_v35  ;;  %v366_v44 = vmax.f32 %v309_v36, 0.0 }
 0x126   :  { %v1582_v46 = vmax.f32 %v1573_v38, %v1577_v39  ;;  %780 = vst.msk [vmem:[#allocation2 + $0x134] sm:$0xff] %vm376_vm4, %v755_v40  ;;  %v756_v48 = vmax.f32 %v699_v41, 0.0  ;;  %v1661_v61 = vld [vmem:[#allocation2 + $0x118] ss:$2 sm:$0xff]  ;;  %v1665_v0 = vld [vmem:[#allocation2 + $0x119] ss:$2 sm:$0xff] }
 0x127   :  { %392 = vst.msk [vmem:[#allocation2 + $0x78] sm:$0xff] %vm376_vm4, %v366_v44  ;;  %v1575_v50 = vld [vmem:[#allocation2 + $0x64] ss:$2 sm:$0x3f]  ;;  %v1676_v14 = vmax.f32 %v1661_v61, %v1665_v0  ;;  %v12377_v35 = vld [vmem:[%s15788_s3 + $0x18] sm:$0xff]  }
 0x128   :  { %v1584_v49 = vmax.f32 %v1580_v45, %v1582_v46  ;;  %v1579_v51 = vld [vmem:[#allocation2 + $0x65] ss:$2 sm:$0x3f]  ;;  %781 = vst.msk [vmem:[#allocation2 + $0x13c] sm:$0xff] %vm376_vm4, %v756_v48  ;;  %v313_v55 = vpop.f32.mrb[32].mxu0  ;;  %10751 = vmatpush3.bf16.msra.mxu0 %v12377_v35  ;;  %11681 = vmatpush3.bf16.msra.mxu1 %v12377_v35 }
 0x129   :  { %v1583_v53 = vmax.f32 %v1575_v50, %v1579_v51  ;;  %v703_v54 = vpop.f32.mrb[32].mxu1  ;;  %v314_v58 = vadd.f32 %v13149_v5, %v313_v55  ;;  %v10546_v59 = vpop.f32.mrb[33].mxu0  ;;  %v1663_v31 = vld [vmem:[#allocation2 + $0x128] ss:$2 sm:$0x3f]  ;;  %10752 = vmatprep.subr.bf16.mxu0 %v12631_v1  ;;  %11679 = vmatprep.subr.bf16.mxu1 %v12631_v1 }
 0x12a   :  { %1586 = vst.msk [vmem:[#allocation3 + $0xe] sm:$0xff] %vm376_vm4, %v1584_v49  ;;  %v704_v56 = vadd.f32 %v13149_v5, %v703_v54  ;;  %v10608_v57 = vpop.f32.mrb[33].mxu1  ;;  %v316_v63 = vpop.f32.mrb[34].mxu0  ;;  %v1667_v33 = vld [vmem:[#allocation2 + $0x129] ss:$2 sm:$0x3f] }
 0x12b   :  { %v1585_v60 = vmax.f32 %v1581_v52, %v1583_v53  ;;  %v706_v62 = vpop.f32.mrb[34].mxu1  ;;  %v367_v6 = vmax.f32 %v314_v58, 0.0  ;;  %v317_v7 = vadd.f32 %v13149_v5, %v316_v63  ;;  %v10547_v8 = vpop.f32.mrb[35].mxu0  ;;  %v1677_v38 = vmax.f32 %v1663_v31, %v1667_v33 }
 0x12c   :  { %v757_v2 = vmax.f32 %v704_v56, 0.0  ;;  %v707_v3 = vadd.f32 %v13149_v5, %v706_v62  ;;  %v10609_v4 = vpop.f32.mrb[35].mxu1 }
 0x12d   :  { %1587 = vst.msk [vmem:[#allocation3 + $0x16] sm:$0x3f] %vm1562_vm5, %v1585_v60  ;;  %v368_v13 = vmax.f32 %v317_v7, 0.0 }
 0x12e   :  { %782 = vst.msk [vmem:[#allocation2 + $0x144] sm:$0xff] %vm376_vm4, %v757_v2  ;;  %v758_v12 = vmax.f32 %v707_v3, 0.0  ;;  %393 = vst.msk [vmem:[#allocation2 + $0x80] sm:$0xff] %vm376_vm4, %v367_v6  ;;  %v1589_v47 = vld [vmem:[#allocation2 + $0x70] ss:$2 sm:$0xff] }
 0x12f   :  { %v1669_v9 = vld [vmem:[#allocation2 + $0x134] ss:$2 sm:$0xff]  ;;  %v1673_v11 = vld [vmem:[#allocation2 + $0x135] ss:$2 sm:$0xff]  ;;  %394 = vst.msk [vmem:[#allocation2 + $0x88] sm:$0xff] %vm376_vm4, %v368_v13 }
 0x130   :  { %v1678_v15 = vmax.f32 %v1669_v9, %v1673_v11  ;;  %v321_v16 = vpop.f32.mrb[36].mxu0  ;;  %783 = vst.msk [vmem:[#allocation2 + $0x14c] sm:$0xff] %vm376_vm4, %v758_v12  ;;  %v1593_v48 = vld [vmem:[#allocation2 + $0x71] ss:$2 sm:$0xff] }
 0x131   :  { %v322_v17 = vadd.f32 %v13149_v5, %v321_v16  ;;  %v711_v18 = vpop.f32.mrb[36].mxu1  ;;  %v10550_v19 = vpop.f32.mrb[37].mxu0  ;;  %v1604_v61 = vmax.f32 %v1589_v47, %v1593_v48 }
 0x132   :  { %v712_v20 = vadd.f32 %v13149_v5, %v711_v18  ;;  %v10612_v21 = vpop.f32.mrb[37].mxu1  ;;  %v324_v22 = vpop.f32.mrb[38].mxu0  ;;  %v1680_v23 = vmax.f32 %v1676_v14, %v1678_v15  ;;  %v12378_v15 = vld [vmem:[%s15788_s3 + $0x20] sm:$0xff]  }
 0x133   :  { %v369_v24 = vmax.f32 %v322_v17, 0.0  ;;  %v325_v25 = vadd.f32 %v13149_v5, %v324_v22  ;;  %v714_v26 = vpop.f32.mrb[38].mxu1  ;;  %v10551_v27 = vpop.f32.mrb[39].mxu0  ;;  %10753 = vmatpush3.bf16.msra.mxu0 %v12378_v15  ;;  %11682 = vmatpush3.bf16.msra.mxu1 %v12378_v15 }
 0x134   :  { %v759_v28 = vmax.f32 %v712_v20, 0.0  ;;  %v715_v29 = vadd.f32 %v13149_v5, %v714_v26  ;;  %v10613_v30 = vpop.f32.mrb[39].mxu1  ;;  %1682 = vst.msk [vmem:[#allocation3 + $0x46] sm:$0xff] %vm376_vm4, %v1680_v23  ;;  %10754 = vmatprep.subr.bf16.mxu0 %v12631_v1  ;;  %11680 = vmatprep.subr.bf16.mxu1 %v12631_v1  ;;  %v12379_v27 = vld [vmem:[%s15788_s3 + $0x28] sm:$0xff]  }
 0x135   :  { %395 = vst.msk [vmem:[#allocation2 + $0x90] sm:$0xff] %vm376_vm4, %v369_v24  ;;  %v370_v32 = vmax.f32 %v325_v25, 0.0 }
 0x136   :  { %784 = vst.msk [vmem:[#allocation2 + $0x154] sm:$0xff] %vm376_vm4, %v759_v28  ;;  %v760_v34 = vmax.f32 %v715_v29, 0.0  ;;  %v1591_v6 = vld [vmem:[#allocation2 + $0x80] ss:$2 sm:$0x3f] }
 0x137   :  { %396 = vst.msk [vmem:[#allocation2 + $0x98] sm:$0xff] %vm376_vm4, %v370_v32  ;;  %v1671_v36 = vld [vmem:[#allocation2 + $0x144] ss:$2 sm:$0x3f]  ;;  %v1625_v29 = vld [vmem:[#allocation2 + $0xc5] ss:$2 sm:$0xff]  ;;  %10755 = vmatpush3.bf16.msra.mxu0 %v12379_v27  ;;  %11683 = vmatpush3.bf16.msra.mxu1 %v12379_v27 }
 0x138   :  { %v1675_v37 = vld [vmem:[#allocation2 + $0x145] ss:$2 sm:$0x3f]  ;;  %785 = vst.msk [vmem:[#allocation2 + $0x15c] sm:$0xff] %vm376_vm4, %v760_v34  ;;  %v329_v40 = vpop.f32.mrb[40].mxu0  ;;  %10850 = vmatprep.subr.bf16.mxu0 %v12631_v1  ;;  %10800 = vmatprep.subr.bf16.mxu1 %v12631_v1 }
 0x139   :  { %v1679_v39 = vmax.f32 %v1671_v36, %v1675_v37  ;;  %v719_v41 = vpop.f32.mrb[40].mxu1  ;;  %v330_v42 = vadd.f32 %v13149_v5, %v329_v40  ;;  %v10554_v45 = vpop.f32.mrb[41].mxu0  ;;  %v1595_v16 = vld [vmem:[#allocation2 + $0x81] ss:$2 sm:$0x3f] }
 0x13a   :  { %v720_v43 = vadd.f32 %v13149_v5, %v719_v41  ;;  %v10616_v44 = vpop.f32.mrb[41].mxu1  ;;  %v332_v50 = vpop.f32.mrb[42].mxu0  ;;  %v1605_v23 = vmax.f32 %v1591_v6, %v1595_v16  ;;  %v1621_v28 = vld [vmem:[#allocation2 + $0xc4] ss:$2 sm:$0xff] }
 0x13b   :  { %v1681_v46 = vmax.f32 %v1677_v38, %v1679_v39  ;;  %v722_v49 = vpop.f32.mrb[42].mxu1  ;;  %v371_v51 = vmax.f32 %v330_v42, 0.0  ;;  %v333_v55 = vadd.f32 %v13149_v5, %v332_v50  ;;  %v10555_v56 = vpop.f32.mrb[43].mxu0  ;;  %v2188_v37 = vld [vmem:[#allocation3 + $0xf] sm:$0xff] }
 0x13c   :  { %v761_v52 = vmax.f32 %v720_v43, 0.0  ;;  %v723_v53 = vadd.f32 %v13149_v5, %v722_v49  ;;  %v10617_v54 = vpop.f32.mrb[43].mxu1  ;;  %v1878_v56 = vld [vmem:[#allocation3 + $0x10] sm:$0xff] }
 0x13d   :  { %1683 = vst.msk [vmem:[#allocation3 + $0x4e] sm:$0x3f] %vm1562_vm5, %v1681_v46  ;;  %v372_v60 = vmax.f32 %v333_v55, 0.0 }
 0x13e   :  { %v1597_v57 = vld [vmem:[#allocation2 + $0x8c] ss:$2 sm:$0xff]  ;;  %v1601_v58 = vld [vmem:[#allocation2 + $0x8d] ss:$2 sm:$0xff]  ;;  %397 = vst.msk [vmem:[#allocation2 + $0xa0] sm:$0xff] %vm376_vm4, %v371_v51  ;;  %786 = vst.msk [vmem:[#allocation2 + $0x164] sm:$0xff] %vm376_vm4, %v761_v52 }
 0x13f   :  { %v762_v59 = vmax.f32 %v723_v53, 0.0  ;;  %v1606_v62 = vmax.f32 %v1597_v57, %v1601_v58  ;;  %398 = vst.msk [vmem:[#allocation2 + $0xa8] sm:$0xff] %vm376_vm4, %v372_v60  ;;  %v1685_v34 = vld [vmem:[#allocation2 + $0x150] ss:$2 sm:$0xff]  ;;  %v1689_v40 = vld [vmem:[#allocation2 + $0x151] ss:$2 sm:$0xff]  ;;  %v1630_v53 = vmax.f32 %v1621_v28, %v1625_v29 }
 0x140   :  { %v337_v63 = vpop.f32.mrb[44].mxu0  ;;  %v1700_v54 = vmax.f32 %v1685_v34, %v1689_v40  ;;  %v1627_v60 = vld [vmem:[#allocation2 + $0xd5] ss:$2 sm:$0x3f] }
 0x141   :  { %787 = vst.msk [vmem:[#allocation2 + $0x16c] sm:$0xff] %vm376_vm4, %v762_v59  ;;  %v338_v0 = vadd.f32 %v13149_v5, %v337_v63  ;;  %v727_v2 = vpop.f32.mrb[44].mxu1  ;;  %v10558_v3 = vpop.f32.mrb[45].mxu0  ;;  %v1608_v4 = vmax.f32 %v1604_v61, %v1606_v62  ;;  %v1623_v59 = vld [vmem:[#allocation2 + $0xd4] ss:$2 sm:$0x3f] }
 0x142   :  { %v728_v7 = vadd.f32 %v13149_v5, %v727_v2  ;;  %v10620_v8 = vpop.f32.mrb[45].mxu1  ;;  %v340_v9 = vpop.f32.mrb[46].mxu0 }
 0x143   :  { %v373_v11 = vmax.f32 %v338_v0, 0.0  ;;  %v730_v12 = vpop.f32.mrb[46].mxu1  ;;  %v341_v13 = vadd.f32 %v13149_v5, %v340_v9  ;;  %v10559_v14 = vpop.f32.mrb[47].mxu0  ;;  %1610 = vst.msk [vmem:[#allocation3 + $0x1c] sm:$0xff] %vm376_vm4, %v1608_v4 }
 0x144   :  { %v763_v17 = vmax.f32 %v728_v7, 0.0  ;;  %v731_v18 = vadd.f32 %v13149_v5, %v730_v12  ;;  %v10621_v19 = vpop.f32.mrb[47].mxu1 }
 0x145   :  { %399 = vst.msk [vmem:[#allocation2 + $0xb0] sm:$0xff] %vm376_vm4, %v373_v11  ;;  %v374_v20 = vmax.f32 %v341_v13, 0.0  ;;  %v1599_v21 = vld [vmem:[#allocation2 + $0x9c] ss:$2 sm:$0x3f] }
 0x146   :  { %v1603_v22 = vld [vmem:[#allocation2 + $0x9d] ss:$2 sm:$0x3f]  ;;  %788 = vst.msk [vmem:[#allocation2 + $0x174] sm:$0xff] %vm376_vm4, %v763_v17  ;;  %v764_v25 = vmax.f32 %v731_v18, 0.0  ;;  %v1631_v17 = vmax.f32 %v1623_v59, %v1627_v60 }
 0x147   :  { %400 = vst.msk [vmem:[#allocation2 + $0xb8] sm:$0xff] %vm376_vm4, %v374_v20  ;;  %v1607_v24 = vmax.f32 %v1599_v21, %v1603_v22  ;;  %v1687_v63 = vld [vmem:[#allocation2 + $0x160] ss:$2 sm:$0x3f] }
 0x148   :  { %v345_v26 = vpop.f32.mrb[48].mxu0  ;;  %789 = vst.msk [vmem:[#allocation2 + $0x17c] sm:$0xff] %vm376_vm4, %v764_v25  ;;  %v1691_v4 = vld [vmem:[#allocation2 + $0x161] ss:$2 sm:$0x3f] }
 0x149   :  { %v346_v30 = vadd.f32 %v13149_v5, %v345_v26  ;;  %v735_v31 = vpop.f32.mrb[48].mxu1  ;;  %v10562_v32 = vpop.f32.mrb[49].mxu0  ;;  %v1609_v33 = vmax.f32 %v1605_v23, %v1607_v24  ;;  %v1701_v18 = vmax.f32 %v1687_v63, %v1691_v4 }
 0x14a   :  { %v736_v35 = vadd.f32 %v13149_v5, %v735_v31  ;;  %v10624_v36 = vpop.f32.mrb[49].mxu1  ;;  %v2189_v38 = vld [vmem:[#allocation3 + $0x17] sm:$0xff]  ;;  %v348_v39 = vpop.f32.mrb[50].mxu0 }
 0x14b   :  { %v375_v41 = vmax.f32 %v346_v30, 0.0  ;;  %v738_v42 = vpop.f32.mrb[50].mxu1  ;;  %v11690_v43 = vpack.i.bf16 %v2189_v38, %v2188_v37  ;;  %v1879_v44 = vld [vmem:[#allocation3 + $0x18] sm:$0xff]  ;;  %v10563_v45 = vpop.f32.mrb[51].mxu0  ;;  %1611 = vst.msk [vmem:[#allocation3 + $0x24] sm:$0x3f] %vm1562_vm5, %v1609_v33 }
 0x14c   :  { %v1613_v46 = vld [vmem:[#allocation2 + $0xa8] ss:$2 sm:$0xff]  ;;  %v1617_v47 = vld [vmem:[#allocation2 + $0xa9] ss:$2 sm:$0xff]  ;;  %v765_v48 = vmax.f32 %v736_v35, 0.0  ;;  %v10625_v49 = vpop.f32.mrb[51].mxu1  ;;  %v11695_v57 = vpack.i.bf16 %v1879_v44, %v1878_v56 }
 0x14d   :  { %v1693_v50 = vld [vmem:[#allocation2 + $0x16c] ss:$2 sm:$0xff]  ;;  %v1697_v51 = vld [vmem:[#allocation2 + $0x16d] ss:$2 sm:$0xff]  ;;  %402 = vst.msk [vmem:[#allocation2 + $0xc0] sm:$0xf] %vm401_vm6, %v375_v41  ;;  %11691 = vrot.lane.b32.xlu0 %v11690_v43, %s12634_s14  ;;  %v1628_v52 = vmax.f32 %v1613_v46, %v1617_v47 }
 0x14e   :  { %v1702_v55 = vmax.f32 %v1693_v50, %v1697_v51  ;;  %790 = vst.msk [vmem:[#allocation2 + $0x184] sm:$0xf] %vm401_vm6, %v765_v48 }
 0x14f   :  { %v1632_v58 = vmax.f32 %v1628_v52, %v1630_v53 }
 0x150   :  { %v1001_v61 = vpop.f32.mrb[52].mxu0  ;;  %v1704_v62 = vmax.f32 %v1700_v54, %v1702_v55 }
 0x151   :  { %v1388_v0 = vpop.f32.mrb[52].mxu1  ;;  %11696 = vrot.lane.b32.xlu0 %v11695_v57, %s12635_s15  ;;  %v1002_v2 = vadd.f32 %v13149_v5, %v1001_v61  ;;  %v10638_v3 = vpop.f32.mrb[53].mxu0  ;;  %1634 = vst.msk [vmem:[#allocation3 + $0x2a] sm:$0xff] %vm376_vm4, %v1632_v58 }
 0x152   :  { %v1389_v6 = vadd.f32 %v13149_v5, %v1388_v0  ;;  %v10700_v7 = vpop.f32.mrb[53].mxu1  ;;  %v1004_v8 = vpop.f32.mrb[54].mxu0  ;;  %1706 = vst.msk [vmem:[#allocation3 + $0x54] sm:$0xff] %vm376_vm4, %v1704_v62  ;;  %v2190_v28 = vld [vmem:[#allocation3 + $0x1f] sm:$0xff] }
 0x153   :  { %v1391_v9 = vpop.f32.mrb[54].mxu1  ;;  %v1103_v11 = vmax.f32 %v1002_v2, 0.0  ;;  %v1005_v12 = vadd.f32 %v13149_v5, %v1004_v8  ;;  %v10639_v13 = vpop.f32.mrb[55].mxu0  ;;  %v1880_v47 = vld [vmem:[#allocation3 + $0x20] sm:$0xff] }
 0x154   :  { %v1615_v14 = vld [vmem:[#allocation2 + $0xb8] ss:$2 sm:$0x3f]  ;;  %v1619_v15 = vld [vmem:[#allocation2 + $0xb9] ss:$2 sm:$0x3f]  ;;  %v1392_v16 = vadd.f32 %v13149_v5, %v1391_v9 }
 0x155   :  { %v1629_v19 = vmax.f32 %v1615_v14, %v1619_v15  ;;  %v1695_v20 = vld [vmem:[#allocation2 + $0x17c] ss:$2 sm:$0x3f]  ;;  %v1699_v21 = vld [vmem:[#allocation2 + $0x17d] ss:$2 sm:$0x3f] }
 0x156   :  { %1128 = vst.msk [vmem:[#allocation2 + $0x188] sm:$0xff] %vm376_vm4, %v1103_v11  ;;  %v1703_v22 = vmax.f32 %v1695_v20, %v1699_v21  ;;  %v1490_v23 = vmax.f32 %v1389_v6, 0.0  ;;  %v1491_v24 = vmax.f32 %v1392_v16, 0.0  ;;  %v10701_v25 = vpop.f32.mrb[55].mxu1  ;;  %v1104_v26 = vmax.f32 %v1005_v12, 0.0 }
 0x157   :  { %v1633_v27 = vmax.f32 %v1629_v19, %v1631_v17 }
 0x158   :  { %1515 = vst.msk [vmem:[#allocation2 + $0x24c] sm:$0xff] %vm376_vm4, %v1490_v23  ;;  %1516 = vst.msk [vmem:[#allocation2 + $0x254] sm:$0xff] %vm376_vm4, %v1491_v24  ;;  %v2191_v29 = vld [vmem:[#allocation3 + $0x27] sm:$0xff]  ;;  %v1009_v30 = vpop.f32.mrb[56].mxu0  ;;  %v1705_v31 = vmax.f32 %v1701_v18, %v1703_v22 }
 0x159   :  { %1129 = vst.msk [vmem:[#allocation2 + $0x190] sm:$0xff] %vm376_vm4, %v1104_v26  ;;  %v1396_v32 = vpop.f32.mrb[56].mxu1  ;;  %v11700_v33 = vpack.i.bf16 %v2191_v29, %v2190_v28  ;;  %v1010_v34 = vadd.f32 %v13149_v5, %v1009_v30  ;;  %v10642_v35 = vpop.f32.mrb[57].mxu0  ;;  %v1881_v39 = vld [vmem:[#allocation3 + $0x28] sm:$0xff] }
 0x15a   :  { %1635 = vst.msk [vmem:[#allocation3 + $0x32] sm:$0x3f] %vm1562_vm5, %v1633_v27  ;;  %v1397_v36 = vadd.f32 %v13149_v5, %v1396_v32  ;;  %v10704_v37 = vpop.f32.mrb[57].mxu1  ;;  %v1012_v38 = vpop.f32.mrb[58].mxu0  ;;  %1707 = vst.msk [vmem:[#allocation3 + $0x5c] sm:$0x3f] %vm1562_vm5, %v1705_v31  ;;  %v11705_v49 = vpack.i.bf16 %v1881_v39, %v1880_v47 }
 0x15b   :  { %v1399_v40 = vpop.f32.mrb[58].mxu1  ;;  %11701 = vrot.lane.b32.xlu1 %v11700_v33, %s12634_s14  ;;  %v1105_v41 = vmax.f32 %v1010_v34, 0.0  ;;  %v1013_v42 = vadd.f32 %v13149_v5, %v1012_v38  ;;  %v10643_v43 = vpop.f32.mrb[59].mxu0 }
 0x15c   :  { %v1492_v44 = vmax.f32 %v1397_v36, 0.0  ;;  %v1400_v45 = vadd.f32 %v13149_v5, %v1399_v40  ;;  %v10705_v46 = vpop.f32.mrb[59].mxu1 }
 0x15d   :  { %1130 = vst.msk [vmem:[#allocation2 + $0x198] sm:$0xff] %vm376_vm4, %v1105_v41  ;;  %v1106_v48 = vmax.f32 %v1013_v42, 0.0 }
 0x15e   :  { %1517 = vst.msk [vmem:[#allocation2 + $0x25c] sm:$0xff] %vm376_vm4, %v1492_v44  ;;  %v1493_v50 = vmax.f32 %v1400_v45, 0.0 }
 0x15f   :  { %1131 = vst.msk [vmem:[#allocation2 + $0x1a0] sm:$0xff] %vm376_vm4, %v1106_v48  ;;  %11706 = vrot.lane.b32.xlu1 %v11705_v49, %s12635_s15 }
 0x160   :  { %1518 = vst.msk [vmem:[#allocation2 + $0x264] sm:$0xff] %vm376_vm4, %v1493_v50  ;;  %v1017_v51 = vpop.f32.mrb[60].mxu0  ;;  %v1709_v17 = vld [vmem:[#allocation2 + $0x188] ss:$2 sm:$0xff]  ;;  %v1713_v18 = vld [vmem:[#allocation2 + $0x189] ss:$2 sm:$0xff] }
 0x161   :  { %v1018_v52 = vadd.f32 %v13149_v5, %v1017_v51  ;;  %v1404_v53 = vpop.f32.mrb[60].mxu1  ;;  %v10646_v54 = vpop.f32.mrb[61].mxu0  ;;  %v1724_v26 = vmax.f32 %v1709_v17, %v1713_v18 }
 0x162   :  { %v1405_v55 = vadd.f32 %v13149_v5, %v1404_v53  ;;  %v10708_v56 = vpop.f32.mrb[61].mxu1  ;;  %v1020_v57 = vpop.f32.mrb[62].mxu0 }
 0x163   :  { %v1107_v58 = vmax.f32 %v1018_v52, 0.0  ;;  %v1021_v59 = vadd.f32 %v13149_v5, %v1020_v57  ;;  %v1407_v60 = vpop.f32.mrb[62].mxu1  ;;  %v10647_v61 = vpop.f32.mrb[63].mxu0 }
 0x164   :  { %v1494_v62 = vmax.f32 %v1405_v55, 0.0  ;;  %v1408_v63 = vadd.f32 %v13149_v5, %v1407_v60  ;;  %v10709_v0 = vpop.f32.mrb[63].mxu1 }
 0x165   :  { %1132 = vst.msk [vmem:[#allocation2 + $0x1a8] sm:$0xff] %vm376_vm4, %v1107_v58  ;;  %v1108_v2 = vmax.f32 %v1021_v59, 0.0 }
 0x166   :  { %1519 = vst.msk [vmem:[#allocation2 + $0x26c] sm:$0xff] %vm376_vm4, %v1494_v62  ;;  %v1495_v3 = vmax.f32 %v1408_v63, 0.0  ;;  %v1711_v29 = vld [vmem:[#allocation2 + $0x198] ss:$2 sm:$0x3f] }
 0x167   :  { %1133 = vst.msk [vmem:[#allocation2 + $0x1b0] sm:$0xff] %vm376_vm4, %v1108_v2  ;;  %v1715_v34 = vld [vmem:[#allocation2 + $0x199] ss:$2 sm:$0x3f] }
 0x168   :  { %v1025_v4 = vpop.f32.mrb[64].mxu0  ;;  %1520 = vst.msk [vmem:[#allocation2 + $0x274] sm:$0xff] %vm376_vm4, %v1495_v3  ;;  %v1725_v45 = vmax.f32 %v1711_v29, %v1715_v34 }
 0x169   :  { %v1026_v6 = vadd.f32 %v13149_v5, %v1025_v4  ;;  %v1412_v7 = vpop.f32.mrb[64].mxu1  ;;  %v10650_v8 = vpop.f32.mrb[65].mxu0 }
 0x16a   :  { %v1413_v9 = vadd.f32 %v13149_v5, %v1412_v7  ;;  %v10712_v11 = vpop.f32.mrb[65].mxu1  ;;  %v1028_v12 = vpop.f32.mrb[66].mxu0 }
 0x16b   :  { %v1109_v13 = vmax.f32 %v1026_v6, 0.0  ;;  %v1415_v14 = vpop.f32.mrb[66].mxu1  ;;  %v1029_v15 = vadd.f32 %v13149_v5, %v1028_v12  ;;  %v10651_v16 = vpop.f32.mrb[67].mxu0 }
 0x16c   :  { %v1496_v19 = vmax.f32 %v1413_v9, 0.0  ;;  %v1416_v20 = vadd.f32 %v13149_v5, %v1415_v14  ;;  %v10713_v21 = vpop.f32.mrb[67].mxu1 }
 0x16d   :  { %1134 = vst.msk [vmem:[#allocation2 + $0x1b8] sm:$0xff] %vm376_vm4, %v1109_v13  ;;  %v1110_v22 = vmax.f32 %v1029_v15, 0.0 }
 0x16e   :  { %v1717_v23 = vld [vmem:[#allocation2 + $0x1a4] ss:$2 sm:$0xff]  ;;  %v1721_v24 = vld [vmem:[#allocation2 + $0x1a5] ss:$2 sm:$0xff]  ;;  %1521 = vst.msk [vmem:[#allocation2 + $0x27c] sm:$0xff] %vm376_vm4, %v1496_v19  ;;  %v1497_v25 = vmax.f32 %v1416_v20, 0.0 }
 0x16f   :  { %v1726_v27 = vmax.f32 %v1717_v23, %v1721_v24  ;;  %1135 = vst.msk [vmem:[#allocation2 + $0x1c0] sm:$0xff] %vm376_vm4, %v1110_v22  ;;  %v1805_v3 = vld [vmem:[#allocation2 + $0x268] ss:$2 sm:$0xff]  ;;  %v1809_v4 = vld [vmem:[#allocation2 + $0x269] ss:$2 sm:$0xff] }
 0x170   :  { %1522 = vst.msk [vmem:[#allocation2 + $0x284] sm:$0xff] %vm376_vm4, %v1497_v25  ;;  %v1033_v28 = vpop.f32.mrb[68].mxu0  ;;  %v1820_v11 = vmax.f32 %v1805_v3, %v1809_v4 }
 0x171   :  { %v1420_v30 = vpop.f32.mrb[68].mxu1  ;;  %v1034_v31 = vadd.f32 %v13149_v5, %v1033_v28  ;;  %v10654_v32 = vpop.f32.mrb[69].mxu0  ;;  %v1728_v33 = vmax.f32 %v1724_v26, %v1726_v27 }
 0x172   :  { %v1421_v35 = vadd.f32 %v13149_v5, %v1420_v30  ;;  %v10716_v36 = vpop.f32.mrb[69].mxu1  ;;  %v1036_v37 = vpop.f32.mrb[70].mxu0 }
 0x173   :  { %v1423_v38 = vpop.f32.mrb[70].mxu1  ;;  %v1111_v39 = vmax.f32 %v1034_v31, 0.0  ;;  %v1037_v40 = vadd.f32 %v13149_v5, %v1036_v37  ;;  %v10655_v41 = vpop.f32.mrb[71].mxu0  ;;  %1730 = vst.msk [vmem:[#allocation3 + $0x62] sm:$0xff] %vm376_vm4, %v1728_v33 }
 0x174   :  { %v1719_v42 = vld [vmem:[#allocation2 + $0x1b4] ss:$2 sm:$0x3f]  ;;  %v1723_v43 = vld [vmem:[#allocation2 + $0x1b5] ss:$2 sm:$0x3f]  ;;  %v1424_v44 = vadd.f32 %v13149_v5, %v1423_v38 }
 0x175   :  { %v1727_v46 = vmax.f32 %v1719_v42, %v1723_v43  ;;  %1136 = vst.msk [vmem:[#allocation2 + $0x1c8] sm:$0xff] %vm376_vm4, %v1111_v39  ;;  %v1498_v47 = vmax.f32 %v1421_v35, 0.0  ;;  %v10717_v49 = vpop.f32.mrb[71].mxu1  ;;  %v1112_v50 = vmax.f32 %v1037_v40, 0.0  ;;  %v13328_v5 = vld [vmem:[%s15787_s2] ss:$0 sm:$0xff] }
 0x176   :  { %v1499_v48 = vmax.f32 %v1424_v44, 0.0  ;;  %v1807_v14 = vld [vmem:[#allocation2 + $0x278] ss:$2 sm:$0x3f] }
 0x177   :  { %v1729_v51 = vmax.f32 %v1725_v45, %v1727_v46  ;;  %1523 = vst.msk [vmem:[#allocation2 + $0x28c] sm:$0xff] %vm376_vm4, %v1498_v47  ;;  %1137 = vst.msk [vmem:[#allocation2 + $0x1d0] sm:$0xff] %vm376_vm4, %v1112_v50  ;;  %v1811_v18 = vld [vmem:[#allocation2 + $0x279] ss:$2 sm:$0x3f] }
 0x178   :  { %1524 = vst.msk [vmem:[#allocation2 + $0x294] sm:$0xff] %vm376_vm4, %v1499_v48  ;;  %v1041_v52 = vpop.f32.mrb[72].mxu0  ;;  %v1821_v28 = vmax.f32 %v1807_v14, %v1811_v18 }
 0x179   :  { %v1428_v53 = vpop.f32.mrb[72].mxu1  ;;  %v1042_v54 = vadd.f32 %v13328_v5, %v1041_v52  ;;  %v10658_v55 = vpop.f32.mrb[73].mxu0  ;;  %1731 = vst.msk [vmem:[#allocation3 + $0x6a] sm:$0x3f] %vm1562_vm5, %v1729_v51 }
 0x17a   :  { %v1429_v56 = vadd.f32 %v13328_v5, %v1428_v53  ;;  %v10720_v57 = vpop.f32.mrb[73].mxu1  ;;  %v1044_v58 = vpop.f32.mrb[74].mxu0 }
 0x17b   :  { %v1431_v59 = vpop.f32.mrb[74].mxu1  ;;  %v1113_v60 = vmax.f32 %v1042_v54, 0.0  ;;  %v1045_v61 = vadd.f32 %v13328_v5, %v1044_v58  ;;  %v10659_v62 = vpop.f32.mrb[75].mxu0 }
 0x17c   :  { %v1500_v63 = vmax.f32 %v1429_v56, 0.0  ;;  %v1432_v0 = vadd.f32 %v13328_v5, %v1431_v59  ;;  %v10721_v2 = vpop.f32.mrb[75].mxu1  ;;  %v1733_v41 = vld [vmem:[#allocation2 + $0x1c0] ss:$2 sm:$0xff]  ;;  %v1737_v42 = vld [vmem:[#allocation2 + $0x1c1] ss:$2 sm:$0xff] }
 0x17d   :  { %1138 = vst.msk [vmem:[#allocation2 + $0x1d8] sm:$0xff] %vm376_vm4, %v1113_v60  ;;  %v1114_v6 = vmax.f32 %v1045_v61, 0.0  ;;  %v1748_v55 = vmax.f32 %v1733_v41, %v1737_v42 }
 0x17e   :  { %1525 = vst.msk [vmem:[#allocation2 + $0x29c] sm:$0xff] %vm376_vm4, %v1500_v63  ;;  %v1501_v7 = vmax.f32 %v1432_v0, 0.0  ;;  %v1813_v8 = vld [vmem:[#allocation2 + $0x284] ss:$2 sm:$0xff]  ;;  %v1817_v9 = vld [vmem:[#allocation2 + $0x285] ss:$2 sm:$0xff] }
 0x17f   :  { %1139 = vst.msk [vmem:[#allocation2 + $0x1e0] sm:$0xff] %vm376_vm4, %v1114_v6  ;;  %v1822_v12 = vmax.f32 %v1813_v8, %v1817_v9 }
 0x180   :  { %1526 = vst.msk [vmem:[#allocation2 + $0x2a4] sm:$0xff] %vm376_vm4, %v1501_v7  ;;  %v1049_v13 = vpop.f32.mrb[76].mxu0 }
 0x181   :  { %v1050_v15 = vadd.f32 %v13328_v5, %v1049_v13  ;;  %v1436_v16 = vpop.f32.mrb[76].mxu1  ;;  %v10662_v17 = vpop.f32.mrb[77].mxu0  ;;  %v1824_v22 = vmax.f32 %v1820_v11, %v1822_v12 }
 0x182   :  { %v1437_v19 = vadd.f32 %v13328_v5, %v1436_v16  ;;  %v10724_v20 = vpop.f32.mrb[77].mxu1  ;;  %v1052_v21 = vpop.f32.mrb[78].mxu0 }
 0x183   :  { %v1115_v23 = vmax.f32 %v1050_v15, 0.0  ;;  %v1053_v24 = vadd.f32 %v13328_v5, %v1052_v21  ;;  %v1439_v25 = vpop.f32.mrb[78].mxu1  ;;  %v10663_v26 = vpop.f32.mrb[79].mxu0  ;;  %1826 = vst.msk [vmem:[#allocation3 + $0x9a] sm:$0xff] %vm376_vm4, %v1824_v22 }
 0x184   :  { %v1440_v27 = vadd.f32 %v13328_v5, %v1439_v25  ;;  %v1502_v32 = vmax.f32 %v1437_v19, 0.0  ;;  %v10725_v35 = vpop.f32.mrb[79].mxu1  ;;  %v1735_v56 = vld [vmem:[#allocation2 + $0x1d0] ss:$2 sm:$0x3f] }
 0x185   :  { %v1815_v29 = vld [vmem:[#allocation2 + $0x294] ss:$2 sm:$0x3f]  ;;  %v1819_v30 = vld [vmem:[#allocation2 + $0x295] ss:$2 sm:$0x3f] }
 0x186   :  { %1140 = vst.msk [vmem:[#allocation2 + $0x1e8] sm:$0xff] %vm376_vm4, %v1115_v23  ;;  %v1823_v31 = vmax.f32 %v1815_v29, %v1819_v30  ;;  %v1116_v33 = vmax.f32 %v1053_v24, 0.0  ;;  %v1503_v34 = vmax.f32 %v1440_v27, 0.0  ;;  %1527 = vst.msk [vmem:[#allocation2 + $0x2ac] sm:$0xff] %vm376_vm4, %v1502_v32 }
 0x187   :  { %v1739_v59 = vld [vmem:[#allocation2 + $0x1d1] ss:$2 sm:$0x3f] }
 0x188   :  { %1141 = vst.msk [vmem:[#allocation2 + $0x1f0] sm:$0xff] %vm376_vm4, %v1116_v33  ;;  %1528 = vst.msk [vmem:[#allocation2 + $0x2b4] sm:$0xff] %vm376_vm4, %v1503_v34  ;;  %v1057_v36 = vpop.f32.mrb[80].mxu0  ;;  %v1825_v37 = vmax.f32 %v1821_v28, %v1823_v31  ;;  %v1749_v0 = vmax.f32 %v1735_v56, %v1739_v59 }
 0x189   :  { %v1444_v38 = vpop.f32.mrb[80].mxu1  ;;  %v1058_v39 = vadd.f32 %v13328_v5, %v1057_v36  ;;  %v10666_v40 = vpop.f32.mrb[81].mxu0 }
 0x18a   :  { %v1445_v43 = vadd.f32 %v13328_v5, %v1444_v38  ;;  %v10728_v44 = vpop.f32.mrb[81].mxu1  ;;  %v1060_v45 = vpop.f32.mrb[82].mxu0  ;;  %1827 = vst.msk [vmem:[#allocation3 + $0xa2] sm:$0x3f] %vm1562_vm5, %v1825_v37 }
 0x18b   :  { %v1447_v46 = vpop.f32.mrb[82].mxu1  ;;  %v1117_v47 = vmax.f32 %v1058_v39, 0.0  ;;  %v1061_v48 = vadd.f32 %v13328_v5, %v1060_v45  ;;  %v10667_v49 = vpop.f32.mrb[83].mxu0 }
 0x18c   :  { %v1504_v52 = vmax.f32 %v1445_v43, 0.0  ;;  %v1448_v53 = vadd.f32 %v13328_v5, %v1447_v46  ;;  %v10729_v54 = vpop.f32.mrb[83].mxu1 }
 0x18d   :  { %v1741_v50 = vld [vmem:[#allocation2 + $0x1dc] ss:$2 sm:$0xff]  ;;  %v1745_v51 = vld [vmem:[#allocation2 + $0x1dd] ss:$2 sm:$0xff]  ;;  %1142 = vst.msk [vmem:[#allocation2 + $0x1f8] sm:$0xff] %vm376_vm4, %v1117_v47  ;;  %v1118_v58 = vmax.f32 %v1061_v48, 0.0 }
 0x18e   :  { %v1750_v57 = vmax.f32 %v1741_v50, %v1745_v51  ;;  %1529 = vst.msk [vmem:[#allocation2 + $0x2bc] sm:$0xff] %vm376_vm4, %v1504_v52  ;;  %v1505_v60 = vmax.f32 %v1448_v53, 0.0  ;;  %v1829_v12 = vld [vmem:[#allocation2 + $0x2a0] ss:$2 sm:$0xff]  ;;  %v1833_v15 = vld [vmem:[#allocation2 + $0x2a1] ss:$2 sm:$0xff] }
 0x18f   :  { %1143 = vst.msk [vmem:[#allocation2 + $0x200] sm:$0xff] %vm376_vm4, %v1118_v58  ;;  %v1743_v62 = vld [vmem:[#allocation2 + $0x1ec] ss:$2 sm:$0x3f]  ;;  %v1844_v26 = vmax.f32 %v1829_v12, %v1833_v15  ;;  %v13380_v15 = vld [vmem:[#allocation3 + $0x30] sm:$0xff] }
 0x190   :  { %v1752_v61 = vmax.f32 %v1748_v55, %v1750_v57  ;;  %v1747_v63 = vld [vmem:[#allocation2 + $0x1ed] ss:$2 sm:$0x3f]  ;;  %1530 = vst.msk [vmem:[#allocation2 + $0x2c4] sm:$0xff] %vm376_vm4, %v1505_v60  ;;  %v1065_v4 = vpop.f32.mrb[84].mxu0 }
 0x191   :  { %v1751_v2 = vmax.f32 %v1743_v62, %v1747_v63  ;;  %v1452_v3 = vpop.f32.mrb[84].mxu1  ;;  %v1066_v8 = vadd.f32 %v13328_v5, %v1065_v4  ;;  %v10670_v9 = vpop.f32.mrb[85].mxu0  ;;  %v1831_v43 = vld [vmem:[#allocation2 + $0x2b0] ss:$2 sm:$0x3f] }
 0x192   :  { %1754 = vst.msk [vmem:[#allocation3 + $0x70] sm:$0xff] %vm376_vm4, %v1752_v61  ;;  %v1453_v6 = vadd.f32 %v13328_v5, %v1452_v3  ;;  %v10732_v7 = vpop.f32.mrb[85].mxu1  ;;  %v1068_v14 = vpop.f32.mrb[86].mxu0  ;;  %v1835_v45 = vld [vmem:[#allocation2 + $0x2b1] ss:$2 sm:$0x3f] }
 0x193   :  { %v1753_v11 = vmax.f32 %v1749_v0, %v1751_v2  ;;  %v1455_v13 = vpop.f32.mrb[86].mxu1  ;;  %v1119_v19 = vmax.f32 %v1066_v8, 0.0  ;;  %v1069_v20 = vadd.f32 %v13328_v5, %v1068_v14  ;;  %v10671_v21 = vpop.f32.mrb[87].mxu0  ;;  %v1845_v49 = vmax.f32 %v1831_v43, %v1835_v45  ;;  %v2206_v53 = vld [vmem:[#allocation3 + $0x9f] sm:$0xff]  ;;  %v2192_v61 = vld [vmem:[#allocation3 + $0x2f] sm:$0xff]  ;;  %v2193_v14 = vld [vmem:[#allocation3 + $0x37] sm:$0xff] }
 0x194   :  { %v1506_v16 = vmax.f32 %v1453_v6, 0.0  ;;  %v1456_v17 = vadd.f32 %v13328_v5, %v1455_v13  ;;  %v10733_v18 = vpop.f32.mrb[87].mxu1  ;;  %v2209_v58 = vld [vmem:[#allocation3 + $0xa0] sm:$0xff] }
 0x195   :  { %1755 = vst.msk [vmem:[#allocation3 + $0x78] sm:$0x3f] %vm1562_vm5, %v1753_v11  ;;  %v1120_v25 = vmax.f32 %v1069_v20, 0.0 }
 0x196   :  { %1531 = vst.msk [vmem:[#allocation2 + $0x2cc] sm:$0xff] %vm376_vm4, %v1506_v16  ;;  %v1507_v24 = vmax.f32 %v1456_v17, 0.0  ;;  %1144 = vst.msk [vmem:[#allocation2 + $0x208] sm:$0xff] %vm376_vm4, %v1119_v19  ;;  %v1757_v63 = vld [vmem:[#allocation2 + $0x1f8] ss:$2 sm:$0xff] }
 0x197   :  { %v1837_v22 = vld [vmem:[#allocation2 + $0x2bc] ss:$2 sm:$0xff]  ;;  %v1841_v23 = vld [vmem:[#allocation2 + $0x2bd] ss:$2 sm:$0xff]  ;;  %1145 = vst.msk [vmem:[#allocation2 + $0x210] sm:$0xff] %vm376_vm4, %v1120_v25 }
 0x198   :  { %v1846_v27 = vmax.f32 %v1837_v22, %v1841_v23  ;;  %v1073_v28 = vpop.f32.mrb[88].mxu0  ;;  %1532 = vst.msk [vmem:[#allocation2 + $0x2d4] sm:$0xff] %vm376_vm4, %v1507_v24  ;;  %v1761_v0 = vld [vmem:[#allocation2 + $0x1f9] ss:$2 sm:$0xff]  ;;  %v13387_v22 = vld [vmem:[#allocation3 + $0x38] sm:$0xff]  ;;  %v11715_v24 = vpack.i.bf16 %v2193_v14, %v2192_v61 }
 0x199   :  { %v1074_v29 = vadd.f32 %v13328_v5, %v1073_v28  ;;  %v1460_v30 = vpop.f32.mrb[88].mxu1  ;;  %v10674_v31 = vpop.f32.mrb[89].mxu0  ;;  %v1772_v18 = vmax.f32 %v1757_v63, %v1761_v0  ;;  %v11725_v25 = vpack.i.bf16 %v13387_v22, %v13380_v15  ;;  %v2196_v0 = vld [vmem:[#allocation3 + $0x4f] sm:$0xff] }
 0x19a   :  { %v1461_v32 = vadd.f32 %v13328_v5, %v1460_v30  ;;  %v10736_v33 = vpop.f32.mrb[89].mxu1  ;;  %v1076_v34 = vpop.f32.mrb[90].mxu0  ;;  %v1848_v35 = vmax.f32 %v1844_v26, %v1846_v27 }
 0x19b   :  { %v1121_v36 = vmax.f32 %v1074_v29, 0.0  ;;  %v1077_v37 = vadd.f32 %v13328_v5, %v1076_v34  ;;  %v1463_v38 = vpop.f32.mrb[90].mxu1  ;;  %v10675_v39 = vpop.f32.mrb[91].mxu0  ;;  %v2194_v33 = vld [vmem:[#allocation3 + $0x3f] sm:$0xff] }
 0x19c   :  { %v1508_v40 = vmax.f32 %v1461_v32, 0.0  ;;  %v1464_v41 = vadd.f32 %v13328_v5, %v1463_v38  ;;  %v10737_v42 = vpop.f32.mrb[91].mxu1  ;;  %1850 = vst.msk [vmem:[#allocation3 + $0xa8] sm:$0xff] %vm376_vm4, %v1848_v35  ;;  %v13397_v34 = vld [vmem:[#allocation3 + $0x40] sm:$0xff] }
 0x19d   :  { %1146 = vst.msk [vmem:[#allocation2 + $0x218] sm:$0xff] %vm376_vm4, %v1121_v36  ;;  %v1122_v44 = vmax.f32 %v1077_v37, 0.0 }
 0x19e   :  { %1533 = vst.msk [vmem:[#allocation2 + $0x2dc] sm:$0xff] %vm376_vm4, %v1508_v40  ;;  %v1509_v46 = vmax.f32 %v1464_v41, 0.0  ;;  %v1759_v30 = vld [vmem:[#allocation2 + $0x208] ss:$2 sm:$0x3f] }
 0x19f   :  { %1147 = vst.msk [vmem:[#allocation2 + $0x220] sm:$0xff] %vm376_vm4, %v1122_v44  ;;  %v1839_v47 = vld [vmem:[#allocation2 + $0x2cc] ss:$2 sm:$0x3f] }
 0x1a0   :  { %v1843_v48 = vld [vmem:[#allocation2 + $0x2cd] ss:$2 sm:$0x3f]  ;;  %1534 = vst.msk [vmem:[#allocation2 + $0x2e4] sm:$0xff] %vm376_vm4, %v1509_v46  ;;  %v1081_v51 = vpop.f32.mrb[92].mxu0 }
 0x1a1   :  { %v1847_v50 = vmax.f32 %v1839_v47, %v1843_v48  ;;  %v1468_v52 = vpop.f32.mrb[92].mxu1  ;;  %v1082_v54 = vadd.f32 %v13328_v5, %v1081_v51  ;;  %v10678_v60 = vpop.f32.mrb[93].mxu0  ;;  %v1763_v36 = vld [vmem:[#allocation2 + $0x209] ss:$2 sm:$0x3f] }
 0x1a2   :  { %v1469_v55 = vadd.f32 %v13328_v5, %v1468_v52  ;;  %v10740_v56 = vpop.f32.mrb[93].mxu1  ;;  %v1084_v4 = vpop.f32.mrb[94].mxu0 }
 0x1a3   :  { %v2207_v57 = vld [vmem:[#allocation3 + $0xa7] sm:$0xff]  ;;  %v1849_v62 = vmax.f32 %v1845_v49, %v1847_v50  ;;  %v1471_v6 = vpop.f32.mrb[94].mxu1  ;;  %v1123_v7 = vmax.f32 %v1082_v54, 0.0  ;;  %v1085_v9 = vadd.f32 %v13328_v5, %v1084_v4  ;;  %v10679_v12 = vpop.f32.mrb[95].mxu0 }
 0x1a4   :  { %v2210_v59 = vld [vmem:[#allocation3 + $0xa8] sm:$0xff]  ;;  %v11710_v2 = vpack.i.bf16 %v2207_v57, %v2206_v53  ;;  %v1510_v8 = vmax.f32 %v1469_v55, 0.0  ;;  %v1472_v11 = vadd.f32 %v13328_v5, %v1471_v6  ;;  %v10741_v13 = vpop.f32.mrb[95].mxu1  ;;  %v1773_v53 = vmax.f32 %v1759_v30, %v1763_v36  ;;  %v1899_v36 = vld [vmem:[#allocation3 + $0x11] sm:$0xff] }
 0x1a5   :  { %v11720_v3 = vpack.i.bf16 %v2210_v59, %v2209_v58  ;;  %1851 = vst.msk [vmem:[#allocation3 + $0xb0] sm:$0x3f] %vm1562_vm5, %v1849_v62  ;;  %v1124_v20 = vmax.f32 %v1085_v9, 0.0  ;;  %v2195_v49 = vld [vmem:[#allocation3 + $0x47] sm:$0xff] }
 0x1a6   :  { %v1765_v16 = vld [vmem:[#allocation2 + $0x214] ss:$2 sm:$0xff]  ;;  %v1769_v17 = vld [vmem:[#allocation2 + $0x215] ss:$2 sm:$0xff]  ;;  %11711 = vrot.lane.b32.xlu0 %v11710_v2, %s12634_s14  ;;  %1148 = vst.msk [vmem:[#allocation2 + $0x228] sm:$0xff] %vm376_vm4, %v1123_v7  ;;  %1535 = vst.msk [vmem:[#allocation2 + $0x2ec] sm:$0xff] %vm376_vm4, %v1510_v8 }
 0x1a7   :  { %11721 = vrot.lane.b32.xlu1 %v11720_v3, %s12635_s15  ;;  %v1774_v19 = vmax.f32 %v1765_v16, %v1769_v17  ;;  %v1511_v21 = vmax.f32 %v1472_v11, 0.0  ;;  %1149 = vst.msk [vmem:[#allocation2 + $0x230] sm:$0xff] %vm376_vm4, %v1124_v20  ;;  %v13404_v50 = vld [vmem:[#allocation3 + $0x48] sm:$0xff]  ;;  %v13412_v2 = vld [vmem:[#allocation3 + $0x50] sm:$0xff] }
 0x1a8   :  { %v1089_v23 = vpop.f32.mrb[96].mxu0  ;;  %v1897_v57 = vld [vmem:[#allocation3 + $0x1] sm:$0xff]  ;;  %v1898_v9 = vld [vmem:[#allocation3 + $0x9] sm:$0xff] }
 0x1a9   :  { %1536 = vst.msk [vmem:[#allocation2 + $0x2f4] sm:$0xff] %vm376_vm4, %v1511_v21  ;;  %v1090_v26 = vadd.f32 %v13328_v5, %v1089_v23  ;;  %v1476_v27 = vpop.f32.mrb[96].mxu1  ;;  %v10682_v28 = vpop.f32.mrb[97].mxu0  ;;  %v1776_v29 = vmax.f32 %v1772_v18, %v1774_v19  ;;  %v1918_v58 = vld [vmem:[#allocation3 + $0x2] sm:$0xff]  ;;  %v11735_v62 = vpack.i.bf16 %v1897_v57, %v2195_v49  ;;  %v1919_v16 = vld [vmem:[#allocation3 + $0xa] sm:$0xff] }
 0x1aa   :  { %v1477_v31 = vadd.f32 %v13328_v5, %v1476_v27  ;;  %11716 = vrot.lane.b32.xlu0 %v11715_v24, %s12634_s14  ;;  %v10744_v32 = vpop.f32.mrb[97].mxu1  ;;  %v1092_v35 = vpop.f32.mrb[98].mxu0  ;;  %v1789_v59 = vld [vmem:[#allocation2 + $0x24c] ss:$2 sm:$0xff]  ;;  %v11745_v63 = vpack.i.bf16 %v1918_v58, %v13404_v50  ;;  %v1793_v6 = vld [vmem:[#allocation2 + $0x24d] ss:$2 sm:$0xff]  ;;  %v11750_v27 = vpack.i.bf16 %v2196_v0, %v1898_v9  ;;  %v11755_v28 = vpack.i.bf16 %v13412_v2, %v1919_v16 }
 0x1ab   :  { %11726 = vrot.lane.b32.xlu1 %v11725_v25, %s12635_s15  ;;  %v1125_v37 = vmax.f32 %v1090_v26, 0.0  ;;  %v1093_v38 = vadd.f32 %v13328_v5, %v1092_v35  ;;  %v1479_v39 = vpop.f32.mrb[98].mxu1  ;;  %v10683_v40 = vpop.f32.mrb[99].mxu0  ;;  %1778 = vst.msk [vmem:[#allocation3 + $0x7e] sm:$0xff] %vm376_vm4, %v1776_v29  ;;  %v1853_v7 = vld [vmem:[#allocation2 + $0x2d8] ss:$2 sm:$0xff]  ;;  %v1798_v24 = vmax.f32 %v1789_v59, %v1793_v6 }
 0x1ac   :  { %v1512_v41 = vmax.f32 %v1477_v31, 0.0  ;;  %v2208_v42 = vld [vmem:[#allocation3 + $0xaf] sm:$0x3f]  ;;  %v1480_v44 = vadd.f32 %v13328_v5, %v1479_v39  ;;  %v10745_v45 = vpop.f32.mrb[99].mxu1  ;;  %v2197_v31 = vld [vmem:[#allocation3 + $0x57] sm:$0xff]  ;;  %v2199_v58 = vld [vmem:[#allocation3 + $0x67] sm:$0xff] }
 0x1ad   :  { %v2211_v43 = vld [vmem:[#allocation3 + $0xb0] sm:$0x3f]  ;;  %1150 = vst.msk [vmem:[#allocation2 + $0x238] sm:$0xff] %vm376_vm4, %v1125_v37  ;;  %v11730_v46 = vpack.i.bf16 %v2194_v33, %v2208_v42  ;;  %v1126_v48 = vmax.f32 %v1093_v38, 0.0  ;;  %v13422_v32 = vld [vmem:[#allocation3 + $0x58] sm:$0xff]  ;;  %v13428_v45 = vld [vmem:[#allocation3 + $0x60] sm:$0xff] }
 0x1ae   :  { %v11740_v47 = vpack.i.bf16 %v13397_v34, %v2211_v43  ;;  %v1767_v51 = vld [vmem:[#allocation2 + $0x224] ss:$2 sm:$0x3f]  ;;  %v1771_v52 = vld [vmem:[#allocation2 + $0x225] ss:$2 sm:$0x3f] }
 0x1af   :  { %1537 = vst.msk [vmem:[#allocation2 + $0x2fc] sm:$0xff] %vm376_vm4, %v1512_v41  ;;  %v1775_v54 = vmax.f32 %v1767_v51, %v1771_v52  ;;  %11731 = vrot.lane.b32.xlu0 %v11730_v46, %s12634_s14  ;;  %1151 = vst.msk [vmem:[#allocation2 + $0x240] sm:$0xff] %vm376_vm4, %v1126_v48  ;;  %v1513_v55 = vmax.f32 %v1480_v44, 0.0  ;;  %v1857_v13 = vld [vmem:[#allocation2 + $0x2d9] ss:$2 sm:$0xff]  ;;  %v11760_v41 = vpack.i.bf16 %v1899_v36, %v2197_v31  ;;  %v2198_v44 = vld [vmem:[#allocation3 + $0x5f] sm:$0xff] }
 0x1b0   :  { %11741 = vrot.lane.b32.xlu1 %v11740_v47, %s12635_s15  ;;  %v1097_v56 = vpop.f32.mrb[100].mxu0  ;;  %v1868_v29 = vmax.f32 %v1853_v7, %v1857_v13  ;;  %v1791_v35 = vld [vmem:[#allocation2 + $0x25c] ss:$2 sm:$0x3f]  ;;  %v1900_v46 = vld [vmem:[#allocation3 + $0x19] sm:$0xff]  ;;  %v1922_v0 = vld [vmem:[#allocation3 + $0x22] sm:$0xff] }
 0x1b1   :  { %v1098_v60 = vadd.f32 %v13328_v5, %v1097_v56  ;;  %v1484_v61 = vpop.f32.mrb[100].mxu1  ;;  %v10686_v3 = vpop.f32.mrb[101].mxu0  ;;  %v1777_v4 = vmax.f32 %v1773_v53, %v1775_v54  ;;  %1538 = vst.msk [vmem:[#allocation2 + $0x304] sm:$0xff] %vm376_vm4, %v1513_v55  ;;  %v1920_v37 = vld [vmem:[#allocation3 + $0x12] sm:$0xff]  ;;  %v1921_v47 = vld [vmem:[#allocation3 + $0x1a] sm:$0xff]  ;;  %v11770_v56 = vpack.i.bf16 %v2198_v44, %v1900_v46  ;;  %v13434_v59 = vld [vmem:[#allocation3 + $0x68] sm:$0xff] }
 0x1b2   :  { %v1485_v8 = vadd.f32 %v13328_v5, %v1484_v61  ;;  %v1100_v11 = vpop.f32.mrb[102].mxu0  ;;  %v10748_v12 = vpop.f32.mrb[101].mxu1  ;;  %v1855_v39 = vld [vmem:[#allocation2 + $0x2e8] ss:$2 sm:$0x3f]  ;;  %v11765_v42 = vpack.i.bf16 %v1920_v37, %v13422_v32  ;;  %v11775_v57 = vpack.i.bf16 %v13428_v45, %v1921_v47  ;;  %v2200_v9 = vld [vmem:[#allocation3 + $0x6f] sm:$0xff] }
 0x1b3   :  { %v1127_v14 = vmax.f32 %v1098_v60, 0.0  ;;  %11736 = vrot.lane.b32.xlu0 %v11735_v62, %s12634_s14  ;;  %v10687_v17 = vpop.f32.mrb[103].mxu0  ;;  %1779 = vst.msk [vmem:[#allocation3 + $0x86] sm:$0x3f] %vm1562_vm5, %v1777_v4  ;;  %v1487_v18 = vpop.f32.mrb[102].mxu1  ;;  %v13440_v11 = vld [vmem:[#allocation3 + $0x70] sm:$0xff] }
 0x1b4   :  { %11746 = vrot.lane.b32.xlu1 %v11745_v63, %s12635_s15  ;;  %v1781_v19 = vld [vmem:[#allocation2 + $0x230] ss:$2 sm:$0xff]  ;;  %v1785_v20 = vld [vmem:[#allocation2 + $0x231] ss:$2 sm:$0xff]  ;;  %v1514_v21 = vmax.f32 %v1485_v8, 0.0  ;;  %v10749_v23 = vpop.f32.mrb[103].mxu1  ;;  %v11785_v8 = vpack.i.bf16 %v1922_v0, %v13434_v59 }
 0x1b5   :  { %v1796_v5 = vmax.f32 %v1781_v19, %v1785_v20  ;;  %1152 = vst.msk [vmem:[#allocation2 + $0x248] sm:$0xf] %vm401_vm6, %v1127_v14  ;;  %v1859_v40 = vld [vmem:[#allocation2 + $0x2e9] ss:$2 sm:$0x3f]  ;;  %v2167_v12 = vld [vmem:[#allocation3 + $0xe] sm:$0xff] }
 0x1b6   :  { %v1861_v25 = vld [vmem:[#allocation2 + $0x2f4] ss:$2 sm:$0xff]  ;;  %v1865_v26 = vld [vmem:[#allocation2 + $0x2f5] ss:$2 sm:$0xff]  ;;  %1539 = vst.msk [vmem:[#allocation2 + $0x30c] sm:$0xf] %vm401_vm6, %v1514_v21  ;;  %v1869_v51 = vmax.f32 %v1855_v39, %v1859_v40 }
 0x1b7   :  { %v1870_v30 = vmax.f32 %v1861_v25, %v1865_v26  ;;  %11751 = vrot.lane.b32.xlu0 %v11750_v27, %s12634_s14  ;;  %v1800_v33 = vmax.f32 %v1796_v5, %v1798_v24  ;;  %v1795_v43 = vld [vmem:[#allocation2 + $0x25d] ss:$2 sm:$0x3f]  ;;  %v1901_v63 = vld [vmem:[#allocation3 + $0x21] sm:$0xff]  ;;  %v13450_v27 = vld [vmem:[#allocation3 + $0x78] sm:$0xff] }
 0x1b8   :  { %11756 = vrot.lane.b32.xlu1 %v11755_v28, %s12635_s15  ;;  %v1799_v52 = vmax.f32 %v1791_v35, %v1795_v43  ;;  %v11780_v7 = vpack.i.bf16 %v1901_v63, %v2199_v58  ;;  %v2168_v14 = vld [vmem:[#allocation3 + $0x16] sm:$0xff]  ;;  %v1902_v18 = vld [vmem:[#allocation3 + $0x29] sm:$0xff]  ;;  %v12380_v28 = vld [vmem:[%s15788_s3 + $0x30] sm:$0xff]  }
 0x1b9   :  { %v1872_v38 = vmax.f32 %v1868_v29, %v1870_v30  ;;  %1802 = vst.msk [vmem:[#allocation3 + $0x8c] sm:$0xff] %vm376_vm4, %v1800_v33  ;;  %v1923_v19 = vld [vmem:[#allocation3 + $0x2a] sm:$0xff]  ;;  %v11790_v23 = vpack.i.bf16 %v2200_v9, %v1902_v18  ;;  %v2201_v26 = vld [vmem:[#allocation3 + $0x77] sm:$0xff] }
 0x1ba   :  { %v11795_v24 = vpack.i.bf16 %v13440_v11, %v1923_v19  ;;  %v1903_v30 = vld [vmem:[#allocation3 + $0x31] sm:$0xff]  ;;  %v2202_v36 = vld [vmem:[#allocation3 + $0x7f] sm:$0xff] }
 0x1bb   :  { %1874 = vst.msk [vmem:[#allocation3 + $0xb6] sm:$0xff] %vm376_vm4, %v1872_v38  ;;  %11761 = vrot.lane.b32.xlu0 %v11760_v41, %s12634_s14  ;;  %v1924_v31 = vld [vmem:[#allocation3 + $0x32] sm:$0xff]  ;;  %v11800_v33 = vpack.i.bf16 %v1903_v30, %v2201_v26  ;;  %v13459_v37 = vld [vmem:[#allocation3 + $0x80] sm:$0xff]  ;;  %v12384_v38 = vld [vmem:[%s15788_s3 + $0x38] sm:$0xff]  }
 0x1bc   :  { %11766 = vrot.lane.b32.xlu1 %v11765_v42, %s12635_s15  ;;  %v1783_v48 = vld [vmem:[#allocation2 + $0x240] ss:$2 sm:$0x3f]  ;;  %v1787_v49 = vld [vmem:[#allocation2 + $0x241] ss:$2 sm:$0x3f]  ;;  %v11805_v35 = vpack.i.bf16 %v1924_v31, %v13450_v27 }
 0x1bd   :  { %v1797_v53 = vmax.f32 %v1783_v48, %v1787_v49  ;;  %v1863_v54 = vld [vmem:[#allocation2 + $0x304] ss:$2 sm:$0x3f]  ;;  %v1867_v55 = vld [vmem:[#allocation2 + $0x305] ss:$2 sm:$0x3f] }
 0x1be   :  { %v1871_v60 = vmax.f32 %v1863_v54, %v1867_v55  ;;  %v1904_v39 = vld [vmem:[#allocation3 + $0x39] sm:$0xff]  ;;  %v12387_v47 = vld [vmem:[%s15788_s3 + $0x40] sm:$0xff]   ;;  %v1930_v26 = vld [vmem:[#allocation3 + $0x62] sm:$0xff] }
 0x1bf   :  { %11771 = vrot.lane.b32.xlu0 %v11770_v56, %s12634_s14  ;;  %v11692_v61 = vpop.permute.xlu0 %11691  ;;  %v1801_v62 = vmax.f32 %v1797_v53, %v1799_v52  ;;  %v1925_v40 = vld [vmem:[#allocation3 + $0x3a] sm:$0xff]  ;;  %v11810_v42 = vpack.i.bf16 %v2202_v36, %v1904_v39  ;;  %v1926_v52 = vld [vmem:[#allocation3 + $0x42] sm:$0xff]  ;;  %v13503_v36 = vld [vmem:[#allocation3 + $0x2e] sm:$0xff] }
 0x1c0   :  { %11776 = vrot.lane.b32.xlu1 %v11775_v57, %s12635_s15  ;;  %v1873_v3 = vmax.f32 %v1869_v51, %v1871_v60  ;;  %v11694_v4 = vunpack.i.h.bf16 %v11692_v61  ;;  %v11693_v6 = vunpack.i.l.bf16 %v11692_v61  ;;  %v11815_v43 = vpack.i.bf16 %v13459_v37, %v1925_v40  ;;  %v2203_v44 = vld [vmem:[#allocation3 + $0x87] sm:$0xff]  ;;  %v2169_v53 = vld [vmem:[#allocation3 + $0x1e] sm:$0xff]  ;;  %v1911_v40 = vld [vmem:[#allocation3 + $0x71] sm:$0xff] }
 0x1c1   :  { %1803 = vst.msk [vmem:[#allocation3 + $0x94] sm:$0x3f] %vm1562_vm5, %v1801_v62  ;;  %v13470_v46 = vld [vmem:[#allocation3 + $0x88] sm:$0xff] }
 0x1c2   :  { %1875 = vst.msk [vmem:[#allocation3 + $0xbe] sm:$0x3f] %vm1562_vm5, %v1873_v3  ;;  %v2380_v20 = vsel %vm376_vm4, %v2167_v12, %v11693_v6  ;;  %v2381_v21 = vsel %vm376_vm4, %v2168_v14, %v11694_v4  ;;  %v1905_v51 = vld [vmem:[#allocation3 + $0x41] sm:$0xff]  ;;  %v11825_v56 = vpack.i.bf16 %v1926_v52, %v13470_v46  ;;  %v1906_v6 = vld [vmem:[#allocation3 + $0x49] sm:$0xff] }
 0x1c3   :  { %11781 = vrot.lane.b32.xlu0 %v11780_v7, %s12634_s14  ;;  %v11697_v13 = vpop.permute.xlu0 %11696  ;;  %v11820_v55 = vpack.i.bf16 %v1905_v51, %v2203_v44  ;;  %v2170_v57 = vld [vmem:[#allocation3 + $0x26] sm:$0xff]  ;;  %v2808_v51 = vld [vmem:[#allocation3 + $0x3d] sm:$0xff] }
 0x1c4   :  { %11786 = vrot.lane.b32.xlu1 %v11785_v8, %s12635_s15  ;;  %v11699_v16 = vunpack.i.h.bf16 %v11697_v13  ;;  %v11698_v17 = vunpack.i.l.bf16 %v11697_v13  ;;  %v1927_v7 = vld [vmem:[#allocation3 + $0x4a] sm:$0xff]  ;;  %v11865_v30 = vpack.i.bf16 %v1930_v26, %v2170_v57  ;;  %v13513_v52 = vld [vmem:[#allocation3 + $0x3e] sm:$0xff] }
 0x1c5   :  { %v1910_v31 = vld [vmem:[#allocation3 + $0x69] sm:$0xff] }
 0x1c6   :  { %v2402_v5 = vsel %vm2128_vm7, %v2381_v21, %v11699_v16  ;;  %v2401_v25 = vsel %vm2128_vm7, %v2380_v20, %v11698_v17  ;;  %v1907_v16 = vld [vmem:[#allocation3 + $0x51] sm:$0xff]  ;;  %v1908_v20 = vld [vmem:[#allocation3 + $0x59] sm:$0xff]  ;;  %v2813_v26 = vld [vmem:[#allocation3 + $0x65] sm:$0xff] }
 0x1c7   :  { %v2422_v29 = vpack.c.bf16 %v2402_v5, %v2401_v25  ;;  %11791 = vrot.lane.b32.xlu0 %v11790_v23, %s12634_s14  ;;  %v1928_v17 = vld [vmem:[#allocation3 + $0x52] sm:$0xff]  ;;  %v1929_v21 = vld [vmem:[#allocation3 + $0x5a] sm:$0xff] }
 0x1c8   :  { %11796 = vrot.lane.b32.xlu1 %v11795_v24, %s12635_s15  ;;  %v2204_v61 = vld [vmem:[#allocation3 + $0x8f] sm:$0xff]  ;;  %v2205_v13 = vld [vmem:[#allocation3 + $0x97] sm:$0xff]  ;;  %v11855_v5 = vpack.i.bf16 %v2169_v53, %v1929_v21  ;;  %v1909_v25 = vld [vmem:[#allocation3 + $0x61] sm:$0xff] }
 0x1c9   :  { %10757 = vmatmul.mubr.msk.bf16.vlgmr.msra.gmra.mrb[104].mxu0 %vm2458_vm8, %v2422_v29  ;;  %v13479_v62 = vld [vmem:[#allocation3 + $0x90] sm:$0xff]  ;;  %v11830_v8 = vpack.i.bf16 %v2204_v61, %v1906_v6  ;;  %v13489_v14 = vld [vmem:[#allocation3 + $0x98] sm:$0xff]  ;;  %v11840_v18 = vpack.i.bf16 %v1907_v16, %v2205_v13 }
 0x1ca   :  { %10760 = vmatprep.mubr.msk.bf16.mxu0 %vm12633_vm2, %v12631_v1  ;;  %10851 = vmatpush3.bf16.msra.mxu0 %v12380_v28  ;;  %v11835_v9 = vpack.i.bf16 %v13479_v62, %v1927_v7  ;;  %v11850_v19 = vpack.i.bf16 %v1928_v17, %v13489_v14  ;;  %v2804_v23 = vld [vmem:[#allocation3 + $0x1d] sm:$0xff]  ;;  %v2805_v28 = vld [vmem:[#allocation3 + $0x25] sm:$0xff] }
 0x1cb   :  { %11801 = vrot.lane.b32.xlu0 %v11800_v33, %s12634_s14  ;;  %10852 = vmatprep.subr.bf16.mxu0 %v12631_v1  ;;  %v11845_v24 = vpack.i.bf16 %v2804_v23, %v1908_v20  ;;  %v11860_v29 = vpack.i.bf16 %v1909_v25, %v2805_v28  ;;  %v1931_v33 = vld [vmem:[#allocation3 + $0x6a] sm:$0xff]  ;;  %v13528_v13 = vld [vmem:[#allocation3 + $0x56] sm:$0xff]  ;;  %v13533_v21 = vld [vmem:[#allocation3 + $0x5e] sm:$0xff] }
 0x1cc   :  { %11806 = vrot.lane.b32.xlu1 %v11805_v35, %s12635_s15  ;;  %v2806_v35 = vld [vmem:[#allocation3 + $0x2d] sm:$0xff]  ;;  %v11875_v39 = vpack.i.bf16 %v13503_v36, %v1931_v33  ;;  %v2812_v20 = vld [vmem:[#allocation3 + $0x5d] sm:$0xff] }
 0x1cd   :  { %v11702_v41 = vpop.permute.xlu1 %11701  ;;  %v1938_v25 = vld [vmem:[#allocation3 + $0xa2] sm:$0x3f]  ;;  %v13541_v33 = vld [vmem:[#allocation3 + $0x76] sm:$0xff] }
 0x1ce   :  { %10853 = vmatpush3.bf16.msra.mxu0 %v12384_v38  ;;  %v11704_v48 = vunpack.i.h.bf16 %v11702_v41  ;;  %v11703_v49 = vunpack.i.l.bf16 %v11702_v41  ;;  %v11870_v38 = vpack.i.bf16 %v2806_v35, %v1910_v31  ;;  %v1932_v41 = vld [vmem:[#allocation3 + $0x72] sm:$0xff]  ;;  %v13538_v28 = vld [vmem:[#allocation3 + $0x66] sm:$0xff] }
 0x1cf   :  { %11811 = vrot.lane.b32.xlu0 %v11810_v42, %s12634_s14  ;;  %10854 = vmatprep.subr.bf16.mxu0 %v12631_v1  ;;  %v2807_v42 = vld [vmem:[#allocation3 + $0x35] sm:$0xff]  ;;  %v2814_v35 = vld [vmem:[#allocation3 + $0x6d] sm:$0xff] }
 0x1d0   :  { %11816 = vrot.lane.b32.xlu1 %v11815_v43, %s12635_s15  ;;  %v2382_v63 = vsel %vm376_vm4, %v2169_v53, %v11703_v49  ;;  %v2383_v0 = vsel %vm376_vm4, %v2170_v57, %v11704_v48  ;;  %v13508_v43 = vld [vmem:[#allocation3 + $0x36] sm:$0xff]  ;;  %v11880_v44 = vpack.i.bf16 %v1911_v40, %v2807_v42  ;;  %v2809_v57 = vld [vmem:[#allocation3 + $0x45] sm:$0xff] }
 0x1d1   :  { %v11707_v54 = vpop.permute.xlu1 %11706  ;;  %v1912_v48 = vld [vmem:[#allocation3 + $0x79] sm:$0xff]  ;;  %v13549_v42 = vld [vmem:[#allocation3 + $0x86] sm:$0xff] }
 0x1d2   :  { %v11709_v58 = vunpack.i.h.bf16 %v11707_v54  ;;  %v11708_v60 = vunpack.i.l.bf16 %v11707_v54  ;;  %10855 = vmatpush3.bf16.msra.mxu0 %v12387_v47  ;;  %v11885_v47 = vpack.i.bf16 %v1932_v41, %v13508_v43  ;;  %v1933_v49 = vld [vmem:[#allocation3 + $0x7a] sm:$0xff]  ;;  %v11890_v53 = vpack.i.bf16 %v2808_v51, %v1912_v48  ;;  %v2817_v41 = vld [vmem:[#allocation3 + $0x85] sm:$0xff]  ;;  %v2818_v51 = vld [vmem:[#allocation3 + $0x8d] sm:$0xff] }
 0x1d3   :  { %11821 = vrot.lane.b32.xlu0 %v11820_v55, %s12634_s14  ;;  %10962 = vmatprep.subr.bf16.mxu0 %v12631_v1  ;;  %v11895_v54 = vpack.i.bf16 %v13513_v52, %v1933_v49  ;;  %v1913_v55 = vld [vmem:[#allocation3 + $0x81] sm:$0xff]  ;;  %v2815_v31 = vld [vmem:[#allocation3 + $0x75] sm:$0xff] }
 0x1d4   :  { %11826 = vrot.lane.b32.xlu1 %v11825_v56, %s12635_s15  ;;  %v2404_v3 = vsel %vm2128_vm7, %v2383_v0, %v11709_v58  ;;  %v2403_v4 = vsel %vm2128_vm7, %v2382_v63, %v11708_v60  ;;  %v1934_v56 = vld [vmem:[#allocation3 + $0x82] sm:$0xff]  ;;  %v11900_v60 = vpack.i.bf16 %v1913_v55, %v2809_v57  ;;  %v1935_v0 = vld [vmem:[#allocation3 + $0x8a] sm:$0xff]  ;;  %v13559_v55 = vld [vmem:[#allocation3 + $0x96] sm:$0xff] }
 0x1d5   :  { %v2423_v12 = vpack.c.bf16 %v2404_v3, %v2403_v4  ;;  %v13518_v58 = vld [vmem:[#allocation3 + $0x46] sm:$0xff]  ;;  %v13523_v4 = vld [vmem:[#allocation3 + $0x4e] sm:$0xff] }
 0x1d6   :  { %v11905_v61 = vpack.i.bf16 %v1934_v56, %v13518_v58  ;;  %v1914_v63 = vld [vmem:[#allocation3 + $0x89] sm:$0xff]  ;;  %v11915_v7 = vpack.i.bf16 %v13523_v4, %v1935_v0  ;;  %v2841_v0 = vld [vmem:[#allocation3 + $0x9e] sm:$0xff] }
 0x1d7   :  { %11831 = vrot.lane.b32.xlu0 %v11830_v8, %s12634_s14  ;;  %10761 = vmatmul.mubr.msk.bf16.gmra.mrb[108].mxu0 %vm2458_vm8, %v2423_v12  ;;  %v2810_v3 = vld [vmem:[#allocation3 + $0x4d] sm:$0xff]  ;;  %v2811_v12 = vld [vmem:[#allocation3 + $0x55] sm:$0xff] }
 0x1d8   :  { %11836 = vrot.lane.b32.xlu1 %v11835_v9, %s12635_s15  ;;  %10764 = vmatprep.mubr.msk.bf16.mxu0 %vm12633_vm2, %v12631_v1  ;;  %v11910_v6 = vpack.i.bf16 %v2810_v3, %v1914_v63  ;;  %v1915_v8 = vld [vmem:[#allocation3 + $0x91] sm:$0xff]  ;;  %v2820_v63 = vld [vmem:[#allocation3 + $0x9d] sm:$0xff] }
 0x1d9   :  { %v1936_v9 = vld [vmem:[#allocation3 + $0x92] sm:$0xff]  ;;  %v11920_v16 = vpack.i.bf16 %v1915_v8, %v2811_v12 }
 0x1da   :  { %v11925_v17 = vpack.i.bf16 %v1936_v9, %v13528_v13  ;;  %v2844_v8 = vld [vmem:[#allocation3 + $0xb6] sm:$0xff]  ;;  %v2822_v9 = vld [vmem:[#allocation3 + $0xad] sm:$0xff] }
 0x1db   :  { %11841 = vrot.lane.b32.xlu0 %v11840_v18, %s12634_s14  ;;  %v1916_v18 = vld [vmem:[#allocation3 + $0x99] sm:$0xff]  ;;  %v2843_v12 = vld [vmem:[#allocation3 + $0xae] sm:$0xff] }
 0x1dc   :  { %11851 = vrot.lane.b32.xlu1 %v11850_v19, %s12635_s15  ;;  %v1937_v19 = vld [vmem:[#allocation3 + $0x9a] sm:$0xff]  ;;  %v11930_v23 = vpack.i.bf16 %v2812_v20, %v1916_v18 }
 0x1dd   :  { %v2845_v20 = vld [vmem:[#allocation3 + $0xbe] sm:$0x3f] }
 0x1df   :  { %11846 = vrot.lane.b32.xlu0 %v11845_v24, %s12634_s14  ;;  %v11935_v24 = vpack.i.bf16 %v13533_v21, %v1937_v19 }
 0x1e0   :  { %11856 = vrot.lane.b32.xlu1 %v11855_v5, %s12635_s15  ;;  %v1917_v5 = vld [vmem:[#allocation3 + $0xa1] sm:$0x3f] }
 0x1e3   :  { %11861 = vrot.lane.b32.xlu0 %v11860_v29, %s12634_s14  ;;  %v11940_v29 = vpack.i.bf16 %v1917_v5, %v2813_v26  ;;  %v2824_v26 = vld [vmem:[#allocation3 + $0xbd] sm:$0x3f] }
 0x1e4   :  { %11866 = vrot.lane.b32.xlu1 %v11865_v30, %s12635_s15  ;;  %v11945_v30 = vpack.i.bf16 %v1938_v25, %v13538_v28 }
 0x1e7   :  { %11871 = vrot.lane.b32.xlu0 %v11870_v38, %s12634_s14  ;;  %v13545_v38 = vld [vmem:[#allocation3 + $0x6e] sm:$0xff] }
 0x1e8   :  { %11876 = vrot.lane.b32.xlu1 %v11875_v39, %s12635_s15  ;;  %v11950_v39 = vpack.i.bf16 %v2815_v31, %v2814_v35  ;;  %v11955_v40 = vpack.i.bf16 %v13541_v33, %v13545_v38 }
 0x1eb   :  { %11881 = vrot.lane.b32.xlu0 %v11880_v44, %s12634_s14  ;;  %v2816_v44 = vld [vmem:[#allocation3 + $0x7d] sm:$0xff] }
 0x1ec   :  { %11886 = vrot.lane.b32.xlu1 %v11885_v47, %s12635_s15  ;;  %v13553_v47 = vld [vmem:[#allocation3 + $0x7e] sm:$0xff]  ;;  %v11960_v48 = vpack.i.bf16 %v2817_v41, %v2816_v44  ;;  %v12381_v41 = vld [vmem:[%s15788_s3] sm:$0xff]  }
 0x1ed   :  { %v11965_v49 = vpack.i.bf16 %v13549_v42, %v13553_v47 }
 0x1ef   :  { %11891 = vrot.lane.b32.xlu0 %v11890_v53, %s12634_s14  ;;  %v2819_v53 = vld [vmem:[#allocation3 + $0x95] sm:$0xff] }
 0x1f0   :  { %11896 = vrot.lane.b32.xlu1 %v11895_v54, %s12635_s15  ;;  %v13557_v54 = vld [vmem:[#allocation3 + $0x8e] sm:$0xff]  ;;  %v11970_v56 = vpack.i.bf16 %v2819_v53, %v2818_v51 }
 0x1f1   :  { %v11975_v57 = vpack.i.bf16 %v13559_v55, %v13557_v54 }
 0x1f3   :  { %11901 = vrot.lane.b32.xlu0 %v11900_v60, %s12634_s14  ;;  %v2821_v60 = vld [vmem:[#allocation3 + $0xa5] sm:$0xff] }
 0x1f4   :  { %11906 = vrot.lane.b32.xlu1 %v11905_v61, %s12635_s15  ;;  %v2842_v61 = vld [vmem:[#allocation3 + $0xa6] sm:$0xff]  ;;  %v11980_v3 = vpack.i.bf16 %v2821_v60, %v2820_v63  ;;  %v12382_v63 = vld [vmem:[%s15788_s3 + $0x8] sm:$0xff]  }
 0x1f7   :  { %11911 = vrot.lane.b32.xlu0 %v11910_v6, %s12634_s14  ;;  %v11985_v6 = vpack.i.bf16 %v2842_v61, %v2841_v0 }
 0x1f8   :  { %11916 = vrot.lane.b32.xlu1 %v11915_v7, %s12635_s15  ;;  %v2823_v7 = vld [vmem:[#allocation3 + $0xb5] sm:$0xff] }
 0x1fb   :  { %11921 = vrot.lane.b32.xlu0 %v11920_v16, %s12634_s14  ;;  %v11990_v16 = vpack.i.bf16 %v2823_v7, %v2822_v9 }
 0x1fc   :  { %11926 = vrot.lane.b32.xlu1 %v11925_v17, %s12635_s15  ;;  %v11995_v17 = vpack.i.bf16 %v2844_v8, %v2843_v12  ;;  %v2187_v8 = vld [vmem:[#allocation3 + $0xae] sm:$0x3f]  ;;  %v12383_v12 = vld [vmem:[%s15788_s3 + $0x10] sm:$0xff]  }
 0x1ff   :  { %11931 = vrot.lane.b32.xlu0 %v11930_v23, %s12634_s14 }
 0x200   :  { %11936 = vrot.lane.b32.xlu1 %v11935_v24, %s12635_s15 }
 0x203   :  { %11941 = vrot.lane.b32.xlu0 %v11940_v29, %s12634_s14 }
 0x204   :  { %11946 = vrot.lane.b32.xlu1 %v11945_v30, %s12635_s15 }
 0x207   :  { %11951 = vrot.lane.b32.xlu0 %v11950_v39, %s12634_s14 }
 0x208   :  { %11956 = vrot.lane.b32.xlu1 %v11955_v40, %s12635_s15 }
 0x20b   :  { %11961 = vrot.lane.b32.xlu0 %v11960_v48, %s12634_s14 }
 0x20c   :  { %11966 = vrot.lane.b32.xlu1 %v11965_v49, %s12635_s15 }
 0x20f   :  { %11971 = vrot.lane.b32.xlu0 %v11970_v56, %s12634_s14 }
 0x210   :  { %11976 = vrot.lane.b32.xlu1 %v11975_v57, %s12635_s15 }
 0x213   :  { %11981 = vrot.lane.b32.xlu0 %v11980_v3, %s12634_s14 }
 0x214   :  { %11986 = vrot.lane.b32.xlu1 %v11985_v6, %s12635_s15 }
 0x217   :  { %11991 = vrot.lane.b32.xlu0 %v11990_v16, %s12634_s14 }
 0x218   :  { %11996 = vrot.lane.b32.xlu1 %v11995_v17, %s12635_s15  ;;  %v11712_v18 = vpop.permute.xlu0 %11711 }
 0x219   :  { %v11722_v19 = vpop.permute.xlu1 %11721  ;;  %v11714_v23 = vunpack.i.h.bf16 %v11712_v18  ;;  %v11713_v24 = vunpack.i.l.bf16 %v11712_v18 }
 0x21a   :  { %v11724_v5 = vunpack.i.h.bf16 %v11722_v19  ;;  %v11723_v25 = vunpack.i.l.bf16 %v11722_v19 }
 0x21b   :  { %v2399_v29 = vsel %vm376_vm4, %v2842_v61, %v11714_v23  ;;  %v2398_v30 = vsel %vm376_vm4, %v2841_v0, %v11713_v24  ;;  %2907 = vrot.lane.b32.xlu0 %v2824_v26, %s12634_s14 }
 0x21c   :  { %2991 = vrot.lane.b32.xlu1 %v2845_v20, %s12635_s15  ;;  %v2420_v31 = vsel %vm2128_vm7, %v2399_v29, %v11724_v5  ;;  %v2419_v35 = vsel %vm2128_vm7, %v2398_v30, %v11723_v25  ;;  %v11717_v39 = vpop.permute.xlu0 %11716  ;;  %v1876_v30 = vld [vmem:[#allocation3] sm:$0xff] }
 0x21d   :  { %v11727_v40 = vpop.permute.xlu1 %11726  ;;  %v2431_v44 = vpack.c.bf16 %v2420_v31, %v2419_v35  ;;  %v11719_v48 = vunpack.i.h.bf16 %v11717_v39  ;;  %v11718_v49 = vunpack.i.l.bf16 %v11717_v39 }
 0x21e   :  { %v11729_v51 = vunpack.i.h.bf16 %v11727_v40  ;;  %v11728_v53 = vunpack.i.l.bf16 %v11727_v40 }
 0x21f   :  { %v2384_v56 = vsel %vm376_vm4, %v13503_v36, %v11718_v49  ;;  %v2385_v57 = vsel %vm376_vm4, %v13508_v43, %v11719_v48  ;;  %10793 = vmatmul.mubr.msk.bf16.vlgmr.msra.gmra.mrb[104].mxu1 %vm2458_vm8, %v2431_v44 }
 0x220   :  { %v2406_v60 = vsel %vm2128_vm7, %v2385_v57, %v11729_v51  ;;  %v2405_v61 = vsel %vm2128_vm7, %v2384_v56, %v11728_v53  ;;  %10801 = vmatpush3.bf16.msra.mxu1 %v12381_v41  ;;  %10796 = vmatprep.mubr.msk.bf16.mxu1 %vm12633_vm2, %v12631_v1 }
 0x221   :  { %v11732_v0 = vpop.permute.xlu0 %11731  ;;  %v2424_v36 = vpack.c.bf16 %v2406_v60, %v2405_v61  ;;  %10802 = vmatprep.subr.bf16.mxu1 %v12631_v1 }
 0x222   :  { %v11742_v3 = vpop.permute.xlu1 %11741  ;;  %v11734_v43 = vunpack.i.h.bf16 %v11732_v0  ;;  %v11733_v6 = vunpack.i.l.bf16 %v11732_v0 }
 0x223   :  { %v11743_v7 = vunpack.i.l.bf16 %v11742_v3  ;;  %10765 = vmatmul.mubr.msk.bf16.gmra.mrb[112].mxu0 %vm2458_vm8, %v2424_v36  ;;  %v11744_v16 = vunpack.i.h.bf16 %v11742_v3 }
 0x224   :  { %v2400_v9 = vsel %vm376_vm4, %v2187_v8, %v11733_v6  ;;  %10803 = vmatpush3.bf16.msra.mxu1 %v12382_v63  ;;  %10768 = vmatprep.mubr.msk.bf16.mxu0 %vm12633_vm2, %v12631_v1  ;;  %v2386_v20 = vsel %vm376_vm4, %v13513_v52, %v11734_v43  ;;  %v12385_v43 = vld [vmem:[%s15786_s1] sm:$0xff]  }
 0x225   :  { %v11737_v17 = vpop.permute.xlu0 %11736  ;;  %v2421_v19 = vsel %vm2128_vm7, %v2400_v9, %v11743_v7  ;;  %10804 = vmatprep.subr.bf16.mxu1 %v12631_v1  ;;  %v2407_v29 = vsel %vm2128_vm7, %v2386_v20, %v11744_v16 }
 0x226   :  { %v11747_v18 = vpop.permute.xlu1 %11746  ;;  %v11739_v23 = vunpack.i.h.bf16 %v11737_v17  ;;  %v11738_v24 = vunpack.i.l.bf16 %v11737_v17  ;;  %v2432_v25 = vpack.c.bf16 %v2421_v19, %v2421_v19  ;;  %v12584_v17 = vld [vmem:[#allocation3 + $0x10] sm:$0xff] }
 0x227   :  { %v11748_v5 = vunpack.i.l.bf16 %v11747_v18  ;;  %v11749_v31 = vunpack.i.h.bf16 %v11747_v18 }
 0x228   :  { %v2387_v26 = vsel %vm376_vm4, %v13518_v58, %v11738_v24  ;;  %10805 = vmatpush3.bf16.msra.mxu1 %v12383_v12  ;;  %v2107_v52 = vsel %vm376_vm4, %v1876_v30, %v11739_v23  ;;  %v1877_v58 = vld [vmem:[#allocation3 + $0x8] sm:$0xff] }
 0x229   :  { %v2408_v35 = vsel %vm2128_vm7, %v2387_v26, %v11748_v5  ;;  %10797 = vmatmul.mubr.msk.bf16.gmra.mrb[108].mxu1 %vm2458_vm8, %v2432_v25  ;;  %v11752_v39 = vpop.permute.xlu0 %11751  ;;  %10900 = vmatprep.subr.bf16.mxu1 %v12631_v1  ;;  %v2129_v53 = vsel %vm2128_vm7, %v2107_v52, %v11749_v31  ;;  %v12585_v5 = vld [vmem:[#allocation3 + $0x18] sm:$0xff] }
 0x22a   :  { %v11757_v40 = vpop.permute.xlu1 %11756  ;;  %v11754_v41 = vunpack.i.h.bf16 %v11752_v39  ;;  %v11753_v44 = vunpack.i.l.bf16 %v11752_v39  ;;  %10806 = vmatprep.mubr.msk.bf16.mxu1 %vm12633_vm2, %v12631_v1  ;;  %v2425_v49 = vpack.c.bf16 %v2408_v35, %v2407_v29 }
 0x22b   :  { %v11758_v48 = vunpack.i.l.bf16 %v11757_v40  ;;  %v11759_v56 = vunpack.i.h.bf16 %v11757_v40 }
 0x22c   :  { %v2108_v51 = vsel %vm376_vm4, %v1877_v58, %v11753_v44  ;;  %10769 = vmatmul.mubr.msk.bf16.gmra.mrb[116].mxu0 %vm2458_vm8, %v2425_v49  ;;  %v2388_v63 = vsel %vm376_vm4, %v13523_v4, %v11754_v41  ;;  %v12388_v44 = vld [vmem:[%s15786_s1 + $0x10] sm:$0xff]  }
 0x22d   :  { %v2130_v57 = vsel %vm2128_vm7, %v2108_v51, %v11758_v48  ;;  %v11762_v60 = vpop.permute.xlu0 %11761  ;;  %10772 = vmatprep.mubr.msk.bf16.mxu0 %vm12633_vm2, %v12631_v1  ;;  %v2409_v8 = vsel %vm2128_vm7, %v2388_v63, %v11759_v56 }
 0x22e   :  { %v11767_v61 = vpop.permute.xlu1 %11766  ;;  %v2150_v0 = vpack.c.bf16 %v2130_v57, %v2129_v53  ;;  %v11764_v3 = vunpack.i.h.bf16 %v11762_v60  ;;  %v11763_v36 = vunpack.i.l.bf16 %v11762_v60  ;;  %v12392_v57 = vld [vmem:[%s15786_s1 + $0x20] sm:$0x3f]   ;;  %v12586_v60 = vld [vmem:[#allocation3 + $0x20] sm:$0xff] }
 0x22f   :  { %v11768_v6 = vunpack.i.l.bf16 %v11767_v61  ;;  %v11769_v9 = vunpack.i.h.bf16 %v11767_v61 }
 0x230   :  { %v2389_v7 = vsel %vm376_vm4, %v13528_v13, %v11763_v36  ;;  %v2109_v18 = vsel %vm376_vm4, %v12584_v17, %v11764_v3  ;;  %v12386_v13 = vld [vmem:[%s15786_s1 + $0x8] sm:$0xff]  }
 0x231   :  { %v2410_v12 = vsel %vm2128_vm7, %v2389_v7, %v11768_v6  ;;  %10807 = vmatmul.mubr.msk.bf16.vlgmr.msra.gmra.mrb[112].mxu1 %vm2458_vm8, %v2150_v0  ;;  %v11772_v4 = vpop.permute.xlu0 %11771  ;;  %v2131_v26 = vsel %vm2128_vm7, %v2109_v18, %v11769_v9 }
 0x232   :  { %v11777_v16 = vpop.permute.xlu1 %11776  ;;  %10901 = vmatpush3.bf16.msra.mxu1 %v12385_v43  ;;  %v11774_v19 = vunpack.i.h.bf16 %v11772_v4  ;;  %v11773_v20 = vunpack.i.l.bf16 %v11772_v4  ;;  %10810 = vmatprep.mubr.msk.bf16.mxu1 %vm12633_vm2, %v12631_v1  ;;  %v2426_v24 = vpack.c.bf16 %v2410_v12, %v2409_v8  ;;  %v12587_v43 = vld [vmem:[#allocation3 + $0x28] sm:$0xff] }
 0x233   :  { %v11778_v23 = vunpack.i.l.bf16 %v11777_v16  ;;  %10902 = vmatprep.subr.bf16.mxu1 %v12631_v1  ;;  %v11779_v29 = vunpack.i.h.bf16 %v11777_v16  ;;  %v3584_v16 = vand.u32 %v12392_v57, %v12715_v10 }
 0x234   :  { %v2110_v25 = vsel %vm376_vm4, %v12585_v5, %v11773_v20  ;;  %10773 = vmatmul.mubr.msk.bf16.gmra.mrb[120].mxu0 %vm2458_vm8, %v2426_v24  ;;  %v2390_v39 = vsel %vm376_vm4, %v13533_v21, %v11774_v19 }
 0x235   :  { %v2132_v30 = vsel %vm2128_vm7, %v2110_v25, %v11778_v23  ;;  %v11782_v31 = vpop.permute.xlu0 %11781  ;;  %10776 = vmatprep.mubr.msk.bf16.mxu0 %vm12633_vm2, %v12631_v1  ;;  %v2411_v49 = vsel %vm2128_vm7, %v2390_v39, %v11779_v29 }
 0x236   :  { %v11787_v35 = vpop.permute.xlu1 %11786  ;;  %v11784_v40 = vunpack.i.h.bf16 %v11782_v31  ;;  %v11783_v52 = vunpack.i.l.bf16 %v11782_v31  ;;  %10903 = vmatpush3.bf16.msra.mxu1 %v12386_v13  ;;  %v2151_v48 = vpack.c.bf16 %v2132_v30, %v2131_v26 }
 0x237   :  { %v11788_v41 = vunpack.i.l.bf16 %v11787_v35  ;;  %10904 = vmatprep.subr.bf16.mxu1 %v12631_v1  ;;  %v11789_v21 = vunpack.i.h.bf16 %v11787_v35 }
 0x238   :  { %v2391_v58 = vsel %vm376_vm4, %v13538_v28, %v11783_v52  ;;  %v2111_v61 = vsel %vm376_vm4, %v12586_v60, %v11784_v40  ;;  %v12390_v28 = vld [vmem:[%s15786_s1 + $0x18] sm:$0xff]  }
 0x239   :  { %v2412_v51 = vsel %vm2128_vm7, %v2391_v58, %v11788_v41  ;;  %10811 = vmatmul.mubr.msk.bf16.gmra.mrb[116].mxu1 %vm2458_vm8, %v2151_v48  ;;  %v11792_v53 = vpop.permute.xlu0 %11791  ;;  %v2133_v7 = vsel %vm2128_vm7, %v2111_v61, %v11789_v21 }
 0x23a   :  { %v11797_v56 = vpop.permute.xlu1 %11796  ;;  %v11794_v63 = vunpack.i.h.bf16 %v11792_v53  ;;  %v11793_v0 = vunpack.i.l.bf16 %v11792_v53  ;;  %10814 = vmatprep.mubr.msk.bf16.mxu1 %vm12633_vm2, %v12631_v1  ;;  %10905 = vmatpush3.bf16.msra.mxu1 %v12388_v44  ;;  %v2427_v36 = vpack.c.bf16 %v2412_v51, %v2411_v49 }
 0x23b   :  { %v11798_v3 = vunpack.i.l.bf16 %v11797_v56  ;;  %10906 = vmatprep.subr.bf16.mxu1 %v12631_v1  ;;  %v11799_v8 = vunpack.i.h.bf16 %v11797_v56 }
 0x23c   :  { %v2112_v6 = vsel %vm376_vm4, %v12587_v43, %v11793_v0  ;;  %10777 = vmatmul.mubr.msk.bf16.gmra.mrb[124].mxu0 %vm2458_vm8, %v2427_v36  ;;  %v2392_v17 = vsel %vm376_vm4, %v13545_v38, %v11794_v63 }
 0x23d   :  { %v2134_v9 = vsel %vm2128_vm7, %v2112_v6, %v11798_v3  ;;  %v11802_v12 = vpop.permute.xlu0 %11801  ;;  %10780 = vmatprep.mubr.msk.bf16.mxu0 %vm12633_vm2, %v12631_v1  ;;  %v2413_v24 = vsel %vm2128_vm7, %v2392_v17, %v11799_v8 }
 0x23e   :  { %v11807_v4 = vpop.permute.xlu1 %11806  ;;  %v11804_v18 = vunpack.i.h.bf16 %v11802_v12  ;;  %v11803_v19 = vunpack.i.l.bf16 %v11802_v12  ;;  %10907 = vmatpush3.bf16.msra.mxu1 %v12390_v28  ;;  %v2152_v23 = vpack.c.bf16 %v2134_v9, %v2133_v7 }
 0x23f   :  { %v11808_v20 = vunpack.i.l.bf16 %v11807_v4  ;;  %10908 = vmatprep.subr.bf16.mxu1 %v12631_v1  ;;  %v11809_v5 = vunpack.i.h.bf16 %v11807_v4 }
 0x240   :  { %v2393_v13 = vsel %vm376_vm4, %v13541_v33, %v11803_v19  ;;  %v2113_v29 = vsel %vm376_vm4, %v13380_v15, %v11804_v18 }
 0x241   :  { %v2414_v25 = vsel %vm2128_vm7, %v2393_v13, %v11808_v20  ;;  %10815 = vmatmul.mubr.msk.bf16.gmra.mrb[120].mxu1 %vm2458_vm8, %v2152_v23  ;;  %v11812_v38 = vpop.permute.xlu0 %11811  ;;  %v2135_v40 = vsel %vm2128_vm7, %v2113_v29, %v11809_v5 }
 0x242   :  { %v11817_v26 = vpop.permute.xlu1 %11816  ;;  %v11814_v30 = vunpack.i.h.bf16 %v11812_v38  ;;  %v11813_v31 = vunpack.i.l.bf16 %v11812_v38  ;;  %10818 = vmatprep.mubr.msk.bf16.mxu1 %vm12633_vm2, %v12631_v1  ;;  %10909 = vmatpush3.bf16.msra.mxu1 %v3584_v16  ;;  %v2428_v33 = vpack.c.bf16 %v2414_v25, %v2413_v24 }
 0x243   :  { %v11818_v35 = vunpack.i.l.bf16 %v11817_v26  ;;  %11024 = vmatprep.subr.bf16.mxu1 %v12631_v1  ;;  %v11819_v52 = vunpack.i.h.bf16 %v11817_v26  ;;  %v2783_v26 = vld [vmem:[#allocation3 + $0x1c] sm:$0xff] }
 0x244   :  { %v2114_v39 = vsel %vm376_vm4, %v13387_v22, %v11813_v31  ;;  %10781 = vmatmul.mubr.msk.bf16.gmra.mrb[128].mxu0 %vm2458_vm8, %v2428_v33  ;;  %v2394_v48 = vsel %vm376_vm4, %v13553_v47, %v11814_v30 }
 0x245   :  { %v2136_v41 = vsel %vm2128_vm7, %v2114_v39, %v11818_v35  ;;  %v11822_v15 = vpop.permute.xlu0 %11821  ;;  %10784 = vmatprep.mubr.msk.bf16.mxu0 %vm12633_vm2, %v12631_v1  ;;  %v2415_v53 = vsel %vm2128_vm7, %v2394_v48, %v11819_v52  ;;  %v2784_v52 = vld [vmem:[#allocation3 + $0x24] sm:$0xff] }
 0x246   :  { %v11827_v44 = vpop.permute.xlu1 %11826  ;;  %v11824_v58 = vunpack.i.h.bf16 %v11822_v15  ;;  %v11823_v49 = vunpack.i.l.bf16 %v11822_v15  ;;  %v2153_v51 = vpack.c.bf16 %v2136_v41, %v2135_v40 }
 0x247   :  { %v11828_v21 = vunpack.i.l.bf16 %v11827_v44  ;;  %v11829_v56 = vunpack.i.h.bf16 %v11827_v44 }
 0x248   :  { %v2395_v22 = vsel %vm376_vm4, %v13549_v42, %v11823_v49  ;;  %v2115_v47 = vsel %vm376_vm4, %v13397_v34, %v11824_v58 }
 0x249   :  { %v2416_v57 = vsel %vm2128_vm7, %v2395_v22, %v11828_v21  ;;  %10819 = vmatmul.mubr.msk.bf16.gmra.mrb[124].mxu1 %vm2458_vm8, %v2153_v51  ;;  %v11832_v60 = vpop.permute.xlu0 %11831  ;;  %v2137_v36 = vsel %vm2128_vm7, %v2115_v47, %v11829_v56  ;;  %v12389_v56 = vld [vmem:[%s15786_s1] sm:$0xff]  }
 0x24a   :  { %v11837_v61 = vpop.permute.xlu1 %11836  ;;  %v11834_v63 = vunpack.i.h.bf16 %v11832_v60  ;;  %v11833_v0 = vunpack.i.l.bf16 %v11832_v60  ;;  %10822 = vmatprep.mubr.msk.bf16.mxu1 %vm12633_vm2, %v12631_v1  ;;  %v2429_v28 = vpack.c.bf16 %v2416_v57, %v2415_v53  ;;  %v2785_v47 = vld [vmem:[#allocation3 + $0x2c] sm:$0xff] }
 0x24b   :  { %v11838_v3 = vunpack.i.l.bf16 %v11837_v61  ;;  %v11839_v43 = vunpack.i.h.bf16 %v11837_v61 }
 0x24c   :  { %v2116_v42 = vsel %vm376_vm4, %v13404_v50, %v11833_v0  ;;  %10785 = vmatmul.mubr.msk.bf16.gmra.mrb[132].mxu0 %vm2458_vm8, %v2429_v28  ;;  %v2396_v34 = vsel %vm376_vm4, %v13557_v54, %v11834_v63 }
 0x24d   :  { %v2138_v6 = vsel %vm2128_vm7, %v2116_v42, %v11838_v3  ;;  %v11842_v7 = vpop.permute.xlu0 %11841  ;;  %10788 = vmatprep.mubr.msk.bf16.mxu0 %vm12633_vm2, %v12631_v1  ;;  %v2417_v17 = vsel %vm2128_vm7, %v2396_v34, %v11839_v43 }
 0x24e   :  { %v11852_v8 = vpop.permute.xlu1 %11851  ;;  %v11844_v9 = vunpack.i.h.bf16 %v11842_v7  ;;  %v11843_v12 = vunpack.i.l.bf16 %v11842_v7  ;;  %v2154_v16 = vpack.c.bf16 %v2138_v6, %v2137_v36  ;;  %v2786_v6 = vld [vmem:[#allocation3 + $0x34] sm:$0xff] }
 0x24f   :  { %v11853_v4 = vunpack.i.l.bf16 %v11852_v8  ;;  %v11854_v18 = vunpack.i.h.bf16 %v11852_v8 }
 0x250   :  { %v2397_v50 = vsel %vm376_vm4, %v13559_v55, %v11843_v12  ;;  %v2117_v54 = vsel %vm376_vm4, %v13412_v2, %v11844_v9 }
 0x251   :  { %v2418_v19 = vsel %vm2128_vm7, %v2397_v50, %v11853_v4  ;;  %10823 = vmatmul.mubr.msk.bf16.gmra.mrb[128].mxu1 %vm2458_vm8, %v2154_v16  ;;  %v11847_v20 = vpop.permute.xlu0 %11846  ;;  %v2139_v38 = vsel %vm2128_vm7, %v2117_v54, %v11854_v18 }
 0x252   :  { %v11857_v23 = vpop.permute.xlu1 %11856  ;;  %v2430_v13 = vpack.c.bf16 %v2418_v19, %v2417_v17  ;;  %v11849_v24 = vunpack.i.h.bf16 %v11847_v20  ;;  %v11848_v5 = vunpack.i.l.bf16 %v11847_v20  ;;  %10826 = vmatprep.mubr.msk.bf16.mxu1 %vm12633_vm2, %v12631_v1  ;;  %v12393_v20 = vld [vmem:[%s15786_s1 + $0x10] sm:$0xff]  }
 0x253   :  { %v11858_v25 = vunpack.i.l.bf16 %v11857_v23  ;;  %v11859_v29 = vunpack.i.h.bf16 %v11857_v23 }
 0x254   :  { %v2118_v55 = vsel %vm376_vm4, %v13422_v32, %v11848_v5  ;;  %10789 = vmatmul.mubr.msk.bf16.gmra.mrb[136].mxu0 %vm2458_vm8, %v2430_v13  ;;  %v3014_v35 = vsel %vm376_vm4, %v2783_v26, %v11849_v24 }
 0x255   :  { %v2140_v30 = vsel %vm2128_vm7, %v2118_v55, %v11858_v25  ;;  %v11862_v31 = vpop.permute.xlu0 %11861  ;;  %10856 = vmatprep.mubr.msk.bf16.mxu0 %vm12633_vm2, %v12631_v1  ;;  %v3035_v15 = vsel %vm2128_vm7, %v3014_v35, %v11859_v29 }
 0x256   :  { %v11867_v2 = vpop.permute.xlu1 %11866  ;;  %v2155_v33 = vpack.c.bf16 %v2140_v30, %v2139_v38  ;;  %v11864_v39 = vunpack.i.h.bf16 %v11862_v31  ;;  %v11863_v40 = vunpack.i.l.bf16 %v11862_v31  ;;  %v12401_v38 = vld [vmem:[%s15786_s1 + $0x20] sm:$0x3f]  }
 0x257   :  { %v11868_v32 = vunpack.i.l.bf16 %v11867_v2  ;;  %v11869_v44 = vunpack.i.h.bf16 %v11867_v2  ;;  %v2788_v2 = vld [vmem:[#allocation3 + $0x44] sm:$0xff] }
 0x258   :  { %v3015_v41 = vsel %vm376_vm4, %v2784_v52, %v11863_v40  ;;  %v2119_v21 = vsel %vm376_vm4, %v13428_v45, %v11864_v39 }
 0x259   :  { %v3036_v48 = vsel %vm2128_vm7, %v3015_v41, %v11868_v32  ;;  %10827 = vmatmul.mubr.msk.bf16.gmra.mrb[132].mxu1 %vm2458_vm8, %v2155_v33  ;;  %v11872_v58 = vpop.permute.xlu0 %11871  ;;  %v2141_v61 = vsel %vm2128_vm7, %v2119_v21, %v11869_v44 }
 0x25a   :  { %v11877_v49 = vpop.permute.xlu1 %11876  ;;  %v3056_v51 = vpack.c.bf16 %v3036_v48, %v3035_v15  ;;  %v11874_v22 = vunpack.i.h.bf16 %v11872_v58  ;;  %v11873_v53 = vunpack.i.l.bf16 %v11872_v58  ;;  %10830 = vmatprep.mubr.msk.bf16.mxu1 %vm12633_vm2, %v12631_v1  ;;  %v3971_v15 = vand.u32 %v12401_v38, %v12715_v10 }
 0x25b   :  { %v11878_v57 = vunpack.i.l.bf16 %v11877_v49  ;;  %v11879_v63 = vunpack.i.h.bf16 %v11877_v49 }
 0x25c   :  { %v2120_v60 = vsel %vm376_vm4, %v13434_v59, %v11873_v53  ;;  %10857 = vmatmul.mubr.msk.bf16.vlgmr.msra.gmra.mrb[140].mxu0 %vm2458_vm8, %v3056_v51  ;;  %v3016_v28 = vsel %vm376_vm4, %v2785_v47, %v11874_v22  ;;  %v12391_v59 = vld [vmem:[%s15786_s1 + $0x8] sm:$0xff]   ;;  %v2789_v53 = vld [vmem:[#allocation3 + $0x4c] sm:$0xff] }
 0x25d   :  { %v2142_v45 = vsel %vm2128_vm7, %v2120_v60, %v11878_v57  ;;  %v11882_v0 = vpop.permute.xlu0 %11881  ;;  %10963 = vmatpush3.bf16.msra.mxu0 %v12389_v56  ;;  %10860 = vmatprep.mubr.msk.bf16.mxu0 %vm12633_vm2, %v12631_v1  ;;  %v3037_v34 = vsel %vm2128_vm7, %v3016_v28, %v11879_v63 }
 0x25e   :  { %v11887_v3 = vpop.permute.xlu1 %11886  ;;  %v2156_v42 = vpack.c.bf16 %v2142_v45, %v2141_v61  ;;  %v11884_v36 = vunpack.i.h.bf16 %v11882_v0  ;;  %v11883_v43 = vunpack.i.l.bf16 %v11882_v0  ;;  %10964 = vmatprep.subr.bf16.mxu0 %v12631_v1 }
 0x25f   :  { %v11888_v7 = vunpack.i.l.bf16 %v11887_v3  ;;  %v11889_v9 = vunpack.i.h.bf16 %v11887_v3 }
 0x260   :  { %v3017_v8 = vsel %vm376_vm4, %v2786_v6, %v11883_v43  ;;  %v2121_v50 = vsel %vm376_vm4, %v13440_v11, %v11884_v36  ;;  %v2787_v11 = vld [vmem:[#allocation3 + $0x3c] sm:$0xff] }
 0x261   :  { %v3038_v12 = vsel %vm2128_vm7, %v3017_v8, %v11888_v7  ;;  %10831 = vmatmul.mubr.msk.bf16.gmra.mrb[136].mxu1 %vm2458_vm8, %v2156_v42  ;;  %v11892_v4 = vpop.permute.xlu0 %11891  ;;  %10965 = vmatpush3.bf16.msra.mxu0 %v12391_v59  ;;  %v2143_v13 = vsel %vm2128_vm7, %v2121_v50, %v11889_v9 }
 0x262   :  { %v11897_v16 = vpop.permute.xlu1 %11896  ;;  %v3057_v17 = vpack.c.bf16 %v3038_v12, %v3037_v34  ;;  %v11894_v18 = vunpack.i.h.bf16 %v11892_v4  ;;  %v11893_v19 = vunpack.i.l.bf16 %v11892_v4  ;;  %10834 = vmatprep.mubr.msk.bf16.mxu1 %vm12633_vm2, %v12631_v1  ;;  %10966 = vmatprep.subr.bf16.mxu0 %v12631_v1 }
 0x263   :  { %v11898_v23 = vunpack.i.l.bf16 %v11897_v16  ;;  %v11899_v24 = vunpack.i.h.bf16 %v11897_v16  ;;  %v2791_v16 = vld [vmem:[#allocation3 + $0x5c] sm:$0xff] }
 0x264   :  { %v2122_v54 = vsel %vm376_vm4, %v13450_v27, %v11893_v19  ;;  %10861 = vmatmul.mubr.msk.bf16.gmra.mrb[144].mxu0 %vm2458_vm8, %v3057_v17  ;;  %v3018_v26 = vsel %vm376_vm4, %v2787_v11, %v11894_v18  ;;  %v12397_v27 = vld [vmem:[%s15786_s1 + $0x18] sm:$0xff]   ;;  %v1896_v11 = vld [vmem:[#allocation3 + $0xa0] sm:$0x3f] }
 0x265   :  { %v2144_v5 = vsel %vm2128_vm7, %v2122_v54, %v11898_v23  ;;  %v11902_v25 = vpop.permute.xlu0 %11901  ;;  %10864 = vmatprep.mubr.msk.bf16.mxu0 %vm12633_vm2, %v12631_v1  ;;  %10967 = vmatpush3.bf16.msra.mxu0 %v12393_v20  ;;  %v3039_v39 = vsel %vm2128_vm7, %v3018_v26, %v11899_v24 }
 0x266   :  { %v11907_v55 = vpop.permute.xlu1 %11906  ;;  %v2157_v29 = vpack.c.bf16 %v2144_v5, %v2143_v13  ;;  %v11904_v30 = vunpack.i.h.bf16 %v11902_v25  ;;  %v11903_v31 = vunpack.i.l.bf16 %v11902_v25  ;;  %10968 = vmatprep.subr.bf16.mxu0 %v12631_v1  ;;  %v2792_v13 = vld [vmem:[#allocation3 + $0x64] sm:$0xff] }
 0x267   :  { %v11908_v35 = vunpack.i.l.bf16 %v11907_v55  ;;  %v11909_v40 = vunpack.i.h.bf16 %v11907_v55 }
 0x268   :  { %v3019_v33 = vsel %vm376_vm4, %v2788_v2, %v11903_v31  ;;  %v2123_v44 = vsel %vm376_vm4, %v13459_v37, %v11904_v30 }
 0x269   :  { %v3040_v52 = vsel %vm2128_vm7, %v3019_v33, %v11908_v35  ;;  %10835 = vmatmul.mubr.msk.bf16.gmra.mrb[140].mxu1 %vm2458_vm8, %v2157_v29  ;;  %v11912_v32 = vpop.permute.xlu0 %11911  ;;  %10969 = vmatpush3.bf16.msra.mxu0 %v12397_v27  ;;  %v2145_v22 = vsel %vm2128_vm7, %v2123_v44, %v11909_v40  ;;  %v2793_v35 = vld [vmem:[#allocation3 + $0x6c] sm:$0xff]  ;;  %v2794_v33 = vld [vmem:[#allocation3 + $0x74] sm:$0xff] }
 0x26a   :  { %v11917_v41 = vpop.permute.xlu1 %11916  ;;  %v3058_v48 = vpack.c.bf16 %v3040_v52, %v3039_v39  ;;  %v11914_v58 = vunpack.i.h.bf16 %v11912_v32  ;;  %v11913_v49 = vunpack.i.l.bf16 %v11912_v32  ;;  %10838 = vmatprep.mubr.msk.bf16.mxu1 %vm12633_vm2, %v12631_v1  ;;  %10970 = vmatprep.subr.bf16.mxu0 %v12631_v1 }
 0x26b   :  { %v11918_v21 = vunpack.i.l.bf16 %v11917_v41  ;;  %v11919_v56 = vunpack.i.h.bf16 %v11917_v41 }
 0x26c   :  { %v2124_v51 = vsel %vm376_vm4, %v13470_v46, %v11913_v49  ;;  %10865 = vmatmul.mubr.msk.bf16.gmra.mrb[148].mxu0 %vm2458_vm8, %v3058_v48  ;;  %v3020_v61 = vsel %vm376_vm4, %v2789_v53, %v11914_v58  ;;  %v2790_v46 = vld [vmem:[#allocation3 + $0x54] sm:$0xff]  ;;  %v2796_v53 = vld [vmem:[#allocation3 + $0x84] sm:$0xff] }
 0x26d   :  { %v2146_v57 = vsel %vm2128_vm7, %v2124_v51, %v11918_v21  ;;  %v11922_v37 = vpop.permute.xlu0 %11921  ;;  %10868 = vmatprep.mubr.msk.bf16.mxu0 %vm12633_vm2, %v12631_v1  ;;  %10971 = vmatpush3.bf16.msra.mxu0 %v3971_v15  ;;  %v3041_v28 = vsel %vm2128_vm7, %v3020_v61, %v11919_v56  ;;  %v12394_v61 = vld [vmem:[%s15785_s0 + $0x188] sm:$0xff]  }
 0x26e   :  { %v11927_v60 = vpop.permute.xlu1 %11926  ;;  %v2158_v47 = vpack.c.bf16 %v2146_v57, %v2145_v22  ;;  %v11924_v63 = vunpack.i.h.bf16 %v11922_v37  ;;  %v11923_v45 = vunpack.i.l.bf16 %v11922_v37  ;;  %11086 = vmatprep.subr.bf16.mxu0 %v12631_v1  ;;  %v2795_v22 = vld [vmem:[#allocation3 + $0x7c] sm:$0xff] }
 0x26f   :  { %v11928_v0 = vunpack.i.l.bf16 %v11927_v60  ;;  %v11929_v42 = vunpack.i.h.bf16 %v11927_v60 }
 0x270   :  { %v3021_v3 = vsel %vm376_vm4, %v2790_v46, %v11923_v45  ;;  %v2125_v6 = vsel %vm376_vm4, %v13479_v62, %v11924_v63  ;;  %v12395_v63 = vld [vmem:[%s15786_s1] sm:$0xff]  }
 0x271   :  { %v3042_v36 = vsel %vm2128_vm7, %v3021_v3, %v11928_v0  ;;  %10839 = vmatmul.mubr.msk.bf16.gmra.mrb[144].mxu1 %vm2458_vm8, %v2158_v47  ;;  %v11932_v43 = vpop.permute.xlu0 %11931  ;;  %v2147_v4 = vsel %vm2128_vm7, %v2125_v6, %v11929_v42  ;;  %v12399_v42 = vld [vmem:[%s15786_s1 + $0x8] sm:$0xff]  }
 0x272   :  { %v11937_v59 = vpop.permute.xlu1 %11936  ;;  %v3059_v7 = vpack.c.bf16 %v3042_v36, %v3041_v28  ;;  %v11934_v8 = vunpack.i.h.bf16 %v11932_v43  ;;  %v11933_v34 = vunpack.i.l.bf16 %v11932_v43  ;;  %10842 = vmatprep.mubr.msk.bf16.mxu1 %vm12633_vm2, %v12631_v1  ;;  %v2797_v43 = vld [vmem:[#allocation3 + $0x8c] sm:$0xff] }
 0x273   :  { %v11938_v9 = vunpack.i.l.bf16 %v11937_v59  ;;  %v11939_v50 = vunpack.i.h.bf16 %v11937_v59  ;;  %v2798_v59 = vld [vmem:[#allocation3 + $0x94] sm:$0xff] }
 0x274   :  { %v2126_v12 = vsel %vm376_vm4, %v13489_v14, %v11933_v34  ;;  %10869 = vmatmul.mubr.msk.bf16.gmra.mrb[152].mxu0 %vm2458_vm8, %v3059_v7  ;;  %v3022_v19 = vsel %vm376_vm4, %v2791_v16, %v11934_v8 }
 0x275   :  { %v2148_v17 = vsel %vm2128_vm7, %v2126_v12, %v11938_v9  ;;  %v11942_v18 = vpop.permute.xlu0 %11941  ;;  %10872 = vmatprep.mubr.msk.bf16.mxu0 %vm12633_vm2, %v12631_v1  ;;  %v3043_v25 = vsel %vm2128_vm7, %v3022_v19, %v11939_v50  ;;  %v12396_v9 = vld [vmem:[%s15785_s0 + $0x190] sm:$0xff]   ;;  %v12413_v19 = vld [vmem:[%s15786_s1 + $0x18] sm:$0xff]  }
 0x276   :  { %v11947_v62 = vpop.permute.xlu1 %11946  ;;  %v2159_v20 = vpack.c.bf16 %v2148_v17, %v2147_v4  ;;  %v11944_v23 = vunpack.i.h.bf16 %v11942_v18  ;;  %v11943_v54 = vunpack.i.l.bf16 %v11942_v18  ;;  %v12404_v4 = vld [vmem:[%s15786_s1 + $0x10] sm:$0xff]  }
 0x277   :  { %v11948_v14 = vunpack.i.l.bf16 %v11947_v62  ;;  %v11949_v5 = vunpack.i.h.bf16 %v11947_v62 }
 0x278   :  { %v3023_v24 = vsel %vm376_vm4, %v2792_v13, %v11943_v54  ;;  %v2127_v55 = vsel %vm376_vm4, %v1896_v11, %v11944_v23  ;;  %v2799_v54 = vld [vmem:[#allocation3 + $0x9c] sm:$0xff]  ;;  %v2800_v13 = vld [vmem:[#allocation3 + $0xa4] sm:$0xff] }
 0x279   :  { %v3044_v38 = vsel %vm2128_vm7, %v3023_v24, %v11948_v14  ;;  %10843 = vmatmul.mubr.msk.bf16.gmra.mrb[148].mxu1 %vm2458_vm8, %v2159_v20  ;;  %v11952_v26 = vpop.permute.xlu0 %11951  ;;  %v2149_v2 = vsel %vm2128_vm7, %v2127_v55, %v11949_v5  ;;  %v12420_v20 = vld [vmem:[%s15786_s1 + $0x20] sm:$0x3f]  }
 0x27a   :  { %v11957_v29 = vpop.permute.xlu1 %11956  ;;  %v3060_v30 = vpack.c.bf16 %v3044_v38, %v3043_v25  ;;  %v11954_v31 = vunpack.i.h.bf16 %v11952_v26  ;;  %v11953_v27 = vunpack.i.l.bf16 %v11952_v26  ;;  %10846 = vmatprep.mubr.msk.bf16.mxu1 %vm12633_vm2, %v12631_v1  ;;  %v2160_v15 = vpack.c.bf16 %v2149_v2, %v2149_v2  ;;  %v12398_v25 = vld [vmem:[%s15785_s0 + $0x198] sm:$0xff]  }
 0x27b   :  { %v11959_v39 = vunpack.i.h.bf16 %v11957_v29  ;;  %v11958_v40 = vunpack.i.l.bf16 %v11957_v29  ;;  %v4333_v38 = vand.u32 %v12420_v20, %v12715_v10 }
 0x27c   :  { %v3025_v52 = vsel %vm376_vm4, %v2794_v33, %v11954_v31  ;;  %v3024_v32 = vsel %vm376_vm4, %v2793_v35, %v11953_v27  ;;  %10873 = vmatmul.mubr.msk.bf16.gmra.mrb[156].mxu0 %vm2458_vm8, %v3060_v30  ;;  %v2801_v35 = vld [vmem:[#allocation3 + $0xac] sm:$0xff]  ;;  %v2802_v33 = vld [vmem:[#allocation3 + $0xb4] sm:$0xff] }
 0x27d   :  { %v11962_v41 = vpop.permute.xlu0 %11961  ;;  %10876 = vmatprep.mubr.msk.bf16.mxu0 %vm12633_vm2, %v12631_v1  ;;  %v3046_v44 = vsel %vm2128_vm7, %v3025_v52, %v11959_v39  ;;  %v3045_v48 = vsel %vm2128_vm7, %v3024_v32, %v11958_v40 }
 0x27e   :  { %v11964_v58 = vunpack.i.h.bf16 %v11962_v41  ;;  %v11963_v49 = vunpack.i.l.bf16 %v11962_v41  ;;  %v11967_v21 = vpop.permute.xlu1 %11966  ;;  %v3061_v51 = vpack.c.bf16 %v3046_v44, %v3045_v48  ;;  %v12400_v44 = vld [vmem:[%s15785_s0 + $0x1a0] sm:$0xff]  }
 0x27f   :  { %v11969_v56 = vunpack.i.h.bf16 %v11967_v21  ;;  %v11968_v57 = vunpack.i.l.bf16 %v11967_v21 }
 0x280   :  { %v3027_v37 = vsel %vm376_vm4, %v2796_v53, %v11964_v58  ;;  %v3026_v60 = vsel %vm376_vm4, %v2795_v22, %v11963_v49  ;;  %v2803_v53 = vld [vmem:[#allocation3 + $0xbc] sm:$0x3f] }
 0x281   :  { %10847 = vmatmul.mubr.msk.bf16.gmra.mrb[152].mxu1 %vm2458_vm8, %v2160_v15  ;;  %v11972_v47 = vpop.permute.xlu0 %11971  ;;  %v3048_v45 = vsel %vm2128_vm7, %v3027_v37, %v11969_v56  ;;  %v3047_v46 = vsel %vm2128_vm7, %v3026_v60, %v11968_v57  ;;  %v12402_v37 = vld [vmem:[%s15785_s0 + $0x1a8] sm:$0xff]  }
 0x282   :  { %10910 = vmatprep.mubr.msk.bf16.mxu1 %vm12633_vm2, %v12631_v1  ;;  %v11974_v0 = vunpack.i.h.bf16 %v11972_v47  ;;  %v11973_v3 = vunpack.i.l.bf16 %v11972_v47  ;;  %v11977_v28 = vpop.permute.xlu1 %11976  ;;  %v3062_v36 = vpack.c.bf16 %v3048_v45, %v3047_v46  ;;  %v12406_v47 = vld [vmem:[%s15785_s0 + $0x1f0] sm:$0xff]  }
 0x283   :  { %v11979_v6 = vunpack.i.h.bf16 %v11977_v28  ;;  %v11978_v7 = vunpack.i.l.bf16 %v11977_v28 }
 0x284   :  { %10877 = vmatmul.mubr.msk.bf16.gmra.mrb[160].mxu0 %vm2458_vm8, %v3061_v51  ;;  %v3029_v8 = vsel %vm376_vm4, %v2798_v59, %v11974_v0  ;;  %v3028_v34 = vsel %vm376_vm4, %v2797_v43, %v11973_v3  ;;  %v12403_v3 = vld [vmem:[%s15785_s0 + $0x1b0] sm:$0xff]   ;;  %v12407_v59 = vld [vmem:[%s15786_s1] sm:$0xff]  }
 0x285   :  { %10880 = vmatprep.mubr.msk.bf16.mxu0 %vm12633_vm2, %v12631_v1  ;;  %v11982_v12 = vpop.permute.xlu0 %11981  ;;  %v3050_v16 = vsel %vm2128_vm7, %v3029_v8, %v11979_v6  ;;  %v3049_v50 = vsel %vm2128_vm7, %v3028_v34, %v11978_v7  ;;  %v12409_v6 = vld [vmem:[%s15785_s0 + $0x1f8] sm:$0xff]   ;;  %v12415_v34 = vld [vmem:[%s15786_s1 + $0x8] sm:$0xff]  }
 0x286   :  { %v11984_v17 = vunpack.i.h.bf16 %v11982_v12  ;;  %v11983_v18 = vunpack.i.l.bf16 %v11982_v12  ;;  %v11987_v62 = vpop.permute.xlu1 %11986  ;;  %v3063_v23 = vpack.c.bf16 %v3050_v16, %v3049_v50  ;;  %v12408_v7 = vld [vmem:[%s15785_s0 + $0x1b8] sm:$0xff]   ;;  %v3880_v8 = vrot.slane %v12409_v6, 2  ;;  %v12411_v12 = vld [vmem:[%s15785_s0 + $0x200] sm:$0xff]  }
 0x287   :  { %v11989_v14 = vunpack.i.h.bf16 %v11987_v62  ;;  %v11988_v11 = vunpack.i.l.bf16 %v11987_v62  ;;  %v12410_v16 = vld [vmem:[%s15785_s0 + $0x1c0] sm:$0xff]   ;;  %v3882_v50 = vrot.slane %v12411_v12, 2 }
 0x288   :  { %v3031_v24 = vsel %vm376_vm4, %v2800_v13, %v11984_v17  ;;  %v3030_v5 = vsel %vm376_vm4, %v2799_v54, %v11983_v18  ;;  %v12428_v17 = vld [vmem:[%s15786_s1 + $0x18] sm:$0xff]   ;;  %v12434_v18 = vld [vmem:[%s15786_s1 + $0x20] sm:$0x3f]  }
 0x289   :  { %10911 = vmatmul.mubr.msk.bf16.vlgmr.msra.gmra.mrb[156].mxu1 %vm168_vm3, %v12394_v61  ;;  %v11992_v55 = vpop.permute.xlu0 %11991  ;;  %v3052_v26 = vsel %vm2128_vm7, %v3031_v24, %v11989_v14  ;;  %v3051_v29 = vsel %vm2128_vm7, %v3030_v5, %v11988_v11  ;;  %v12405_v61 = vld [vmem:[%s15785_s0 + $0x1e8] sm:$0xfc]   ;;  %v3883_v62 = vsel %vm209_vm1, %v3880_v8, %v3882_v50  ;;  %v4720_v20 = vand.u32 %v12434_v18, %v12715_v10  ;;  %v12417_v10 = vld [vmem:[%s15785_s0 + $0x210] sm:$0xff]   ;;  %v12419_v5 = vld [vmem:[%s15785_s0 + $0x218] sm:$0xff]  }
 0x28a   :  { %11025 = vmatpush3.bf16.msra.mxu1 %v12395_v63  ;;  %10914 = vmatprep.mubr.msk.bf16.mxu1 %vm12633_vm2, %v12631_v1  ;;  %v11994_v30 = vunpack.i.h.bf16 %v11992_v55  ;;  %v11993_v31 = vunpack.i.l.bf16 %v11992_v55  ;;  %v11997_v27 = vpop.permute.xlu1 %11996  ;;  %v3064_v2 = vpack.c.bf16 %v3052_v26, %v3051_v29  ;;  %v12416_v14 = vld [vmem:[%s15785_s0 + $0x1d0] sm:$0xff]   ;;  %v3886_v11 = vrot.slane %v12417_v10, 2  ;;  %v12423_v26 = vld [vmem:[%s15785_s0 + $0x220] sm:$0xff]  }
 0x28b   :  { %11026 = vmatprep.subr.bf16.mxu1 %v12631_v1  ;;  %v11999_v39 = vunpack.i.h.bf16 %v11997_v27  ;;  %v11998_v40 = vunpack.i.l.bf16 %v11997_v27  ;;  %v3888_v55 = vrot.slane %v12419_v5, 2  ;;  %v12421_v29 = vld [vmem:[%s15785_s0 + $0x1e0] sm:$0xff]   ;;  %v12425_v27 = vld [vmem:[%s15785_s0 + $0x228] sm:$0xff]  }
 0x28c   :  { %10881 = vmatmul.mubr.msk.bf16.gmra.mrb[164].mxu0 %vm2458_vm8, %v3062_v36  ;;  %v3033_v32 = vsel %vm376_vm4, %v2802_v33, %v11994_v30  ;;  %v3032_v41 = vsel %vm376_vm4, %v2801_v35, %v11993_v31  ;;  %v3878_v36 = vrot.slane %v12406_v47, 2  ;;  %v3890_v30 = vrot.slane %v12423_v26, 2  ;;  %v12436_v10 = vld [vmem:[%s15785_s0 + $0x26c] sm:$0xff]  }
 0x28d   :  { %10884 = vmatprep.mubr.msk.bf16.mxu0 %vm12633_vm2, %v12631_v1  ;;  %v3054_v49 = vsel %vm2128_vm7, %v3033_v32, %v11999_v39  ;;  %v3053_v21 = vsel %vm2128_vm7, %v3032_v41, %v11998_v40  ;;  %v2908_v51 = vpop.permute.xlu0 %2907  ;;  %v3892_v35 = vrot.slane %v12425_v27, 2  ;;  %v12427_v39 = vld [vmem:[%s15785_s0 + $0x230] sm:$0xff]  }
 0x28e   :  { %11027 = vmatpush3.bf16.msra.mxu1 %v12399_v42  ;;  %v3065_v22 = vpack.c.bf16 %v3054_v49, %v3053_v21  ;;  %v3034_v56 = vsel %vm376_vm4, %v2803_v53, %v2908_v51  ;;  %v2992_v57 = vpop.permute.xlu1 %2991  ;;  %v3877_v42 = vrot.slane %v12405_v61, 2  ;;  %v3891_v31 = vsel %vm209_vm1, %v3888_v55, %v3890_v30  ;;  %v12426_v40 = vld [vmem:[%s15785_s0 + $0x24c] sm:$0xff]   ;;  %v12429_v51 = vld [vmem:[%s15785_s0 + $0x254] sm:$0xff]   ;;  %v12432_v61 = vld [vmem:[%s15785_s0 + $0x240] sm:$0xff]  }
 0x28f   :  { %11028 = vmatprep.subr.bf16.mxu1 %v12631_v1  ;;  %v3055_v60 = vsel %vm2128_vm7, %v3034_v56, %v2992_v57  ;;  %v3893_v33 = vsel %vm209_vm1, %v3890_v30, %v3892_v35  ;;  %v3894_v32 = vrot.slane %v12427_v39, 2 }
 0x290   :  { %v3066_v63 = vpack.c.bf16 %v3055_v60, %v3055_v60  ;;  %v3879_v43 = vsel %vm209_vm1, %v3877_v42, %v3878_v36 }
 0x291   :  { %10915 = vmatmul.mubr.msk.bf16.gmra.mrb[160].mxu1 %vm168_vm3, %v12396_v9  ;;  %v3881_v9 = vsel %vm209_vm1, %v3878_v36, %v3880_v8 }
 0x292   :  { %10918 = vmatprep.mubr.msk.bf16.mxu1 %vm12633_vm2, %v12631_v1  ;;  %11029 = vmatpush3.bf16.msra.mxu1 %v12404_v4  ;;  %v12422_v4 = vld [vmem:[%s15786_s1 + $0x10] sm:$0xff]  }
 0x293   :  { %11030 = vmatprep.subr.bf16.mxu1 %v12631_v1 }
 0x294   :  { %10885 = vmatmul.mubr.msk.bf16.gmra.mrb[168].mxu0 %vm2458_vm8, %v3063_v23  ;;  %v12412_v23 = vld [vmem:[%s15785_s0 + $0x1c8] sm:$0xff]  }
 0x295   :  { %10888 = vmatprep.mubr.msk.bf16.mxu0 %vm12633_vm2, %v12631_v1 }
 0x296   :  { %11031 = vmatpush3.bf16.msra.mxu1 %v12413_v19  ;;  %v12414_v19 = vld [vmem:[%s15785_s0 + $0x208] sm:$0xff]  }
 0x297   :  { %11032 = vmatprep.subr.bf16.mxu1 %v12631_v1  ;;  %v3884_v54 = vrot.slane %v12414_v19, 2 }
 0x299   :  { %10919 = vmatmul.mubr.msk.bf16.gmra.mrb[164].mxu1 %vm168_vm3, %v12398_v25  ;;  %v3885_v13 = vsel %vm209_vm1, %v3882_v50, %v3884_v54  ;;  %v3887_v24 = vsel %vm209_vm1, %v3884_v54, %v3886_v11  ;;  %v12418_v25 = vld [vmem:[%s15785_s0 + $0x1d8] sm:$0xff]  }
 0x29a   :  { %10922 = vmatprep.mubr.msk.bf16.mxu1 %vm12633_vm2, %v12631_v1  ;;  %11033 = vmatpush3.bf16.msra.mxu1 %v4333_v38  ;;  %v3889_v38 = vsel %vm209_vm1, %v3886_v11, %v3888_v55  ;;  %v12438_v55 = vld [vmem:[%s15785_s0 + $0x2ac] sm:$0xfc]  }
 0x29b   :  { %11148 = vmatprep.subr.bf16.mxu1 %v12631_v1 }
 0x29c   :  { %v13890_v52 = vpop.f32.mrb[104].mxu0  ;;  %10889 = vmatmul.mubr.msk.bf16.gmra.mrb[172].mxu0 %vm2458_vm8, %v3064_v2  ;;  %v12424_v2 = vld [vmem:[%s15785_s0 + $0x1e8] ss:$0 sps:$4 sm:$0x33]  }
 0x29d   :  { %v10758_v15 = vpop.f32.mrb[105].mxu0  ;;  %10892 = vmatprep.mubr.msk.bf16.mxu0 %vm12633_vm2, %v12631_v1 }
 0x29e   :  { %v13898_v48 = vpop.f32.mrb[106].mxu0  ;;  %v3895_v15 = vsel %vm209_vm1, %v3892_v35, %v3894_v32 }
 0x29f   :  { %v10759_v58 = vpop.f32.mrb[107].mxu0 }
 0x2a1   :  { %10923 = vmatmul.mubr.msk.bf16.gmra.mrb[168].mxu1 %vm168_vm3, %v12400_v44  ;;  %v12430_v44 = vld [vmem:[%s15785_s0 + $0x238] sm:$0xff]  }
 0x2a2   :  { %10926 = vmatprep.mubr.msk.bf16.mxu1 %vm12633_vm2, %v12631_v1  ;;  %v3896_v53 = vrot.slane %v12430_v44, 2 }
 0x2a4   :  { %10893 = vmatmul.mubr.msk.bf16.gmra.mrb[176].mxu0 %vm2458_vm8, %v3065_v22  ;;  %v3897_v60 = vsel %vm209_vm1, %v3894_v32, %v3896_v53 }
 0x2a5   :  { %10896 = vmatprep.mubr.msk.bf16.mxu0 %vm12633_vm2, %v12631_v1 }
 0x2a9   :  { %10927 = vmatmul.mubr.msk.bf16.gmra.mrb[172].mxu1 %vm168_vm3, %v12402_v37 }
 0x2aa   :  { %10930 = vmatprep.mubr.msk.bf16.mxu1 %vm12633_vm2, %v12631_v1  ;;  %v13924_v45 = vpop.f32.mrb[108].mxu0 }
 0x2ab   :  { %v10762_v46 = vpop.f32.mrb[109].mxu0 }
 0x2ac   :  { %10897 = vmatmul.mubr.msk.bf16.gmra.mrb[180].mxu0 %vm2458_vm8, %v3066_v63  ;;  %v13927_v0 = vpop.f32.mrb[110].mxu0  ;;  %v12431_v46 = vld [vmem:[%s15785_s0 + $0x25c] sm:$0xff]  }
 0x2ad   :  { %v10763_v28 = vpop.f32.mrb[111].mxu0  ;;  %10972 = vmatprep.mubr.msk.bf16.mxu0 %vm12633_vm2, %v12631_v1 }
 0x2ae   :  { %v3898_v28 = vrot.slane %v12432_v61, 2 }
 0x2b0   :  { %v3899_v6 = vsel %vm209_vm1, %v3896_v53, %v3898_v28  ;;  %v12440_v53 = vld [vmem:[%s15785_s0 + $0x27c] sm:$0xff]  }
 0x2b1   :  { %10931 = vmatmul.mubr.msk.bf16.gmra.mrb[176].mxu1 %vm168_vm3, %v12403_v3 }
 0x2b2   :  { %10934 = vmatprep.mubr.msk.bf16.mxu1 %vm12633_vm2, %v12631_v1 }
 0x2b4   :  { %10973 = vmatmul.mubr.msk.bf16.vlgmr.msra.gmra.mrb[184].mxu0 %vm168_vm3, %v3879_v43 }
 0x2b5   :  { %11087 = vmatpush3.bf16.msra.mxu0 %v12407_v59  ;;  %10976 = vmatprep.mubr.msk.bf16.mxu0 %vm12633_vm2, %v12631_v1 }
 0x2b6   :  { %11088 = vmatprep.subr.bf16.mxu0 %v12631_v1 }
 0x2b9   :  { %10935 = vmatmul.mubr.msk.bf16.gmra.mrb[180].mxu1 %vm168_vm3, %v12408_v7  ;;  %11089 = vmatpush3.bf16.msra.mxu0 %v12415_v34  ;;  %v12435_v7 = vld [vmem:[%s15785_s0 + $0x248] ss:$0 sps:$4 sm:$0xff]  }
 0x2ba   :  { %10938 = vmatprep.mubr.msk.bf16.mxu1 %vm12633_vm2, %v12631_v1  ;;  %11090 = vmatprep.subr.bf16.mxu0 %v12631_v1  ;;  %v3900_v50 = vrot.slane %v12435_v7, 2 }
 0x2bc   :  { %10977 = vmatmul.mubr.msk.bf16.gmra.mrb[188].mxu0 %vm168_vm3, %v3881_v9 }
 0x2bd   :  { %10980 = vmatprep.mubr.msk.bf16.mxu0 %vm12633_vm2, %v12631_v1  ;;  %11091 = vmatpush3.bf16.msra.mxu0 %v12422_v4  ;;  %v12433_v4 = vld [vmem:[%s15785_s0 + $0x264] sm:$0xff]  }
 0x2be   :  { %11092 = vmatprep.subr.bf16.mxu0 %v12631_v1 }
 0x2c1   :  { %10939 = vmatmul.mubr.msk.bf16.gmra.mrb[184].mxu1 %vm168_vm3, %v12410_v16  ;;  %11093 = vmatpush3.bf16.msra.mxu0 %v12428_v17 }
 0x2c2   :  { %10942 = vmatprep.mubr.msk.bf16.mxu1 %vm12633_vm2, %v12631_v1  ;;  %11094 = vmatprep.subr.bf16.mxu0 %v12631_v1 }
 0x2c4   :  { %10981 = vmatmul.mubr.msk.bf16.gmra.mrb[192].mxu0 %vm168_vm3, %v3883_v62 }
 0x2c5   :  { %10984 = vmatprep.mubr.msk.bf16.mxu0 %vm12633_vm2, %v12631_v1  ;;  %11095 = vmatpush3.bf16.msra.mxu0 %v4720_v20  ;;  %v3901_v20 = vsel %vm209_vm1, %v3898_v28, %v3900_v50 }
 0x2c6   :  { %11198 = vmatprep.subr.bf16.mxu0 %v12631_v1 }
 0x2c9   :  { %10943 = vmatmul.mubr.msk.bf16.gmra.mrb[188].mxu1 %vm168_vm3, %v12412_v23 }
 0x2ca   :  { %10946 = vmatprep.mubr.msk.bf16.mxu1 %vm12633_vm2, %v12631_v1 }
 0x2cc   :  { %10985 = vmatmul.mubr.msk.bf16.gmra.mrb[196].mxu0 %vm168_vm3, %v3885_v13 }
 0x2cd   :  { %10988 = vmatprep.mubr.msk.bf16.mxu0 %vm12633_vm2, %v12631_v1 }
 0x2d1   :  { %10947 = vmatmul.mubr.msk.bf16.gmra.mrb[192].mxu1 %vm168_vm3, %v12416_v14 }
 0x2d2   :  { %10950 = vmatprep.mubr.msk.bf16.mxu1 %vm12633_vm2, %v12631_v1 }
 0x2d4   :  { %10989 = vmatmul.mubr.msk.bf16.gmra.mrb[200].mxu0 %vm168_vm3, %v3887_v24 }
 0x2d5   :  { %10992 = vmatprep.mubr.msk.bf16.mxu0 %vm12633_vm2, %v12631_v1 }
 0x2d9   :  { %10951 = vmatmul.mubr.msk.bf16.gmra.mrb[196].mxu1 %vm168_vm3, %v12418_v25 }
 0x2da   :  { %10954 = vmatprep.mubr.msk.bf16.mxu1 %vm12633_vm2, %v12631_v1 }
 0x2dc   :  { %10993 = vmatmul.mubr.msk.bf16.gmra.mrb[204].mxu0 %vm168_vm3, %v3889_v38 }
 0x2dd   :  { %10996 = vmatprep.mubr.msk.bf16.mxu0 %vm12633_vm2, %v12631_v1 }
 0x2e1   :  { %10955 = vmatmul.mubr.msk.bf16.gmra.mrb[200].mxu1 %vm168_vm3, %v12421_v29 }
 0x2e2   :  { %10958 = vmatprep.mubr.msk.bf16.mxu1 %vm12633_vm2, %v12631_v1 }
 0x2e4   :  { %10997 = vmatmul.mubr.msk.bf16.gmra.mrb[208].mxu0 %vm168_vm3, %v3891_v31  ;;  %v12437_v31 = vld [vmem:[%s15785_s0 + $0x274] sm:$0xff]  }
 0x2e5   :  { %11000 = vmatprep.mubr.msk.bf16.mxu0 %vm12633_vm2, %v12631_v1 }
 0x2e9   :  { %10959 = vmatmul.mubr.msk.bf16.gmra.mrb[204].mxu1 %vm168_vm3, %v12424_v2  ;;  %v4626_v2 = vrot.slane %v12438_v55, 2 }
 0x2ea   :  { %11034 = vmatprep.mubr.msk.bf16.mxu1 %vm12633_vm2, %v12631_v1 }
 0x2ec   :  { %11001 = vmatmul.mubr.msk.bf16.gmra.mrb[212].mxu0 %vm168_vm3, %v3893_v33 }
 0x2ed   :  { %11004 = vmatprep.mubr.msk.bf16.mxu0 %vm12633_vm2, %v12631_v1 }
 0x2f1   :  { %11035 = vmatmul.mubr.msk.bf16.vlgmr.msra.gmra.mrb[208].mxu1 %vm168_vm3, %v12426_v40 }
 0x2f2   :  { %v14060_v41 = vpop.f32.mrb[104].mxu1  ;;  %11038 = vmatprep.mubr.msk.bf16.mxu1 %vm12633_vm2, %v12631_v1 }
 0x2f3   :  { %v10794_v58 = vpop.f32.mrb[105].mxu1 }
 0x2f4   :  { %v14068_v49 = vpop.f32.mrb[106].mxu1  ;;  %11005 = vmatmul.mubr.msk.bf16.gmra.mrb[216].mxu0 %vm168_vm3, %v3895_v15  ;;  %v12441_v58 = vld [vmem:[%s15785_s0 + $0x2bc] sm:$0xff]  }
 0x2f5   :  { %v10795_v21 = vpop.f32.mrb[107].mxu1  ;;  %11008 = vmatprep.mubr.msk.bf16.mxu0 %vm12633_vm2, %v12631_v1 }
 0x2f6   :  { %v2542_v22 = vpop.f32.mrb[112].mxu0 }
 0x2f7   :  { %v10766_v56 = vpop.f32.mrb[113].mxu0 }
 0x2f8   :  { %v14076_v57 = vpop.f32.mrb[114].mxu0 }
 0x2f9   :  { %11039 = vmatmul.mubr.msk.bf16.gmra.mrb[212].mxu1 %vm168_vm3, %v12429_v51  ;;  %v10767_v37 = vpop.f32.mrb[115].mxu0 }
 0x2fa   :  { %11042 = vmatprep.mubr.msk.bf16.mxu1 %vm12633_vm2, %v12631_v1  ;;  %v4629_v37 = vrot.slane %v12441_v58, 2 }
 0x2fc   :  { %v14085_v47 = vpop.f32.mrb[108].mxu1  ;;  %11009 = vmatmul.mubr.msk.bf16.gmra.mrb[220].mxu0 %vm168_vm3, %v3897_v60 }
 0x2fd   :  { %v10798_v63 = vpop.f32.mrb[109].mxu1  ;;  %11012 = vmatprep.mubr.msk.bf16.mxu0 %vm12633_vm2, %v12631_v1 }
 0x2fe   :  { %v2609_v3 = vpop.f32.mrb[110].mxu1 }
 0x2ff   :  { %v10799_v42 = vpop.f32.mrb[111].mxu1  ;;  %v14093_v36 = vpop.f32.mrb[116].mxu0 }
 0x300   :  { %v10770_v43 = vpop.f32.mrb[117].mxu0  ;;  %v12443_v42 = vld [vmem:[%s15785_s0 + $0x2c4] sm:$0xff]  }
 0x301   :  { %11043 = vmatmul.mubr.msk.bf16.gmra.mrb[216].mxu1 %vm168_vm3, %v12431_v46  ;;  %v14096_v59 = vpop.f32.mrb[118].mxu0 }
 0x302   :  { %11046 = vmatprep.mubr.msk.bf16.mxu1 %vm12633_vm2, %v12631_v1  ;;  %v10771_v8 = vpop.f32.mrb[119].mxu0 }
 0x304   :  { %v2697_v34 = vpop.f32.mrb[112].mxu1  ;;  %11013 = vmatmul.mubr.msk.bf16.gmra.mrb[224].mxu0 %vm168_vm3, %v3899_v6  ;;  %v12442_v6 = vld [vmem:[%s15785_s0 + $0x284] sm:$0xff]  }
 0x305   :  { %v14105_v9 = vadd.f32 %v2697_v34, %v13890_v52  ;;  %v10808_v12 = vpop.f32.mrb[113].mxu1  ;;  %11016 = vmatprep.mubr.msk.bf16.mxu0 %vm12633_vm2, %v12631_v1  ;;  %v4631_v34 = vrot.slane %v12443_v42, 2 }
 0x306   :  { %v2700_v16 = vpop.f32.mrb[114].mxu1 }
 0x307   :  { %v14114_v17 = vadd.f32 %v2700_v16, %v13898_v48  ;;  %v10809_v18 = vpop.f32.mrb[115].mxu1  ;;  %v14116_v62 = vpop.f32.mrb[120].mxu0 }
 0x308   :  { %v10774_v52 = vpop.f32.mrb[121].mxu0 }
 0x309   :  { %11047 = vmatmul.mubr.msk.bf16.gmra.mrb[220].mxu1 %vm168_vm3, %v12433_v4  ;;  %v14119_v19 = vpop.f32.mrb[122].mxu0  ;;  %v4632_v52 = vsel %vm209_vm1, %v4629_v37, %v4631_v34 }
 0x30a   :  { %11050 = vmatprep.mubr.msk.bf16.mxu1 %vm12633_vm2, %v12631_v1  ;;  %v10775_v23 = vpop.f32.mrb[123].mxu0 }
 0x30c   :  { %v2705_v54 = vpop.f32.mrb[116].mxu1  ;;  %11017 = vmatmul.mubr.msk.bf16.gmra.mrb[228].mxu0 %vm168_vm3, %v3901_v20 }
 0x30d   :  { %v14125_v13 = vadd.f32 %v2705_v54, %v13924_v45  ;;  %v10812_v48 = vpop.f32.mrb[117].mxu1  ;;  %11020 = vmatprep.mubr.msk.bf16.mxu0 %vm12633_vm2, %v12631_v1  ;;  %v12444_v54 = vld [vmem:[%s15785_s0 + $0x28c] sm:$0xff]  }
 0x30e   :  { %v2708_v14 = vpop.f32.mrb[118].mxu1 }
 0x30f   :  { %v14134_v11 = vadd.f32 %v2708_v14, %v13927_v0  ;;  %v10813_v24 = vpop.f32.mrb[119].mxu1  ;;  %v14136_v5 = vpop.f32.mrb[124].mxu0  ;;  %v12439_v0 = vld [vmem:[%s15785_s0 + $0x2b4] sm:$0xff]  }
 0x310   :  { %v10778_v25 = vpop.f32.mrb[125].mxu0  ;;  %v4627_v35 = vrot.slane %v12439_v0, 2  ;;  %v14232_v0 = vld [vmem:[%s15789_s4] ss:$0 sm:$0xff] }
 0x311   :  { %11051 = vmatmul.mubr.msk.bf16.gmra.mrb[224].mxu1 %vm168_vm3, %v12436_v10  ;;  %v14139_v45 = vpop.f32.mrb[126].mxu0 }
 0x312   :  { %11054 = vmatprep.mubr.msk.bf16.mxu1 %vm12633_vm2, %v12631_v1  ;;  %v10779_v38 = vpop.f32.mrb[127].mxu0  ;;  %v4628_v44 = vsel %vm209_vm1, %v4626_v2, %v4627_v35  ;;  %v4630_v28 = vsel %vm209_vm1, %v4627_v35, %v4629_v37 }
 0x314   :  { %v2713_v26 = vpop.f32.mrb[120].mxu1  ;;  %11021 = vmatmul.mubr.msk.bf16.gmra.mrb[232].mxu0 %vm168_vm3, %v3900_v50 }
 0x315   :  { %v14149_v29 = vadd.f32 %v2713_v26, %v2542_v22  ;;  %v10816_v30 = vpop.f32.mrb[121].mxu1  ;;  %11096 = vmatprep.mubr.msk.bf16.mxu0 %vm12633_vm2, %v12631_v1 }
 0x316   :  { %v2716_v27 = vpop.f32.mrb[122].mxu1 }
 0x317   :  { %v14158_v33 = vadd.f32 %v2716_v27, %v14076_v57  ;;  %v10817_v39 = vpop.f32.mrb[123].mxu1  ;;  %v14160_v40 = vpop.f32.mrb[128].mxu0 }
 0x318   :  { %v10782_v32 = vpop.f32.mrb[129].mxu0 }
 0x319   :  { %11055 = vmatmul.mubr.msk.bf16.gmra.mrb[228].mxu1 %vm168_vm3, %v12437_v31  ;;  %v14163_v15 = vpop.f32.mrb[130].mxu0 }
 0x31a   :  { %11058 = vmatprep.mubr.msk.bf16.mxu1 %vm12633_vm2, %v12631_v1  ;;  %v10783_v21 = vpop.f32.mrb[131].mxu0 }
 0x31c   :  { %v2721_v51 = vpop.f32.mrb[124].mxu1  ;;  %11097 = vmatmul.mubr.msk.bf16.vlgmr.msra.gmra.mrb[236].mxu0 %vm168_vm3, %v4628_v44  ;;  %v12446_v44 = vld [vmem:[%s15785_s0 + $0x294] sm:$0xff]  }
 0x31d   :  { %v10820_v22 = vpop.f32.mrb[125].mxu1  ;;  %v14176_v56 = vadd.f32 %v2721_v51, %v14093_v36  ;;  %11100 = vmatprep.mubr.msk.bf16.mxu0 %vm12633_vm2, %v12631_v1 }
 0x31e   :  { %v2724_v57 = vpop.f32.mrb[126].mxu1 }
 0x31f   :  { %v10821_v60 = vpop.f32.mrb[127].mxu1  ;;  %v14181_v61 = vadd.f32 %v2724_v57, %v14096_v59  ;;  %v14183_v63 = vpop.f32.mrb[132].mxu0 }
 0x320   :  { %v10786_v46 = vpop.f32.mrb[133].mxu0 }
 0x321   :  { %11059 = vmatmul.mubr.msk.bf16.gmra.mrb[232].mxu1 %vm168_vm3, %v12440_v53  ;;  %v14186_v3 = vpop.f32.mrb[134].mxu0  ;;  %v12448_v46 = vld [vmem:[%s15785_s0 + $0x2dc] sm:$0xff]  }
 0x322   :  { %11062 = vmatprep.mubr.msk.bf16.mxu1 %vm12633_vm2, %v12631_v1  ;;  %v10787_v36 = vpop.f32.mrb[135].mxu0 }
 0x324   :  { %v2729_v43 = vpop.f32.mrb[128].mxu1  ;;  %11101 = vmatmul.mubr.msk.bf16.gmra.mrb[240].mxu0 %vm168_vm3, %v4630_v28 }
 0x325   :  { %v10824_v59 = vpop.f32.mrb[129].mxu1  ;;  %v14199_v7 = vadd.f32 %v2729_v43, %v14116_v62  ;;  %11104 = vmatprep.mubr.msk.bf16.mxu0 %vm12633_vm2, %v12631_v1  ;;  %v12445_v62 = vld [vmem:[%s15785_s0 + $0x2cc] sm:$0xff]  }
 0x326   :  { %v2732_v8 = vpop.f32.mrb[130].mxu1  ;;  %v4633_v14 = vrot.slane %v12445_v62, 2 }
 0x327   :  { %v10825_v12 = vpop.f32.mrb[131].mxu1  ;;  %v14204_v4 = vadd.f32 %v2732_v8, %v14119_v19  ;;  %v14206_v16 = vpop.f32.mrb[136].mxu0  ;;  %v12449_v8 = vld [vmem:[%s15785_s0 + $0x29c] sm:$0xff]  }
 0x328   :  { %v10790_v50 = vpop.f32.mrb[137].mxu0  ;;  %v4634_v30 = vsel %vm209_vm1, %v4631_v34, %v4633_v14  ;;  %v4637_v12 = vrot.slane %v12448_v46, 2 }
 0x329   :  { %11063 = vmatmul.mubr.msk.bf16.gmra.mrb[236].mxu1 %vm168_vm3, %v12442_v6  ;;  %v14209_v18 = vpop.f32.mrb[138].mxu0 }
 0x32a   :  { %11066 = vmatprep.mubr.msk.bf16.mxu1 %vm12633_vm2, %v12631_v1  ;;  %v10791_v20 = vpop.f32.mrb[139].mxu0 }
 0x32c   :  { %v2737_v23 = vpop.f32.mrb[132].mxu1  ;;  %11105 = vmatmul.mubr.msk.bf16.gmra.mrb[244].mxu0 %vm168_vm3, %v4632_v52 }
 0x32d   :  { %v10828_v19 = vpop.f32.mrb[133].mxu1  ;;  %v14222_v48 = vadd.f32 %v2737_v23, %v14136_v5  ;;  %11108 = vmatprep.mubr.msk.bf16.mxu0 %vm12633_vm2, %v12631_v1 }
 0x32e   :  { %v2740_v10 = vpop.f32.mrb[134].mxu1 }
 0x32f   :  { %v10829_v24 = vpop.f32.mrb[135].mxu1  ;;  %v14227_v25 = vadd.f32 %v2740_v10, %v14139_v45  ;;  %v3159_v55 = vpop.f32.mrb[140].mxu0  ;;  %v12447_v45 = vld [vmem:[%s15785_s0 + $0x2d4] sm:$0xff]   ;;  %v12451_v10 = vld [vmem:[%s15785_s0 + $0x2e4] sm:$0xff]  }
 0x330   :  { %v3245_v38 = vadd.f32 %v3159_v55, %v14105_v9  ;;  %v10858_v26 = vpop.f32.mrb[141].mxu0 }
 0x331   :  { %11067 = vmatmul.mubr.msk.bf16.gmra.mrb[240].mxu1 %vm168_vm3, %v12444_v54  ;;  %v3162_v5 = vpop.f32.mrb[142].mxu0 }
 0x332   :  { %11070 = vmatprep.mubr.msk.bf16.mxu1 %vm12633_vm2, %v12631_v1  ;;  %v3273_v31 = vadd.f32 %v14232_v0, %v3245_v38  ;;  %v3246_v27 = vadd.f32 %v3162_v5, %v14114_v17  ;;  %v10859_v2 = vpop.f32.mrb[143].mxu0  ;;  %v4635_v17 = vrot.slane %v12447_v45, 2  ;;  %v12450_v5 = vld [vmem:[%s15785_s0 + $0x2a4] sm:$0xff]  }
 0x334   :  { %v2745_v9 = vpop.f32.mrb[136].mxu1  ;;  %v3294_v35 = vmax.f32 %v3273_v31, 0.0  ;;  %v3274_v39 = vadd.f32 %v14232_v0, %v3246_v27  ;;  %11109 = vmatmul.mubr.msk.bf16.gmra.mrb[248].mxu0 %vm168_vm3, %v4634_v30  ;;  %v4636_v28 = vsel %vm209_vm1, %v4633_v14, %v4635_v17 }
 0x335   :  { %v10832_v32 = vpop.f32.mrb[137].mxu1  ;;  %v14250_v58 = vadd.f32 %v2745_v9, %v14160_v40  ;;  %11112 = vmatprep.mubr.msk.bf16.mxu0 %vm12633_vm2, %v12631_v1 }
 0x336   :  { %v2748_v21 = vpop.f32.mrb[138].mxu1  ;;  %3316 = vst.msk [vmem:[#allocation4] sm:$0xff] %vm3315_vm9, %v3294_v35  ;;  %v3295_v51 = vmax.f32 %v3274_v39, 0.0 }
 0x337   :  { %v10833_v22 = vpop.f32.mrb[139].mxu1  ;;  %v14256_v53 = vadd.f32 %v2748_v21, %v14163_v15  ;;  %v3167_v57 = vpop.f32.mrb[144].mxu0 }
 0x338   :  { %3317 = vst.msk [vmem:[#allocation4 + $0x8] sm:$0xff] %vm3315_vm9, %v3295_v51  ;;  %v3247_v37 = vadd.f32 %v3167_v57, %v14125_v13  ;;  %v10862_v60 = vpop.f32.mrb[145].mxu0 }
 0x339   :  { %11071 = vmatmul.mubr.msk.bf16.gmra.mrb[244].mxu1 %vm168_vm3, %v12446_v44  ;;  %v3170_v40 = vpop.f32.mrb[146].mxu0 }
 0x33a   :  { %11074 = vmatprep.mubr.msk.bf16.mxu1 %vm12633_vm2, %v12631_v1  ;;  %v3275_v15 = vadd.f32 %v14232_v0, %v3247_v37  ;;  %v3248_v42 = vadd.f32 %v3170_v40, %v14134_v11  ;;  %v10863_v36 = vpop.f32.mrb[147].mxu0 }
 0x33b   :  { %v12452_v36 = vld [vmem:[%s15785_s0 + $0x2ac] ss:$0 sps:$4 sm:$0x33]  }
 0x33c   :  { %v2753_v43 = vpop.f32.mrb[140].mxu1  ;;  %v3296_v13 = vmax.f32 %v3275_v15, 0.0  ;;  %v3276_v59 = vadd.f32 %v14232_v0, %v3248_v42  ;;  %11113 = vmatmul.mubr.msk.bf16.gmra.mrb[252].mxu0 %vm168_vm3, %v4636_v28 }
 0x33d   :  { %v10836_v6 = vpop.f32.mrb[141].mxu1  ;;  %v14275_v34 = vadd.f32 %v2753_v43, %v14183_v63  ;;  %11116 = vmatprep.mubr.msk.bf16.mxu0 %vm12633_vm2, %v12631_v1  ;;  %v4638_v63 = vsel %vm209_vm1, %v4635_v17, %v4637_v12 }
 0x33e   :  { %v2756_v50 = vpop.f32.mrb[142].mxu1  ;;  %3318 = vst.msk [vmem:[#allocation4 + $0x10] sm:$0xff] %vm3315_vm9, %v3296_v13  ;;  %v3297_v11 = vmax.f32 %v3276_v59, 0.0 }
 0x33f   :  { %v10837_v52 = vpop.f32.mrb[143].mxu1  ;;  %v14281_v62 = vadd.f32 %v2756_v50, %v14186_v3  ;;  %v3175_v20 = vpop.f32.mrb[148].mxu0  ;;  %v3338_v31 = vld [vmem:[#allocation4] ss:$2 sm:$0x3f] }
 0x340   :  { %3319 = vst.msk [vmem:[#allocation4 + $0x18] sm:$0xff] %vm3315_vm9, %v3297_v11  ;;  %v3249_v23 = vadd.f32 %v3175_v20, %v14149_v29  ;;  %v10866_v19 = vpop.f32.mrb[149].mxu0  ;;  %v3340_v35 = vld [vmem:[#allocation4 + $0x1] ss:$2 sm:$0x3f] }
 0x341   :  { %11075 = vmatmul.mubr.msk.bf16.gmra.mrb[248].mxu1 %vm168_vm3, %v12449_v8  ;;  %v3178_v54 = vpop.f32.mrb[150].mxu0  ;;  %v3345_v22 = vmax.f32 %v3338_v31, %v3340_v35  ;;  %v12454_v20 = vld [vmem:[%s15785_s0 + $0x2f4] sm:$0xff]   ;;  %v14358_v35 = vld [vmem:[%s15787_s2] ss:$0 sm:$0xff] }
 0x342   :  { %11078 = vmatprep.mubr.msk.bf16.mxu1 %vm12633_vm2, %v12631_v1  ;;  %v3277_v3 = vadd.f32 %v14232_v0, %v3249_v23  ;;  %v3250_v14 = vadd.f32 %v3178_v54, %v14158_v33  ;;  %v10867_v24 = vpop.f32.mrb[151].mxu0  ;;  %v4639_v33 = vrot.slane %v12451_v10, 2 }
 0x344   :  { %v2761_v55 = vpop.f32.mrb[144].mxu1  ;;  %v3298_v29 = vmax.f32 %v3277_v3, 0.0  ;;  %v3278_v38 = vadd.f32 %v14232_v0, %v3250_v14  ;;  %11117 = vmatmul.mubr.msk.bf16.gmra.mrb[0].mxu0 %vm168_vm3, %v4638_v63  ;;  %v4640_v51 = vsel %vm209_vm1, %v4637_v12, %v4639_v33 }
 0x345   :  { %v10840_v26 = vpop.f32.mrb[145].mxu1  ;;  %v14300_v30 = vadd.f32 %v2761_v55, %v14206_v16  ;;  %11120 = vmatprep.mubr.msk.bf16.mxu0 %vm12633_vm2, %v12631_v1 }
 0x346   :  { %v2764_v45 = vpop.f32.mrb[146].mxu1  ;;  %3320 = vst.msk [vmem:[#allocation4 + $0x20] sm:$0xff] %vm3315_vm9, %v3298_v29  ;;  %v3299_v27 = vmax.f32 %v3278_v38, 0.0  ;;  %v4643_v29 = vrot.slane %v12454_v20, 2 }
 0x347   :  { %v10841_v2 = vpop.f32.mrb[147].mxu1  ;;  %v14306_v9 = vadd.f32 %v2764_v45, %v14209_v18  ;;  %v3183_v39 = vpop.f32.mrb[152].mxu0  ;;  %v3342_v32 = vld [vmem:[#allocation4 + $0xe] ss:$2 sm:$0x3f] }
 0x348   :  { %3321 = vst.msk [vmem:[#allocation4 + $0x28] sm:$0xff] %vm3315_vm9, %v3299_v27  ;;  %v3251_v16 = vadd.f32 %v3183_v39, %v14176_v56  ;;  %v10870_v44 = vpop.f32.mrb[153].mxu0  ;;  %v3344_v21 = vld [vmem:[#allocation4 + $0xf] ss:$2 sm:$0x3f] }
 0x349   :  { %11079 = vmatmul.mubr.msk.bf16.gmra.mrb[252].mxu1 %vm168_vm3, %v12450_v5  ;;  %v3186_v17 = vpop.f32.mrb[154].mxu0  ;;  %v12453_v18 = vld [vmem:[%s15785_s0 + $0x2ec] sm:$0xff]   ;;  %v3346_v57 = vmax.f32 %v3342_v32, %v3344_v21  ;;  %v12455_v32 = vld [vmem:[%s15785_s0 + $0x2fc] sm:$0xff]  }
 0x34a   :  { %11082 = vmatprep.mubr.msk.bf16.mxu1 %vm12633_vm2, %v12631_v1  ;;  %v3279_v37 = vadd.f32 %v14232_v0, %v3251_v16  ;;  %v3252_v56 = vadd.f32 %v3186_v17, %v14181_v61  ;;  %v10871_v60 = vpop.f32.mrb[155].mxu0  ;;  %v4641_v61 = vrot.slane %v12453_v18, 2 }
 0x34b   :  { %v3347_v46 = vmax.f32 %v3345_v22, %v3346_v57 }
 0x34c   :  { %v2769_v40 = vpop.f32.mrb[148].mxu1  ;;  %v3300_v28 = vmax.f32 %v3279_v37, 0.0  ;;  %v3280_v15 = vadd.f32 %v14232_v0, %v3252_v56  ;;  %11121 = vmatmul.mubr.msk.bf16.gmra.mrb[4].mxu0 %vm168_vm3, %v4640_v51  ;;  %v4642_v52 = vsel %vm209_vm1, %v4639_v33, %v4641_v61  ;;  %v4644_v39 = vsel %vm209_vm1, %v4641_v61, %v4643_v29 }
 0x34d   :  { %v10844_v42 = vpop.f32.mrb[149].mxu1  ;;  %v14325_v43 = vadd.f32 %v2769_v40, %v14060_v41  ;;  %11124 = vmatprep.mubr.msk.bf16.mxu0 %vm12633_vm2, %v12631_v1  ;;  %3348 = vst.msk [vmem:[#allocation5] sm:$0x3f] %vm3336_vm10, %v3347_v46  ;;  %v3352_v24 = vld [vmem:[#allocation4 + $0x1d] ss:$2 sm:$0x3f] }
 0x34e   :  { %v2772_v13 = vpop.f32.mrb[150].mxu1  ;;  %3322 = vst.msk [vmem:[#allocation4 + $0x30] sm:$0xff] %vm3315_vm9, %v3300_v28  ;;  %v3301_v59 = vmax.f32 %v3280_v15, 0.0  ;;  %v4645_v56 = vrot.slane %v12455_v32, 2 }
 0x34f   :  { %v10845_v6 = vpop.f32.mrb[151].mxu1  ;;  %v14332_v8 = vadd.f32 %v2772_v13, %v14068_v49  ;;  %v3191_v12 = vpop.f32.mrb[156].mxu0 }
 0x350   :  { %3323 = vst.msk [vmem:[#allocation4 + $0x38] sm:$0xff] %vm3315_vm9, %v3301_v59  ;;  %v3253_v41 = vadd.f32 %v3191_v12, %v14199_v7  ;;  %v10874_v50 = vpop.f32.mrb[157].mxu0  ;;  %v3350_v7 = vld [vmem:[#allocation4 + $0x1c] ss:$2 sm:$0x3f]  ;;  %v4646_v61 = vsel %vm209_vm1, %v4643_v29, %v4645_v56  ;;  %v14381_v59 = vld [vmem:[%s15785_s0 + $0x304] sm:$0xff]  }
 0x351   :  { %11083 = vmatmul.mubr.msk.bf16.gmra.mrb[0].mxu1 %vm168_vm3, %v12452_v36  ;;  %v3194_v11 = vpop.f32.mrb[158].mxu0  ;;  %v3357_v33 = vmax.f32 %v3350_v7, %v3352_v24 }
 0x352   :  { %11154 = vmatprep.mubr.msk.bf16.mxu1 %vm12633_vm2, %v12631_v1  ;;  %v3281_v49 = vadd.f32 %v14232_v0, %v3253_v41  ;;  %v3254_v23 = vadd.f32 %v3194_v11, %v14204_v4  ;;  %v10875_v19 = vpop.f32.mrb[159].mxu0 }
 0x354   :  { %v2777_v63 = vpop.f32.mrb[152].mxu1  ;;  %v3302_v54 = vmax.f32 %v3281_v49, 0.0  ;;  %v3282_v10 = vadd.f32 %v14232_v0, %v3254_v23  ;;  %11125 = vmatmul.mubr.msk.bf16.gmra.mrb[8].mxu0 %vm168_vm3, %v4642_v52 }
 0x355   :  { %v10848_v3 = vpop.f32.mrb[153].mxu1  ;;  %v14348_v14 = vadd.f32 %v2777_v63, %v14085_v47  ;;  %11128 = vmatprep.mubr.msk.bf16.mxu0 %vm12633_vm2, %v12631_v1  ;;  %v3354_v38 = vld [vmem:[#allocation4 + $0x2a] ss:$2 sm:$0x3f]  ;;  %v4647_v63 = vrot.slane %v14381_v59, 2 }
 0x356   :  { %v2780_v55 = vpop.f32.mrb[154].mxu1  ;;  %3324 = vst.msk [vmem:[#allocation4 + $0x40] sm:$0xff] %vm3315_vm9, %v3302_v54  ;;  %v3303_v4 = vmax.f32 %v3282_v10, 0.0  ;;  %v3356_v5 = vld [vmem:[#allocation4 + $0x2b] ss:$2 sm:$0x3f] }
 0x357   :  { %v10849_v26 = vpop.f32.mrb[155].mxu1  ;;  %v3199_v45 = vpop.f32.mrb[160].mxu0  ;;  %v3358_v31 = vmax.f32 %v3354_v38, %v3356_v5 }
 0x358   :  { %3325 = vst.msk [vmem:[#allocation4 + $0x48] sm:$0xff] %vm3315_vm9, %v3303_v4  ;;  %v3255_v47 = vadd.f32 %v3199_v45, %v14222_v48  ;;  %v10878_v27 = vpop.f32.mrb[161].mxu0 }
 0x359   :  { %v3202_v2 = vpop.f32.mrb[162].mxu0  ;;  %v3359_v16 = vmax.f32 %v3357_v33, %v3358_v31  ;;  %v4648_v33 = vsel %vm209_vm1, %v4645_v56, %v4647_v63  ;;  %v14401_v31 = vld [vmem:[%s15785_s0 + $0x30c] ss:$0 sps:$4 sm:$0xff]  }
 0x35a   :  { %v3283_v44 = vadd.f32 %v14232_v0, %v3255_v47  ;;  %v3256_v21 = vadd.f32 %v3202_v2, %v14227_v25  ;;  %v10879_v17 = vpop.f32.mrb[163].mxu0 }
 0x35b   :  { %3360 = vst.msk [vmem:[#allocation5 + $0x6] sm:$0x3f] %vm3336_vm10, %v3359_v16 }
 0x35c   :  { %v3620_v48 = vpop.f32.mrb[156].mxu1  ;;  %v3304_v51 = vmax.f32 %v3283_v44, 0.0  ;;  %v3284_v18 = vadd.f32 %v14232_v0, %v3256_v21  ;;  %11129 = vmatmul.mubr.msk.bf16.gmra.mrb[12].mxu0 %vm168_vm3, %v4644_v39 }
 0x35d   :  { %v3621_v22 = vadd.f32 %v14358_v35, %v3620_v48  ;;  %v10912_v57 = vpop.f32.mrb[157].mxu1  ;;  %11132 = vmatprep.mubr.msk.bf16.mxu0 %vm12633_vm2, %v12631_v1  ;;  %v3362_v11 = vld [vmem:[#allocation4 + $0x38] ss:$2 sm:$0x3f]  ;;  %v4649_v48 = vrot.slane %v14401_v31, 2 }
 0x35e   :  { %v3623_v37 = vpop.f32.mrb[158].mxu1  ;;  %3326 = vst.msk [vmem:[#allocation4 + $0x50] sm:$0xff] %vm3315_vm9, %v3304_v51  ;;  %v3305_v25 = vmax.f32 %v3284_v18, 0.0  ;;  %v3364_v23 = vld [vmem:[#allocation4 + $0x39] ss:$2 sm:$0x3f] }
 0x35f   :  { %v3722_v60 = vmax.f32 %v3621_v22, 0.0  ;;  %v3624_v40 = vadd.f32 %v14358_v35, %v3623_v37  ;;  %v10913_v46 = vpop.f32.mrb[159].mxu1  ;;  %v3207_v28 = vpop.f32.mrb[164].mxu0  ;;  %v3369_v29 = vmax.f32 %v3362_v11, %v3364_v23 }
 0x360   :  { %3327 = vst.msk [vmem:[#allocation4 + $0x58] sm:$0xff] %vm3315_vm9, %v3305_v25  ;;  %v3257_v42 = vadd.f32 %v3207_v28, %v14250_v58  ;;  %v10882_v36 = vpop.f32.mrb[165].mxu0 }
 0x361   :  { %3747 = vst.msk [vmem:[#allocation2] sm:$0xff] %vm376_vm4, %v3722_v60  ;;  %v3723_v15 = vmax.f32 %v3624_v40, 0.0  ;;  %v3210_v13 = vpop.f32.mrb[166].mxu0 }
 0x362   :  { %v3285_v6 = vadd.f32 %v14232_v0, %v3257_v42  ;;  %v3258_v12 = vadd.f32 %v3210_v13, %v14256_v53  ;;  %v10883_v41 = vpop.f32.mrb[167].mxu0  ;;  %v4650_v42 = vsel %vm209_vm1, %v4647_v63, %v4649_v48 }
 0x363   :  { %3748 = vst.msk [vmem:[#allocation2 + $0x8] sm:$0xff] %vm376_vm4, %v3723_v15 }
 0x364   :  { %v3628_v50 = vpop.f32.mrb[160].mxu1  ;;  %v3306_v52 = vmax.f32 %v3285_v6, 0.0  ;;  %v3286_v58 = vadd.f32 %v14232_v0, %v3258_v12  ;;  %11133 = vmatmul.mubr.msk.bf16.gmra.mrb[16].mxu0 %vm168_vm3, %v4646_v61 }
 0x365   :  { %v3629_v20 = vadd.f32 %v14358_v35, %v3628_v50  ;;  %v10916_v49 = vpop.f32.mrb[161].mxu1  ;;  %11136 = vmatprep.mubr.msk.bf16.mxu0 %vm12633_vm2, %v12631_v1  ;;  %v3366_v7 = vld [vmem:[#allocation4 + $0x46] ss:$2 sm:$0x3f] }
 0x366   :  { %v3631_v19 = vpop.f32.mrb[162].mxu1  ;;  %3328 = vst.msk [vmem:[#allocation4 + $0x60] sm:$0xff] %vm3315_vm9, %v3306_v52  ;;  %v3307_v53 = vmax.f32 %v3286_v58, 0.0  ;;  %v3368_v24 = vld [vmem:[#allocation4 + $0x47] ss:$2 sm:$0x3f] }
 0x367   :  { %v3724_v54 = vmax.f32 %v3629_v20, 0.0  ;;  %v3632_v10 = vadd.f32 %v14358_v35, %v3631_v19  ;;  %v10917_v3 = vpop.f32.mrb[163].mxu1  ;;  %v3215_v55 = vpop.f32.mrb[168].mxu0  ;;  %v3370_v38 = vmax.f32 %v3366_v7, %v3368_v24  ;;  %v3374_v51 = vld [vmem:[#allocation4 + $0x54] ss:$2 sm:$0x3f] }
 0x368   :  { %3329 = vst.msk [vmem:[#allocation4 + $0x68] sm:$0xff] %vm3315_vm9, %v3307_v53  ;;  %v3259_v26 = vadd.f32 %v3215_v55, %v14275_v34  ;;  %v10886_v5 = vpop.f32.mrb[169].mxu0  ;;  %v3376_v37 = vld [vmem:[#allocation4 + $0x55] ss:$2 sm:$0x3f] }
 0x369   :  { %3749 = vst.msk [vmem:[#allocation2 + $0x10] sm:$0xff] %vm376_vm4, %v3724_v54  ;;  %v3725_v4 = vmax.f32 %v3632_v10, 0.0  ;;  %v3218_v45 = vpop.f32.mrb[170].mxu0  ;;  %v3371_v47 = vmax.f32 %v3369_v29, %v3370_v38  ;;  %v3381_v36 = vmax.f32 %v3374_v51, %v3376_v37 }
 0x36a   :  { %v3287_v27 = vadd.f32 %v14232_v0, %v3259_v26  ;;  %v3260_v2 = vadd.f32 %v3218_v45, %v14281_v62  ;;  %v10887_v39 = vpop.f32.mrb[171].mxu0  ;;  %v4908_v19 = vld [vmem:[#allocation2] ss:$2 sm:$0xff]  ;;  %v4910_v63 = vld [vmem:[#allocation2 + $0x1] ss:$2 sm:$0xff] }
 0x36b   :  { %3750 = vst.msk [vmem:[#allocation2 + $0x18] sm:$0xff] %vm376_vm4, %v3725_v4  ;;  %v4916_v29 = vmax.f32 %v4908_v19, %v4910_v63 }
 0x36c   :  { %v3636_v32 = vpop.f32.mrb[164].mxu1  ;;  %3372 = vst.msk [vmem:[#allocation5 + $0xc] sm:$0x3f] %vm3336_vm10, %v3371_v47  ;;  %v3308_v34 = vmax.f32 %v3287_v27, 0.0  ;;  %v3288_v16 = vadd.f32 %v14232_v0, %v3260_v2  ;;  %11137 = vmatmul.mubr.msk.bf16.gmra.mrb[20].mxu0 %vm168_vm3, %v4648_v33 }
 0x36d   :  { %v3637_v44 = vadd.f32 %v14358_v35, %v3636_v32  ;;  %v10920_v21 = vpop.f32.mrb[165].mxu1  ;;  %11140 = vmatprep.mubr.msk.bf16.mxu0 %vm12633_vm2, %v12631_v1 }
 0x36e   :  { %v3639_v17 = vpop.f32.mrb[166].mxu1  ;;  %3330 = vst.msk [vmem:[#allocation4 + $0x70] sm:$0xff] %vm3315_vm9, %v3308_v34  ;;  %v3309_v62 = vmax.f32 %v3288_v16, 0.0 }
 0x36f   :  { %v3726_v18 = vmax.f32 %v3637_v44, 0.0  ;;  %v3640_v22 = vadd.f32 %v14358_v35, %v3639_v17  ;;  %v10921_v57 = vpop.f32.mrb[167].mxu1  ;;  %v3223_v56 = vpop.f32.mrb[172].mxu0  ;;  %v3378_v25 = vld [vmem:[#allocation4 + $0x62] ss:$2 sm:$0x3f] }
 0x370   :  { %3331 = vst.msk [vmem:[#allocation4 + $0x78] sm:$0xff] %vm3315_vm9, %v3309_v62  ;;  %v3261_v40 = vadd.f32 %v3223_v56, %v14300_v30  ;;  %v10890_v46 = vpop.f32.mrb[173].mxu0  ;;  %v3380_v28 = vld [vmem:[#allocation4 + $0x63] ss:$2 sm:$0x3f] }
 0x371   :  { %3751 = vst.msk [vmem:[#allocation2 + $0x20] sm:$0xff] %vm376_vm4, %v3726_v18  ;;  %v3727_v60 = vmax.f32 %v3640_v22, 0.0  ;;  %v3226_v15 = vpop.f32.mrb[174].mxu0  ;;  %v3382_v13 = vmax.f32 %v3378_v25, %v3380_v28 }
 0x372   :  { %v3289_v61 = vadd.f32 %v14232_v0, %v3261_v40  ;;  %v3262_v59 = vadd.f32 %v3226_v15, %v14306_v9  ;;  %v10891_v6 = vpop.f32.mrb[175].mxu0  ;;  %v4909_v45 = vld [vmem:[#allocation2 + $0x10] ss:$2 sm:$0x3f] }
 0x373   :  { %3752 = vst.msk [vmem:[#allocation2 + $0x28] sm:$0xff] %vm376_vm4, %v3727_v60  ;;  %v3383_v41 = vmax.f32 %v3381_v36, %v3382_v13  ;;  %v4911_v47 = vld [vmem:[#allocation2 + $0x11] ss:$2 sm:$0x3f] }
 0x374   :  { %v3644_v12 = vpop.f32.mrb[168].mxu1  ;;  %v3310_v50 = vmax.f32 %v3289_v61, 0.0  ;;  %v3290_v30 = vadd.f32 %v14232_v0, %v3262_v59  ;;  %11141 = vmatmul.mubr.msk.bf16.gmra.mrb[24].mxu0 %vm168_vm3, %v4650_v42  ;;  %v4917_v18 = vmax.f32 %v4909_v45, %v4911_v47 }
 0x375   :  { %v3645_v11 = vadd.f32 %v14358_v35, %v3644_v12  ;;  %v10924_v52 = vpop.f32.mrb[169].mxu1  ;;  %11144 = vmatprep.mubr.msk.bf16.mxu0 %vm12633_vm2, %v12631_v1  ;;  %3384 = vst.msk [vmem:[#allocation5 + $0x12] sm:$0x3f] %vm3336_vm10, %v3383_v41 }
 0x376   :  { %v3647_v58 = vpop.f32.mrb[170].mxu1  ;;  %3332 = vst.msk [vmem:[#allocation4 + $0x80] sm:$0xff] %vm3315_vm9, %v3310_v50  ;;  %v3311_v9 = vmax.f32 %v3290_v30, 0.0 }
 0x377   :  { %v3728_v20 = vmax.f32 %v3645_v11, 0.0  ;;  %v3648_v49 = vadd.f32 %v14358_v35, %v3647_v58  ;;  %v10925_v23 = vpop.f32.mrb[171].mxu1  ;;  %v3231_v7 = vpop.f32.mrb[176].mxu0  ;;  %v3388_v51 = vld [vmem:[#allocation4 + $0x71] ss:$2 sm:$0x3f] }
 0x378   :  { %3333 = vst.msk [vmem:[#allocation4 + $0x88] sm:$0xff] %vm3315_vm9, %v3311_v9  ;;  %v3263_v54 = vadd.f32 %v3231_v7, %v14325_v43  ;;  %v10894_v10 = vpop.f32.mrb[177].mxu0 }
 0x379   :  { %3753 = vst.msk [vmem:[#allocation2 + $0x30] sm:$0xff] %vm376_vm4, %v3728_v20  ;;  %v3729_v53 = vmax.f32 %v3648_v49, 0.0  ;;  %v3234_v55 = vpop.f32.mrb[178].mxu0 }
 0x37a   :  { %v4912_v3 = vld [vmem:[#allocation2 + $0x1c] ss:$2 sm:$0xff]  ;;  %v4914_v24 = vld [vmem:[#allocation2 + $0x1d] ss:$2 sm:$0xff]  ;;  %v3291_v38 = vadd.f32 %v14232_v0, %v3263_v54  ;;  %v3264_v4 = vadd.f32 %v3234_v55, %v14332_v8  ;;  %v10895_v26 = vpop.f32.mrb[179].mxu0 }
 0x37b   :  { %3754 = vst.msk [vmem:[#allocation2 + $0x38] sm:$0xff] %vm376_vm4, %v3729_v53  ;;  %v4918_v5 = vmax.f32 %v4912_v3, %v4914_v24  ;;  %v3386_v8 = vld [vmem:[#allocation4 + $0x70] ss:$2 sm:$0x3f] }
 0x37c   :  { %v3652_v33 = vpop.f32.mrb[172].mxu1  ;;  %v3312_v27 = vmax.f32 %v3291_v38, 0.0  ;;  %v3292_v2 = vadd.f32 %v14232_v0, %v3264_v4  ;;  %11145 = vmatmul.mubr.msk.bf16.gmra.mrb[28].mxu0 %vm168_vm3, %v4649_v48  ;;  %v3393_v28 = vmax.f32 %v3386_v8, %v3388_v51 }
 0x37d   :  { %v3653_v43 = vadd.f32 %v14358_v35, %v3652_v33  ;;  %v10928_v39 = vpop.f32.mrb[173].mxu1  ;;  %v4920_v32 = vmax.f32 %v4916_v29, %v4918_v5  ;;  %11204 = vmatprep.mubr.msk.bf16.mxu0 %vm12633_vm2, %v12631_v1 }
 0x37e   :  { %v3655_v34 = vpop.f32.mrb[174].mxu1  ;;  %3334 = vst.msk [vmem:[#allocation4 + $0x90] sm:$0xff] %vm3315_vm9, %v3312_v27  ;;  %v3313_v16 = vmax.f32 %v3292_v2, 0.0 }
 0x37f   :  { %v3730_v44 = vmax.f32 %v3653_v43, 0.0  ;;  %v3656_v21 = vadd.f32 %v14358_v35, %v3655_v34  ;;  %v10929_v17 = vpop.f32.mrb[175].mxu1  ;;  %4922 = vst.msk [vmem:[#allocation3] sm:$0xff] %vm376_vm4, %v4920_v32  ;;  %v3239_v57 = vpop.f32.mrb[180].mxu0 }
 0x380   :  { %v4913_v62 = vld [vmem:[#allocation2 + $0x2c] ss:$2 sm:$0x3f]  ;;  %v4915_v31 = vld [vmem:[#allocation2 + $0x2d] ss:$2 sm:$0x3f]  ;;  %v3265_v56 = vadd.f32 %v3239_v57, %v14348_v14 }
 0x381   :  { %v4919_v48 = vmax.f32 %v4913_v62, %v4915_v31  ;;  %3335 = vst.msk [vmem:[#allocation4 + $0x98] sm:$0xff] %vm3315_vm9, %v3313_v16  ;;  %v3731_v22 = vmax.f32 %v3656_v21, 0.0  ;;  %v3390_v37 = vld [vmem:[#allocation4 + $0x7e] ss:$2 sm:$0x3f]  ;;  %v10898_v25 = vpop.f32.mrb[181].mxu0 }
 0x382   :  { %3755 = vst.msk [vmem:[#allocation2 + $0x40] sm:$0xff] %vm376_vm4, %v3730_v44  ;;  %v3392_v60 = vld [vmem:[#allocation4 + $0x7f] ss:$2 sm:$0x3f]  ;;  %v3242_v46 = vpop.f32.mrb[182].mxu0  ;;  %v3293_v42 = vadd.f32 %v14232_v0, %v3265_v56 }
 0x383   :  { %v4921_v40 = vmax.f32 %v4917_v18, %v4919_v48  ;;  %3756 = vst.msk [vmem:[#allocation2 + $0x48] sm:$0xff] %vm376_vm4, %v3731_v22  ;;  %v3394_v15 = vmax.f32 %v3390_v37, %v3392_v60  ;;  %v10899_v36 = vpop.f32.mrb[183].mxu0 }
 0x384   :  { %v3660_v13 = vpop.f32.mrb[176].mxu1  ;;  %v3314_v12 = vmax.f32 %v3293_v42, 0.0 }
 0x385   :  { %4923 = vst.msk [vmem:[#allocation3 + $0x8] sm:$0x3f] %vm1562_vm5, %v4921_v40  ;;  %v3661_v61 = vadd.f32 %v14358_v35, %v3660_v13  ;;  %v10932_v59 = vpop.f32.mrb[177].mxu1  ;;  %v3395_v6 = vmax.f32 %v3393_v28, %v3394_v15  ;;  %v3398_v54 = vld [vmem:[#allocation4 + $0x8c] ss:$2 sm:$0x3f] }
 0x386   :  { %v3663_v14 = vpop.f32.mrb[178].mxu1  ;;  %3337 = vst.msk [vmem:[#allocation4 + $0xa0] sm:$0x3f] %vm3336_vm10, %v3314_v12  ;;  %v3400_v3 = vld [vmem:[#allocation4 + $0x8d] ss:$2 sm:$0x3f] }
 0x387   :  { %v3732_v41 = vmax.f32 %v3661_v61, 0.0  ;;  %v3664_v50 = vadd.f32 %v14358_v35, %v3663_v14  ;;  %v10933_v30 = vpop.f32.mrb[179].mxu1  ;;  %3396 = vst.msk [vmem:[#allocation5 + $0x18] sm:$0x3f] %vm3336_vm10, %v3395_v6  ;;  %v4007_v11 = vpop.f32.mrb[184].mxu0  ;;  %v3405_v47 = vmax.f32 %v3398_v54, %v3400_v3 }
 0x388   :  { %v4008_v52 = vadd.f32 %v14358_v35, %v4007_v11  ;;  %v10974_v58 = vpop.f32.mrb[185].mxu0 }
 0x389   :  { %3757 = vst.msk [vmem:[#allocation2 + $0x50] sm:$0xff] %vm376_vm4, %v3732_v41  ;;  %v3733_v0 = vmax.f32 %v3664_v50, 0.0  ;;  %v4010_v9 = vpop.f32.mrb[186].mxu0  ;;  %v4924_v16 = vld [vmem:[#allocation2 + $0x38] ss:$2 sm:$0xff] }
 0x38a   :  { %v4109_v20 = vmax.f32 %v4008_v52, 0.0  ;;  %v4011_v49 = vadd.f32 %v14358_v35, %v4010_v9  ;;  %v10975_v23 = vpop.f32.mrb[187].mxu0  ;;  %v4926_v44 = vld [vmem:[#allocation2 + $0x39] ss:$2 sm:$0xff] }
 0x38b   :  { %3758 = vst.msk [vmem:[#allocation2 + $0x58] sm:$0xff] %vm376_vm4, %v3733_v0  ;;  %v4932_v60 = vmax.f32 %v4924_v16, %v4926_v44 }
 0x38c   :  { %v3668_v19 = vpop.f32.mrb[180].mxu1  ;;  %4134 = vst.msk [vmem:[#allocation2 + $0xc4] sm:$0xff] %vm376_vm4, %v4109_v20  ;;  %v4110_v63 = vmax.f32 %v4011_v49, 0.0 }
 0x38d   :  { %v3669_v7 = vadd.f32 %v14358_v35, %v3668_v19  ;;  %v10936_v53 = vpop.f32.mrb[181].mxu1  ;;  %v3402_v38 = vld [vmem:[#allocation4 + $0x9a] ss:$2 sm:$0x3f] }
 0x38e   :  { %v3671_v10 = vpop.f32.mrb[182].mxu1  ;;  %4135 = vst.msk [vmem:[#allocation2 + $0xcc] sm:$0xff] %vm376_vm4, %v4110_v63  ;;  %v3404_v5 = vld [vmem:[#allocation4 + $0x9b] ss:$2 sm:$0x3f] }
 0x38f   :  { %v3734_v24 = vmax.f32 %v3669_v7, 0.0  ;;  %v3672_v55 = vadd.f32 %v14358_v35, %v3671_v10  ;;  %v10937_v29 = vpop.f32.mrb[183].mxu1  ;;  %v4015_v26 = vpop.f32.mrb[188].mxu0  ;;  %v3406_v27 = vmax.f32 %v3402_v38, %v3404_v5  ;;  %v12458_v53 = vld [vmem:[%s15788_s3 + $0x18] sm:$0xff]  }
 0x390   :  { %v4016_v45 = vadd.f32 %v14358_v35, %v4015_v26  ;;  %v10978_v33 = vpop.f32.mrb[189].mxu0  ;;  %v4925_v51 = vld [vmem:[#allocation2 + $0x48] ss:$2 sm:$0x3f]  ;;  %11149 = vmatpush3.bf16.msra.mxu1 %v12458_v53 }
 0x391   :  { %3759 = vst.msk [vmem:[#allocation2 + $0x60] sm:$0xff] %vm376_vm4, %v3734_v24  ;;  %v3735_v4 = vmax.f32 %v3672_v55, 0.0  ;;  %v4018_v2 = vpop.f32.mrb[190].mxu0  ;;  %v3407_v8 = vmax.f32 %v3405_v47, %v3406_v27  ;;  %v4927_v18 = vld [vmem:[#allocation2 + $0x49] ss:$2 sm:$0x3f]  ;;  %11150 = vmatprep.subr.bf16.mxu1 %v12631_v1 }
 0x392   :  { %v4111_v43 = vmax.f32 %v4016_v45, 0.0  ;;  %v4019_v39 = vadd.f32 %v14358_v35, %v4018_v2  ;;  %v10979_v32 = vpop.f32.mrb[191].mxu0  ;;  %v4933_v61 = vmax.f32 %v4925_v51, %v4927_v18 }
 0x393   :  { %3760 = vst.msk [vmem:[#allocation2 + $0x68] sm:$0xff] %vm376_vm4, %v3735_v4 }
 0x394   :  { %v3676_v34 = vpop.f32.mrb[184].mxu1  ;;  %4136 = vst.msk [vmem:[#allocation2 + $0xd4] sm:$0xff] %vm376_vm4, %v4111_v43  ;;  %v4112_v62 = vmax.f32 %v4019_v39, 0.0 }
 0x395   :  { %v3677_v21 = vadd.f32 %v14358_v35, %v3676_v34  ;;  %v10940_v17 = vpop.f32.mrb[185].mxu1  ;;  %3408 = vst.msk [vmem:[#allocation5 + $0x1e] sm:$0x3f] %vm3336_vm10, %v3407_v8 }
 0x396   :  { %v3679_v31 = vpop.f32.mrb[186].mxu1  ;;  %4137 = vst.msk [vmem:[#allocation2 + $0xdc] sm:$0xff] %vm376_vm4, %v4112_v62 }
 0x397   :  { %v3736_v48 = vmax.f32 %v3677_v21, 0.0  ;;  %v3680_v22 = vadd.f32 %v14358_v35, %v3679_v31  ;;  %v10941_v57 = vpop.f32.mrb[187].mxu1  ;;  %v4023_v25 = vpop.f32.mrb[192].mxu0 }
 0x398   :  { %v4928_v37 = vld [vmem:[#allocation2 + $0x54] ss:$2 sm:$0xff]  ;;  %v4930_v56 = vld [vmem:[#allocation2 + $0x55] ss:$2 sm:$0xff]  ;;  %v4024_v28 = vadd.f32 %v14358_v35, %v4023_v25  ;;  %v10982_v15 = vpop.f32.mrb[193].mxu0 }
 0x399   :  { %v4934_v40 = vmax.f32 %v4928_v37, %v4930_v56  ;;  %3761 = vst.msk [vmem:[#allocation2 + $0x70] sm:$0xff] %vm376_vm4, %v3736_v48  ;;  %v3737_v46 = vmax.f32 %v3680_v22, 0.0  ;;  %v4026_v12 = vpop.f32.mrb[194].mxu0 }
 0x39a   :  { %v4929_v42 = vld [vmem:[#allocation2 + $0x64] ss:$2 sm:$0x3f]  ;;  %v4931_v36 = vld [vmem:[#allocation2 + $0x65] ss:$2 sm:$0x3f]  ;;  %v4027_v14 = vadd.f32 %v14358_v35, %v4026_v12 }
 0x39b   :  { %v4936_v13 = vmax.f32 %v4932_v60, %v4934_v40  ;;  %v4935_v59 = vmax.f32 %v4929_v42, %v4931_v36  ;;  %3762 = vst.msk [vmem:[#allocation2 + $0x78] sm:$0xff] %vm376_vm4, %v3737_v46  ;;  %v4113_v6 = vmax.f32 %v4024_v28, 0.0  ;;  %v10983_v41 = vpop.f32.mrb[195].mxu0 }
 0x39c   :  { %v3684_v50 = vpop.f32.mrb[188].mxu1  ;;  %v4114_v52 = vmax.f32 %v4027_v14, 0.0 }
 0x39d   :  { %4938 = vst.msk [vmem:[#allocation3 + $0xe] sm:$0xff] %vm376_vm4, %v4936_v13  ;;  %v4937_v30 = vmax.f32 %v4933_v61, %v4935_v59  ;;  %4138 = vst.msk [vmem:[#allocation2 + $0xe4] sm:$0xff] %vm376_vm4, %v4113_v6  ;;  %v3685_v11 = vadd.f32 %v14358_v35, %v3684_v50  ;;  %v10944_v0 = vpop.f32.mrb[189].mxu1  ;;  %v12459_v50 = vld [vmem:[%s15788_s3 + $0x20] sm:$0xff]  }
 0x39e   :  { %v3687_v58 = vpop.f32.mrb[190].mxu1  ;;  %4139 = vst.msk [vmem:[#allocation2 + $0xec] sm:$0xff] %vm376_vm4, %v4114_v52  ;;  %11151 = vmatpush3.bf16.msra.mxu1 %v12459_v50 }
 0x39f   :  { %4939 = vst.msk [vmem:[#allocation3 + $0x16] sm:$0x3f] %vm1562_vm5, %v4937_v30  ;;  %v3738_v9 = vmax.f32 %v3685_v11, 0.0  ;;  %v3688_v20 = vadd.f32 %v14358_v35, %v3687_v58  ;;  %v10945_v49 = vpop.f32.mrb[191].mxu1  ;;  %v4031_v23 = vpop.f32.mrb[196].mxu0  ;;  %11152 = vmatprep.subr.bf16.mxu1 %v12631_v1 }
 0x3a0   :  { %v4032_v63 = vadd.f32 %v14358_v35, %v4031_v23  ;;  %v10986_v7 = vpop.f32.mrb[197].mxu0 }
 0x3a1   :  { %3763 = vst.msk [vmem:[#allocation2 + $0x80] sm:$0xff] %vm376_vm4, %v3738_v9  ;;  %v3739_v19 = vmax.f32 %v3688_v20, 0.0  ;;  %v4034_v54 = vpop.f32.mrb[198].mxu0 }
 0x3a2   :  { %v4115_v10 = vmax.f32 %v4032_v63, 0.0  ;;  %v4035_v3 = vadd.f32 %v14358_v35, %v4034_v54  ;;  %v10987_v24 = vpop.f32.mrb[199].mxu0  ;;  %v4940_v51 = vld [vmem:[#allocation2 + $0x70] ss:$2 sm:$0xff]  ;;  %v4942_v31 = vld [vmem:[#allocation2 + $0x71] ss:$2 sm:$0xff] }
 0x3a3   :  { %3764 = vst.msk [vmem:[#allocation2 + $0x88] sm:$0xff] %vm376_vm4, %v3739_v19  ;;  %v4948_v42 = vmax.f32 %v4940_v51, %v4942_v31 }
 0x3a4   :  { %v3692_v55 = vpop.f32.mrb[192].mxu1  ;;  %4140 = vst.msk [vmem:[#allocation2 + $0xf4] sm:$0xff] %vm376_vm4, %v4115_v10  ;;  %v4116_v29 = vmax.f32 %v4035_v3, 0.0  ;;  %v12460_v10 = vld [vmem:[%s15788_s3 + $0x28] sm:$0xff]  }
 0x3a5   :  { %v3693_v38 = vadd.f32 %v14358_v35, %v3692_v55  ;;  %v10948_v4 = vpop.f32.mrb[193].mxu1  ;;  %v4972_v37 = vld [vmem:[#allocation2 + $0xe0] ss:$2 sm:$0xff]  ;;  %v4974_v56 = vld [vmem:[#allocation2 + $0xe1] ss:$2 sm:$0xff]  ;;  %11153 = vmatpush3.bf16.msra.mxu1 %v12460_v10 }
 0x3a6   :  { %v3695_v26 = vpop.f32.mrb[194].mxu1  ;;  %4141 = vst.msk [vmem:[#allocation2 + $0xfc] sm:$0xff] %vm376_vm4, %v4116_v29  ;;  %v4980_v14 = vmax.f32 %v4972_v37, %v4974_v56  ;;  %11248 = vmatprep.subr.bf16.mxu1 %v12631_v1 }
 0x3a7   :  { %v3740_v5 = vmax.f32 %v3693_v38, 0.0  ;;  %v3696_v45 = vadd.f32 %v14358_v35, %v3695_v26  ;;  %v10949_v33 = vpop.f32.mrb[195].mxu1  ;;  %v4039_v47 = vpop.f32.mrb[200].mxu0 }
 0x3a8   :  { %v4040_v2 = vadd.f32 %v14358_v35, %v4039_v47  ;;  %v10990_v43 = vpop.f32.mrb[201].mxu0  ;;  %v4960_v47 = vld [vmem:[#allocation2 + $0xc4] ss:$2 sm:$0xff] }
 0x3a9   :  { %3765 = vst.msk [vmem:[#allocation2 + $0x90] sm:$0xff] %vm376_vm4, %v3740_v5  ;;  %v3741_v27 = vmax.f32 %v3696_v45, 0.0  ;;  %v4042_v39 = vpop.f32.mrb[202].mxu0 }
 0x3aa   :  { %v4117_v32 = vmax.f32 %v4040_v2, 0.0  ;;  %v4043_v34 = vadd.f32 %v14358_v35, %v4042_v39  ;;  %v10991_v8 = vpop.f32.mrb[203].mxu0  ;;  %v4941_v9 = vld [vmem:[#allocation2 + $0x80] ss:$2 sm:$0x3f] }
 0x3ab   :  { %3766 = vst.msk [vmem:[#allocation2 + $0x98] sm:$0xff] %vm376_vm4, %v3741_v27  ;;  %v4943_v23 = vld [vmem:[#allocation2 + $0x81] ss:$2 sm:$0x3f] }
 0x3ac   :  { %4142 = vst.msk [vmem:[#allocation2 + $0x104] sm:$0xff] %vm376_vm4, %v4117_v32  ;;  %v4118_v16 = vmax.f32 %v4043_v34, 0.0  ;;  %v3700_v44 = vpop.f32.mrb[196].mxu1  ;;  %v4973_v53 = vld [vmem:[#allocation2 + $0xf0] ss:$2 sm:$0x3f]  ;;  %v4949_v38 = vmax.f32 %v4941_v9, %v4943_v23 }
 0x3ad   :  { %v3701_v21 = vadd.f32 %v14358_v35, %v3700_v44  ;;  %v10952_v17 = vpop.f32.mrb[197].mxu1  ;;  %v4975_v29 = vld [vmem:[#allocation2 + $0xf1] ss:$2 sm:$0x3f] }
 0x3ae   :  { %4143 = vst.msk [vmem:[#allocation2 + $0x10c] sm:$0xff] %vm376_vm4, %v4118_v16  ;;  %v3703_v62 = vpop.f32.mrb[198].mxu1  ;;  %v4962_v32 = vld [vmem:[#allocation2 + $0xc5] ss:$2 sm:$0xff]  ;;  %v4981_v34 = vmax.f32 %v4973_v53, %v4975_v29 }
 0x3af   :  { %v3742_v18 = vmax.f32 %v3701_v21, 0.0  ;;  %v3704_v48 = vadd.f32 %v14358_v35, %v3703_v62  ;;  %v10953_v22 = vpop.f32.mrb[199].mxu1  ;;  %v4047_v57 = vpop.f32.mrb[204].mxu0  ;;  %v5443_v21 = vld [vmem:[#allocation3 + $0xf] sm:$0xff] }
 0x3b0   :  { %v4048_v25 = vadd.f32 %v14358_v35, %v4047_v57  ;;  %v10994_v60 = vpop.f32.mrb[205].mxu0 }
 0x3b1   :  { %3767 = vst.msk [vmem:[#allocation2 + $0xa0] sm:$0xff] %vm376_vm4, %v3742_v18  ;;  %v3743_v28 = vmax.f32 %v3704_v48, 0.0  ;;  %v4050_v15 = vpop.f32.mrb[206].mxu0  ;;  %v5134_v18 = vld [vmem:[#allocation3 + $0x10] sm:$0xff] }
 0x3b2   :  { %v4944_v40 = vld [vmem:[#allocation2 + $0x8c] ss:$2 sm:$0xff]  ;;  %v4946_v46 = vld [vmem:[#allocation2 + $0x8d] ss:$2 sm:$0xff]  ;;  %v4119_v13 = vmax.f32 %v4048_v25, 0.0  ;;  %v4051_v61 = vadd.f32 %v14358_v35, %v4050_v15  ;;  %v10995_v59 = vpop.f32.mrb[207].mxu0 }
 0x3b3   :  { %v4950_v36 = vmax.f32 %v4944_v40, %v4946_v46  ;;  %v4976_v6 = vld [vmem:[#allocation2 + $0xfc] ss:$2 sm:$0xff]  ;;  %v4978_v12 = vld [vmem:[#allocation2 + $0xfd] ss:$2 sm:$0xff]  ;;  %3768 = vst.msk [vmem:[#allocation2 + $0xa8] sm:$0xff] %vm376_vm4, %v3743_v28  ;;  %v4966_v28 = vmax.f32 %v4960_v47, %v4962_v32 }
 0x3b4   :  { %v3708_v41 = vpop.f32.mrb[200].mxu1  ;;  %v4982_v11 = vmax.f32 %v4976_v6, %v4978_v12  ;;  %4144 = vst.msk [vmem:[#allocation2 + $0x114] sm:$0xff] %vm376_vm4, %v4119_v13  ;;  %v4120_v0 = vmax.f32 %v4051_v61, 0.0 }
 0x3b5   :  { %v4952_v30 = vmax.f32 %v4948_v42, %v4950_v36  ;;  %v3709_v52 = vadd.f32 %v14358_v35, %v3708_v41  ;;  %v10956_v58 = vpop.f32.mrb[201].mxu1 }
 0x3b6   :  { %v3711_v20 = vpop.f32.mrb[202].mxu1  ;;  %v4984_v49 = vmax.f32 %v4980_v14, %v4982_v11  ;;  %4145 = vst.msk [vmem:[#allocation2 + $0x11c] sm:$0xff] %vm376_vm4, %v4120_v0  ;;  %v4961_v0 = vld [vmem:[#allocation2 + $0xd4] ss:$2 sm:$0x3f] }
 0x3b7   :  { %4954 = vst.msk [vmem:[#allocation3 + $0x1c] sm:$0xff] %vm376_vm4, %v4952_v30  ;;  %v3744_v19 = vmax.f32 %v3709_v52, 0.0  ;;  %v3712_v63 = vadd.f32 %v14358_v35, %v3711_v20  ;;  %v10957_v7 = vpop.f32.mrb[203].mxu1  ;;  %v4055_v54 = vpop.f32.mrb[208].mxu0 }
 0x3b8   :  { %4986 = vst.msk [vmem:[#allocation3 + $0x38] sm:$0xff] %vm376_vm4, %v4984_v49  ;;  %v4945_v3 = vld [vmem:[#allocation2 + $0x9c] ss:$2 sm:$0x3f]  ;;  %v4056_v55 = vadd.f32 %v14358_v35, %v4055_v54  ;;  %v10998_v5 = vpop.f32.mrb[209].mxu0 }
 0x3b9   :  { %v4947_v24 = vld [vmem:[#allocation2 + $0x9d] ss:$2 sm:$0x3f]  ;;  %3769 = vst.msk [vmem:[#allocation2 + $0xb0] sm:$0xff] %vm376_vm4, %v3744_v19  ;;  %v3745_v26 = vmax.f32 %v3712_v63, 0.0  ;;  %v4058_v33 = vpop.f32.mrb[210].mxu0 }
 0x3ba   :  { %v4951_v4 = vmax.f32 %v4945_v3, %v4947_v24  ;;  %v4121_v45 = vmax.f32 %v4056_v55, 0.0  ;;  %v4059_v39 = vadd.f32 %v14358_v35, %v4058_v33  ;;  %v10999_v16 = vpop.f32.mrb[211].mxu0  ;;  %v4963_v52 = vld [vmem:[#allocation2 + $0xd5] ss:$2 sm:$0x3f] }
 0x3bb   :  { %v4977_v2 = vld [vmem:[#allocation2 + $0x10c] ss:$2 sm:$0x3f]  ;;  %v4979_v43 = vld [vmem:[#allocation2 + $0x10d] ss:$2 sm:$0x3f]  ;;  %v4967_v53 = vmax.f32 %v4961_v0, %v4963_v52 }
 0x3bc   :  { %v4953_v27 = vmax.f32 %v4949_v38, %v4951_v4  ;;  %3770 = vst.msk [vmem:[#allocation2 + $0xb8] sm:$0xff] %vm376_vm4, %v3745_v26  ;;  %v4983_v8 = vmax.f32 %v4977_v2, %v4979_v43  ;;  %4146 = vst.msk [vmem:[#allocation2 + $0x124] sm:$0xff] %vm376_vm4, %v4121_v45  ;;  %v3716_v44 = vpop.f32.mrb[204].mxu1  ;;  %v4122_v17 = vmax.f32 %v4059_v39, 0.0 }
 0x3bd   :  { %v3717_v51 = vadd.f32 %v14358_v35, %v3716_v44  ;;  %v10960_v62 = vpop.f32.mrb[205].mxu1 }
 0x3be   :  { %4955 = vst.msk [vmem:[#allocation3 + $0x24] sm:$0x3f] %vm1562_vm5, %v4953_v27  ;;  %v5444_v31 = vld [vmem:[#allocation3 + $0x17] sm:$0xff]  ;;  %v4985_v22 = vmax.f32 %v4981_v34, %v4983_v8  ;;  %v3719_v57 = vpop.f32.mrb[206].mxu1 }
 0x3bf   :  { %v5135_v48 = vld [vmem:[#allocation3 + $0x18] sm:$0xff]  ;;  %v12000_v37 = vpack.i.bf16 %v5444_v31, %v5443_v21  ;;  %4147 = vst.msk [vmem:[#allocation2 + $0x12c] sm:$0xff] %vm376_vm4, %v4122_v17  ;;  %v3746_v40 = vmax.f32 %v3717_v51, 0.0  ;;  %v10961_v46 = vpop.f32.mrb[207].mxu1  ;;  %v4063_v42 = vpop.f32.mrb[212].mxu0 }
 0x3c0   :  { %v12005_v56 = vpack.i.bf16 %v5135_v48, %v5134_v18  ;;  %v4956_v25 = vld [vmem:[#allocation2 + $0xa8] ss:$2 sm:$0xff]  ;;  %v4958_v60 = vld [vmem:[#allocation2 + $0xa9] ss:$2 sm:$0xff]  ;;  %4987 = vst.msk [vmem:[#allocation3 + $0x40] sm:$0x3f] %vm1562_vm5, %v4985_v22  ;;  %v4064_v36 = vadd.f32 %v14358_v35, %v4063_v42 }
 0x3c1   :  { %v4964_v15 = vmax.f32 %v4956_v25, %v4958_v60  ;;  %12001 = vrot.lane.b32.xlu0 %v12000_v37, %s12634_s14  ;;  %3771 = vst.msk [vmem:[#allocation2 + $0xc0] sm:$0xf] %vm401_vm6, %v3746_v40  ;;  %v11002_v13 = vpop.f32.mrb[213].mxu0 }
 0x3c2   :  { %12006 = vrot.lane.b32.xlu1 %v12005_v56, %s12635_s15  ;;  %v4066_v59 = vpop.f32.mrb[214].mxu0  ;;  %v4123_v6 = vmax.f32 %v4064_v36, 0.0  ;;  %v5139_v36 = vld [vmem:[#allocation3 + $0x38] sm:$0xff] }
 0x3c3   :  { %v4968_v61 = vmax.f32 %v4964_v15, %v4966_v28  ;;  %v4067_v12 = vadd.f32 %v14358_v35, %v4066_v59  ;;  %v11003_v14 = vpop.f32.mrb[215].mxu0  ;;  %v4988_v27 = vld [vmem:[#allocation2 + $0x118] ss:$2 sm:$0xff]  ;;  %v4990_v2 = vld [vmem:[#allocation2 + $0x119] ss:$2 sm:$0xff] }
 0x3c4   :  { %v4369_v41 = vpop.f32.mrb[208].mxu1  ;;  %4148 = vst.msk [vmem:[#allocation2 + $0x134] sm:$0xff] %vm376_vm4, %v4123_v6  ;;  %v4996_v31 = vmax.f32 %v4988_v27, %v4990_v2 }
 0x3c5   :  { %4970 = vst.msk [vmem:[#allocation3 + $0x2a] sm:$0xff] %vm376_vm4, %v4968_v61  ;;  %v4124_v50 = vmax.f32 %v4067_v12, 0.0  ;;  %v4370_v30 = vadd.f32 %v14358_v35, %v4369_v41  ;;  %v11036_v11 = vpop.f32.mrb[209].mxu1  ;;  %v5445_v29 = vld [vmem:[#allocation3 + $0x1f] sm:$0xff] }
 0x3c6   :  { %v4372_v9 = vpop.f32.mrb[210].mxu1  ;;  %v5136_v33 = vld [vmem:[#allocation3 + $0x20] sm:$0xff] }
 0x3c7   :  { %4149 = vst.msk [vmem:[#allocation2 + $0x13c] sm:$0xff] %vm376_vm4, %v4124_v50  ;;  %v4471_v58 = vmax.f32 %v4370_v30, 0.0  ;;  %v4071_v20 = vpop.f32.mrb[216].mxu0  ;;  %v4373_v19 = vadd.f32 %v14358_v35, %v4372_v9  ;;  %v11037_v54 = vpop.f32.mrb[211].mxu1 }
 0x3c8   :  { %v4957_v49 = vld [vmem:[#allocation2 + $0xb8] ss:$2 sm:$0x3f]  ;;  %v4959_v23 = vld [vmem:[#allocation2 + $0xb9] ss:$2 sm:$0x3f]  ;;  %v4072_v63 = vadd.f32 %v14358_v35, %v4071_v20 }
 0x3c9   :  { %v4965_v7 = vmax.f32 %v4957_v49, %v4959_v23  ;;  %4496 = vst.msk [vmem:[#allocation2 + $0x188] sm:$0xff] %vm376_vm4, %v4471_v58  ;;  %v11006_v10 = vpop.f32.mrb[217].mxu0  ;;  %v4472_v3 = vmax.f32 %v4373_v19, 0.0  ;;  %v4989_v60 = vld [vmem:[#allocation2 + $0x128] ss:$2 sm:$0x3f] }
 0x3ca   :  { %v4125_v24 = vmax.f32 %v4072_v63, 0.0  ;;  %v4074_v55 = vpop.f32.mrb[218].mxu0  ;;  %v4991_v15 = vld [vmem:[#allocation2 + $0x129] ss:$2 sm:$0x3f] }
 0x3cb   :  { %v4969_v38 = vmax.f32 %v4965_v7, %v4967_v53  ;;  %v4075_v4 = vadd.f32 %v14358_v35, %v4074_v55  ;;  %v11007_v26 = vpop.f32.mrb[219].mxu0  ;;  %4497 = vst.msk [vmem:[#allocation2 + $0x190] sm:$0xff] %vm376_vm4, %v4472_v3  ;;  %v4997_v58 = vmax.f32 %v4989_v60, %v4991_v15 }
 0x3cc   :  { %v4377_v5 = vpop.f32.mrb[212].mxu1  ;;  %v5446_v45 = vld [vmem:[#allocation3 + $0x27] sm:$0xff]  ;;  %4150 = vst.msk [vmem:[#allocation2 + $0x144] sm:$0xff] %vm376_vm4, %v4125_v24 }
 0x3cd   :  { %v5137_v47 = vld [vmem:[#allocation3 + $0x28] sm:$0xff]  ;;  %v4378_v43 = vadd.f32 %v14358_v35, %v4377_v5  ;;  %v11040_v39 = vpop.f32.mrb[213].mxu1  ;;  %v12010_v32 = vpack.i.bf16 %v5446_v45, %v5445_v29  ;;  %4971 = vst.msk [vmem:[#allocation3 + $0x32] sm:$0x3f] %vm1562_vm5, %v4969_v38  ;;  %v4126_v8 = vmax.f32 %v4075_v4, 0.0 }
 0x3ce   :  { %v12015_v34 = vpack.i.bf16 %v5137_v47, %v5136_v33  ;;  %v4380_v16 = vpop.f32.mrb[214].mxu1  ;;  %v4992_v44 = vld [vmem:[#allocation2 + $0x134] ss:$2 sm:$0xff]  ;;  %v4994_v21 = vld [vmem:[#allocation2 + $0x135] ss:$2 sm:$0xff] }
 0x3cf   :  { %v4473_v17 = vmax.f32 %v4378_v43, 0.0  ;;  %v4381_v51 = vadd.f32 %v14358_v35, %v4380_v16  ;;  %v11041_v62 = vpop.f32.mrb[215].mxu1  ;;  %12011 = vrot.lane.b32.xlu0 %v12010_v32, %s12634_s14  ;;  %v4998_v18 = vmax.f32 %v4992_v44, %v4994_v21  ;;  %4151 = vst.msk [vmem:[#allocation2 + $0x14c] sm:$0xff] %vm376_vm4, %v4126_v8  ;;  %v4079_v48 = vpop.f32.mrb[220].mxu0  ;;  %v14573_v38 = vld [vmem:[%s15787_s2] ss:$0 sm:$0xff] }
 0x3d0   :  { %12016 = vrot.lane.b32.xlu1 %v12015_v34, %s12635_s15  ;;  %v4080_v57 = vadd.f32 %v14358_v35, %v4079_v48  ;;  %v11010_v37 = vpop.f32.mrb[221].mxu0 }
 0x3d1   :  { %4498 = vst.msk [vmem:[#allocation2 + $0x198] sm:$0xff] %vm376_vm4, %v4473_v17  ;;  %v4474_v22 = vmax.f32 %v4381_v51, 0.0  ;;  %v5000_v56 = vmax.f32 %v4996_v31, %v4998_v18  ;;  %v4082_v25 = vpop.f32.mrb[222].mxu0 }
 0x3d2   :  { %v4127_v40 = vmax.f32 %v4080_v57, 0.0  ;;  %v4083_v46 = vadd.f32 %v14358_v35, %v4082_v25  ;;  %v11011_v28 = vpop.f32.mrb[223].mxu0  ;;  %v5020_v47 = vld [vmem:[#allocation2 + $0x188] ss:$2 sm:$0xff]  ;;  %v5022_v27 = vld [vmem:[#allocation2 + $0x189] ss:$2 sm:$0xff] }
 0x3d3   :  { %4499 = vst.msk [vmem:[#allocation2 + $0x1a0] sm:$0xff] %vm376_vm4, %v4474_v22  ;;  %5002 = vst.msk [vmem:[#allocation3 + $0x46] sm:$0xff] %vm376_vm4, %v5000_v56  ;;  %v5028_v21 = vmax.f32 %v5020_v47, %v5022_v27 }
 0x3d4   :  { %v4385_v42 = vpop.f32.mrb[216].mxu1  ;;  %4152 = vst.msk [vmem:[#allocation2 + $0x154] sm:$0xff] %vm376_vm4, %v4127_v40  ;;  %v4128_v13 = vmax.f32 %v4083_v46, 0.0  ;;  %v5447_v6 = vld [vmem:[#allocation3 + $0x2f] sm:$0xff]  ;;  %v5448_v12 = vld [vmem:[#allocation3 + $0x37] sm:$0xff] }
 0x3d5   :  { %v4386_v61 = vadd.f32 %v14358_v35, %v4385_v42  ;;  %v11044_v59 = vpop.f32.mrb[217].mxu1  ;;  %v5138_v14 = vld [vmem:[#allocation3 + $0x30] sm:$0xff]  ;;  %v12020_v50 = vpack.i.bf16 %v5448_v12, %v5447_v6 }
 0x3d6   :  { %v4388_v41 = vpop.f32.mrb[218].mxu1  ;;  %v12025_v30 = vpack.i.bf16 %v5139_v36, %v5138_v14  ;;  %v4993_v11 = vld [vmem:[#allocation2 + $0x144] ss:$2 sm:$0x3f]  ;;  %4153 = vst.msk [vmem:[#allocation2 + $0x15c] sm:$0xff] %vm376_vm4, %v4128_v13 }
 0x3d7   :  { %v4995_v0 = vld [vmem:[#allocation2 + $0x145] ss:$2 sm:$0x3f]  ;;  %v4389_v52 = vadd.f32 %v14358_v35, %v4388_v41  ;;  %v4475_v20 = vmax.f32 %v4386_v61, 0.0  ;;  %v11045_v49 = vpop.f32.mrb[219].mxu1  ;;  %12021 = vrot.lane.b32.xlu0 %v12020_v50, %s12634_s14  ;;  %v4087_v23 = vpop.f32.mrb[224].mxu0 }
 0x3d8   :  { %v4999_v9 = vmax.f32 %v4993_v11, %v4995_v0  ;;  %12026 = vrot.lane.b32.xlu1 %v12025_v30, %s12635_s15  ;;  %v4088_v63 = vadd.f32 %v14358_v35, %v4087_v23  ;;  %v11014_v7 = vpop.f32.mrb[225].mxu0  ;;  %v12461_v42 = vld [vmem:[%s15788_s3] sm:$0xff]  }
 0x3d9   :  { %v4476_v19 = vmax.f32 %v4389_v52, 0.0  ;;  %4500 = vst.msk [vmem:[#allocation2 + $0x1a8] sm:$0xff] %vm376_vm4, %v4475_v20  ;;  %v4090_v54 = vpop.f32.mrb[226].mxu0  ;;  %11199 = vmatpush3.bf16.msra.mxu0 %v12461_v42 }
 0x3da   :  { %v5001_v53 = vmax.f32 %v4997_v58, %v4999_v9  ;;  %v4129_v10 = vmax.f32 %v4088_v63, 0.0  ;;  %v4091_v3 = vadd.f32 %v14358_v35, %v4090_v54  ;;  %v11015_v24 = vpop.f32.mrb[227].mxu0  ;;  %v5449_v44 = vld [vmem:[#allocation3 + $0x3f] sm:$0xff]  ;;  %v5021_v25 = vld [vmem:[#allocation2 + $0x198] ss:$2 sm:$0x3f]  ;;  %11200 = vmatprep.subr.bf16.mxu0 %v12631_v1 }
 0x3db   :  { %4501 = vst.msk [vmem:[#allocation2 + $0x1b0] sm:$0xff] %vm376_vm4, %v4476_v19  ;;  %v5140_v48 = vld [vmem:[#allocation3 + $0x40] sm:$0xff]  ;;  %v5023_v46 = vld [vmem:[#allocation2 + $0x199] ss:$2 sm:$0x3f] }
 0x3dc   :  { %5003 = vst.msk [vmem:[#allocation3 + $0x4e] sm:$0x3f] %vm1562_vm5, %v5001_v53  ;;  %v4393_v55 = vpop.f32.mrb[220].mxu1  ;;  %v4130_v29 = vmax.f32 %v4091_v3, 0.0  ;;  %v5029_v6 = vmax.f32 %v5021_v25, %v5023_v46  ;;  %v14602_v24 = vld [vmem:[%s15787_s2] ss:$0 sm:$0xff] }
 0x3dd   :  { %4154 = vst.msk [vmem:[#allocation2 + $0x164] sm:$0xff] %vm376_vm4, %v4129_v10  ;;  %v4394_v4 = vadd.f32 %v14573_v38, %v4393_v55  ;;  %v11048_v26 = vpop.f32.mrb[221].mxu1  ;;  %v5004_v30 = vld [vmem:[#allocation2 + $0x150] ss:$2 sm:$0xff]  ;;  %v5006_v11 = vld [vmem:[#allocation2 + $0x151] ss:$2 sm:$0xff] }
 0x3de   :  { %v4396_v5 = vpop.f32.mrb[222].mxu1  ;;  %4155 = vst.msk [vmem:[#allocation2 + $0x16c] sm:$0xff] %vm376_vm4, %v4130_v29  ;;  %v5012_v7 = vmax.f32 %v5004_v30, %v5006_v11 }
 0x3df   :  { %v4477_v45 = vmax.f32 %v4394_v4, 0.0  ;;  %v4397_v35 = vadd.f32 %v14573_v38, %v4396_v5  ;;  %v11049_v33 = vpop.f32.mrb[223].mxu1  ;;  %v4095_v2 = vpop.f32.mrb[228].mxu0 }
 0x3e0   :  { %v4096_v39 = vadd.f32 %v14573_v38, %v4095_v2  ;;  %v11018_v32 = vpop.f32.mrb[229].mxu0 }
 0x3e1   :  { %4502 = vst.msk [vmem:[#allocation2 + $0x1b8] sm:$0xff] %vm376_vm4, %v4477_v45  ;;  %v4478_v43 = vmax.f32 %v4397_v35, 0.0  ;;  %v4098_v16 = vpop.f32.mrb[230].mxu0 }
 0x3e2   :  { %v5024_v34 = vld [vmem:[#allocation2 + $0x1a4] ss:$2 sm:$0xff]  ;;  %v5026_v8 = vld [vmem:[#allocation2 + $0x1a5] ss:$2 sm:$0xff]  ;;  %v4131_v51 = vmax.f32 %v4096_v39, 0.0  ;;  %v4099_v62 = vadd.f32 %v14573_v38, %v4098_v16  ;;  %v11019_v31 = vpop.f32.mrb[231].mxu0 }
 0x3e3   :  { %v5030_v17 = vmax.f32 %v5024_v34, %v5026_v8  ;;  %4503 = vst.msk [vmem:[#allocation2 + $0x1c0] sm:$0xff] %vm376_vm4, %v4478_v43  ;;  %v5450_v18 = vld [vmem:[#allocation3 + $0x47] sm:$0xff] }
 0x3e4   :  { %v5141_v22 = vld [vmem:[#allocation3 + $0x48] sm:$0xff]  ;;  %v12030_v57 = vpack.i.bf16 %v5450_v18, %v5449_v44  ;;  %4156 = vst.msk [vmem:[#allocation2 + $0x174] sm:$0xff] %vm376_vm4, %v4131_v51  ;;  %v4132_v60 = vmax.f32 %v4099_v62, 0.0  ;;  %v4401_v40 = vpop.f32.mrb[224].mxu1 }
 0x3e5   :  { %v12035_v37 = vpack.i.bf16 %v5141_v22, %v5140_v48  ;;  %v5032_v56 = vmax.f32 %v5028_v21, %v5030_v17  ;;  %v4402_v28 = vadd.f32 %v14573_v38, %v4401_v40  ;;  %v11052_v15 = vpop.f32.mrb[225].mxu1  ;;  %v5005_v47 = vld [vmem:[#allocation2 + $0x160] ss:$2 sm:$0x3f] }
 0x3e6   :  { %12031 = vrot.lane.b32.xlu0 %v12030_v57, %s12634_s14  ;;  %4157 = vst.msk [vmem:[#allocation2 + $0x17c] sm:$0xff] %vm376_vm4, %v4132_v60  ;;  %v4404_v36 = vpop.f32.mrb[226].mxu1  ;;  %v5007_v43 = vld [vmem:[#allocation2 + $0x161] ss:$2 sm:$0x3f] }
 0x3e7   :  { %12036 = vrot.lane.b32.xlu1 %v12035_v37, %s12635_s15  ;;  %5034 = vst.msk [vmem:[#allocation3 + $0x62] sm:$0xff] %vm376_vm4, %v5032_v56  ;;  %v4405_v59 = vadd.f32 %v14573_v38, %v4404_v36  ;;  %v4479_v14 = vmax.f32 %v4402_v28, 0.0  ;;  %v11053_v41 = vpop.f32.mrb[227].mxu1  ;;  %v4103_v50 = vpop.f32.mrb[232].mxu0  ;;  %v5013_v17 = vmax.f32 %v5005_v47, %v5007_v43 }
 0x3e8   :  { %v5025_v13 = vld [vmem:[#allocation2 + $0x1b4] ss:$2 sm:$0x3f]  ;;  %v5027_v61 = vld [vmem:[#allocation2 + $0x1b5] ss:$2 sm:$0x3f]  ;;  %v4104_v52 = vadd.f32 %v14573_v38, %v4103_v50 }
 0x3e9   :  { %v5031_v12 = vmax.f32 %v5025_v13, %v5027_v61  ;;  %v4480_v0 = vmax.f32 %v4405_v59, 0.0  ;;  %v11022_v58 = vpop.f32.mrb[233].mxu0  ;;  %4504 = vst.msk [vmem:[#allocation2 + $0x1c8] sm:$0xff] %vm376_vm4, %v4479_v14 }
 0x3ea   :  { %v4106_v20 = vpop.f32.mrb[234].mxu0  ;;  %v4133_v19 = vmax.f32 %v4104_v52, 0.0 }
 0x3eb   :  { %v5033_v9 = vmax.f32 %v5029_v6, %v5031_v12  ;;  %v5008_v49 = vld [vmem:[#allocation2 + $0x16c] ss:$2 sm:$0xff]  ;;  %v5010_v23 = vld [vmem:[#allocation2 + $0x16d] ss:$2 sm:$0xff]  ;;  %4505 = vst.msk [vmem:[#allocation2 + $0x1d0] sm:$0xff] %vm376_vm4, %v4480_v0  ;;  %v11023_v63 = vpop.f32.mrb[235].mxu0 }
 0x3ec   :  { %v5014_v53 = vmax.f32 %v5008_v49, %v5010_v23  ;;  %v4409_v54 = vpop.f32.mrb[228].mxu1  ;;  %4158 = vst.msk [vmem:[#allocation2 + $0x184] sm:$0xf] %vm401_vm6, %v4133_v19 }
 0x3ed   :  { %5035 = vst.msk [vmem:[#allocation3 + $0x6a] sm:$0x3f] %vm1562_vm5, %v5033_v9  ;;  %v4410_v10 = vadd.f32 %v14573_v38, %v4409_v54  ;;  %v11056_v3 = vpop.f32.mrb[229].mxu1 }
 0x3ee   :  { %v5016_v55 = vmax.f32 %v5012_v7, %v5014_v53  ;;  %v4412_v29 = vpop.f32.mrb[230].mxu1 }
 0x3ef   :  { %v4481_v4 = vmax.f32 %v4410_v10, 0.0  ;;  %v4413_v26 = vadd.f32 %v14573_v38, %v4412_v29  ;;  %v11057_v5 = vpop.f32.mrb[231].mxu1  ;;  %v4756_v45 = vpop.f32.mrb[236].mxu0 }
 0x3f0   :  { %5018 = vst.msk [vmem:[#allocation3 + $0x54] sm:$0xff] %vm376_vm4, %v5016_v55  ;;  %v4757_v35 = vadd.f32 %v14602_v24, %v4756_v45  ;;  %v11098_v33 = vpop.f32.mrb[237].mxu0  ;;  %v5036_v59 = vld [vmem:[#allocation2 + $0x1c0] ss:$2 sm:$0xff]  ;;  %v5038_v6 = vld [vmem:[#allocation2 + $0x1c1] ss:$2 sm:$0xff] }
 0x3f1   :  { %4506 = vst.msk [vmem:[#allocation2 + $0x1d8] sm:$0xff] %vm376_vm4, %v4481_v4  ;;  %v4482_v27 = vmax.f32 %v4413_v26, 0.0  ;;  %v4759_v2 = vpop.f32.mrb[238].mxu0  ;;  %v5044_v49 = vmax.f32 %v5036_v59, %v5038_v6 }
 0x3f2   :  { %v4858_v39 = vmax.f32 %v4757_v35, 0.0  ;;  %v4760_v32 = vadd.f32 %v14602_v24, %v4759_v2  ;;  %v11099_v34 = vpop.f32.mrb[239].mxu0 }
 0x3f3   :  { %4507 = vst.msk [vmem:[#allocation2 + $0x1e0] sm:$0xff] %vm376_vm4, %v4482_v27  ;;  %v5009_v16 = vld [vmem:[#allocation2 + $0x17c] ss:$2 sm:$0x3f] }
 0x3f4   :  { %v4417_v8 = vpop.f32.mrb[232].mxu1  ;;  %v5011_v44 = vld [vmem:[#allocation2 + $0x17d] ss:$2 sm:$0x3f]  ;;  %4883 = vst.msk [vmem:[#allocation2 + $0x24c] sm:$0xff] %vm376_vm4, %v4858_v39  ;;  %v4859_v62 = vmax.f32 %v4760_v32, 0.0 }
 0x3f5   :  { %v4418_v21 = vadd.f32 %v14573_v38, %v4417_v8  ;;  %v5015_v51 = vmax.f32 %v5009_v16, %v5011_v44  ;;  %v11060_v31 = vpop.f32.mrb[233].mxu1  ;;  %v5454_v16 = vld [vmem:[#allocation3 + $0x67] sm:$0xff] }
 0x3f6   :  { %v4420_v48 = vpop.f32.mrb[234].mxu1  ;;  %4884 = vst.msk [vmem:[#allocation2 + $0x254] sm:$0xff] %vm376_vm4, %v4859_v62  ;;  %v5145_v44 = vld [vmem:[#allocation3 + $0x68] sm:$0xff] }
 0x3f7   :  { %v4483_v18 = vmax.f32 %v4418_v21, 0.0  ;;  %v5017_v22 = vmax.f32 %v5013_v17, %v5015_v51  ;;  %v4421_v57 = vadd.f32 %v14573_v38, %v4420_v48  ;;  %v11061_v37 = vpop.f32.mrb[235].mxu1  ;;  %v4764_v56 = vpop.f32.mrb[240].mxu0  ;;  %v5451_v20 = vld [vmem:[#allocation3 + $0x4f] sm:$0xff] }
 0x3f8   :  { %v4765_v25 = vadd.f32 %v14602_v24, %v4764_v56  ;;  %v11102_v40 = vpop.f32.mrb[241].mxu0  ;;  %v5037_v41 = vld [vmem:[#allocation2 + $0x1d0] ss:$2 sm:$0x3f]  ;;  %v5142_v54 = vld [vmem:[#allocation3 + $0x50] sm:$0xff] }
 0x3f9   :  { %4508 = vst.msk [vmem:[#allocation2 + $0x1e8] sm:$0xff] %vm376_vm4, %v4483_v18  ;;  %v4484_v60 = vmax.f32 %v4421_v57, 0.0  ;;  %v4767_v28 = vpop.f32.mrb[242].mxu0  ;;  %v5039_v50 = vld [vmem:[#allocation2 + $0x1d1] ss:$2 sm:$0x3f] }
 0x3fa   :  { %5019 = vst.msk [vmem:[#allocation3 + $0x5c] sm:$0x3f] %vm1562_vm5, %v5017_v22  ;;  %v4860_v46 = vmax.f32 %v4765_v25, 0.0  ;;  %v4768_v15 = vadd.f32 %v14602_v24, %v4767_v28  ;;  %v11103_v42 = vpop.f32.mrb[243].mxu0  ;;  %v5045_v47 = vmax.f32 %v5037_v41, %v5039_v50 }
 0x3fb   :  { %4509 = vst.msk [vmem:[#allocation2 + $0x1f0] sm:$0xff] %vm376_vm4, %v4484_v60  ;;  %v12463_v60 = vld [vmem:[%s15788_s3 + $0x8] sm:$0xff]  }
 0x3fc   :  { %v4425_v36 = vpop.f32.mrb[236].mxu1  ;;  %4885 = vst.msk [vmem:[#allocation2 + $0x25c] sm:$0xff] %vm376_vm4, %v4860_v46  ;;  %v4861_v12 = vmax.f32 %v4768_v15, 0.0  ;;  %11201 = vmatpush3.bf16.msra.mxu0 %v12463_v60 }
 0x3fd   :  { %v4426_v13 = vadd.f32 %v14573_v38, %v4425_v36  ;;  %v11064_v61 = vpop.f32.mrb[237].mxu1  ;;  %11202 = vmatprep.subr.bf16.mxu0 %v12631_v1 }
 0x3fe   :  { %v4428_v14 = vpop.f32.mrb[238].mxu1  ;;  %4886 = vst.msk [vmem:[#allocation2 + $0x264] sm:$0xff] %vm376_vm4, %v4861_v12 }
 0x3ff   :  { %v4485_v30 = vmax.f32 %v4426_v13, 0.0  ;;  %v4429_v11 = vadd.f32 %v14573_v38, %v4428_v14  ;;  %v11065_v0 = vpop.f32.mrb[239].mxu1  ;;  %v4772_v9 = vpop.f32.mrb[244].mxu0 }
 0x400   :  { %v5040_v52 = vld [vmem:[#allocation2 + $0x1dc] ss:$2 sm:$0xff]  ;;  %v5042_v58 = vld [vmem:[#allocation2 + $0x1dd] ss:$2 sm:$0xff]  ;;  %v4773_v63 = vadd.f32 %v14602_v24, %v4772_v9  ;;  %v11106_v7 = vpop.f32.mrb[245].mxu0 }
 0x401   :  { %v5046_v23 = vmax.f32 %v5040_v52, %v5042_v58  ;;  %4510 = vst.msk [vmem:[#allocation2 + $0x1f8] sm:$0xff] %vm376_vm4, %v4485_v30  ;;  %v4486_v19 = vmax.f32 %v4429_v11, 0.0  ;;  %v5452_v53 = vld [vmem:[#allocation3 + $0x57] sm:$0xff]  ;;  %v4775_v3 = vpop.f32.mrb[246].mxu0  ;;  %v5453_v4 = vld [vmem:[#allocation3 + $0x5f] sm:$0xff] }
 0x402   :  { %v5143_v10 = vld [vmem:[#allocation3 + $0x58] sm:$0xff]  ;;  %v12040_v55 = vpack.i.bf16 %v5452_v53, %v5451_v20  ;;  %v5144_v26 = vld [vmem:[#allocation3 + $0x60] sm:$0xff]  ;;  %v4776_v33 = vadd.f32 %v14602_v24, %v4775_v3  ;;  %v4862_v2 = vmax.f32 %v4773_v63, 0.0  ;;  %v11107_v43 = vpop.f32.mrb[247].mxu0  ;;  %v12050_v51 = vpack.i.bf16 %v5454_v16, %v5453_v4 }
 0x403   :  { %v12045_v29 = vpack.i.bf16 %v5143_v10, %v5142_v54  ;;  %v5048_v5 = vmax.f32 %v5044_v49, %v5046_v23  ;;  %v5041_v45 = vld [vmem:[#allocation2 + $0x1ec] ss:$2 sm:$0x3f]  ;;  %v5043_v35 = vld [vmem:[#allocation2 + $0x1ed] ss:$2 sm:$0x3f]  ;;  %v12055_v62 = vpack.i.bf16 %v5145_v44, %v5144_v26 }
 0x404   :  { %4511 = vst.msk [vmem:[#allocation2 + $0x200] sm:$0xff] %vm376_vm4, %v4486_v19  ;;  %v5047_v27 = vmax.f32 %v5041_v45, %v5043_v35  ;;  %12041 = vrot.lane.b32.xlu0 %v12040_v55, %s12634_s14  ;;  %v4433_v39 = vpop.f32.mrb[240].mxu1  ;;  %v4863_v32 = vmax.f32 %v4776_v33, 0.0  ;;  %4887 = vst.msk [vmem:[#allocation2 + $0x26c] sm:$0xff] %vm376_vm4, %v4862_v2 }
 0x405   :  { %12046 = vrot.lane.b32.xlu1 %v12045_v29, %s12635_s15  ;;  %5050 = vst.msk [vmem:[#allocation3 + $0x70] sm:$0xff] %vm376_vm4, %v5048_v5  ;;  %v4434_v34 = vadd.f32 %v14573_v38, %v4433_v39  ;;  %v11068_v8 = vpop.f32.mrb[241].mxu1 }
 0x406   :  { %v5049_v21 = vmax.f32 %v5045_v47, %v5047_v27  ;;  %v4436_v17 = vpop.f32.mrb[242].mxu1  ;;  %4888 = vst.msk [vmem:[#allocation2 + $0x274] sm:$0xff] %vm376_vm4, %v4863_v32 }
 0x407   :  { %v4487_v31 = vmax.f32 %v4434_v34, 0.0  ;;  %v4437_v18 = vadd.f32 %v14573_v38, %v4436_v17  ;;  %v11069_v48 = vpop.f32.mrb[243].mxu1  ;;  %v4780_v22 = vpop.f32.mrb[248].mxu0 }
 0x408   :  { %5051 = vst.msk [vmem:[#allocation3 + $0x78] sm:$0x3f] %vm1562_vm5, %v5049_v21  ;;  %12051 = vrot.lane.b32.xlu0 %v12050_v51, %s12634_s14  ;;  %v4781_v37 = vadd.f32 %v14602_v24, %v4780_v22  ;;  %v11110_v56 = vpop.f32.mrb[249].mxu0 }
 0x409   :  { %12056 = vrot.lane.b32.xlu1 %v12055_v62, %s12635_s15  ;;  %4512 = vst.msk [vmem:[#allocation2 + $0x208] sm:$0xff] %vm376_vm4, %v4487_v31  ;;  %v4488_v57 = vmax.f32 %v4437_v18, 0.0  ;;  %v4783_v25 = vpop.f32.mrb[250].mxu0 }
 0x40a   :  { %v4864_v40 = vmax.f32 %v4781_v37, 0.0  ;;  %v4784_v46 = vadd.f32 %v14602_v24, %v4783_v25  ;;  %v11111_v28 = vpop.f32.mrb[251].mxu0 }
 0x40b   :  { %4513 = vst.msk [vmem:[#allocation2 + $0x210] sm:$0xff] %vm376_vm4, %v4488_v57  ;;  %v5052_v19 = vld [vmem:[#allocation2 + $0x1f8] ss:$2 sm:$0xff]  ;;  %v5054_v7 = vld [vmem:[#allocation2 + $0x1f9] ss:$2 sm:$0xff] }
 0x40c   :  { %v4441_v15 = vpop.f32.mrb[244].mxu1  ;;  %4889 = vst.msk [vmem:[#allocation2 + $0x27c] sm:$0xff] %vm376_vm4, %v4864_v40  ;;  %v4865_v42 = vmax.f32 %v4784_v46, 0.0  ;;  %v5060_v47 = vmax.f32 %v5052_v19, %v5054_v7  ;;  %v5146_v7 = vld [vmem:[#allocation3 + $0x70] sm:$0xff] }
 0x40d   :  { %v4442_v36 = vadd.f32 %v14573_v38, %v4441_v15  ;;  %v11072_v13 = vpop.f32.mrb[245].mxu1  ;;  %v5084_v55 = vld [vmem:[#allocation2 + $0x268] ss:$2 sm:$0xff]  ;;  %v5086_v29 = vld [vmem:[#allocation2 + $0x269] ss:$2 sm:$0xff] }
 0x40e   :  { %v4444_v61 = vpop.f32.mrb[246].mxu1  ;;  %4890 = vst.msk [vmem:[#allocation2 + $0x284] sm:$0xff] %vm376_vm4, %v4865_v42  ;;  %v5092_v8 = vmax.f32 %v5084_v55, %v5086_v29 }
 0x40f   :  { %v4489_v59 = vmax.f32 %v4442_v36, 0.0  ;;  %v4445_v6 = vadd.f32 %v14573_v38, %v4444_v61  ;;  %v11073_v12 = vpop.f32.mrb[247].mxu1  ;;  %v4788_v14 = vpop.f32.mrb[252].mxu0 }
 0x410   :  { %v4789_v50 = vadd.f32 %v14602_v24, %v4788_v14  ;;  %v11114_v30 = vpop.f32.mrb[253].mxu0  ;;  %v5072_v12 = vld [vmem:[#allocation2 + $0x24c] ss:$2 sm:$0xff] }
 0x411   :  { %4514 = vst.msk [vmem:[#allocation2 + $0x218] sm:$0xff] %vm376_vm4, %v4489_v59  ;;  %v4490_v41 = vmax.f32 %v4445_v6, 0.0  ;;  %v4791_v11 = vpop.f32.mrb[254].mxu0 }
 0x412   :  { %v4866_v0 = vmax.f32 %v4789_v50, 0.0  ;;  %v4792_v52 = vadd.f32 %v14602_v24, %v4791_v11  ;;  %v11115_v58 = vpop.f32.mrb[255].mxu0  ;;  %v5053_v31 = vld [vmem:[#allocation2 + $0x208] ss:$2 sm:$0x3f] }
 0x413   :  { %4515 = vst.msk [vmem:[#allocation2 + $0x220] sm:$0xff] %vm376_vm4, %v4490_v41  ;;  %v5055_v22 = vld [vmem:[#allocation2 + $0x209] ss:$2 sm:$0x3f] }
 0x414   :  { %4891 = vst.msk [vmem:[#allocation2 + $0x28c] sm:$0xff] %vm376_vm4, %v4866_v0  ;;  %v4867_v9 = vmax.f32 %v4792_v52, 0.0  ;;  %v4449_v20 = vpop.f32.mrb[248].mxu1  ;;  %v5085_v25 = vld [vmem:[#allocation2 + $0x278] ss:$2 sm:$0x3f]  ;;  %v5061_v42 = vmax.f32 %v5053_v31, %v5055_v22 }
 0x415   :  { %v4450_v49 = vadd.f32 %v14573_v38, %v4449_v20  ;;  %v11076_v23 = vpop.f32.mrb[249].mxu1  ;;  %v5087_v15 = vld [vmem:[#allocation2 + $0x279] ss:$2 sm:$0x3f] }
 0x416   :  { %4892 = vst.msk [vmem:[#allocation2 + $0x294] sm:$0xff] %vm376_vm4, %v4867_v9  ;;  %v4452_v63 = vpop.f32.mrb[250].mxu1  ;;  %v5074_v11 = vld [vmem:[#allocation2 + $0x24d] ss:$2 sm:$0xff]  ;;  %v5093_v0 = vmax.f32 %v5085_v25, %v5087_v15  ;;  %v5455_v20 = vld [vmem:[#allocation3 + $0x6f] sm:$0xff] }
 0x417   :  { %v4491_v53 = vmax.f32 %v4450_v49, 0.0  ;;  %v4453_v54 = vadd.f32 %v14573_v38, %v4452_v63  ;;  %v11077_v10 = vpop.f32.mrb[251].mxu1  ;;  %v4796_v3 = vpop.f32.mrb[0].mxu0 }
 0x418   :  { %v4797_v4 = vadd.f32 %v14602_v24, %v4796_v3  ;;  %v11118_v26 = vpop.f32.mrb[1].mxu0 }
 0x419   :  { %4516 = vst.msk [vmem:[#allocation2 + $0x228] sm:$0xff] %vm376_vm4, %v4491_v53  ;;  %v4492_v35 = vmax.f32 %v4453_v54, 0.0  ;;  %v4799_v33 = vpop.f32.mrb[2].mxu0 }
 0x41a   :  { %v5056_v5 = vld [vmem:[#allocation2 + $0x214] ss:$2 sm:$0xff]  ;;  %v5058_v45 = vld [vmem:[#allocation2 + $0x215] ss:$2 sm:$0xff]  ;;  %v4868_v2 = vmax.f32 %v4797_v4, 0.0  ;;  %v4800_v43 = vadd.f32 %v14602_v24, %v4799_v33  ;;  %v11119_v39 = vpop.f32.mrb[3].mxu0 }
 0x41b   :  { %v5062_v27 = vmax.f32 %v5056_v5, %v5058_v45  ;;  %v5088_v32 = vld [vmem:[#allocation2 + $0x284] ss:$2 sm:$0xff]  ;;  %v5090_v34 = vld [vmem:[#allocation2 + $0x285] ss:$2 sm:$0xff]  ;;  %4517 = vst.msk [vmem:[#allocation2 + $0x230] sm:$0xff] %vm376_vm4, %v4492_v35  ;;  %v5078_v45 = vmax.f32 %v5072_v12, %v5074_v11 }
 0x41c   :  { %v4457_v16 = vpop.f32.mrb[252].mxu1  ;;  %v5094_v21 = vmax.f32 %v5088_v32, %v5090_v34  ;;  %4893 = vst.msk [vmem:[#allocation2 + $0x29c] sm:$0xff] %vm376_vm4, %v4868_v2  ;;  %v4869_v17 = vmax.f32 %v4800_v43, 0.0  ;;  %v5423_v12 = vld [vmem:[#allocation3 + $0x16] sm:$0xff] }
 0x41d   :  { %v5064_v44 = vmax.f32 %v5060_v47, %v5062_v27  ;;  %v4458_v51 = vadd.f32 %v14573_v38, %v4457_v16  ;;  %v11080_v62 = vpop.f32.mrb[253].mxu1  ;;  %v5073_v16 = vld [vmem:[#allocation2 + $0x25c] ss:$2 sm:$0x3f] }
 0x41e   :  { %v4460_v18 = vpop.f32.mrb[254].mxu1  ;;  %v5096_v48 = vmax.f32 %v5092_v8, %v5094_v21  ;;  %4894 = vst.msk [vmem:[#allocation2 + $0x2a4] sm:$0xff] %vm376_vm4, %v4869_v17  ;;  %v12465_v8 = vld [vmem:[%s15788_s3 + $0x10] sm:$0xff]  }
 0x41f   :  { %5066 = vst.msk [vmem:[#allocation3 + $0x7e] sm:$0xff] %vm376_vm4, %v5064_v44  ;;  %v4493_v57 = vmax.f32 %v4458_v51, 0.0  ;;  %v4461_v37 = vadd.f32 %v14573_v38, %v4460_v18  ;;  %v11081_v56 = vpop.f32.mrb[255].mxu1  ;;  %v4804_v60 = vpop.f32.mrb[4].mxu0  ;;  %11203 = vmatpush3.bf16.msra.mxu0 %v12465_v8 }
 0x420   :  { %5098 = vst.msk [vmem:[#allocation3 + $0x9a] sm:$0xff] %vm376_vm4, %v5096_v48  ;;  %v5057_v40 = vld [vmem:[#allocation2 + $0x224] ss:$2 sm:$0x3f]  ;;  %v4805_v28 = vadd.f32 %v14602_v24, %v4804_v60  ;;  %v11122_v61 = vpop.f32.mrb[5].mxu0  ;;  %11298 = vmatprep.subr.bf16.mxu0 %v12631_v1 }
 0x421   :  { %v5059_v46 = vld [vmem:[#allocation2 + $0x225] ss:$2 sm:$0x3f]  ;;  %4518 = vst.msk [vmem:[#allocation2 + $0x238] sm:$0xff] %vm376_vm4, %v4493_v57  ;;  %v4494_v13 = vmax.f32 %v4461_v37, 0.0  ;;  %v4807_v6 = vpop.f32.mrb[6].mxu0 }
 0x422   :  { %v5063_v36 = vmax.f32 %v5057_v40, %v5059_v46  ;;  %v4870_v59 = vmax.f32 %v4805_v28, 0.0  ;;  %v4808_v30 = vadd.f32 %v14602_v24, %v4807_v6  ;;  %v11123_v58 = vpop.f32.mrb[7].mxu0  ;;  %v5075_v44 = vld [vmem:[#allocation2 + $0x25d] ss:$2 sm:$0x3f] }
 0x423   :  { %v5089_v41 = vld [vmem:[#allocation2 + $0x294] ss:$2 sm:$0x3f]  ;;  %v5091_v50 = vld [vmem:[#allocation2 + $0x295] ss:$2 sm:$0x3f]  ;;  %v5079_v18 = vmax.f32 %v5073_v16, %v5075_v44 }
 0x424   :  { %v5065_v14 = vmax.f32 %v5061_v42, %v5063_v36  ;;  %4519 = vst.msk [vmem:[#allocation2 + $0x240] sm:$0xff] %vm376_vm4, %v4494_v13  ;;  %v5095_v52 = vmax.f32 %v5089_v41, %v5091_v50  ;;  %4895 = vst.msk [vmem:[#allocation2 + $0x2ac] sm:$0xff] %vm376_vm4, %v4870_v59  ;;  %v4465_v9 = vpop.f32.mrb[0].mxu1  ;;  %v4871_v49 = vmax.f32 %v4808_v30, 0.0  ;;  %v5422_v37 = vld [vmem:[#allocation3 + $0xe] sm:$0xff] }
 0x425   :  { %v4466_v23 = vadd.f32 %v14573_v38, %v4465_v9  ;;  %v11084_v19 = vpop.f32.mrb[1].mxu1 }
 0x426   :  { %5067 = vst.msk [vmem:[#allocation3 + $0x86] sm:$0x3f] %vm1562_vm5, %v5065_v14  ;;  %v5456_v63 = vld [vmem:[#allocation3 + $0x77] sm:$0xff]  ;;  %v5097_v54 = vmax.f32 %v5093_v0, %v5095_v52  ;;  %v4468_v10 = vpop.f32.mrb[2].mxu1 }
 0x427   :  { %v5147_v53 = vld [vmem:[#allocation3 + $0x78] sm:$0xff]  ;;  %v12060_v3 = vpack.i.bf16 %v5456_v63, %v5455_v20  ;;  %4896 = vst.msk [vmem:[#allocation2 + $0x2b4] sm:$0xff] %vm376_vm4, %v4871_v49  ;;  %v4495_v26 = vmax.f32 %v4466_v23, 0.0  ;;  %v11085_v5 = vpop.f32.mrb[3].mxu1  ;;  %v4812_v33 = vpop.f32.mrb[8].mxu0  ;;  %v12462_v23 = vld [vmem:[%s15788_s3 + $0x30] sm:$0xff]  }
 0x428   :  { %v12065_v55 = vpack.i.bf16 %v5147_v53, %v5146_v7  ;;  %v5068_v29 = vld [vmem:[#allocation2 + $0x230] ss:$2 sm:$0xff]  ;;  %v5070_v4 = vld [vmem:[#allocation2 + $0x231] ss:$2 sm:$0xff]  ;;  %5099 = vst.msk [vmem:[#allocation3 + $0xa2] sm:$0x3f] %vm1562_vm5, %v5097_v54  ;;  %v4813_v38 = vadd.f32 %v14602_v24, %v4812_v33 }
 0x429   :  { %v5076_v35 = vmax.f32 %v5068_v29, %v5070_v4  ;;  %12061 = vrot.lane.b32.xlu0 %v12060_v3, %s12634_s14  ;;  %4520 = vst.msk [vmem:[#allocation2 + $0x248] sm:$0xf] %vm401_vm6, %v4495_v26  ;;  %v11126_v47 = vpop.f32.mrb[9].mxu0  ;;  %v12464_v5 = vld [vmem:[%s15788_s3 + $0x38] sm:$0xff]  }
 0x42a   :  { %12066 = vrot.lane.b32.xlu1 %v12065_v55, %s12635_s15  ;;  %v4815_v2 = vpop.f32.mrb[10].mxu0  ;;  %v4872_v43 = vmax.f32 %v4813_v38, 0.0 }
 0x42b   :  { %v5080_v27 = vmax.f32 %v5076_v35, %v5078_v45  ;;  %v4816_v39 = vadd.f32 %v14602_v24, %v4815_v2  ;;  %v11127_v32 = vpop.f32.mrb[11].mxu0  ;;  %v5100_v59 = vld [vmem:[#allocation2 + $0x2a0] ss:$2 sm:$0xff]  ;;  %v5102_v6 = vld [vmem:[#allocation2 + $0x2a1] ss:$2 sm:$0xff] }
 0x42c   :  { %4897 = vst.msk [vmem:[#allocation2 + $0x2bc] sm:$0xff] %vm376_vm4, %v4872_v43  ;;  %v5108_v19 = vmax.f32 %v5100_v59, %v5102_v6 }
 0x42d   :  { %5082 = vst.msk [vmem:[#allocation3 + $0x8c] sm:$0xff] %vm376_vm4, %v5080_v27  ;;  %v4873_v34 = vmax.f32 %v4816_v39, 0.0  ;;  %v5457_v25 = vld [vmem:[#allocation3 + $0x7f] sm:$0xff]  ;;  %v12466_v39 = vld [vmem:[%s15788_s3 + $0x40] sm:$0xff]  }
 0x42e   :  { %v5148_v13 = vld [vmem:[#allocation3 + $0x80] sm:$0xff] }
 0x42f   :  { %4898 = vst.msk [vmem:[#allocation2 + $0x2c4] sm:$0xff] %vm376_vm4, %v4873_v34  ;;  %v4820_v21 = vpop.f32.mrb[12].mxu0  ;;  %v5101_v45 = vld [vmem:[#allocation2 + $0x2b0] ss:$2 sm:$0x3f] }
 0x430   :  { %v5069_v17 = vld [vmem:[#allocation2 + $0x240] ss:$2 sm:$0x3f]  ;;  %v5071_v51 = vld [vmem:[#allocation2 + $0x241] ss:$2 sm:$0x3f]  ;;  %v4821_v62 = vadd.f32 %v14602_v24, %v4820_v21 }
 0x431   :  { %v5077_v31 = vmax.f32 %v5069_v17, %v5071_v51  ;;  %v11130_v48 = vpop.f32.mrb[13].mxu0  ;;  %v5103_v35 = vld [vmem:[#allocation2 + $0x2b1] ss:$2 sm:$0x3f] }
 0x432   :  { %v4874_v22 = vmax.f32 %v4821_v62, 0.0  ;;  %v4823_v57 = vpop.f32.mrb[14].mxu0  ;;  %v5109_v16 = vmax.f32 %v5101_v45, %v5103_v35 }
 0x433   :  { %v12002_v56 = vpop.permute.xlu0 %12001  ;;  %v5081_v60 = vmax.f32 %v5077_v31, %v5079_v18  ;;  %v4824_v40 = vadd.f32 %v14602_v24, %v4823_v57  ;;  %v11131_v42 = vpop.f32.mrb[15].mxu0  ;;  %v14721_v18 = vld [vmem:[#allocation3 + $0x1e] sm:$0xff]  ;;  %v14723_v57 = vld [vmem:[#allocation3 + $0x26] sm:$0xff] }
 0x434   :  { %v12004_v46 = vunpack.i.h.bf16 %v12002_v56  ;;  %v12003_v28 = vunpack.i.l.bf16 %v12002_v56  ;;  %v12007_v15 = vpop.permute.xlu1 %12006  ;;  %v5458_v36 = vld [vmem:[#allocation3 + $0x87] sm:$0xff]  ;;  %4899 = vst.msk [vmem:[#allocation2 + $0x2cc] sm:$0xff] %vm376_vm4, %v4874_v22 }
 0x435   :  { %v5149_v61 = vld [vmem:[#allocation3 + $0x88] sm:$0xff]  ;;  %v12009_v14 = vunpack.i.h.bf16 %v12007_v15  ;;  %v12008_v41 = vunpack.i.l.bf16 %v12007_v15  ;;  %v12070_v50 = vpack.i.bf16 %v5458_v36, %v5457_v25  ;;  %5083 = vst.msk [vmem:[#allocation3 + $0x94] sm:$0x3f] %vm1562_vm5, %v5081_v60  ;;  %v4875_v11 = vmax.f32 %v4824_v40, 0.0  ;;  %v5464_v56 = vld [vmem:[#allocation3 + $0xa0] sm:$0xff] }
 0x436   :  { %v12075_v30 = vpack.i.bf16 %v5149_v61, %v5148_v13  ;;  %v5635_v0 = vsel %vm376_vm4, %v5422_v37, %v12003_v28  ;;  %v5636_v52 = vsel %vm376_vm4, %v5423_v12, %v12004_v46  ;;  %v5104_v58 = vld [vmem:[#allocation2 + $0x2bc] ss:$2 sm:$0xff]  ;;  %v5106_v9 = vld [vmem:[#allocation2 + $0x2bd] ss:$2 sm:$0xff]  ;;  %v5461_v28 = vld [vmem:[#allocation3 + $0x9f] sm:$0xff] }
 0x437   :  { %v5657_v20 = vsel %vm2128_vm7, %v5636_v52, %v12009_v14  ;;  %v5656_v49 = vsel %vm2128_vm7, %v5635_v0, %v12008_v41  ;;  %12071 = vrot.lane.b32.xlu0 %v12070_v50, %s12634_s14  ;;  %v5110_v63 = vmax.f32 %v5104_v58, %v5106_v9  ;;  %4900 = vst.msk [vmem:[#allocation2 + $0x2d4] sm:$0xff] %vm376_vm4, %v4875_v11  ;;  %v4828_v53 = vpop.f32.mrb[16].mxu0 }
 0x438   :  { %12076 = vrot.lane.b32.xlu1 %v12075_v30, %s12635_s15  ;;  %v5677_v7 = vpack.c.bf16 %v5657_v20, %v5656_v49  ;;  %v4829_v54 = vadd.f32 %v14602_v24, %v4828_v53  ;;  %v11134_v10 = vpop.f32.mrb[17].mxu0  ;;  %v5174_v20 = vld [vmem:[#allocation3 + $0x2] sm:$0xff] }
 0x439   :  { %v5112_v3 = vmax.f32 %v5108_v19, %v5110_v63  ;;  %v4831_v55 = vpop.f32.mrb[18].mxu0  ;;  %v5153_v49 = vld [vmem:[#allocation3 + $0x1] sm:$0xff] }
 0x43a   :  { %11155 = vmatmul.mubr.msk.bf16.vlgmr.msra.gmra.mrb[4].mxu1 %vm2458_vm8, %v5677_v7  ;;  %v4876_v29 = vmax.f32 %v4829_v54, 0.0  ;;  %v4832_v4 = vadd.f32 %v14602_v24, %v4831_v55  ;;  %v11135_v26 = vpop.f32.mrb[19].mxu0  ;;  %v14744_v55 = vld [vmem:[#allocation3 + $0x36] sm:$0xff] }
 0x43b   :  { %11158 = vmatprep.mubr.msk.bf16.mxu1 %vm12633_vm2, %v12631_v1  ;;  %11249 = vmatpush3.bf16.msra.mxu1 %v12462_v23  ;;  %5114 = vst.msk [vmem:[#allocation3 + $0xa8] sm:$0xff] %vm376_vm4, %v5112_v3  ;;  %v14742_v3 = vld [vmem:[#allocation3 + $0x2e] sm:$0xff] }
 0x43c   :  { %11250 = vmatprep.subr.bf16.mxu1 %v12631_v1  ;;  %4901 = vst.msk [vmem:[#allocation2 + $0x2dc] sm:$0xff] %vm376_vm4, %v4876_v29  ;;  %v4877_v33 = vmax.f32 %v4832_v4, 0.0  ;;  %v5459_v38 = vld [vmem:[#allocation3 + $0x8f] sm:$0xff]  ;;  %v5460_v47 = vld [vmem:[#allocation3 + $0x97] sm:$0xff] }
 0x43d   :  { %v5150_v27 = vld [vmem:[#allocation3 + $0x90] sm:$0xff]  ;;  %v12080_v2 = vpack.i.bf16 %v5460_v47, %v5459_v38  ;;  %v5151_v43 = vld [vmem:[#allocation3 + $0x98] sm:$0xff] }
 0x43e   :  { %v5105_v32 = vld [vmem:[#allocation2 + $0x2cc] ss:$2 sm:$0x3f]  ;;  %v5107_v34 = vld [vmem:[#allocation2 + $0x2cd] ss:$2 sm:$0x3f]  ;;  %v12085_v8 = vpack.i.bf16 %v5151_v43, %v5150_v27 }
 0x43f   :  { %4902 = vst.msk [vmem:[#allocation2 + $0x2e4] sm:$0xff] %vm376_vm4, %v4877_v33  ;;  %11251 = vmatpush3.bf16.msra.mxu1 %v12464_v5  ;;  %v5111_v44 = vmax.f32 %v5105_v32, %v5107_v34  ;;  %12081 = vrot.lane.b32.xlu0 %v12080_v2, %s12634_s14  ;;  %v4836_v21 = vpop.f32.mrb[20].mxu0  ;;  %v6057_v38 = vld [vmem:[#allocation3 + $0x1d] sm:$0xff]  ;;  %v5154_v32 = vld [vmem:[#allocation3 + $0x9] sm:$0xff] }
 0x440   :  { %11252 = vmatprep.subr.bf16.mxu1 %v12631_v1  ;;  %12086 = vrot.lane.b32.xlu1 %v12085_v8, %s12635_s15  ;;  %v4837_v62 = vadd.f32 %v14602_v24, %v4836_v21  ;;  %v11138_v25 = vpop.f32.mrb[21].mxu0  ;;  %v6058_v21 = vld [vmem:[#allocation3 + $0x25] sm:$0xff] }
 0x441   :  { %v12012_v17 = vpop.permute.xlu0 %12011  ;;  %v5113_v31 = vmax.f32 %v5109_v16, %v5111_v44  ;;  %v4839_v42 = vpop.f32.mrb[22].mxu0  ;;  %v12105_v16 = vpack.i.bf16 %v6057_v38, %v5154_v32  ;;  %v5180_v38 = vld [vmem:[#allocation3 + $0x32] sm:$0xff] }
 0x442   :  { %v12017_v51 = vpop.permute.xlu1 %12016  ;;  %v12014_v48 = vunpack.i.h.bf16 %v12012_v17  ;;  %v12013_v22 = vunpack.i.l.bf16 %v12012_v17  ;;  %v4878_v40 = vmax.f32 %v4837_v62, 0.0  ;;  %v5465_v46 = vld [vmem:[#allocation3 + $0xa8] sm:$0xff]  ;;  %v11139_v6 = vpop.f32.mrb[23].mxu0  ;;  %v4840_v41 = vadd.f32 %v14602_v24, %v4839_v42  ;;  %v5177_v42 = vld [vmem:[#allocation3 + $0x1a] sm:$0xff] }
 0x443   :  { %v12019_v37 = vunpack.i.h.bf16 %v12017_v51  ;;  %v12018_v60 = vunpack.i.l.bf16 %v12017_v51  ;;  %v5462_v15 = vld [vmem:[#allocation3 + $0xa7] sm:$0xff]  ;;  %11253 = vmatpush3.bf16.msra.mxu1 %v12466_v39  ;;  %5115 = vst.msk [vmem:[#allocation3 + $0xb0] sm:$0x3f] %vm1562_vm5, %v5113_v31  ;;  %v12095_v61 = vpack.i.bf16 %v5465_v46, %v5464_v56  ;;  %v6085_v32 = vld [vmem:[#allocation3 + $0x56] sm:$0xff] }
 0x444   :  { %v5637_v36 = vsel %vm376_vm4, %v14721_v18, %v12013_v22  ;;  %v5638_v13 = vsel %vm376_vm4, %v14723_v57, %v12014_v48  ;;  %v12090_v59 = vpack.i.bf16 %v5462_v15, %v5461_v28  ;;  %11308 = vmatprep.subr.bf16.mxu1 %v12631_v1  ;;  %4903 = vst.msk [vmem:[#allocation2 + $0x2ec] sm:$0xff] %vm376_vm4, %v4878_v40  ;;  %v4879_v30 = vmax.f32 %v4840_v41, 0.0  ;;  %v5175_v39 = vld [vmem:[#allocation3 + $0xa] sm:$0xff]  ;;  %v5176_v22 = vld [vmem:[#allocation3 + $0x12] sm:$0xff] }
 0x445   :  { %v5659_v12 = vsel %vm2128_vm7, %v5638_v13, %v12019_v37  ;;  %v5658_v14 = vsel %vm2128_vm7, %v5637_v36, %v12018_v60  ;;  %12096 = vrot.lane.b32.xlu1 %v12095_v61, %s12635_s15  ;;  %v12115_v8 = vpack.i.bf16 %v14721_v18, %v5175_v39  ;;  %v5155_v37 = vld [vmem:[#allocation3 + $0x11] sm:$0xff]  ;;  %v12125_v25 = vpack.i.bf16 %v5176_v22, %v14723_v57  ;;  %v5156_v36 = vld [vmem:[#allocation3 + $0x19] sm:$0xff] }
 0x446   :  { %v5678_v50 = vpack.c.bf16 %v5659_v12, %v5658_v14  ;;  %12091 = vrot.lane.b32.xlu0 %v12090_v59, %s12634_s14  ;;  %4904 = vst.msk [vmem:[#allocation2 + $0x2f4] sm:$0xff] %vm376_vm4, %v4879_v30  ;;  %v5116_v51 = vld [vmem:[#allocation2 + $0x2d8] ss:$2 sm:$0xff]  ;;  %v5118_v62 = vld [vmem:[#allocation2 + $0x2d9] ss:$2 sm:$0xff]  ;;  %v12120_v60 = vpack.i.bf16 %v5155_v37, %v6058_v21  ;;  %v12135_v12 = vpack.i.bf16 %v14742_v3, %v5177_v42  ;;  %v6086_v37 = vld [vmem:[#allocation3 + $0x5e] sm:$0xff] }
 0x447   :  { %v4844_v11 = vpop.f32.mrb[24].mxu0  ;;  %v5124_v40 = vmax.f32 %v5116_v51, %v5118_v62  ;;  %v6059_v28 = vld [vmem:[#allocation3 + $0x2d] sm:$0xff]  ;;  %v5182_v62 = vld [vmem:[#allocation3 + $0x42] sm:$0xff] }
 0x448   :  { %11159 = vmatmul.mubr.msk.bf16.gmra.mrb[8].mxu1 %vm2458_vm8, %v5678_v50  ;;  %v4845_v0 = vadd.f32 %v14602_v24, %v4844_v11  ;;  %v11142_v52 = vpop.f32.mrb[25].mxu0  ;;  %v12130_v57 = vpack.i.bf16 %v6059_v28, %v5156_v36  ;;  %v5428_v11 = vld [vmem:[#allocation3 + $0x3e] sm:$0xff]  ;;  %v5162_v51 = vld [vmem:[#allocation3 + $0x49] sm:$0xff] }
 0x449   :  { %11162 = vmatprep.mubr.msk.bf16.mxu1 %vm12633_vm2, %v12631_v1  ;;  %v12022_v58 = vpop.permute.xlu0 %12021  ;;  %v4847_v10 = vpop.f32.mrb[26].mxu0 }
 0x44a   :  { %v12027_v9 = vpop.permute.xlu1 %12026  ;;  %v4880_v23 = vmax.f32 %v4845_v0, 0.0  ;;  %v12024_v19 = vunpack.i.h.bf16 %v12022_v58  ;;  %v12023_v63 = vunpack.i.l.bf16 %v12022_v58  ;;  %v5466_v53 = vld [vmem:[#allocation3 + $0xb0] sm:$0x3f]  ;;  %v4848_v5 = vadd.f32 %v14602_v24, %v4847_v10  ;;  %v11143_v33 = vpop.f32.mrb[27].mxu0  ;;  %v5429_v0 = vld [vmem:[#allocation3 + $0x46] sm:$0xff] }
 0x44b   :  { %v12029_v7 = vunpack.i.h.bf16 %v12027_v9  ;;  %v5463_v54 = vld [vmem:[#allocation3 + $0xaf] sm:$0x3f]  ;;  %v12028_v29 = vunpack.i.l.bf16 %v12027_v9  ;;  %v12110_v4 = vpack.i.bf16 %v5174_v20, %v5466_v53  ;;  %v5117_v13 = vld [vmem:[#allocation2 + $0x2e8] ss:$2 sm:$0x3f] }
 0x44c   :  { %v12100_v26 = vpack.i.bf16 %v5153_v49, %v5463_v54  ;;  %4905 = vst.msk [vmem:[#allocation2 + $0x2fc] sm:$0xff] %vm376_vm4, %v4880_v23  ;;  %v5639_v45 = vsel %vm376_vm4, %v14742_v3, %v12023_v63  ;;  %v5640_v35 = vsel %vm376_vm4, %v14744_v55, %v12024_v19  ;;  %v4881_v2 = vmax.f32 %v4848_v5, 0.0  ;;  %v5119_v61 = vld [vmem:[#allocation2 + $0x2e9] ss:$2 sm:$0x3f]  ;;  %v5179_v54 = vld [vmem:[#allocation3 + $0x2a] sm:$0xff] }
 0x44d   :  { %v5661_v47 = vsel %vm2128_vm7, %v5640_v35, %v12029_v7  ;;  %v5660_v27 = vsel %vm2128_vm7, %v5639_v45, %v12028_v29  ;;  %12111 = vrot.lane.b32.xlu1 %v12110_v4, %s12635_s15  ;;  %v5125_v52 = vmax.f32 %v5117_v13, %v5119_v61  ;;  %v6060_v53 = vld [vmem:[#allocation3 + $0x35] sm:$0xff]  ;;  %v5158_v10 = vld [vmem:[#allocation3 + $0x29] sm:$0xff]  ;;  %v5157_v4 = vld [vmem:[#allocation3 + $0x21] sm:$0xff]  ;;  %v12155_v35 = vpack.i.bf16 %v5429_v0, %v5428_v11 }
 0x44e   :  { %12101 = vrot.lane.b32.xlu0 %v12100_v26, %s12634_s14  ;;  %v5679_v43 = vpack.c.bf16 %v5661_v47, %v5660_v27  ;;  %4906 = vst.msk [vmem:[#allocation2 + $0x304] sm:$0xff] %vm376_vm4, %v4881_v2  ;;  %v5178_v29 = vld [vmem:[#allocation3 + $0x22] sm:$0xff]  ;;  %v12140_v5 = vpack.i.bf16 %v5158_v10, %v5157_v4  ;;  %v5159_v47 = vld [vmem:[#allocation3 + $0x31] sm:$0xff]  ;;  %v5181_v27 = vld [vmem:[#allocation3 + $0x3a] sm:$0xff] }
 0x44f   :  { %v4852_v34 = vpop.f32.mrb[28].mxu0  ;;  %v12145_v26 = vpack.i.bf16 %v5179_v54, %v5178_v29  ;;  %v6062_v45 = vld [vmem:[#allocation3 + $0x45] sm:$0xff]  ;;  %v5160_v2 = vld [vmem:[#allocation3 + $0x39] sm:$0xff] }
 0x450   :  { %v4853_v44 = vadd.f32 %v14602_v24, %v4852_v34  ;;  %11163 = vmatmul.mubr.msk.bf16.gmra.mrb[12].mxu1 %vm2458_vm8, %v5679_v43  ;;  %v11146_v17 = vpop.f32.mrb[29].mxu0  ;;  %v12165_v43 = vpack.i.bf16 %v5181_v27, %v5180_v38  ;;  %v12160_v39 = vpack.i.bf16 %v5160_v2, %v5159_v47  ;;  %v6064_v34 = vld [vmem:[#allocation3 + $0x55] sm:$0xff]  ;;  %v5187_v29 = vld [vmem:[#allocation3 + $0x6a] sm:$0xff]  ;;  %v14820_v2 = vld [vmem:[#allocation3 + $0x7e] sm:$0xff] }
 0x451   :  { %12116 = vrot.lane.b32.xlu1 %v12115_v8, %s12635_s15  ;;  %v4855_v31 = vpop.f32.mrb[30].mxu0  ;;  %11166 = vmatprep.mubr.msk.bf16.mxu1 %vm12633_vm2, %v12631_v1  ;;  %v6084_v8 = vld [vmem:[#allocation3 + $0x4e] sm:$0xff]  ;;  %v14816_v38 = vld [vmem:[#allocation3 + $0x86] sm:$0xff] }
 0x452   :  { %12106 = vrot.lane.b32.xlu0 %v12105_v16, %s12634_s14  ;;  %v4882_v48 = vmax.f32 %v4853_v44, 0.0  ;;  %v11147_v18 = vpop.f32.mrb[31].mxu0  ;;  %v6063_v16 = vld [vmem:[#allocation3 + $0x4d] sm:$0xff]  ;;  %v12175_v44 = vpack.i.bf16 %v6085_v32, %v6084_v8  ;;  %v5161_v31 = vld [vmem:[#allocation3 + $0x41] sm:$0xff] }
 0x453   :  { %v5120_v56 = vld [vmem:[#allocation2 + $0x2f4] ss:$2 sm:$0xff]  ;;  %v5122_v24 = vld [vmem:[#allocation2 + $0x2f5] ss:$2 sm:$0xff]  ;;  %v12170_v21 = vpack.i.bf16 %v6064_v34, %v6063_v16  ;;  %v12180_v22 = vpack.i.bf16 %v5162_v51, %v5161_v31  ;;  %v5189_v34 = vld [vmem:[#allocation3 + $0x7a] sm:$0xff] }
 0x454   :  { %v5126_v46 = vmax.f32 %v5120_v56, %v5122_v24  ;;  %4907 = vst.msk [vmem:[#allocation2 + $0x30c] sm:$0xf] %vm401_vm6, %v4882_v48  ;;  %v5183_v17 = vld [vmem:[#allocation3 + $0x4a] sm:$0xff]  ;;  %v6065_v18 = vld [vmem:[#allocation3 + $0x5d] sm:$0xff]  ;;  %v5188_v16 = vld [vmem:[#allocation3 + $0x72] sm:$0xff] }
 0x455   :  { %12126 = vrot.lane.b32.xlu1 %v12125_v25, %s12635_s15  ;;  %v12185_v48 = vpack.i.bf16 %v5183_v17, %v5182_v62  ;;  %v6087_v56 = vld [vmem:[#allocation3 + $0x66] sm:$0xff]  ;;  %v14829_v51 = vld [vmem:[#allocation3 + $0x8e] sm:$0xff]  ;;  %v14831_v62 = vld [vmem:[#allocation3 + $0x96] sm:$0xff] }
 0x456   :  { %12121 = vrot.lane.b32.xlu0 %v12120_v60, %s12634_s14  ;;  %v5128_v15 = vmax.f32 %v5124_v40, %v5126_v46  ;;  %v6066_v24 = vld [vmem:[#allocation3 + $0x65] sm:$0xff]  ;;  %v12195_v25 = vpack.i.bf16 %v6087_v56, %v6086_v37  ;;  %v5185_v40 = vld [vmem:[#allocation3 + $0x5a] sm:$0xff]  ;;  %v6071_v31 = vld [vmem:[#allocation3 + $0x8d] sm:$0xff] }
 0x457   :  { %v12190_v60 = vpack.i.bf16 %v6066_v24, %v6065_v18  ;;  %v5164_v46 = vld [vmem:[#allocation3 + $0x59] sm:$0xff]  ;;  %v5166_v4 = vld [vmem:[#allocation3 + $0x69] sm:$0xff] }
 0x458   :  { %v12032_v59 = vpop.permute.xlu0 %12031  ;;  %5130 = vst.msk [vmem:[#allocation3 + $0xb6] sm:$0xff] %vm376_vm4, %v5128_v15  ;;  %v6070_v47 = vld [vmem:[#allocation3 + $0x85] sm:$0xff] }
 0x459   :  { %v12037_v6 = vpop.permute.xlu1 %12036  ;;  %v12034_v14 = vunpack.i.h.bf16 %v12032_v59  ;;  %v12033_v41 = vunpack.i.l.bf16 %v12032_v59  ;;  %12136 = vrot.lane.b32.xlu1 %v12135_v12, %s12635_s15  ;;  %v5184_v59 = vld [vmem:[#allocation3 + $0x52] sm:$0xff]  ;;  %v5191_v18 = vld [vmem:[#allocation3 + $0x8a] sm:$0xff]  ;;  %v5190_v24 = vld [vmem:[#allocation3 + $0x82] sm:$0xff] }
 0x45a   :  { %v12039_v50 = vunpack.i.h.bf16 %v12037_v6  ;;  %v12038_v30 = vunpack.i.l.bf16 %v12037_v6  ;;  %12131 = vrot.lane.b32.xlu0 %v12130_v57, %s12634_s14  ;;  %v5163_v6 = vld [vmem:[#allocation3 + $0x51] sm:$0xff]  ;;  %v12205_v12 = vpack.i.bf16 %v5185_v40, %v5184_v59 }
 0x45b   :  { %v5642_v58 = vsel %vm376_vm4, %v5429_v0, %v12034_v14  ;;  %v5641_v9 = vsel %vm376_vm4, %v5428_v11, %v12033_v41  ;;  %v5121_v20 = vld [vmem:[#allocation2 + $0x304] ss:$2 sm:$0x3f]  ;;  %v5123_v49 = vld [vmem:[#allocation2 + $0x305] ss:$2 sm:$0x3f]  ;;  %v12200_v57 = vpack.i.bf16 %v5164_v46, %v5163_v6 }
 0x45c   :  { %v5663_v23 = vsel %vm2128_vm7, %v5642_v58, %v12039_v50  ;;  %v5662_v19 = vsel %vm2128_vm7, %v5641_v9, %v12038_v30  ;;  %v5127_v63 = vmax.f32 %v5121_v20, %v5123_v49  ;;  %v14797_v50 = vld [vmem:[#allocation3 + $0x76] sm:$0xff]  ;;  %v14839_v46 = vld [vmem:[#allocation3 + $0xa6] sm:$0xff] }
 0x45d   :  { %v5680_v7 = vpack.c.bf16 %v5663_v23, %v5662_v19  ;;  %6210 = vrot.lane.b32.xlu1 %v14744_v55, %s12635_s15  ;;  %v6061_v55 = vld [vmem:[#allocation3 + $0x3d] sm:$0xff]  ;;  %v6068_v30 = vld [vmem:[#allocation3 + $0x75] sm:$0xff]  ;;  %v6067_v19 = vld [vmem:[#allocation3 + $0x6d] sm:$0xff] }
 0x45e   :  { %6126 = vrot.lane.b32.xlu0 %v6060_v53, %s12634_s14  ;;  %v5129_v3 = vmax.f32 %v5125_v52, %v5127_v63  ;;  %v12150_v33 = vpack.i.bf16 %v6062_v45, %v6061_v55  ;;  %v14803_v23 = vld [vmem:[#allocation3 + $0x6e] sm:$0xff]  ;;  %v12210_v54 = vpack.i.bf16 %v6068_v30, %v6067_v19  ;;  %v5172_v6 = vld [vmem:[#allocation3 + $0x99] sm:$0xff] }
 0x45f   :  { %11167 = vmatmul.mubr.msk.bf16.gmra.mrb[16].mxu1 %vm2458_vm8, %v5680_v7  ;;  %v12215_v53 = vpack.i.bf16 %v14797_v50, %v14803_v23  ;;  %v5171_v59 = vld [vmem:[#allocation3 + $0x91] sm:$0xff] }
 0x460   :  { %11170 = vmatprep.mubr.msk.bf16.mxu1 %vm12633_vm2, %v12631_v1  ;;  %5131 = vst.msk [vmem:[#allocation3 + $0xbe] sm:$0x3f] %vm1562_vm5, %v5129_v3  ;;  %v6076_v30 = vld [vmem:[#allocation3 + $0xb5] sm:$0xff] }
 0x461   :  { %12146 = vrot.lane.b32.xlu1 %v12145_v26, %s12635_s15  ;;  %v5186_v26 = vld [vmem:[#allocation3 + $0x62] sm:$0xff] }
 0x462   :  { %12141 = vrot.lane.b32.xlu0 %v12140_v5, %s12634_s14  ;;  %v5165_v5 = vld [vmem:[#allocation3 + $0x61] sm:$0xff] }
 0x465   :  { %12156 = vrot.lane.b32.xlu1 %v12155_v35, %s12635_s15  ;;  %v12225_v35 = vpack.i.bf16 %v5187_v29, %v5186_v26 }
 0x466   :  { %12151 = vrot.lane.b32.xlu0 %v12150_v33, %s12634_s14  ;;  %v12220_v33 = vpack.i.bf16 %v5166_v4, %v5165_v5  ;;  %v5173_v4 = vld [vmem:[#allocation3 + $0xa1] sm:$0x3f] }
 0x469   :  { %12166 = vrot.lane.b32.xlu1 %v12165_v43, %s12635_s15  ;;  %v6069_v43 = vld [vmem:[#allocation3 + $0x7d] sm:$0xff] }
 0x46a   :  { %12161 = vrot.lane.b32.xlu0 %v12160_v39, %s12634_s14  ;;  %v12235_v39 = vpack.i.bf16 %v14816_v38, %v14820_v2 }
 0x46d   :  { %12176 = vrot.lane.b32.xlu1 %v12175_v44, %s12635_s15  ;;  %v5167_v44 = vld [vmem:[#allocation3 + $0x71] sm:$0xff] }
 0x46e   :  { %12171 = vrot.lane.b32.xlu0 %v12170_v21, %s12634_s14  ;;  %v12245_v21 = vpack.i.bf16 %v5189_v34, %v5188_v16 }
 0x471   :  { %12186 = vrot.lane.b32.xlu1 %v12185_v48, %s12635_s15  ;;  %v6072_v48 = vld [vmem:[#allocation3 + $0x95] sm:$0xff] }
 0x472   :  { %12181 = vrot.lane.b32.xlu0 %v12180_v22, %s12634_s14  ;;  %v12260_v22 = vpack.i.bf16 %v14831_v62, %v14829_v51 }
 0x475   :  { %12196 = vrot.lane.b32.xlu1 %v12195_v25, %s12635_s15  ;;  %v5169_v25 = vld [vmem:[#allocation3 + $0x81] sm:$0xff] }
 0x476   :  { %v12042_v28 = vpop.permute.xlu0 %12041  ;;  %12191 = vrot.lane.b32.xlu0 %v12190_v60, %s12634_s14  ;;  %v12265_v60 = vpack.i.bf16 %v5191_v18, %v5190_v24 }
 0x477   :  { %v12047_v15 = vpop.permute.xlu1 %12046  ;;  %v12044_v42 = vunpack.i.h.bf16 %v12042_v28  ;;  %v12043_v36 = vunpack.i.l.bf16 %v12042_v28  ;;  %v6074_v28 = vld [vmem:[#allocation3 + $0xa5] sm:$0xff] }
 0x478   :  { %v12049_v13 = vunpack.i.h.bf16 %v12047_v15  ;;  %v12048_v61 = vunpack.i.l.bf16 %v12047_v15  ;;  %v14843_v15 = vld [vmem:[#allocation3 + $0x9e] sm:$0xff] }
 0x479   :  { %v5643_v14 = vsel %vm376_vm4, %v6084_v8, %v12043_v36  ;;  %v5644_v41 = vsel %vm376_vm4, %v6085_v32, %v12044_v42  ;;  %12206 = vrot.lane.b32.xlu1 %v12205_v12, %s12635_s15  ;;  %v12230_v32 = vpack.i.bf16 %v6070_v47, %v6069_v43  ;;  %v5168_v8 = vld [vmem:[#allocation3 + $0x79] sm:$0xff]  ;;  %v12275_v36 = vpack.i.bf16 %v14839_v46, %v14843_v15 }
 0x47a   :  { %v5665_v11 = vsel %vm2128_vm7, %v5644_v41, %v12049_v13  ;;  %v5664_v0 = vsel %vm2128_vm7, %v5643_v14, %v12048_v61  ;;  %v12052_v52 = vpop.permute.xlu0 %12051  ;;  %12201 = vrot.lane.b32.xlu0 %v12200_v57, %s12634_s14  ;;  %v12240_v17 = vpack.i.bf16 %v5168_v8, %v5167_v44  ;;  %v6073_v42 = vld [vmem:[#allocation3 + $0x9d] sm:$0xff]  ;;  %v5192_v61 = vld [vmem:[#allocation3 + $0x92] sm:$0xff]  ;;  %v12280_v14 = vpack.i.bf16 %v5172_v6, %v5171_v59 }
 0x47b   :  { %v12057_v58 = vpop.permute.xlu1 %12056  ;;  %v5681_v9 = vpack.c.bf16 %v5665_v11, %v5664_v0  ;;  %v12054_v20 = vunpack.i.h.bf16 %v12052_v52  ;;  %v12053_v49 = vunpack.i.l.bf16 %v12052_v52  ;;  %v12270_v13 = vpack.i.bf16 %v6074_v28, %v6073_v42  ;;  %v5193_v12 = vld [vmem:[#allocation3 + $0x9a] sm:$0xff]  ;;  %v6096_v11 = vld [vmem:[#allocation3 + $0xae] sm:$0xff] }
 0x47c   :  { %v12059_v63 = vunpack.i.h.bf16 %v12057_v58  ;;  %v12058_v7 = vunpack.i.l.bf16 %v12057_v58  ;;  %v12285_v57 = vpack.i.bf16 %v5193_v12, %v5192_v61  ;;  %v6097_v41 = vld [vmem:[#allocation3 + $0xb6] sm:$0xff]  ;;  %v6075_v0 = vld [vmem:[#allocation3 + $0xad] sm:$0xff] }
 0x47d   :  { %v5646_v10 = vsel %vm376_vm4, %v6087_v56, %v12054_v20  ;;  %v5645_v3 = vsel %vm376_vm4, %v6086_v37, %v12053_v49  ;;  %11171 = vmatmul.mubr.msk.bf16.gmra.mrb[20].mxu1 %vm2458_vm8, %v5681_v9  ;;  %12216 = vrot.lane.b32.xlu1 %v12215_v53, %s12635_s15  ;;  %v12250_v37 = vpack.i.bf16 %v6072_v48, %v6071_v31  ;;  %v5170_v56 = vld [vmem:[#allocation3 + $0x89] sm:$0xff]  ;;  %v6077_v53 = vld [vmem:[#allocation3 + $0xbd] sm:$0x3f] }
 0x47e   :  { %12211 = vrot.lane.b32.xlu0 %v12210_v54, %s12634_s14  ;;  %11174 = vmatprep.mubr.msk.bf16.mxu1 %vm12633_vm2, %v12631_v1  ;;  %v5667_v45 = vsel %vm2128_vm7, %v5646_v10, %v12059_v63  ;;  %v5666_v55 = vsel %vm2128_vm7, %v5645_v3, %v12058_v7  ;;  %v12255_v40 = vpack.i.bf16 %v5170_v56, %v5169_v25 }
 0x47f   :  { %v5682_v27 = vpack.c.bf16 %v5667_v45, %v5666_v55  ;;  %v12295_v9 = vpack.i.bf16 %v6097_v41, %v6096_v11  ;;  %v12290_v20 = vpack.i.bf16 %v6076_v30, %v6075_v0  ;;  %v12300_v5 = vpack.i.bf16 %v6077_v53, %v5173_v4  ;;  %v5194_v45 = vld [vmem:[#allocation3 + $0xa2] sm:$0x3f] }
 0x480   :  { %v5132_v0 = vld [vmem:[#allocation3] sm:$0xff] }
 0x481   :  { %12226 = vrot.lane.b32.xlu1 %v12225_v35, %s12635_s15  ;;  %v6036_v4 = vld [vmem:[#allocation3 + $0x1c] sm:$0xff] }
 0x482   :  { %12221 = vrot.lane.b32.xlu0 %v12220_v33, %s12634_s14 }
 0x485   :  { %11175 = vmatmul.mubr.msk.bf16.gmra.mrb[24].mxu1 %vm2458_vm8, %v5682_v27  ;;  %12236 = vrot.lane.b32.xlu1 %v12235_v39, %s12635_s15 }
 0x486   :  { %12231 = vrot.lane.b32.xlu0 %v12230_v32, %s12634_s14  ;;  %11178 = vmatprep.mubr.msk.bf16.mxu1 %vm12633_vm2, %v12631_v1 }
 0x489   :  { %12246 = vrot.lane.b32.xlu1 %v12245_v21, %s12635_s15 }
 0x48a   :  { %12241 = vrot.lane.b32.xlu0 %v12240_v17, %s12634_s14 }
 0x48d   :  { %12261 = vrot.lane.b32.xlu1 %v12260_v22, %s12635_s15 }
 0x48e   :  { %12251 = vrot.lane.b32.xlu0 %v12250_v37, %s12634_s14 }
 0x491   :  { %12266 = vrot.lane.b32.xlu1 %v12265_v60, %s12635_s15 }
 0x492   :  { %12256 = vrot.lane.b32.xlu0 %v12255_v40, %s12634_s14 }
 0x495   :  { %12276 = vrot.lane.b32.xlu1 %v12275_v36, %s12635_s15 }
 0x496   :  { %12271 = vrot.lane.b32.xlu0 %v12270_v13, %s12634_s14 }
 0x499   :  { %12286 = vrot.lane.b32.xlu1 %v12285_v57, %s12635_s15 }
 0x49a   :  { %12281 = vrot.lane.b32.xlu0 %v12280_v14, %s12634_s14  ;;  %v5442_v14 = vld [vmem:[#allocation3 + $0xae] sm:$0x3f] }
 0x49b   :  { %v12062_v52 = vpop.permute.xlu0 %12061 }
 0x49c   :  { %v12067_v58 = vpop.permute.xlu1 %12066  ;;  %v12064_v49 = vunpack.i.h.bf16 %v12062_v52  ;;  %v12063_v19 = vunpack.i.l.bf16 %v12062_v52 }
 0x49d   :  { %v12069_v63 = vunpack.i.h.bf16 %v12067_v58  ;;  %v12068_v7 = vunpack.i.l.bf16 %v12067_v58  ;;  %12296 = vrot.lane.b32.xlu1 %v12295_v9, %s12635_s15 }
 0x49e   :  { %v5648_v54 = vsel %vm376_vm4, %v14797_v50, %v12064_v49  ;;  %v5647_v10 = vsel %vm376_vm4, %v14803_v23, %v12063_v19  ;;  %12291 = vrot.lane.b32.xlu0 %v12290_v20, %s12634_s14  ;;  %v6098_v50 = vld [vmem:[#allocation3 + $0xbe] sm:$0x3f]  ;;  %v5133_v49 = vld [vmem:[#allocation3 + $0x8] sm:$0xff] }
 0x49f   :  { %v5669_v3 = vsel %vm2128_vm7, %v5648_v54, %v12069_v63  ;;  %v5668_v29 = vsel %vm2128_vm7, %v5647_v10, %v12068_v7 }
 0x4a0   :  { %v5683_v26 = vpack.c.bf16 %v5669_v3, %v5668_v29 }
 0x4a1   :  { %5340 = vrot.lane.b32.xlu1 %v5194_v45, %s12635_s15 }
 0x4a2   :  { %12301 = vrot.lane.b32.xlu0 %v12300_v5, %s12634_s14  ;;  %11179 = vmatmul.mubr.msk.bf16.gmra.mrb[28].mxu1 %vm2458_vm8, %v5683_v26 }
 0x4a3   :  { %11182 = vmatprep.mubr.msk.bf16.mxu1 %vm12633_vm2, %v12631_v1 }
 0x4a6   :  { %6244 = vrot.lane.b32.xlu0 %v6098_v50, %s12635_s15  ;;  %s12636_s15 = smov [#allocation6]  }
 0x4a7   :  { %s9318_s0 = sshll.u32 %s12636_s15, 4  ;;  %s9319_s0 = int_to_ptr.vmem [resolvable:$true] %s9318_s0 }
 0x4a8   :  { %p12612_p1 = scmp.lt.s32.totalorder %s9319_s0, %s9319_s0 }
 0x4a9   :  { %v12072_v23 = vpop.permute.xlu0 %12071 }
 0x4aa   :  { %v12077_v55 = vpop.permute.xlu1 %12076  ;;  %v12074_v35 = vunpack.i.h.bf16 %v12072_v23  ;;  %v12073_v33 = vunpack.i.l.bf16 %v12072_v23  ;;  %v6037_v23 = vld [vmem:[#allocation3 + $0x24] sm:$0xff] }
 0x4ab   :  { %v12079_v47 = vunpack.i.h.bf16 %v12077_v55  ;;  %v12078_v27 = vunpack.i.l.bf16 %v12077_v55 }
 0x4ac   :  { %v5649_v43 = vsel %vm376_vm4, %v14820_v2, %v12073_v33  ;;  %v5650_v39 = vsel %vm376_vm4, %v14816_v38, %v12074_v35 }
 0x4ad   :  { %v5671_v32 = vsel %vm2128_vm7, %v5650_v39, %v12079_v47  ;;  %v5670_v34 = vsel %vm2128_vm7, %v5649_v43, %v12078_v27 }
 0x4ae   :  { %v5684_v8 = vpack.c.bf16 %v5671_v32, %v5670_v34  ;;  %v12589_v32 = vld [vmem:[#allocation3 + $0x10] sm:$0xff] }
 0x4b0   :  { %11183 = vmatmul.mubr.msk.bf16.gmra.mrb[32].mxu1 %vm2458_vm8, %v5684_v8 }
 0x4b1   :  { %11186 = vmatprep.mubr.msk.bf16.mxu1 %vm12633_vm2, %v12631_v1  ;;  %v12082_v16 = vpop.permute.xlu0 %12081 }
 0x4b2   :  { %v12084_v44 = vunpack.i.h.bf16 %v12082_v16  ;;  %v12083_v21 = vunpack.i.l.bf16 %v12082_v16  ;;  %v12087_v17 = vpop.permute.xlu1 %12086 }
 0x4b3   :  { %v12089_v31 = vunpack.i.h.bf16 %v12087_v17  ;;  %v12088_v48 = vunpack.i.l.bf16 %v12087_v17 }
 0x4b4   :  { %v5651_v2 = vsel %vm376_vm4, %v14829_v51, %v12083_v21  ;;  %v5652_v38 = vsel %vm376_vm4, %v14831_v62, %v12084_v44  ;;  %v12590_v21 = vld [vmem:[#allocation3 + $0x18] sm:$0xff] }
 0x4b5   :  { %v5673_v22 = vsel %vm2128_vm7, %v5652_v38, %v12089_v31  ;;  %v5672_v37 = vsel %vm2128_vm7, %v5651_v2, %v12088_v48  ;;  %v6039_v48 = vld [vmem:[#allocation3 + $0x34] sm:$0xff] }
 0x4b6   :  { %v5685_v18 = vpack.c.bf16 %v5673_v22, %v5672_v37 }
 0x4b7   :  { %v12097_v56 = vpop.permute.xlu1 %12096 }
 0x4b8   :  { %v12092_v24 = vpop.permute.xlu0 %12091  ;;  %v12099_v25 = vunpack.i.h.bf16 %v12097_v56  ;;  %v12098_v60 = vunpack.i.l.bf16 %v12097_v56  ;;  %11187 = vmatmul.mubr.msk.bf16.gmra.mrb[36].mxu1 %vm2458_vm8, %v5685_v18  ;;  %v6038_v56 = vld [vmem:[#allocation3 + $0x2c] sm:$0xff] }
 0x4b9   :  { %v12094_v40 = vunpack.i.h.bf16 %v12092_v24  ;;  %v12093_v28 = vunpack.i.l.bf16 %v12092_v24  ;;  %11190 = vmatprep.mubr.msk.bf16.mxu1 %vm12633_vm2, %v12631_v1 }
 0x4bb   :  { %v5653_v51 = vsel %vm376_vm4, %v14843_v15, %v12093_v28  ;;  %v5654_v62 = vsel %vm376_vm4, %v14839_v46, %v12094_v40 }
 0x4bc   :  { %v5674_v42 = vsel %vm2128_vm7, %v5653_v51, %v12098_v60  ;;  %v5675_v36 = vsel %vm2128_vm7, %v5654_v62, %v12099_v25 }
 0x4bd   :  { %v5686_v13 = vpack.c.bf16 %v5675_v36, %v5674_v42 }
 0x4bf   :  { %v12112_v61 = vpop.permute.xlu1 %12111 }
 0x4c0   :  { %v12102_v59 = vpop.permute.xlu0 %12101  ;;  %v12113_v6 = vunpack.i.l.bf16 %v12112_v61  ;;  %11191 = vmatmul.mubr.msk.bf16.gmra.mrb[40].mxu1 %vm2458_vm8, %v5686_v13  ;;  %v12114_v11 = vunpack.i.h.bf16 %v12112_v61 }
 0x4c1   :  { %v12103_v12 = vunpack.i.l.bf16 %v12102_v59  ;;  %v12104_v57 = vunpack.i.h.bf16 %v12102_v59  ;;  %11194 = vmatprep.mubr.msk.bf16.mxu1 %vm12633_vm2, %v12631_v1  ;;  %v12591_v59 = vld [vmem:[#allocation3 + $0x28] sm:$0xff] }
 0x4c3   :  { %v5655_v15 = vsel %vm376_vm4, %v5442_v14, %v12103_v12  ;;  %v12117_v41 = vpop.permute.xlu1 %12116  ;;  %v5363_v58 = vsel %vm376_vm4, %v5132_v0, %v12104_v57  ;;  %v12592_v12 = vld [vmem:[#allocation3 + $0x20] sm:$0xff] }
 0x4c4   :  { %v5676_v46 = vsel %vm2128_vm7, %v5655_v15, %v12113_v6  ;;  %v12107_v30 = vpop.permute.xlu0 %12106  ;;  %v12118_v52 = vunpack.i.l.bf16 %v12117_v41  ;;  %v5384_v54 = vsel %vm2128_vm7, %v5363_v58, %v12114_v11  ;;  %v12119_v29 = vunpack.i.h.bf16 %v12117_v41  ;;  %v6041_v58 = vld [vmem:[#allocation3 + $0x44] sm:$0xff] }
 0x4c5   :  { %v12108_v9 = vunpack.i.l.bf16 %v12107_v30  ;;  %v5687_v20 = vpack.c.bf16 %v5676_v46, %v5676_v46  ;;  %v12109_v19 = vunpack.i.h.bf16 %v12107_v30 }
 0x4c7   :  { %v5364_v63 = vsel %vm376_vm4, %v5133_v49, %v12108_v9  ;;  %v12127_v7 = vpop.permute.xlu1 %12126  ;;  %v6267_v50 = vsel %vm376_vm4, %v6036_v4, %v12109_v19  ;;  %v12467_v19 = vld [vmem:[%s15790_s5 + $0x14] sm:$0xff]  }
 0x4c8   :  { %v12122_v53 = vpop.permute.xlu0 %12121  ;;  %v5385_v10 = vsel %vm2128_vm7, %v5364_v63, %v12118_v52  ;;  %v12128_v3 = vunpack.i.l.bf16 %v12127_v7  ;;  %11195 = vmatmul.mubr.msk.bf16.gmra.mrb[44].mxu1 %vm2458_vm8, %v5687_v20  ;;  %v12129_v47 = vunpack.i.h.bf16 %v12127_v7  ;;  %v6288_v39 = vsel %vm2128_vm7, %v6267_v50, %v12119_v29  ;;  %v6040_v20 = vld [vmem:[#allocation3 + $0x3c] sm:$0xff] }
 0x4c9   :  { %v5405_v26 = vpack.c.bf16 %v5385_v10, %v5384_v54  ;;  %v12124_v5 = vunpack.i.h.bf16 %v12122_v53  ;;  %v12123_v45 = vunpack.i.l.bf16 %v12122_v53  ;;  %11254 = vmatprep.mubr.msk.bf16.mxu1 %vm12633_vm2, %v12631_v1 }
 0x4cb   :  { %v6268_v55 = vsel %vm376_vm4, %v6037_v23, %v12123_v45  ;;  %11205 = vmatmul.mubr.msk.bf16.vlgmr.msra.gmra.mrb[32].mxu0 %vm2458_vm8, %v5405_v26  ;;  %v12137_v35 = vpop.permute.xlu1 %12136  ;;  %v5365_v34 = vsel %vm376_vm4, %v12589_v32, %v12124_v5  ;;  %v12593_v45 = vld [vmem:[#allocation3 + $0x38] sm:$0xff] }
 0x4cc   :  { %v12132_v33 = vpop.permute.xlu0 %12131  ;;  %v6289_v27 = vsel %vm2128_vm7, %v6268_v55, %v12128_v3  ;;  %v12138_v43 = vunpack.i.l.bf16 %v12137_v35  ;;  %11208 = vmatprep.mubr.msk.bf16.mxu0 %vm12633_vm2, %v12631_v1  ;;  %v5386_v38 = vsel %vm2128_vm7, %v5365_v34, %v12129_v47  ;;  %v12139_v18 = vunpack.i.h.bf16 %v12137_v35  ;;  %11299 = vmatpush3.bf16.msra.mxu0 %v12467_v19  ;;  %v12594_v55 = vld [vmem:[#allocation3 + $0x30] sm:$0xff]  ;;  %v12597_v19 = vld [vmem:[#allocation3 + $0x58] sm:$0xff] }
 0x4cd   :  { %v12133_v8 = vunpack.i.l.bf16 %v12132_v33  ;;  %v6309_v16 = vpack.c.bf16 %v6289_v27, %v6288_v39  ;;  %v12134_v44 = vunpack.i.h.bf16 %v12132_v33  ;;  %11300 = vmatprep.subr.bf16.mxu0 %v12631_v1 }
 0x4cf   :  { %v5366_v17 = vsel %vm376_vm4, %v12590_v21, %v12133_v8  ;;  %v6211_v31 = vpop.permute.xlu1 %6210  ;;  %v6269_v25 = vsel %vm376_vm4, %v6038_v56, %v12134_v44  ;;  %v6043_v8 = vld [vmem:[#allocation3 + $0x54] sm:$0xff]  ;;  %v6042_v44 = vld [vmem:[#allocation3 + $0x4c] sm:$0xff] }
 0x4d0   :  { %v6127_v2 = vpop.permute.xlu0 %6126  ;;  %v5387_v22 = vsel %vm2128_vm7, %v5366_v17, %v12138_v43  ;;  %11255 = vmatmul.mubr.msk.bf16.vlgmr.msra.gmra.mrb[48].mxu1 %vm2458_vm8, %v6309_v16  ;;  %v6290_v13 = vsel %vm2128_vm7, %v6269_v25, %v12139_v18  ;;  %v12595_v25 = vld [vmem:[#allocation3 + $0x48] sm:$0xff] }
 0x4d1   :  { %v6270_v37 = vsel %vm376_vm4, %v6039_v48, %v6127_v2  ;;  %v5406_v24 = vpack.c.bf16 %v5387_v22, %v5386_v38  ;;  %11258 = vmatprep.mubr.msk.bf16.mxu1 %vm12633_vm2, %v12631_v1 }
 0x4d2   :  { %v6291_v60 = vsel %vm2128_vm7, %v6270_v37, %v6211_v31 }
 0x4d3   :  { %11209 = vmatmul.mubr.msk.bf16.gmra.mrb[36].mxu0 %vm2458_vm8, %v5406_v24  ;;  %v12147_v40 = vpop.permute.xlu1 %12146  ;;  %v6310_v61 = vpack.c.bf16 %v6291_v60, %v6290_v13 }
 0x4d4   :  { %v12142_v28 = vpop.permute.xlu0 %12141  ;;  %v12149_v51 = vunpack.i.h.bf16 %v12147_v40  ;;  %v12148_v62 = vunpack.i.l.bf16 %v12147_v40  ;;  %11212 = vmatprep.mubr.msk.bf16.mxu0 %vm12633_vm2, %v12631_v1 }
 0x4d5   :  { %v12144_v42 = vunpack.i.h.bf16 %v12142_v28  ;;  %v12143_v36 = vunpack.i.l.bf16 %v12142_v28  ;;  %v12596_v28 = vld [vmem:[#allocation3 + $0x40] sm:$0xff] }
 0x4d7   :  { %v5368_v6 = vsel %vm376_vm4, %v12591_v59, %v12144_v42  ;;  %v5367_v57 = vsel %vm376_vm4, %v12592_v12, %v12143_v36  ;;  %v12157_v46 = vpop.permute.xlu1 %12156  ;;  %v6045_v12 = vld [vmem:[#allocation3 + $0x64] sm:$0xff] }
 0x4d8   :  { %v5389_v14 = vsel %vm2128_vm7, %v5368_v6, %v12149_v51  ;;  %v5388_v15 = vsel %vm2128_vm7, %v5367_v57, %v12148_v62  ;;  %v12152_v41 = vpop.permute.xlu0 %12151  ;;  %v12159_v11 = vunpack.i.h.bf16 %v12157_v46  ;;  %v12158_v0 = vunpack.i.l.bf16 %v12157_v46  ;;  %11259 = vmatmul.mubr.msk.bf16.gmra.mrb[52].mxu1 %vm2458_vm8, %v6310_v61 }
 0x4d9   :  { %v5407_v30 = vpack.c.bf16 %v5389_v14, %v5388_v15  ;;  %v12154_v52 = vunpack.i.h.bf16 %v12152_v41  ;;  %v12153_v9 = vunpack.i.l.bf16 %v12152_v41  ;;  %11262 = vmatprep.mubr.msk.bf16.mxu1 %vm12633_vm2, %v12631_v1  ;;  %v6044_v14 = vld [vmem:[#allocation3 + $0x5c] sm:$0xff] }
 0x4db   :  { %v6272_v49 = vsel %vm376_vm4, %v6041_v58, %v12154_v52  ;;  %v6271_v7 = vsel %vm376_vm4, %v6040_v20, %v12153_v9  ;;  %11213 = vmatmul.mubr.msk.bf16.gmra.mrb[40].mxu0 %vm2458_vm8, %v5407_v30  ;;  %v12167_v53 = vpop.permute.xlu1 %12166 }
 0x4dc   :  { %v6293_v63 = vsel %vm2128_vm7, %v6272_v49, %v12159_v11  ;;  %v12162_v54 = vpop.permute.xlu0 %12161  ;;  %v6292_v10 = vsel %vm2128_vm7, %v6271_v7, %v12158_v0  ;;  %v12169_v3 = vunpack.i.h.bf16 %v12167_v53  ;;  %v12168_v29 = vunpack.i.l.bf16 %v12167_v53  ;;  %11216 = vmatprep.mubr.msk.bf16.mxu0 %vm12633_vm2, %v12631_v1  ;;  %v12598_v53 = vld [vmem:[#allocation3 + $0x50] sm:$0xff] }
 0x4dd   :  { %v12164_v4 = vunpack.i.h.bf16 %v12162_v54  ;;  %v12163_v26 = vunpack.i.l.bf16 %v12162_v54  ;;  %v6311_v5 = vpack.c.bf16 %v6293_v63, %v6292_v10 }
 0x4df   :  { %v5370_v50 = vsel %vm376_vm4, %v12593_v45, %v12164_v4  ;;  %v5369_v35 = vsel %vm376_vm4, %v12594_v55, %v12163_v26  ;;  %v12177_v33 = vpop.permute.xlu1 %12176  ;;  %v6046_v55 = vld [vmem:[#allocation3 + $0x6c] sm:$0xff] }
 0x4e0   :  { %v5391_v23 = vsel %vm2128_vm7, %v5370_v50, %v12169_v3  ;;  %v12172_v47 = vpop.permute.xlu0 %12171  ;;  %v5390_v27 = vsel %vm2128_vm7, %v5369_v35, %v12168_v29  ;;  %v12179_v43 = vunpack.i.h.bf16 %v12177_v33  ;;  %v12178_v39 = vunpack.i.l.bf16 %v12177_v33  ;;  %11263 = vmatmul.mubr.msk.bf16.gmra.mrb[56].mxu1 %vm2458_vm8, %v6311_v5  ;;  %v6047_v50 = vld [vmem:[#allocation3 + $0x74] sm:$0xff] }
 0x4e1   :  { %v12174_v32 = vunpack.i.h.bf16 %v12172_v47  ;;  %v5408_v34 = vpack.c.bf16 %v5391_v23, %v5390_v27  ;;  %v12173_v16 = vunpack.i.l.bf16 %v12172_v47  ;;  %11266 = vmatprep.mubr.msk.bf16.mxu1 %vm12633_vm2, %v12631_v1 }
 0x4e3   :  { %v6274_v21 = vsel %vm376_vm4, %v6043_v8, %v12174_v32  ;;  %v6273_v31 = vsel %vm376_vm4, %v6042_v44, %v12173_v16  ;;  %11217 = vmatmul.mubr.msk.bf16.gmra.mrb[44].mxu0 %vm2458_vm8, %v5408_v34  ;;  %v12187_v48 = vpop.permute.xlu1 %12186  ;;  %v12468_v44 = vld [vmem:[%s15790_s5] sm:$0xff]  }
 0x4e4   :  { %v6295_v17 = vsel %vm2128_vm7, %v6274_v21, %v12179_v43  ;;  %v12182_v2 = vpop.permute.xlu0 %12181  ;;  %v6294_v38 = vsel %vm2128_vm7, %v6273_v31, %v12178_v39  ;;  %v12189_v22 = vunpack.i.h.bf16 %v12187_v48  ;;  %v12188_v37 = vunpack.i.l.bf16 %v12187_v48  ;;  %11220 = vmatprep.mubr.msk.bf16.mxu0 %vm12633_vm2, %v12631_v1  ;;  %11309 = vmatpush3.bf16.msra.mxu1 %v12468_v44 }
 0x4e5   :  { %v12184_v18 = vunpack.i.h.bf16 %v12182_v2  ;;  %v12183_v56 = vunpack.i.l.bf16 %v12182_v2  ;;  %v6312_v24 = vpack.c.bf16 %v6295_v17, %v6294_v38  ;;  %v12599_v17 = vld [vmem:[#allocation3 + $0x68] sm:$0xff]  ;;  %v12600_v2 = vld [vmem:[#allocation3 + $0x60] sm:$0xff]  ;;  %11310 = vmatprep.subr.bf16.mxu1 %v12631_v1 }
 0x4e7   :  { %v5372_v60 = vsel %vm376_vm4, %v12595_v25, %v12184_v18  ;;  %v5371_v51 = vsel %vm376_vm4, %v12596_v28, %v12183_v56  ;;  %v12197_v62 = vpop.permute.xlu1 %12196 }
 0x4e8   :  { %v5393_v40 = vsel %vm2128_vm7, %v5372_v60, %v12189_v22  ;;  %v12192_v42 = vpop.permute.xlu0 %12191  ;;  %v5392_v36 = vsel %vm2128_vm7, %v5371_v51, %v12188_v37  ;;  %v12199_v13 = vunpack.i.h.bf16 %v12197_v62  ;;  %v12198_v61 = vunpack.i.l.bf16 %v12197_v62  ;;  %11267 = vmatmul.mubr.msk.bf16.gmra.mrb[60].mxu1 %vm2458_vm8, %v6312_v24  ;;  %v6048_v51 = vld [vmem:[#allocation3 + $0x7c] sm:$0xff] }
 0x4e9   :  { %v12194_v59 = vunpack.i.h.bf16 %v12192_v42  ;;  %v5409_v6 = vpack.c.bf16 %v5393_v40, %v5392_v36  ;;  %v12193_v57 = vunpack.i.l.bf16 %v12192_v42  ;;  %11270 = vmatprep.mubr.msk.bf16.mxu1 %vm12633_vm2, %v12631_v1  ;;  %v6049_v40 = vld [vmem:[#allocation3 + $0x84] sm:$0xff] }
 0x4eb   :  { %v6276_v15 = vsel %vm376_vm4, %v6045_v12, %v12194_v59  ;;  %v6275_v41 = vsel %vm376_vm4, %v6044_v14, %v12193_v57  ;;  %11221 = vmatmul.mubr.msk.bf16.gmra.mrb[48].mxu0 %vm2458_vm8, %v5409_v6  ;;  %v12207_v30 = vpop.permute.xlu1 %12206 }
 0x4ec   :  { %v6297_v46 = vsel %vm2128_vm7, %v6276_v15, %v12199_v13  ;;  %v12202_v11 = vpop.permute.xlu0 %12201  ;;  %v6296_v0 = vsel %vm2128_vm7, %v6275_v41, %v12198_v61  ;;  %v12209_v52 = vunpack.i.h.bf16 %v12207_v30  ;;  %v12208_v58 = vunpack.i.l.bf16 %v12207_v30  ;;  %11224 = vmatprep.mubr.msk.bf16.mxu0 %vm12633_vm2, %v12631_v1 }
 0x4ed   :  { %v12204_v9 = vunpack.i.h.bf16 %v12202_v11  ;;  %v12203_v20 = vunpack.i.l.bf16 %v12202_v11  ;;  %v6313_v49 = vpack.c.bf16 %v6297_v46, %v6296_v0  ;;  %v12601_v46 = vld [vmem:[#allocation3 + $0x78] sm:$0xff]  ;;  %v12602_v11 = vld [vmem:[#allocation3 + $0x70] sm:$0xff] }
 0x4ef   :  { %v5374_v63 = vsel %vm376_vm4, %v12597_v19, %v12204_v9  ;;  %v5373_v54 = vsel %vm376_vm4, %v12598_v53, %v12203_v20  ;;  %v12217_v10 = vpop.permute.xlu1 %12216 }
 0x4f0   :  { %v5395_v7 = vsel %vm2128_vm7, %v5374_v63, %v12209_v52  ;;  %v12212_v3 = vpop.permute.xlu0 %12211  ;;  %v5394_v29 = vsel %vm2128_vm7, %v5373_v54, %v12208_v58  ;;  %v12219_v4 = vunpack.i.h.bf16 %v12217_v10  ;;  %v12218_v26 = vunpack.i.l.bf16 %v12217_v10  ;;  %11271 = vmatmul.mubr.msk.bf16.gmra.mrb[64].mxu1 %vm2458_vm8, %v6313_v49  ;;  %v6050_v54 = vld [vmem:[#allocation3 + $0x8c] sm:$0xff] }
 0x4f1   :  { %v12214_v5 = vunpack.i.h.bf16 %v12212_v3  ;;  %v5410_v45 = vpack.c.bf16 %v5395_v7, %v5394_v29  ;;  %v12213_v23 = vunpack.i.l.bf16 %v12212_v3  ;;  %11274 = vmatprep.mubr.msk.bf16.mxu1 %vm12633_vm2, %v12631_v1  ;;  %v6051_v7 = vld [vmem:[#allocation3 + $0x94] sm:$0xff] }
 0x4f3   :  { %v6278_v35 = vsel %vm376_vm4, %v6047_v50, %v12214_v5  ;;  %v6277_v47 = vsel %vm376_vm4, %v6046_v55, %v12213_v23  ;;  %11225 = vmatmul.mubr.msk.bf16.gmra.mrb[52].mxu0 %vm2458_vm8, %v5410_v45  ;;  %v12227_v27 = vpop.permute.xlu1 %12226 }
 0x4f4   :  { %v6299_v33 = vsel %vm2128_vm7, %v6278_v35, %v12219_v4  ;;  %v12222_v43 = vpop.permute.xlu0 %12221  ;;  %v6298_v39 = vsel %vm2128_vm7, %v6277_v47, %v12218_v26  ;;  %v12229_v32 = vunpack.i.h.bf16 %v12227_v27  ;;  %v12228_v34 = vunpack.i.l.bf16 %v12227_v27  ;;  %11228 = vmatprep.mubr.msk.bf16.mxu0 %vm12633_vm2, %v12631_v1 }
 0x4f5   :  { %v12224_v8 = vunpack.i.h.bf16 %v12222_v43  ;;  %v12223_v16 = vunpack.i.l.bf16 %v12222_v43  ;;  %v6314_v21 = vpack.c.bf16 %v6299_v33, %v6298_v39  ;;  %v12603_v33 = vld [vmem:[#allocation3 + $0x88] sm:$0xff]  ;;  %v12604_v43 = vld [vmem:[#allocation3 + $0x80] sm:$0xff] }
 0x4f7   :  { %v5376_v31 = vsel %vm376_vm4, %v12599_v17, %v12224_v8  ;;  %v5375_v38 = vsel %vm376_vm4, %v12600_v2, %v12223_v16  ;;  %v12237_v22 = vpop.permute.xlu1 %12236  ;;  %v6052_v2 = vld [vmem:[#allocation3 + $0x9c] sm:$0xff] }
 0x4f8   :  { %v5397_v48 = vsel %vm2128_vm7, %v5376_v31, %v12229_v32  ;;  %v12232_v37 = vpop.permute.xlu0 %12231  ;;  %v5396_v18 = vsel %vm2128_vm7, %v5375_v38, %v12228_v34  ;;  %v12239_v56 = vunpack.i.h.bf16 %v12237_v22  ;;  %v12238_v24 = vunpack.i.l.bf16 %v12237_v22  ;;  %11275 = vmatmul.mubr.msk.bf16.gmra.mrb[68].mxu1 %vm2458_vm8, %v6314_v21  ;;  %v6053_v31 = vld [vmem:[#allocation3 + $0xa4] sm:$0xff] }
 0x4f9   :  { %v12234_v25 = vunpack.i.h.bf16 %v12232_v37  ;;  %v5411_v60 = vpack.c.bf16 %v5397_v48, %v5396_v18  ;;  %v12233_v28 = vunpack.i.l.bf16 %v12232_v37  ;;  %11278 = vmatprep.mubr.msk.bf16.mxu1 %vm12633_vm2, %v12631_v1 }
 0x4fb   :  { %v6280_v62 = vsel %vm376_vm4, %v6049_v40, %v12234_v25  ;;  %v6279_v36 = vsel %vm376_vm4, %v6048_v51, %v12233_v28  ;;  %11229 = vmatmul.mubr.msk.bf16.gmra.mrb[56].mxu0 %vm2458_vm8, %v5411_v60  ;;  %v12247_v13 = vpop.permute.xlu1 %12246 }
 0x4fc   :  { %v6301_v42 = vsel %vm2128_vm7, %v6280_v62, %v12239_v56  ;;  %v12242_v61 = vpop.permute.xlu0 %12241  ;;  %v6300_v59 = vsel %vm2128_vm7, %v6279_v36, %v12238_v24  ;;  %v12249_v6 = vunpack.i.h.bf16 %v12247_v13  ;;  %v12248_v12 = vunpack.i.l.bf16 %v12247_v13  ;;  %11232 = vmatprep.mubr.msk.bf16.mxu0 %vm12633_vm2, %v12631_v1  ;;  %v12605_v36 = vld [vmem:[#allocation3 + $0x98] sm:$0xff] }
 0x4fd   :  { %v12244_v57 = vunpack.i.h.bf16 %v12242_v61  ;;  %v12243_v14 = vunpack.i.l.bf16 %v12242_v61  ;;  %v6315_v15 = vpack.c.bf16 %v6301_v42, %v6300_v59  ;;  %v12469_v59 = vld [vmem:[%s15790_s5 + $0x1c] sm:$0xff]  }
 0x4fe   :  { %11301 = vmatpush3.bf16.msra.mxu0 %v12469_v59 }
 0x4ff   :  { %v5378_v41 = vsel %vm376_vm4, %v12601_v46, %v12244_v57  ;;  %v5377_v0 = vsel %vm376_vm4, %v12602_v11, %v12243_v14  ;;  %v12262_v52 = vpop.permute.xlu1 %12261  ;;  %11302 = vmatprep.subr.bf16.mxu0 %v12631_v1 }
 0x500   :  { %v5399_v30 = vsel %vm2128_vm7, %v5378_v41, %v12249_v6  ;;  %v12252_v58 = vpop.permute.xlu0 %12251  ;;  %v5398_v9 = vsel %vm2128_vm7, %v5377_v0, %v12248_v12  ;;  %v12264_v20 = vunpack.i.h.bf16 %v12262_v52  ;;  %v12263_v49 = vunpack.i.l.bf16 %v12262_v52  ;;  %11279 = vmatmul.mubr.msk.bf16.gmra.mrb[72].mxu1 %vm2458_vm8, %v6315_v15  ;;  %v12606_v12 = vld [vmem:[#allocation3 + $0x90] sm:$0xff] }
 0x501   :  { %v12254_v19 = vunpack.i.h.bf16 %v12252_v58  ;;  %v5412_v63 = vpack.c.bf16 %v5399_v30, %v5398_v9  ;;  %v12253_v53 = vunpack.i.l.bf16 %v12252_v58  ;;  %11282 = vmatprep.mubr.msk.bf16.mxu1 %vm12633_vm2, %v12631_v1  ;;  %v6055_v9 = vld [vmem:[#allocation3 + $0xb4] sm:$0xff] }
 0x503   :  { %v6282_v10 = vsel %vm376_vm4, %v6051_v7, %v12254_v19  ;;  %v6281_v29 = vsel %vm376_vm4, %v6050_v54, %v12253_v53  ;;  %11233 = vmatmul.mubr.msk.bf16.gmra.mrb[60].mxu0 %vm2458_vm8, %v5412_v63  ;;  %v12267_v4 = vpop.permute.xlu1 %12266  ;;  %v12470_v53 = vld [vmem:[%s15790_s5 + $0x8] sm:$0xff]  }
 0x504   :  { %v6303_v3 = vsel %vm2128_vm7, %v6282_v10, %v12264_v20  ;;  %v12257_v26 = vpop.permute.xlu0 %12256  ;;  %v6302_v5 = vsel %vm2128_vm7, %v6281_v29, %v12263_v49  ;;  %v12269_v45 = vunpack.i.h.bf16 %v12267_v4  ;;  %v12268_v50 = vunpack.i.l.bf16 %v12267_v4  ;;  %11236 = vmatprep.mubr.msk.bf16.mxu0 %vm12633_vm2, %v12631_v1  ;;  %v6054_v20 = vld [vmem:[#allocation3 + $0xac] sm:$0xff]  ;;  %v5152_v29 = vld [vmem:[#allocation3 + $0xa0] sm:$0x3f]  ;;  %11311 = vmatpush3.bf16.msra.mxu1 %v12470_v53 }
 0x505   :  { %v12259_v23 = vunpack.i.h.bf16 %v12257_v26  ;;  %v12258_v55 = vunpack.i.l.bf16 %v12257_v26  ;;  %v6316_v35 = vpack.c.bf16 %v6303_v3, %v6302_v5  ;;  %11312 = vmatprep.subr.bf16.mxu1 %v12631_v1 }
 0x507   :  { %v5380_v47 = vsel %vm376_vm4, %v12603_v33, %v12259_v23  ;;  %v5379_v39 = vsel %vm376_vm4, %v12604_v43, %v12258_v55  ;;  %v12277_v32 = vpop.permute.xlu1 %12276 }
 0x508   :  { %v5401_v27 = vsel %vm2128_vm7, %v5380_v47, %v12269_v45  ;;  %v12272_v34 = vpop.permute.xlu0 %12271  ;;  %v5400_v8 = vsel %vm2128_vm7, %v5379_v39, %v12268_v50  ;;  %v12279_v16 = vunpack.i.h.bf16 %v12277_v32  ;;  %v12278_v44 = vunpack.i.l.bf16 %v12277_v32  ;;  %11283 = vmatmul.mubr.msk.bf16.gmra.mrb[76].mxu1 %vm2458_vm8, %v6316_v35  ;;  %v6056_v50 = vld [vmem:[#allocation3 + $0xbc] sm:$0x3f] }
 0x509   :  { %v12274_v21 = vunpack.i.h.bf16 %v12272_v34  ;;  %v5413_v17 = vpack.c.bf16 %v5401_v27, %v5400_v8  ;;  %v12273_v48 = vunpack.i.l.bf16 %v12272_v34  ;;  %11286 = vmatprep.mubr.msk.bf16.mxu1 %vm12633_vm2, %v12631_v1 }
 0x50b   :  { %v6284_v38 = vsel %vm376_vm4, %v6053_v31, %v12274_v21  ;;  %v6283_v37 = vsel %vm376_vm4, %v6052_v2, %v12273_v48  ;;  %11237 = vmatmul.mubr.msk.bf16.gmra.mrb[64].mxu0 %vm2458_vm8, %v5413_v17  ;;  %v12287_v18 = vpop.permute.xlu1 %12286  ;;  %v12471_v2 = vld [vmem:[%s15790_s5 + $0x24] ss:$0 sps:$4 sm:$0x33]  }
 0x50c   :  { %v6305_v22 = vsel %vm2128_vm7, %v6284_v38, %v12279_v16  ;;  %v12282_v56 = vpop.permute.xlu0 %12281  ;;  %v6304_v24 = vsel %vm2128_vm7, %v6283_v37, %v12278_v44  ;;  %v12289_v25 = vunpack.i.h.bf16 %v12287_v18  ;;  %v12288_v60 = vunpack.i.l.bf16 %v12287_v18  ;;  %11240 = vmatprep.mubr.msk.bf16.mxu0 %vm12633_vm2, %v12631_v1  ;;  %v12472_v38 = vld [vmem:[%s15790_s5 + $0x10] ss:$0 sps:$4 sm:$0x33]  }
 0x50d   :  { %v12284_v40 = vunpack.i.h.bf16 %v12282_v56  ;;  %v15026_v28 = vpop.f32.mrb[4].mxu1  ;;  %v12283_v51 = vunpack.i.l.bf16 %v12282_v56  ;;  %v6317_v42 = vpack.c.bf16 %v6305_v22, %v6304_v24  ;;  %v6672_v22 = vsel %vm6670_vm11, %v12471_v2, 0 }
 0x50e   :  { %v11156_v62 = vpop.f32.mrb[5].mxu1  ;;  %11303 = vmatpush3.bf16.msra.mxu0 %v6672_v22  ;;  %v6733_v37 = vsel %vm6670_vm11, %v12472_v38, 0 }
 0x50f   :  { %v5382_v13 = vsel %vm376_vm4, %v12605_v36, %v12284_v40  ;;  %v15031_v61 = vpop.f32.mrb[6].mxu1  ;;  %v5381_v57 = vsel %vm376_vm4, %v12606_v12, %v12283_v51  ;;  %v12297_v14 = vpop.permute.xlu1 %12296  ;;  %11313 = vmatpush3.bf16.msra.mxu1 %v6733_v37  ;;  %11318 = vmatprep.subr.bf16.mxu0 %v12631_v1 }
 0x510   :  { %v5403_v6 = vsel %vm2128_vm7, %v5382_v13, %v12289_v25  ;;  %v12292_v15 = vpop.permute.xlu0 %12291  ;;  %v5402_v46 = vsel %vm2128_vm7, %v5381_v57, %v12288_v60  ;;  %v12299_v41 = vunpack.i.h.bf16 %v12297_v14  ;;  %v12298_v30 = vunpack.i.l.bf16 %v12297_v14  ;;  %v11157_v0 = vpop.f32.mrb[7].mxu1  ;;  %11287 = vmatmul.mubr.msk.bf16.gmra.mrb[80].mxu1 %vm2458_vm8, %v6317_v42  ;;  %11328 = vmatprep.subr.bf16.mxu1 %v12631_v1 }
 0x511   :  { %v12294_v11 = vunpack.i.h.bf16 %v12292_v15  ;;  %v5414_v52 = vpack.c.bf16 %v5403_v6, %v5402_v46  ;;  %v12293_v58 = vunpack.i.l.bf16 %v12292_v15  ;;  %11290 = vmatprep.mubr.msk.bf16.mxu1 %vm12633_vm2, %v12631_v1 }
 0x513   :  { %v6286_v49 = vsel %vm376_vm4, %v6055_v9, %v12294_v11  ;;  %v6285_v19 = vsel %vm376_vm4, %v6054_v20, %v12293_v58  ;;  %11241 = vmatmul.mubr.msk.bf16.gmra.mrb[68].mxu0 %vm2458_vm8, %v5414_v52  ;;  %v5341_v26 = vpop.permute.xlu1 %5340 }
 0x514   :  { %v6307_v63 = vsel %vm2128_vm7, %v6286_v49, %v12299_v41  ;;  %v12302_v7 = vpop.permute.xlu0 %12301  ;;  %v6306_v54 = vsel %vm2128_vm7, %v6285_v19, %v12298_v30  ;;  %11244 = vmatprep.mubr.msk.bf16.mxu0 %vm12633_vm2, %v12631_v1 }
 0x515   :  { %v12304_v10 = vunpack.i.h.bf16 %v12302_v7  ;;  %v12303_v3 = vunpack.i.l.bf16 %v12302_v7  ;;  %v6318_v4 = vpack.c.bf16 %v6307_v63, %v6306_v54 }
 0x517   :  { %v5383_v5 = vsel %vm376_vm4, %v5152_v29, %v12303_v3  ;;  %v6287_v35 = vsel %vm376_vm4, %v6056_v50, %v12304_v10 }
 0x518   :  { %v5404_v45 = vsel %vm2128_vm7, %v5383_v5, %v5341_v26  ;;  %v6245_v55 = vpop.permute.xlu0 %6244  ;;  %11291 = vmatmul.mubr.msk.bf16.gmra.mrb[84].mxu1 %vm2458_vm8, %v6318_v4  ;;  %v15120_v4 = vld [vmem:[%s15789_s4] ss:$0 sm:$0xff] }
 0x519   :  { %v5415_v23 = vpack.c.bf16 %v5404_v45, %v5404_v45  ;;  %11294 = vmatprep.mubr.msk.bf16.mxu1 %vm12633_vm2, %v12631_v1  ;;  %v6308_v47 = vsel %vm2128_vm7, %v6287_v35, %v6245_v55 }
 0x51a   :  { %v6319_v32 = vpack.c.bf16 %v6308_v47, %v6308_v47 }
 0x51b   :  { %v15060_v33 = vpop.f32.mrb[8].mxu1  ;;  %11245 = vmatmul.mubr.msk.bf16.gmra.mrb[72].mxu0 %vm2458_vm8, %v5415_v23 }
 0x51c   :  { %v11160_v27 = vpop.f32.mrb[9].mxu1  ;;  %11304 = vmatprep.mubr.msk.bf16.mxu0 %vm12633_vm2, %v12631_v1 }
 0x51d   :  { %v15064_v43 = vpop.f32.mrb[10].mxu1 }
 0x51e   :  { %v11161_v39 = vpop.f32.mrb[11].mxu1 }
 0x520   :  { %11295 = vmatmul.mubr.msk.bf16.gmra.mrb[88].mxu1 %vm2458_vm8, %v6319_v32 }
 0x521   :  { %11314 = vmatprep.mubr.msk.bf16.mxu1 %vm12633_vm2, %v12631_v1 }
 0x523   :  { %v15071_v34 = vpop.f32.mrb[12].mxu1 }
 0x524   :  { %v11164_v8 = vpop.f32.mrb[13].mxu1 }
 0x525   :  { %v15073_v16 = vpop.f32.mrb[14].mxu1 }
 0x526   :  { %v11165_v44 = vpop.f32.mrb[15].mxu1 }
 0x532   :  { %v15075_v21 = vpop.f32.mrb[16].mxu1 }
 0x533   :  { %v11168_v17 = vpop.f32.mrb[17].mxu1 }
 0x534   :  { %v15077_v31 = vpop.f32.mrb[18].mxu1 }
 0x535   :  { %v11169_v48 = vpop.f32.mrb[19].mxu1 }
 0x550   :  { %v15089_v18 = vpop.f32.mrb[20].mxu1 }
 0x551   :  { %v11172_v56 = vpop.f32.mrb[21].mxu1 }
 0x552   :  { %v15091_v24 = vpop.f32.mrb[22].mxu1 }
 0x553   :  { %v11173_v25 = vpop.f32.mrb[23].mxu1 }
 0x558   :  { %v15093_v60 = vpop.f32.mrb[24].mxu1 }
 0x559   :  { %v11176_v40 = vpop.f32.mrb[25].mxu1 }
 0x55a   :  { %v15095_v51 = vpop.f32.mrb[26].mxu1 }
 0x55b   :  { %v11177_v62 = vpop.f32.mrb[27].mxu1 }
 0x575   :  { %v15097_v42 = vpop.f32.mrb[28].mxu1 }
 0x576   :  { %v11180_v36 = vpop.f32.mrb[29].mxu1 }
 0x577   :  { %v15099_v13 = vpop.f32.mrb[30].mxu1 }
 0x578   :  { %v11181_v59 = vpop.f32.mrb[31].mxu1 }
 0x583   :  { %v15101_v6 = vpop.f32.mrb[32].mxu1 }
 0x584   :  { %v11184_v12 = vpop.f32.mrb[33].mxu1 }
 0x585   :  { %v15103_v57 = vpop.f32.mrb[34].mxu1 }
 0x586   :  { %v11185_v14 = vpop.f32.mrb[35].mxu1 }
 0x58b   :  { %v15105_v15 = vpop.f32.mrb[36].mxu1 }
 0x58c   :  { %v11188_v46 = vpop.f32.mrb[37].mxu1 }
 0x58d   :  { %v15107_v41 = vpop.f32.mrb[38].mxu1 }
 0x58e   :  { %v11189_v30 = vpop.f32.mrb[39].mxu1 }
 0x593   :  { %v15109_v11 = vpop.f32.mrb[40].mxu1 }
 0x594   :  { %v11192_v0 = vpop.f32.mrb[41].mxu1 }
 0x595   :  { %v15111_v52 = vpop.f32.mrb[42].mxu1 }
 0x596   :  { %v11193_v58 = vpop.f32.mrb[43].mxu1 }
 0x59b   :  { %v15113_v9 = vpop.f32.mrb[44].mxu1 }
 0x59c   :  { %v11196_v20 = vpop.f32.mrb[45].mxu1 }
 0x59d   :  { %v5862_v49 = vpop.f32.mrb[46].mxu1 }
 0x59e   :  { %v5950_v19 = vpop.f32.mrb[32].mxu0  ;;  %v11197_v63 = vpop.f32.mrb[47].mxu1 }
 0x59f   :  { %v5951_v7 = vadd.f32 %v5950_v19, %v15026_v28  ;;  %v11206_v53 = vpop.f32.mrb[33].mxu0 }
 0x5a0   :  { %v5953_v54 = vpop.f32.mrb[34].mxu0 }
 0x5a1   :  { %v5954_v10 = vadd.f32 %v5953_v54, %v15031_v61  ;;  %v11207_v3 = vpop.f32.mrb[35].mxu0 }
 0x5a3   :  { %v6411_v29 = vpop.f32.mrb[48].mxu1 }
 0x5a4   :  { %v6497_v26 = vadd.f32 %v6411_v29, %v5951_v7  ;;  %v11256_v5 = vpop.f32.mrb[49].mxu1 }
 0x5a5   :  { %v6414_v45 = vpop.f32.mrb[50].mxu1 }
 0x5a6   :  { %v6525_v50 = vadd.f32 %v15120_v4, %v6497_v26  ;;  %v5958_v23 = vpop.f32.mrb[36].mxu0  ;;  %v6498_v55 = vadd.f32 %v6414_v45, %v5954_v10  ;;  %v11257_v35 = vpop.f32.mrb[51].mxu1 }
 0x5a7   :  { %v5959_v28 = vadd.f32 %v5958_v23, %v15060_v33  ;;  %v11210_v47 = vpop.f32.mrb[37].mxu0 }
 0x5a8   :  { %v6546_v27 = vmax.f32 %v6525_v50, 0.0  ;;  %v6526_v61 = vadd.f32 %v15120_v4, %v6498_v55  ;;  %v5961_v39 = vpop.f32.mrb[38].mxu0 }
 0x5a9   :  { %v5962_v32 = vadd.f32 %v5961_v39, %v15064_v43  ;;  %v11211_v8 = vpop.f32.mrb[39].mxu0 }
 0x5aa   :  { %6567 = vst.msk [vmem:[#allocation4] sm:$0xff] %vm3315_vm9, %v6546_v27  ;;  %v6547_v44 = vmax.f32 %v6526_v61, 0.0 }
 0x5ab   :  { %v6419_v17 = vpop.f32.mrb[52].mxu1 }
 0x5ac   :  { %v6499_v48 = vadd.f32 %v6419_v17, %v5959_v28  ;;  %6568 = vst.msk [vmem:[#allocation4 + $0x8] sm:$0xff] %vm3315_vm9, %v6547_v44  ;;  %v11260_v2 = vpop.f32.mrb[53].mxu1 }
 0x5ad   :  { %v6422_v38 = vpop.f32.mrb[54].mxu1 }
 0x5ae   :  { %v6527_v22 = vadd.f32 %v15120_v4, %v6499_v48  ;;  %v5966_v33 = vpop.f32.mrb[40].mxu0  ;;  %v6500_v37 = vadd.f32 %v6422_v38, %v5962_v32  ;;  %v11261_v56 = vpop.f32.mrb[55].mxu1 }
 0x5af   :  { %v5967_v25 = vadd.f32 %v5966_v33, %v15071_v34  ;;  %v11214_v40 = vpop.f32.mrb[41].mxu0 }
 0x5b0   :  { %v6548_v62 = vmax.f32 %v6527_v22, 0.0  ;;  %v6528_v43 = vadd.f32 %v15120_v4, %v6500_v37  ;;  %v5969_v36 = vpop.f32.mrb[42].mxu0 }
 0x5b1   :  { %v5970_v59 = vadd.f32 %v5969_v36, %v15073_v16  ;;  %v11215_v12 = vpop.f32.mrb[43].mxu0 }
 0x5b2   :  { %6569 = vst.msk [vmem:[#allocation4 + $0x10] sm:$0xff] %vm3315_vm9, %v6548_v62  ;;  %v6549_v14 = vmax.f32 %v6528_v43, 0.0 }
 0x5b3   :  { %v6427_v46 = vpop.f32.mrb[56].mxu1  ;;  %v6588_v53 = vld [vmem:[#allocation4] ss:$2 sm:$0x3f] }
 0x5b4   :  { %6570 = vst.msk [vmem:[#allocation4 + $0x18] sm:$0xff] %vm3315_vm9, %v6549_v14  ;;  %v6501_v30 = vadd.f32 %v6427_v46, %v5967_v25  ;;  %v11264_v0 = vpop.f32.mrb[57].mxu1  ;;  %v6589_v54 = vld [vmem:[#allocation4 + $0x1] ss:$2 sm:$0x3f] }
 0x5b5   :  { %v6430_v20 = vpop.f32.mrb[58].mxu1  ;;  %v6592_v50 = vmax.f32 %v6588_v53, %v6589_v54 }
 0x5b6   :  { %v5974_v58 = vpop.f32.mrb[44].mxu0  ;;  %v6529_v34 = vadd.f32 %v15120_v4, %v6501_v30  ;;  %v6502_v19 = vadd.f32 %v6430_v20, %v5970_v59  ;;  %v11265_v7 = vpop.f32.mrb[59].mxu1  ;;  %v12473_v30 = vld [vmem:[%s15790_s5 + $0x28] sm:$0xff]  }
 0x5b7   :  { %v5975_v49 = vadd.f32 %v5974_v58, %v15075_v21  ;;  %v11218_v63 = vpop.f32.mrb[45].mxu0 }
 0x5b8   :  { %v5977_v16 = vpop.f32.mrb[46].mxu0  ;;  %v6550_v10 = vmax.f32 %v6529_v34, 0.0  ;;  %v6530_v3 = vadd.f32 %v15120_v4, %v6502_v19  ;;  %v12474_v19 = vld [vmem:[%s15790_s5 + $0x3c] sm:$0xff]  }
 0x5b9   :  { %v5978_v29 = vadd.f32 %v5977_v16, %v15077_v31  ;;  %v11219_v26 = vpop.f32.mrb[47].mxu0 }
 0x5ba   :  { %6571 = vst.msk [vmem:[#allocation4 + $0x20] sm:$0xff] %vm3315_vm9, %v6550_v10  ;;  %v6551_v55 = vmax.f32 %v6530_v3, 0.0  ;;  %v12475_v26 = vld [vmem:[%s15790_s5 + $0x30] sm:$0xff]  }
 0x5bb   :  { %v6590_v5 = vld [vmem:[#allocation4 + $0xe] ss:$2 sm:$0x3f]  ;;  %v6591_v45 = vld [vmem:[#allocation4 + $0xf] ss:$2 sm:$0x3f] }
 0x5bc   :  { %v6593_v23 = vmax.f32 %v6590_v5, %v6591_v45  ;;  %v6435_v21 = vpop.f32.mrb[60].mxu1  ;;  %6572 = vst.msk [vmem:[#allocation4 + $0x28] sm:$0xff] %vm3315_vm9, %v6551_v55  ;;  %v12476_v45 = vld [vmem:[%s15790_s5 + $0x44] sm:$0xff]  }
 0x5bd   :  { %v6503_v35 = vadd.f32 %v6435_v21, %v5975_v49  ;;  %v11268_v28 = vpop.f32.mrb[61].mxu1  ;;  %v12478_v21 = vld [vmem:[%s15790_s5 + $0x4c] ss:$0 sps:$4 sm:$0x33]  }
 0x5be   :  { %v6594_v47 = vmax.f32 %v6592_v50, %v6593_v23  ;;  %v5982_v27 = vpop.f32.mrb[48].mxu0  ;;  %v6438_v61 = vpop.f32.mrb[62].mxu1  ;;  %v12477_v50 = vld [vmem:[%s15790_s5 + $0x38] ss:$0 sps:$4 sm:$0x33]  }
 0x5bf   :  { %v6531_v39 = vadd.f32 %v15120_v4, %v6503_v35  ;;  %v5983_v31 = vadd.f32 %v5982_v27, %v15089_v18  ;;  %v6504_v32 = vadd.f32 %v6438_v61, %v5978_v29  ;;  %v11222_v8 = vpop.f32.mrb[49].mxu0  ;;  %v11269_v44 = vpop.f32.mrb[63].mxu1 }
 0x5c0   :  { %6595 = vst.msk [vmem:[#allocation5 + $0x24] sm:$0x3f] %vm3336_vm10, %v6594_v47  ;;  %v5985_v17 = vpop.f32.mrb[50].mxu0  ;;  %v6803_v44 = vsel %vm6670_vm11, %v12477_v50, 0 }
 0x5c1   :  { %v6552_v48 = vmax.f32 %v6531_v39, 0.0  ;;  %v6532_v2 = vadd.f32 %v15120_v4, %v6504_v32  ;;  %v5986_v38 = vadd.f32 %v5985_v17, %v15091_v24  ;;  %v11223_v22 = vpop.f32.mrb[51].mxu0  ;;  %v6596_v40 = vld [vmem:[#allocation4 + $0x1c] ss:$2 sm:$0x3f] }
 0x5c2   :  { %v6597_v62 = vld [vmem:[#allocation4 + $0x1d] ss:$2 sm:$0x3f] }
 0x5c3   :  { %6573 = vst.msk [vmem:[#allocation4 + $0x30] sm:$0xff] %vm3315_vm9, %v6552_v48  ;;  %v6553_v33 = vmax.f32 %v6532_v2, 0.0  ;;  %v6443_v37 = vpop.f32.mrb[64].mxu1  ;;  %v6600_v54 = vmax.f32 %v6596_v40, %v6597_v62  ;;  %v6874_v48 = vsel %vm6670_vm11, %v12478_v21, 0 }
 0x5c4   :  { %v6505_v56 = vadd.f32 %v6443_v37, %v5983_v31  ;;  %v11272_v25 = vpop.f32.mrb[65].mxu1  ;;  %v12479_v37 = vld [vmem:[%s15790_s5 + $0x50] sm:$0xff]  }
 0x5c5   :  { %6574 = vst.msk [vmem:[#allocation4 + $0x38] sm:$0xff] %vm3315_vm9, %v6553_v33  ;;  %v6446_v18 = vpop.f32.mrb[66].mxu1 }
 0x5c6   :  { %v6533_v43 = vadd.f32 %v15120_v4, %v6505_v56  ;;  %v5990_v36 = vpop.f32.mrb[52].mxu0  ;;  %v6506_v59 = vadd.f32 %v6446_v18, %v5986_v38  ;;  %v11273_v12 = vpop.f32.mrb[67].mxu1  ;;  %v12480_v18 = vld [vmem:[%s15790_s5 + $0x64] sm:$0xff]  }
 0x5c7   :  { %v5991_v14 = vadd.f32 %v5990_v36, %v15093_v60  ;;  %v11226_v24 = vpop.f32.mrb[53].mxu0  ;;  %v6644_v46 = vld [vmem:[#allocation5 + $0x1] ss:$36 sm:$0x3] }
 0x5c8   :  { %v6554_v0 = vmax.f32 %v6533_v43, 0.0  ;;  %v6534_v58 = vadd.f32 %v15120_v4, %v6506_v59  ;;  %v5993_v20 = vpop.f32.mrb[54].mxu0  ;;  %v6645_v34 = vpack.c.bf16 %v6644_v46, %v6644_v46  ;;  %v6636_v49 = vld [vmem:[#allocation5] ss:$36 sm:$0x3] }
 0x5c9   :  { %v5994_v63 = vadd.f32 %v5993_v20, %v15095_v51  ;;  %v11227_v7 = vpop.f32.mrb[55].mxu0  ;;  %v6637_v60 = vpack.c.bf16 %v6636_v49, %v6636_v49  ;;  %v6776_v2 = vld [vmem:[#allocation5 + $0x2] ss:$36 sm:$0x3] }
 0x5ca   :  { %v6598_v53 = vld [vmem:[#allocation4 + $0x2a] ss:$2 sm:$0x3f]  ;;  %v6599_v16 = vld [vmem:[#allocation4 + $0x2b] ss:$2 sm:$0x3f]  ;;  %11305 = vmatmul.mubr.msk.bf16.vlgmr.msra.gmra.mrb[76].mxu0 %vm3315_vm9, %v6645_v34  ;;  %v6777_v25 = vpack.c.bf16 %v6776_v2, %v6776_v2 }
 0x5cb   :  { %6575 = vst.msk [vmem:[#allocation4 + $0x40] sm:$0xff] %vm3315_vm9, %v6554_v0  ;;  %v6601_v10 = vmax.f32 %v6598_v53, %v6599_v16  ;;  %v6555_v3 = vmax.f32 %v6534_v58, 0.0  ;;  %11315 = vmatmul.mubr.msk.bf16.vlgmr.msra.gmra.mrb[92].mxu1 %vm3315_vm9, %v6637_v60  ;;  %11319 = vmatpush3.bf16.msra.mxu0 %v12473_v30  ;;  %v6451_v29 = vpop.f32.mrb[68].mxu1  ;;  %v6847_v22 = vld [vmem:[#allocation5 + $0x3] ss:$36 sm:$0x3] }
 0x5cc   :  { %11329 = vmatpush3.bf16.msra.mxu1 %v12474_v19  ;;  %v6507_v51 = vadd.f32 %v6451_v29, %v5991_v14  ;;  %v11276_v5 = vpop.f32.mrb[69].mxu1  ;;  %11320 = vmatprep.subr.bf16.mxu0 %v12631_v1  ;;  %v6848_v62 = vpack.c.bf16 %v6847_v22, %v6847_v22  ;;  %v12483_v24 = vld [vmem:[%s15790_s5 + $0x60] ss:$0 sps:$4 sm:$0x33]   ;;  %v12481_v58 = vld [vmem:[%s15790_s5 + $0x58] sm:$0xff]   ;;  %v12482_v19 = vld [vmem:[%s15790_s5 + $0x6c] sm:$0xff]  }
 0x5cd   :  { %v6602_v23 = vmax.f32 %v6600_v54, %v6601_v10  ;;  %6576 = vst.msk [vmem:[#allocation4 + $0x48] sm:$0xff] %vm3315_vm9, %v6555_v3  ;;  %v6454_v55 = vpop.f32.mrb[70].mxu1  ;;  %11330 = vmatprep.subr.bf16.mxu1 %v12631_v1  ;;  %11324 = vmatprep.mubr.msk.bf16.mxu0 %vm12633_vm2, %v12631_v1  ;;  %v6945_v29 = vsel %vm6670_vm11, %v12483_v24, 0 }
 0x5ce   :  { %v6535_v35 = vadd.f32 %v15120_v4, %v6507_v51  ;;  %v5998_v28 = vpop.f32.mrb[56].mxu0  ;;  %v6508_v47 = vadd.f32 %v6454_v55, %v5994_v63  ;;  %v11277_v27 = vpop.f32.mrb[71].mxu1  ;;  %11334 = vmatprep.mubr.msk.bf16.mxu1 %vm12633_vm2, %v12631_v1  ;;  %v6989_v55 = vld [vmem:[#allocation5 + $0x5] ss:$36 sm:$0x3] }
 0x5cf   :  { %6603 = vst.msk [vmem:[#allocation5 + $0x2a] sm:$0x3f] %vm3336_vm10, %v6602_v23  ;;  %v5999_v61 = vadd.f32 %v5998_v28, %v15097_v42  ;;  %v11230_v39 = vpop.f32.mrb[57].mxu0  ;;  %11321 = vmatpush3.bf16.msra.mxu0 %v12475_v26 }
 0x5d0   :  { %v6556_v31 = vmax.f32 %v6535_v35, 0.0  ;;  %v6536_v32 = vadd.f32 %v15120_v4, %v6508_v47  ;;  %11331 = vmatpush3.bf16.msra.mxu1 %v12476_v45  ;;  %v6001_v8 = vpop.f32.mrb[58].mxu0  ;;  %11322 = vmatprep.subr.bf16.mxu0 %v12631_v1  ;;  %v6918_v45 = vld [vmem:[#allocation5 + $0x4] ss:$36 sm:$0x3] }
 0x5d1   :  { %v6002_v17 = vadd.f32 %v6001_v8, %v15099_v13  ;;  %11332 = vmatprep.subr.bf16.mxu1 %v12631_v1  ;;  %v11231_v42 = vpop.f32.mrb[59].mxu0  ;;  %v12486_v8 = vld [vmem:[%s15790_s5 + $0x8c] sm:$0xff]  }
 0x5d2   :  { %v6557_v38 = vmax.f32 %v6536_v32, 0.0  ;;  %6577 = vst.msk [vmem:[#allocation4 + $0x50] sm:$0xff] %vm3315_vm9, %v6556_v31  ;;  %v6604_v43 = vld [vmem:[#allocation4 + $0x38] ss:$2 sm:$0x3f]  ;;  %v6919_v32 = vpack.c.bf16 %v6918_v45, %v6918_v45  ;;  %v12487_v42 = vld [vmem:[%s15790_s5 + $0x80] sm:$0xff]  }
 0x5d3   :  { %11323 = vmatpush3.bf16.msra.mxu0 %v6803_v44  ;;  %v6459_v33 = vpop.f32.mrb[72].mxu1  ;;  %v6605_v46 = vld [vmem:[#allocation4 + $0x39] ss:$2 sm:$0x3f] }
 0x5d4   :  { %6578 = vst.msk [vmem:[#allocation4 + $0x58] sm:$0xff] %vm3315_vm9, %v6557_v38  ;;  %11333 = vmatpush3.bf16.msra.mxu1 %v6874_v48  ;;  %v6509_v13 = vadd.f32 %v6459_v33, %v5999_v61  ;;  %v11280_v56 = vpop.f32.mrb[73].mxu1  ;;  %11338 = vmatprep.subr.bf16.mxu0 %v12631_v1  ;;  %v6608_v53 = vmax.f32 %v6604_v43, %v6605_v46  ;;  %v12485_v61 = vld [vmem:[%s15790_s5 + $0x78] sm:$0xff]  }
 0x5d5   :  { %v6462_v40 = vpop.f32.mrb[74].mxu1  ;;  %11348 = vmatprep.subr.bf16.mxu1 %v12631_v1  ;;  %v6990_v38 = vpack.c.bf16 %v6989_v55, %v6989_v55  ;;  %v12490_v43 = vld [vmem:[%s15790_s5 + $0x9c] ss:$0 sps:$4 sm:$0x33]   ;;  %v12493_v55 = vld [vmem:[%s15790_s5 + $0xa8] sm:$0xff]  }
 0x5d6   :  { %v6537_v36 = vadd.f32 %v15120_v4, %v6509_v13  ;;  %v6006_v59 = vpop.f32.mrb[60].mxu0  ;;  %v6510_v12 = vadd.f32 %v6462_v40, %v6002_v17  ;;  %11325 = vmatmul.mubr.msk.bf16.vlgmr.msra.gmra.mrb[80].mxu0 %vm3315_vm9, %v6777_v25  ;;  %v11281_v14 = vpop.f32.mrb[75].mxu1  ;;  %v12488_v25 = vld [vmem:[%s15790_s5 + $0x94] sm:$0xff]  }
 0x5d7   :  { %v6007_v30 = vadd.f32 %v6006_v59, %v15101_v6  ;;  %11335 = vmatmul.mubr.msk.bf16.vlgmr.msra.gmra.mrb[96].mxu1 %vm3315_vm9, %v6848_v62  ;;  %v11234_v0 = vpop.f32.mrb[61].mxu0  ;;  %11339 = vmatpush3.bf16.msra.mxu0 %v12479_v37  ;;  %v12484_v6 = vld [vmem:[%s15790_s5 + $0x74] ss:$0 sps:$4 sm:$0x33]  }
 0x5d8   :  { %v6558_v20 = vmax.f32 %v6537_v36, 0.0  ;;  %v6538_v34 = vadd.f32 %v15120_v4, %v6510_v12  ;;  %11349 = vmatpush3.bf16.msra.mxu1 %v12480_v18  ;;  %v6009_v49 = vpop.f32.mrb[62].mxu0  ;;  %11340 = vmatprep.subr.bf16.mxu0 %v12631_v1  ;;  %v7016_v5 = vsel %vm6670_vm11, %v12484_v6, 0  ;;  %v12489_v18 = vld [vmem:[%s15790_s5 + $0x88] ss:$0 sps:$4 sm:$0x33]  }
 0x5d9   :  { %v6606_v63 = vld [vmem:[#allocation4 + $0x46] ss:$2 sm:$0x3f]  ;;  %v6607_v7 = vld [vmem:[#allocation4 + $0x47] ss:$2 sm:$0x3f]  ;;  %v6010_v60 = vadd.f32 %v6009_v49, %v15103_v57  ;;  %11350 = vmatprep.subr.bf16.mxu1 %v12631_v1  ;;  %11344 = vmatprep.mubr.msk.bf16.mxu0 %vm12633_vm2, %v12631_v1 }
 0x5da   :  { %v6609_v16 = vmax.f32 %v6606_v63, %v6607_v7  ;;  %6579 = vst.msk [vmem:[#allocation4 + $0x60] sm:$0xff] %vm3315_vm9, %v6558_v20  ;;  %v6559_v54 = vmax.f32 %v6538_v34, 0.0  ;;  %v11235_v10 = vpop.f32.mrb[63].mxu0  ;;  %11354 = vmatprep.mubr.msk.bf16.mxu1 %vm12633_vm2, %v12631_v1  ;;  %v7087_v20 = vsel %vm6670_vm11, %v12489_v18, 0  ;;  %v12497_v18 = vld [vmem:[%s15790_s5 + $0xc8] sm:$0xff]  }
 0x5db   :  { %11341 = vmatpush3.bf16.msra.mxu0 %v12481_v58  ;;  %v6467_v57 = vpop.f32.mrb[76].mxu1  ;;  %v6612_v39 = vld [vmem:[#allocation4 + $0x54] ss:$2 sm:$0x3f] }
 0x5dc   :  { %v6610_v3 = vmax.f32 %v6608_v53, %v6609_v16  ;;  %6580 = vst.msk [vmem:[#allocation4 + $0x68] sm:$0xff] %vm3315_vm9, %v6559_v54  ;;  %11351 = vmatpush3.bf16.msra.mxu1 %v12482_v19  ;;  %11342 = vmatprep.subr.bf16.mxu0 %v12631_v1  ;;  %v6511_v26 = vadd.f32 %v6467_v57, %v6007_v30  ;;  %v11284_v51 = vpop.f32.mrb[77].mxu1  ;;  %v6613_v44 = vld [vmem:[#allocation4 + $0x55] ss:$2 sm:$0x3f]  ;;  %v12491_v16 = vld [vmem:[%s15790_s5 + $0xa0] sm:$0xff]  }
 0x5dd   :  { %11352 = vmatprep.subr.bf16.mxu1 %v12631_v1  ;;  %v6470_v23 = vpop.f32.mrb[78].mxu1  ;;  %v6616_v37 = vmax.f32 %v6612_v39, %v6613_v44  ;;  %v7060_v63 = vld [vmem:[#allocation5 + $0x6] ss:$36 sm:$0x3] }
 0x5de   :  { %6611 = vst.msk [vmem:[#allocation5 + $0x30] sm:$0x3f] %vm3336_vm10, %v6610_v3  ;;  %v6014_v50 = vpop.f32.mrb[64].mxu0  ;;  %v6539_v21 = vadd.f32 %v15120_v4, %v6511_v26  ;;  %v6512_v28 = vadd.f32 %v6470_v23, %v6010_v60  ;;  %v11285_v27 = vpop.f32.mrb[79].mxu1  ;;  %v12492_v3 = vld [vmem:[%s15790_s5 + $0xb4] sm:$0xff]  }
 0x5df   :  { %v6015_v35 = vadd.f32 %v6014_v50, %v15105_v15  ;;  %v11238_v47 = vpop.f32.mrb[65].mxu0  ;;  %11343 = vmatpush3.bf16.msra.mxu0 %v6945_v29  ;;  %v7131_v7 = vld [vmem:[#allocation5 + $0x7] ss:$36 sm:$0x3] }
 0x5e0   :  { %11353 = vmatpush3.bf16.msra.mxu1 %v7016_v5  ;;  %v6017_v31 = vpop.f32.mrb[66].mxu0  ;;  %11358 = vmatprep.subr.bf16.mxu0 %v12631_v1  ;;  %v6560_v15 = vmax.f32 %v6539_v21, 0.0  ;;  %v6540_v17 = vadd.f32 %v15120_v4, %v6512_v28  ;;  %v7132_v57 = vpack.c.bf16 %v7131_v7, %v7131_v7  ;;  %v12495_v21 = vld [vmem:[%s15790_s5 + $0xb0] ss:$0 sps:$4 sm:$0x33]  }
 0x5e1   :  { %v6018_v48 = vadd.f32 %v6017_v31, %v15107_v41  ;;  %v11239_v2 = vpop.f32.mrb[67].mxu0  ;;  %11368 = vmatprep.subr.bf16.mxu1 %v12631_v1  ;;  %v7229_v44 = vsel %vm6670_vm11, %v12495_v21, 0  ;;  %v12513_v21 = vld [vmem:[%s15790_s5 + $0x128] ss:$0 sps:$4 sm:$0x33]  }
 0x5e2   :  { %11345 = vmatmul.mubr.msk.bf16.vlgmr.msra.gmra.mrb[84].mxu0 %vm3315_vm9, %v6919_v32  ;;  %6581 = vst.msk [vmem:[#allocation4 + $0x70] sm:$0xff] %vm3315_vm9, %v6560_v15  ;;  %v6561_v41 = vmax.f32 %v6540_v17, 0.0 }
 0x5e3   :  { %v6614_v22 = vld [vmem:[#allocation4 + $0x62] ss:$2 sm:$0x3f]  ;;  %v6615_v33 = vld [vmem:[#allocation4 + $0x63] ss:$2 sm:$0x3f]  ;;  %11355 = vmatmul.mubr.msk.bf16.vlgmr.msra.gmra.mrb[100].mxu1 %vm3315_vm9, %v6990_v38  ;;  %11359 = vmatpush3.bf16.msra.mxu0 %v12485_v61 }
 0x5e4   :  { %v6617_v13 = vmax.f32 %v6614_v22, %v6615_v33  ;;  %11369 = vmatpush3.bf16.msra.mxu1 %v12486_v8  ;;  %v6475_v56 = vpop.f32.mrb[80].mxu1  ;;  %11360 = vmatprep.subr.bf16.mxu0 %v12631_v1  ;;  %6582 = vst.msk [vmem:[#allocation4 + $0x78] sm:$0xff] %vm3315_vm9, %v6561_v41  ;;  %v12496_v61 = vld [vmem:[%s15790_s5 + $0xc4] ss:$0 sps:$4 sm:$0x33]  }
 0x5e5   :  { %v6513_v40 = vadd.f32 %v6475_v56, %v6015_v35  ;;  %v11288_v62 = vpop.f32.mrb[81].mxu1  ;;  %11370 = vmatprep.subr.bf16.mxu1 %v12631_v1  ;;  %11364 = vmatprep.mubr.msk.bf16.mxu0 %vm12633_vm2, %v12631_v1  ;;  %v7300_v22 = vsel %vm6670_vm11, %v12496_v61, 0  ;;  %v7202_v33 = vld [vmem:[#allocation5 + $0x8] ss:$36 sm:$0x3]  ;;  %v12515_v61 = vld [vmem:[%s15790_s5 + $0x140] sm:$0xff]  }
 0x5e6   :  { %v6618_v36 = vmax.f32 %v6616_v37, %v6617_v13  ;;  %v6022_v59 = vpop.f32.mrb[68].mxu0  ;;  %v6478_v12 = vpop.f32.mrb[82].mxu1  ;;  %11374 = vmatprep.mubr.msk.bf16.mxu1 %vm12633_vm2, %v12631_v1  ;;  %v7273_v41 = vld [vmem:[#allocation5 + $0x9] ss:$36 sm:$0x3]  ;;  %v7203_v62 = vpack.c.bf16 %v7202_v33, %v7202_v33 }
 0x5e7   :  { %v6541_v14 = vadd.f32 %v15120_v4, %v6513_v40  ;;  %v6023_v24 = vadd.f32 %v6022_v59, %v15109_v11  ;;  %v6514_v46 = vadd.f32 %v6478_v12, %v6018_v48  ;;  %v11242_v30 = vpop.f32.mrb[69].mxu0  ;;  %v11289_v0 = vpop.f32.mrb[83].mxu1  ;;  %11361 = vmatpush3.bf16.msra.mxu0 %v12487_v42  ;;  %v7158_v11 = vsel %vm6670_vm11, %v12490_v43, 0  ;;  %v12498_v43 = vld [vmem:[%s15790_s5 + $0xdc] sm:$0xff]   ;;  %v12500_v59 = vld [vmem:[%s15790_s5 + $0xe4] sm:$0xff]  }
 0x5e8   :  { %6619 = vst.msk [vmem:[#allocation5 + $0x36] sm:$0x3f] %vm3336_vm10, %v6618_v36  ;;  %11371 = vmatpush3.bf16.msra.mxu1 %v12488_v25  ;;  %v6025_v58 = vpop.f32.mrb[70].mxu0  ;;  %11362 = vmatprep.subr.bf16.mxu0 %v12631_v1  ;;  %v12499_v36 = vld [vmem:[%s15790_s5 + $0xd0] sm:$0xff]  }
 0x5e9   :  { %v6562_v34 = vmax.f32 %v6541_v14, 0.0  ;;  %v6542_v49 = vadd.f32 %v15120_v4, %v6514_v46  ;;  %v6026_v19 = vadd.f32 %v6025_v58, %v15111_v52  ;;  %v11243_v6 = vpop.f32.mrb[71].mxu0  ;;  %11372 = vmatprep.subr.bf16.mxu1 %v12631_v1  ;;  %v7061_v52 = vpack.c.bf16 %v7060_v63, %v7060_v63  ;;  %v12501_v12 = vld [vmem:[%s15790_s5 + $0xd8] ss:$0 sps:$4 sm:$0x33]  }
 0x5ea   :  { %v12502_v14 = vld [vmem:[%s15790_s5 + $0xec] ss:$0 sps:$4 sm:$0x33]   ;;  %v7371_v30 = vsel %vm6670_vm11, %v12501_v12, 0  ;;  %v12528_v12 = vld [vmem:[%s15790_s5 + $0x1a4] sm:$0xff]  }
 0x5eb   :  { %6583 = vst.msk [vmem:[#allocation4 + $0x80] sm:$0xff] %vm3315_vm9, %v6562_v34  ;;  %v6563_v60 = vmax.f32 %v6542_v49, 0.0  ;;  %11363 = vmatpush3.bf16.msra.mxu0 %v7087_v20  ;;  %v6483_v53 = vpop.f32.mrb[84].mxu1  ;;  %v6620_v39 = vld [vmem:[#allocation4 + $0x70] ss:$2 sm:$0x3f] }
 0x5ec   :  { %11373 = vmatpush3.bf16.msra.mxu1 %v7158_v11  ;;  %v6515_v54 = vadd.f32 %v6483_v53, %v6023_v24  ;;  %v11292_v10 = vpop.f32.mrb[85].mxu1  ;;  %11378 = vmatprep.subr.bf16.mxu0 %v12631_v1  ;;  %v6621_v31 = vld [vmem:[#allocation4 + $0x71] ss:$2 sm:$0x3f]  ;;  %v7442_v0 = vsel %vm6670_vm11, %v12502_v14, 0 }
 0x5ed   :  { %6584 = vst.msk [vmem:[#allocation4 + $0x88] sm:$0xff] %vm3315_vm9, %v6563_v60  ;;  %11388 = vmatprep.subr.bf16.mxu1 %v12631_v1  ;;  %v6486_v51 = vpop.f32.mrb[86].mxu1  ;;  %v6624_v2 = vmax.f32 %v6620_v39, %v6621_v31  ;;  %v7344_v58 = vld [vmem:[#allocation5 + $0xa] ss:$36 sm:$0x3]  ;;  %v12503_v11 = vld [vmem:[%s15790_s5 + $0xf0] sm:$0xff]  }
 0x5ee   :  { %v6543_v29 = vadd.f32 %v15120_v4, %v6515_v54  ;;  %v6030_v26 = vpop.f32.mrb[72].mxu0  ;;  %11365 = vmatmul.mubr.msk.bf16.vlgmr.msra.gmra.mrb[88].mxu0 %vm3315_vm9, %v7061_v52  ;;  %v6516_v45 = vadd.f32 %v6486_v51, %v6026_v19  ;;  %v11293_v23 = vpop.f32.mrb[87].mxu1  ;;  %v7415_v6 = vld [vmem:[#allocation5 + $0xb] ss:$36 sm:$0x3]  ;;  %v7345_v7 = vpack.c.bf16 %v7344_v58, %v7344_v58  ;;  %v12509_v51 = vld [vmem:[%s15790_s5 + $0x118] sm:$0xff]  }
 0x5ef   :  { %v6031_v5 = vadd.f32 %v6030_v26, %v15113_v9  ;;  %11375 = vmatmul.mubr.msk.bf16.vlgmr.msra.gmra.mrb[104].mxu1 %vm3315_vm9, %v7132_v57  ;;  %v11246_v50 = vpop.f32.mrb[73].mxu0  ;;  %11379 = vmatpush3.bf16.msra.mxu0 %v12491_v16  ;;  %v12494_v9 = vld [vmem:[%s15790_s5 + $0xbc] sm:$0xff]   ;;  %v12504_v60 = vld [vmem:[%s15790_s5 + $0x104] sm:$0xff]   ;;  %v7416_v53 = vpack.c.bf16 %v7415_v6, %v7415_v6  ;;  %v12506_v54 = vld [vmem:[%s15790_s5 + $0x10c] sm:$0xff]  }
 0x5f0   :  { %v6564_v35 = vmax.f32 %v6543_v29, 0.0  ;;  %11389 = vmatpush3.bf16.msra.mxu1 %v12492_v3  ;;  %v6033_v28 = vpop.f32.mrb[74].mxu0  ;;  %11380 = vmatprep.subr.bf16.mxu0 %v12631_v1  ;;  %v6544_v47 = vadd.f32 %v15120_v4, %v6516_v45  ;;  %v12505_v16 = vld [vmem:[%s15790_s5 + $0xf8] sm:$0xff]   ;;  %v12507_v10 = vld [vmem:[%s15790_s5 + $0x100] ss:$0 sps:$4 sm:$0x33]  }
 0x5f1   :  { %v11247_v27 = vpop.f32.mrb[75].mxu0  ;;  %11390 = vmatprep.subr.bf16.mxu1 %v12631_v1  ;;  %11384 = vmatprep.mubr.msk.bf16.mxu0 %vm12633_vm2, %v12631_v1  ;;  %v12508_v52 = vld [vmem:[%s15790_s5 + $0x114] ss:$0 sps:$4 sm:$0x33]   ;;  %v7513_v3 = vsel %vm6670_vm11, %v12507_v10, 0  ;;  %v12510_v45 = vld [vmem:[%s15790_s5 + $0x12c] sm:$0xff]  }
 0x5f2   :  { %6585 = vst.msk [vmem:[#allocation4 + $0x90] sm:$0xff] %vm3315_vm9, %v6564_v35  ;;  %11394 = vmatprep.mubr.msk.bf16.mxu1 %vm12633_vm2, %v12631_v1  ;;  %v6565_v32 = vmax.f32 %v6544_v47, 0.0  ;;  %v7584_v57 = vsel %vm6670_vm11, %v12508_v52, 0  ;;  %v7486_v29 = vld [vmem:[#allocation5 + $0xc] ss:$36 sm:$0x3] }
 0x5f3   :  { %11381 = vmatpush3.bf16.msra.mxu0 %v12493_v55  ;;  %v6491_v8 = vpop.f32.mrb[88].mxu1  ;;  %v7557_v26 = vld [vmem:[#allocation5 + $0xd] ss:$36 sm:$0x3]  ;;  %v12511_v23 = vld [vmem:[%s15790_s5 + $0x120] sm:$0xff]   ;;  %v12512_v55 = vld [vmem:[%s15790_s5 + $0x134] sm:$0xff]  }
 0x5f4   :  { %v6622_v15 = vld [vmem:[#allocation4 + $0x7e] ss:$2 sm:$0x3f]  ;;  %v6623_v17 = vld [vmem:[#allocation4 + $0x7f] ss:$2 sm:$0x3f]  ;;  %11391 = vmatpush3.bf16.msra.mxu1 %v12494_v9  ;;  %v6517_v48 = vadd.f32 %v6491_v8, %v6031_v5  ;;  %11382 = vmatprep.subr.bf16.mxu0 %v12631_v1  ;;  %v7487_v5 = vpack.c.bf16 %v7486_v29, %v7486_v29  ;;  %v7558_v50 = vpack.c.bf16 %v7557_v26, %v7557_v26 }
 0x5f5   :  { %v6625_v38 = vmax.f32 %v6622_v15, %v6623_v17  ;;  %6586 = vst.msk [vmem:[#allocation4 + $0x98] sm:$0xff] %vm3315_vm9, %v6565_v32  ;;  %v11296_v42 = vpop.f32.mrb[89].mxu1  ;;  %11392 = vmatprep.subr.bf16.mxu1 %v12631_v1  ;;  %v12514_v35 = vld [vmem:[%s15790_s5 + $0x13c] ss:$0 sps:$4 sm:$0x33]   ;;  %v7655_v28 = vsel %vm6670_vm11, %v12513_v21, 0 }
 0x5f6   :  { %v6545_v37 = vadd.f32 %v15120_v4, %v6517_v48  ;;  %v6494_v13 = vpop.f32.mrb[90].mxu1  ;;  %v7274_v4 = vpack.c.bf16 %v7273_v41, %v7273_v41  ;;  %v7726_v9 = vsel %vm6670_vm11, %v12514_v35, 0  ;;  %v7628_v47 = vld [vmem:[#allocation5 + $0xe] ss:$36 sm:$0x3]  ;;  %v12516_v31 = vld [vmem:[%s15790_s5 + $0x154] sm:$0xff]  }
 0x5f7   :  { %v6626_v56 = vmax.f32 %v6624_v2, %v6625_v38  ;;  %v11297_v25 = vpop.f32.mrb[91].mxu1  ;;  %11383 = vmatpush3.bf16.msra.mxu0 %v7229_v44  ;;  %v7699_v27 = vld [vmem:[#allocation5 + $0xf] ss:$36 sm:$0x3]  ;;  %v7629_v39 = vpack.c.bf16 %v7628_v47, %v7628_v47  ;;  %v12518_v44 = vld [vmem:[%s15790_s5 + $0x15c] sm:$0xff]   ;;  %v12540_v26 = vld [vmem:[%s15790_s5 + $0x1f4] sm:$0xff]  }
 0x5f8   :  { %v6566_v40 = vmax.f32 %v6545_v37, 0.0  ;;  %11393 = vmatpush3.bf16.msra.mxu1 %v7300_v22  ;;  %11398 = vmatprep.subr.bf16.mxu0 %v12631_v1  ;;  %v7700_v32 = vpack.c.bf16 %v7699_v27, %v7699_v27  ;;  %v12517_v8 = vld [vmem:[%s15790_s5 + $0x148] sm:$0xff]   ;;  %v12519_v15 = vld [vmem:[%s15790_s5 + $0x150] ss:$0 sps:$4 sm:$0x33]   ;;  %v12522_v37 = vld [vmem:[%s15790_s5 + $0x17c] sm:$0xff]  }
 0x5f9   :  { %6627 = vst.msk [vmem:[#allocation5 + $0x3c] sm:$0x3f] %vm3336_vm10, %v6626_v56  ;;  %11408 = vmatprep.subr.bf16.mxu1 %v12631_v1  ;;  %v6628_v24 = vld [vmem:[#allocation4 + $0x8c] ss:$2 sm:$0x3f]  ;;  %v7797_v48 = vsel %vm6670_vm11, %v12519_v15, 0 }
 0x5fa   :  { %6587 = vst.msk [vmem:[#allocation4 + $0xa0] sm:$0x3f] %vm3336_vm10, %v6566_v40  ;;  %11385 = vmatmul.mubr.msk.bf16.vlgmr.msra.gmra.mrb[92].mxu0 %vm3315_vm9, %v7203_v62  ;;  %v6629_v46 = vld [vmem:[#allocation4 + $0x8d] ss:$2 sm:$0x3f]  ;;  %v12523_v41 = vld [vmem:[%s15790_s5 + $0x170] sm:$0xff]  }
 0x5fb   :  { %11395 = vmatmul.mubr.msk.bf16.vlgmr.msra.gmra.mrb[108].mxu1 %vm3315_vm9, %v7274_v4  ;;  %11399 = vmatpush3.bf16.msra.mxu0 %v12497_v18  ;;  %v6632_v49 = vmax.f32 %v6628_v24, %v6629_v46  ;;  %v12520_v17 = vld [vmem:[%s15790_s5 + $0x164] ss:$0 sps:$4 sm:$0x33]   ;;  %v7770_v38 = vld [vmem:[#allocation5 + $0x10] ss:$36 sm:$0x3] }
 0x5fc   :  { %11409 = vmatpush3.bf16.msra.mxu1 %v12498_v43  ;;  %11400 = vmatprep.subr.bf16.mxu0 %v12631_v1  ;;  %v7868_v2 = vsel %vm6670_vm11, %v12520_v17, 0  ;;  %v7841_v42 = vld [vmem:[#allocation5 + $0x11] ss:$36 sm:$0x3]  ;;  %v12521_v22 = vld [vmem:[%s15790_s5 + $0x168] sm:$0xff]   ;;  %v7771_v33 = vpack.c.bf16 %v7770_v38, %v7770_v38  ;;  %v12529_v24 = vld [vmem:[%s15790_s5 + $0x198] sm:$0xff]  }
 0x5fd   :  { %11410 = vmatprep.subr.bf16.mxu1 %v12631_v1  ;;  %11404 = vmatprep.mubr.msk.bf16.mxu0 %vm12633_vm2, %v12631_v1  ;;  %v7842_v13 = vpack.c.bf16 %v7841_v42, %v7841_v42  ;;  %v12524_v56 = vld [vmem:[%s15790_s5 + $0x184] sm:$0xff]   ;;  %v12525_v25 = vld [vmem:[%s15790_s5 + $0x178] ss:$0 sps:$4 sm:$0x33]   ;;  %v12530_v46 = vld [vmem:[%s15790_s5 + $0x1ac] sm:$0xff]  }
 0x5fe   :  { %11414 = vmatprep.mubr.msk.bf16.mxu1 %vm12633_vm2, %v12631_v1  ;;  %v12526_v18 = vld [vmem:[%s15790_s5 + $0x18c] ss:$0 sps:$4 sm:$0x33]   ;;  %v7939_v40 = vsel %vm6670_vm11, %v12525_v25, 0  ;;  %v12546_v27 = vld [vmem:[%s15790_s5 + $0x21c] sm:$0xff]   ;;  %v12552_v42 = vld [vmem:[%s15790_s5 + $0x244] sm:$0xff]  }
 0x5ff   :  { %11401 = vmatpush3.bf16.msra.mxu0 %v12499_v36  ;;  %v8010_v62 = vsel %vm6670_vm11, %v12526_v18, 0  ;;  %v7912_v43 = vld [vmem:[#allocation5 + $0x12] ss:$36 sm:$0x3] }
 0x600   :  { %11411 = vmatpush3.bf16.msra.mxu1 %v12500_v59  ;;  %11402 = vmatprep.subr.bf16.mxu0 %v12631_v1  ;;  %v7983_v4 = vld [vmem:[#allocation5 + $0x13] ss:$36 sm:$0x3]  ;;  %v7913_v59 = vpack.c.bf16 %v7912_v43, %v7912_v43  ;;  %v8196_v52 = vld [vmem:[#allocation5 + $0x16] ss:$36 sm:$0x3] }
 0x601   :  { %v6630_v20 = vld [vmem:[#allocation4 + $0x9a] ss:$2 sm:$0x3f]  ;;  %v6631_v34 = vld [vmem:[#allocation4 + $0x9b] ss:$2 sm:$0x3f]  ;;  %11412 = vmatprep.subr.bf16.mxu1 %v12631_v1  ;;  %v7984_v14 = vpack.c.bf16 %v7983_v4, %v7983_v4  ;;  %v8197_v29 = vpack.c.bf16 %v8196_v52, %v8196_v52 }
 0x602   :  { %v6633_v19 = vmax.f32 %v6630_v20, %v6631_v34  ;;  %v12527_v36 = vld [vmem:[%s15790_s5 + $0x190] sm:$0xff]   ;;  %v8338_v35 = vld [vmem:[#allocation5 + $0x18] ss:$36 sm:$0x3] }
 0x603   :  { %11403 = vmatpush3.bf16.msra.mxu0 %v7371_v30  ;;  %v12531_v30 = vld [vmem:[%s15790_s5 + $0x1a0] ss:$0 sps:$4 sm:$0x33]   ;;  %v8054_v34 = vld [vmem:[#allocation5 + $0x14] ss:$36 sm:$0x3]  ;;  %v8339_v47 = vpack.c.bf16 %v8338_v35, %v8338_v35 }
 0x604   :  { %v6634_v63 = vmax.f32 %v6632_v49, %v6633_v19  ;;  %11413 = vmatpush3.bf16.msra.mxu1 %v7442_v0  ;;  %11418 = vmatprep.subr.bf16.mxu0 %v12631_v1  ;;  %v12532_v0 = vld [vmem:[%s15790_s5 + $0x1b4] ss:$0 sps:$4 sm:$0x33]   ;;  %v8081_v58 = vsel %vm6670_vm11, %v12531_v30, 0  ;;  %v12533_v19 = vld [vmem:[%s15790_s5 + $0x1b8] sm:$0xff]   ;;  %v8055_v6 = vpack.c.bf16 %v8054_v34, %v8054_v34  ;;  %v12558_v4 = vld [vmem:[%s15790_s5 + $0x26c] sm:$0xff]  }
 0x605   :  { %11428 = vmatprep.subr.bf16.mxu1 %v12631_v1  ;;  %v8152_v20 = vsel %vm6670_vm11, %v12532_v0, 0  ;;  %v8125_v49 = vld [vmem:[#allocation5 + $0x15] ss:$36 sm:$0x3] }
 0x606   :  { %6635 = vst.msk [vmem:[#allocation5 + $0x42] sm:$0x3f] %vm3336_vm10, %v6634_v63  ;;  %11405 = vmatmul.mubr.msk.bf16.vlgmr.msra.gmra.mrb[96].mxu0 %vm3315_vm9, %v7345_v7  ;;  %v8126_v63 = vpack.c.bf16 %v8125_v49, %v8125_v49  ;;  %v12535_v7 = vld [vmem:[%s15790_s5 + $0x1c0] sm:$0xff]   ;;  %v8480_v17 = vld [vmem:[#allocation5 + $0x1a] ss:$36 sm:$0x3] }
 0x607   :  { %11415 = vmatmul.mubr.msk.bf16.vlgmr.msra.gmra.mrb[112].mxu1 %vm3315_vm9, %v7416_v53  ;;  %11419 = vmatpush3.bf16.msra.mxu0 %v12503_v11  ;;  %v12534_v11 = vld [vmem:[%s15790_s5 + $0x1cc] sm:$0xff]   ;;  %v12537_v53 = vld [vmem:[%s15790_s5 + $0x1c8] ss:$0 sps:$4 sm:$0x33]   ;;  %v8481_v38 = vpack.c.bf16 %v8480_v17, %v8480_v17  ;;  %v12564_v49 = vld [vmem:[%s15790_s5 + $0x294] sm:$0xff]  }
 0x608   :  { %11429 = vmatpush3.bf16.msra.mxu1 %v12504_v60  ;;  %11420 = vmatprep.subr.bf16.mxu0 %v12631_v1  ;;  %v12536_v60 = vld [vmem:[%s15790_s5 + $0x1d4] sm:$0xff]   ;;  %v8622_v18 = vld [vmem:[#allocation5 + $0x1c] ss:$36 sm:$0x3] }
 0x609   :  { %11430 = vmatprep.subr.bf16.mxu1 %v12631_v1  ;;  %11424 = vmatprep.mubr.msk.bf16.mxu0 %vm12633_vm2, %v12631_v1  ;;  %v8623_v43 = vpack.c.bf16 %v8622_v18, %v8622_v18 }
 0x60a   :  { %11434 = vmatprep.mubr.msk.bf16.mxu1 %vm12633_vm2, %v12631_v1 }
 0x60b   :  { %11421 = vmatpush3.bf16.msra.mxu0 %v12505_v16  ;;  %v12538_v16 = vld [vmem:[%s15790_s5 + $0x1dc] ss:$0 sps:$4 sm:$0x33]  }
 0x60c   :  { %11431 = vmatpush3.bf16.msra.mxu1 %v12506_v54  ;;  %11422 = vmatprep.subr.bf16.mxu0 %v12631_v1  ;;  %v8223_v54 = vsel %vm6670_vm11, %v12537_v53, 0  ;;  %v8294_v10 = vsel %vm6670_vm11, %v12538_v16, 0 }
 0x60d   :  { %11432 = vmatprep.subr.bf16.mxu1 %v12631_v1  ;;  %v8764_v0 = vld [vmem:[#allocation5 + $0x1e] ss:$36 sm:$0x3]  ;;  %v8906_v16 = vld [vmem:[#allocation5 + $0x20] ss:$36 sm:$0x3] }
 0x60e   :  { %v8765_v34 = vpack.c.bf16 %v8764_v0, %v8764_v0  ;;  %v8907_v52 = vpack.c.bf16 %v8906_v16, %v8906_v16 }
 0x60f   :  { %11423 = vmatpush3.bf16.msra.mxu0 %v7513_v3  ;;  %v8267_v3 = vld [vmem:[#allocation5 + $0x17] ss:$36 sm:$0x3] }
 0x610   :  { %11433 = vmatpush3.bf16.msra.mxu1 %v7584_v57  ;;  %11438 = vmatprep.subr.bf16.mxu0 %v12631_v1  ;;  %v12539_v57 = vld [vmem:[%s15790_s5 + $0x1e0] sm:$0xff]  }
 0x611   :  { %11448 = vmatprep.subr.bf16.mxu1 %v12631_v1 }
 0x612   :  { %11425 = vmatmul.mubr.msk.bf16.vlgmr.msra.gmra.mrb[100].mxu0 %vm3315_vm9, %v7487_v5  ;;  %v12541_v5 = vld [vmem:[%s15790_s5 + $0x1e8] sm:$0xff]  }
 0x613   :  { %11435 = vmatmul.mubr.msk.bf16.vlgmr.msra.gmra.mrb[116].mxu1 %vm3315_vm9, %v7558_v50  ;;  %11439 = vmatpush3.bf16.msra.mxu0 %v12509_v51  ;;  %v8268_v51 = vpack.c.bf16 %v8267_v3, %v8267_v3  ;;  %v12543_v50 = vld [vmem:[%s15790_s5 + $0x1f0] ss:$0 sps:$4 sm:$0x33]   ;;  %v12570_v3 = vld [vmem:[%s15790_s5 + $0x2bc] sm:$0xff]  }
 0x614   :  { %11449 = vmatpush3.bf16.msra.mxu1 %v12510_v45  ;;  %11440 = vmatprep.subr.bf16.mxu0 %v12631_v1  ;;  %v12542_v45 = vld [vmem:[%s15790_s5 + $0x1fc] sm:$0xff]  }
 0x615   :  { %11450 = vmatprep.subr.bf16.mxu1 %v12631_v1  ;;  %11444 = vmatprep.mubr.msk.bf16.mxu0 %vm12633_vm2, %v12631_v1 }
 0x616   :  { %11454 = vmatprep.mubr.msk.bf16.mxu1 %vm12633_vm2, %v12631_v1 }
 0x617   :  { %11441 = vmatpush3.bf16.msra.mxu0 %v12511_v23  ;;  %v12544_v23 = vld [vmem:[%s15790_s5 + $0x204] ss:$0 sps:$4 sm:$0x33]  }
 0x618   :  { %11451 = vmatpush3.bf16.msra.mxu1 %v12512_v55  ;;  %11442 = vmatprep.subr.bf16.mxu0 %v12631_v1  ;;  %v8365_v55 = vsel %vm6670_vm11, %v12543_v50, 0  ;;  %v8436_v21 = vsel %vm6670_vm11, %v12544_v23, 0  ;;  %v9048_v23 = vld [vmem:[#allocation5 + $0x22] ss:$36 sm:$0x3] }
 0x619   :  { %11452 = vmatprep.subr.bf16.mxu1 %v12631_v1 }
 0x61b   :  { %11443 = vmatpush3.bf16.msra.mxu0 %v7655_v28  ;;  %v8409_v28 = vld [vmem:[#allocation5 + $0x19] ss:$36 sm:$0x3] }
 0x61c   :  { %11453 = vmatpush3.bf16.msra.mxu1 %v7726_v9  ;;  %11458 = vmatprep.subr.bf16.mxu0 %v12631_v1  ;;  %v12545_v9 = vld [vmem:[%s15790_s5 + $0x208] sm:$0xff]  }
 0x61d   :  { %11468 = vmatprep.subr.bf16.mxu1 %v12631_v1 }
 0x61e   :  { %11445 = vmatmul.mubr.msk.bf16.vlgmr.msra.gmra.mrb[104].mxu0 %vm3315_vm9, %v7629_v39  ;;  %v12547_v39 = vld [vmem:[%s15790_s5 + $0x210] sm:$0xff]  }
 0x61f   :  { %11455 = vmatmul.mubr.msk.bf16.vlgmr.msra.gmra.mrb[120].mxu1 %vm3315_vm9, %v7700_v32  ;;  %11459 = vmatpush3.bf16.msra.mxu0 %v12515_v61  ;;  %v8410_v61 = vpack.c.bf16 %v8409_v28, %v8409_v28  ;;  %v12549_v32 = vld [vmem:[%s15790_s5 + $0x218] ss:$0 sps:$4 sm:$0x33]  }
 0x620   :  { %11469 = vmatpush3.bf16.msra.mxu1 %v12516_v31  ;;  %11460 = vmatprep.subr.bf16.mxu0 %v12631_v1  ;;  %v12548_v31 = vld [vmem:[%s15790_s5 + $0x224] sm:$0xff]  }
 0x621   :  { %11470 = vmatprep.subr.bf16.mxu1 %v12631_v1  ;;  %11464 = vmatprep.mubr.msk.bf16.mxu0 %vm12633_vm2, %v12631_v1 }
 0x622   :  { %11474 = vmatprep.mubr.msk.bf16.mxu1 %vm12633_vm2, %v12631_v1 }
 0x623   :  { %11461 = vmatpush3.bf16.msra.mxu0 %v12517_v8  ;;  %v12550_v8 = vld [vmem:[%s15790_s5 + $0x22c] ss:$0 sps:$4 sm:$0x33]  }
 0x624   :  { %11471 = vmatpush3.bf16.msra.mxu1 %v12518_v44  ;;  %11462 = vmatprep.subr.bf16.mxu0 %v12631_v1  ;;  %v8507_v44 = vsel %vm6670_vm11, %v12549_v32, 0  ;;  %v8578_v15 = vsel %vm6670_vm11, %v12550_v8, 0 }
 0x625   :  { %11472 = vmatprep.subr.bf16.mxu1 %v12631_v1 }
 0x627   :  { %11463 = vmatpush3.bf16.msra.mxu0 %v7797_v48  ;;  %v8551_v48 = vld [vmem:[#allocation5 + $0x1b] ss:$36 sm:$0x3] }
 0x628   :  { %11473 = vmatpush3.bf16.msra.mxu1 %v7868_v2  ;;  %11478 = vmatprep.subr.bf16.mxu0 %v12631_v1  ;;  %v12551_v2 = vld [vmem:[%s15790_s5 + $0x230] sm:$0xff]  }
 0x629   :  { %11488 = vmatprep.subr.bf16.mxu1 %v12631_v1 }
 0x62a   :  { %11465 = vmatmul.mubr.msk.bf16.vlgmr.msra.gmra.mrb[108].mxu0 %vm3315_vm9, %v7771_v33  ;;  %v12553_v33 = vld [vmem:[%s15790_s5 + $0x238] sm:$0xff]  }
 0x62b   :  { %11475 = vmatmul.mubr.msk.bf16.vlgmr.msra.gmra.mrb[124].mxu1 %vm3315_vm9, %v7842_v13  ;;  %11479 = vmatpush3.bf16.msra.mxu0 %v12521_v22  ;;  %v8552_v22 = vpack.c.bf16 %v8551_v48, %v8551_v48  ;;  %v12555_v13 = vld [vmem:[%s15790_s5 + $0x240] ss:$0 sps:$4 sm:$0x33]  }
 0x62c   :  { %11489 = vmatpush3.bf16.msra.mxu1 %v12522_v37  ;;  %11480 = vmatprep.subr.bf16.mxu0 %v12631_v1  ;;  %v12554_v37 = vld [vmem:[%s15790_s5 + $0x24c] sm:$0xff]  }
 0x62d   :  { %11490 = vmatprep.subr.bf16.mxu1 %v12631_v1  ;;  %11484 = vmatprep.mubr.msk.bf16.mxu0 %vm12633_vm2, %v12631_v1 }
 0x62e   :  { %11494 = vmatprep.mubr.msk.bf16.mxu1 %vm12633_vm2, %v12631_v1 }
 0x62f   :  { %11481 = vmatpush3.bf16.msra.mxu0 %v12523_v41  ;;  %v12556_v41 = vld [vmem:[%s15790_s5 + $0x254] ss:$0 sps:$4 sm:$0x33]  }
 0x630   :  { %11491 = vmatpush3.bf16.msra.mxu1 %v12524_v56  ;;  %11482 = vmatprep.subr.bf16.mxu0 %v12631_v1  ;;  %v8649_v56 = vsel %vm6670_vm11, %v12555_v13, 0  ;;  %v8720_v25 = vsel %vm6670_vm11, %v12556_v41, 0 }
 0x631   :  { %11492 = vmatprep.subr.bf16.mxu1 %v12631_v1 }
 0x633   :  { %11483 = vmatpush3.bf16.msra.mxu0 %v7939_v40  ;;  %v8693_v40 = vld [vmem:[#allocation5 + $0x1d] ss:$36 sm:$0x3] }
 0x634   :  { %11493 = vmatpush3.bf16.msra.mxu1 %v8010_v62  ;;  %11498 = vmatprep.subr.bf16.mxu0 %v12631_v1  ;;  %v12557_v62 = vld [vmem:[%s15790_s5 + $0x258] sm:$0xff]  }
 0x635   :  { %11508 = vmatprep.subr.bf16.mxu1 %v12631_v1 }
 0x636   :  { %11485 = vmatmul.mubr.msk.bf16.vlgmr.msra.gmra.mrb[112].mxu0 %vm3315_vm9, %v7913_v59  ;;  %v12559_v59 = vld [vmem:[%s15790_s5 + $0x260] sm:$0xff]  }
 0x637   :  { %11495 = vmatmul.mubr.msk.bf16.vlgmr.msra.gmra.mrb[128].mxu1 %vm3315_vm9, %v7984_v14  ;;  %11499 = vmatpush3.bf16.msra.mxu0 %v12527_v36  ;;  %v8694_v36 = vpack.c.bf16 %v8693_v40, %v8693_v40  ;;  %v12561_v14 = vld [vmem:[%s15790_s5 + $0x268] ss:$0 sps:$4 sm:$0x33]  }
 0x638   :  { %11509 = vmatpush3.bf16.msra.mxu1 %v12528_v12  ;;  %11500 = vmatprep.subr.bf16.mxu0 %v12631_v1  ;;  %v12560_v12 = vld [vmem:[%s15790_s5 + $0x274] sm:$0xff]  }
 0x639   :  { %11510 = vmatprep.subr.bf16.mxu1 %v12631_v1  ;;  %11504 = vmatprep.mubr.msk.bf16.mxu0 %vm12633_vm2, %v12631_v1 }
 0x63a   :  { %11514 = vmatprep.mubr.msk.bf16.mxu1 %vm12633_vm2, %v12631_v1 }
 0x63b   :  { %11501 = vmatpush3.bf16.msra.mxu0 %v12529_v24  ;;  %v12562_v24 = vld [vmem:[%s15790_s5 + $0x27c] ss:$0 sps:$4 sm:$0x33]  }
 0x63c   :  { %11511 = vmatpush3.bf16.msra.mxu1 %v12530_v46  ;;  %11502 = vmatprep.subr.bf16.mxu0 %v12631_v1  ;;  %v8791_v46 = vsel %vm6670_vm11, %v12561_v14, 0  ;;  %v8862_v30 = vsel %vm6670_vm11, %v12562_v24, 0 }
 0x63d   :  { %11512 = vmatprep.subr.bf16.mxu1 %v12631_v1 }
 0x63f   :  { %11503 = vmatpush3.bf16.msra.mxu0 %v8081_v58  ;;  %v8835_v58 = vld [vmem:[#allocation5 + $0x1f] ss:$36 sm:$0x3] }
 0x640   :  { %11513 = vmatpush3.bf16.msra.mxu1 %v8152_v20  ;;  %11518 = vmatprep.subr.bf16.mxu0 %v12631_v1  ;;  %v12563_v20 = vld [vmem:[%s15790_s5 + $0x280] sm:$0xff]  }
 0x641   :  { %11528 = vmatprep.subr.bf16.mxu1 %v12631_v1 }
 0x642   :  { %11505 = vmatmul.mubr.msk.bf16.vlgmr.msra.gmra.mrb[116].mxu0 %vm3315_vm9, %v8055_v6  ;;  %v12565_v6 = vld [vmem:[%s15790_s5 + $0x288] sm:$0xff]  }
 0x643   :  { %11515 = vmatmul.mubr.msk.bf16.vlgmr.msra.gmra.mrb[132].mxu1 %vm3315_vm9, %v8126_v63  ;;  %11519 = vmatpush3.bf16.msra.mxu0 %v12533_v19  ;;  %v8836_v19 = vpack.c.bf16 %v8835_v58, %v8835_v58  ;;  %v12567_v63 = vld [vmem:[%s15790_s5 + $0x290] ss:$0 sps:$4 sm:$0x33]  }
 0x644   :  { %11529 = vmatpush3.bf16.msra.mxu1 %v12534_v11  ;;  %11520 = vmatprep.subr.bf16.mxu0 %v12631_v1  ;;  %v12566_v11 = vld [vmem:[%s15790_s5 + $0x29c] sm:$0xff]  }
 0x645   :  { %11530 = vmatprep.subr.bf16.mxu1 %v12631_v1  ;;  %11524 = vmatprep.mubr.msk.bf16.mxu0 %vm12633_vm2, %v12631_v1 }
 0x646   :  { %11534 = vmatprep.mubr.msk.bf16.mxu1 %vm12633_vm2, %v12631_v1 }
 0x647   :  { %11521 = vmatpush3.bf16.msra.mxu0 %v12535_v7  ;;  %v12568_v7 = vld [vmem:[%s15790_s5 + $0x2a4] ss:$0 sps:$4 sm:$0x33]  }
 0x648   :  { %11531 = vmatpush3.bf16.msra.mxu1 %v12536_v60  ;;  %11522 = vmatprep.subr.bf16.mxu0 %v12631_v1  ;;  %v8933_v60 = vsel %vm6670_vm11, %v12567_v63, 0  ;;  %v9004_v53 = vsel %vm6670_vm11, %v12568_v7, 0 }
 0x649   :  { %11532 = vmatprep.subr.bf16.mxu1 %v12631_v1 }
 0x64b   :  { %11523 = vmatpush3.bf16.msra.mxu0 %v8223_v54  ;;  %v8977_v54 = vld [vmem:[#allocation5 + $0x21] ss:$36 sm:$0x3] }
 0x64c   :  { %11533 = vmatpush3.bf16.msra.mxu1 %v8294_v10  ;;  %11538 = vmatprep.subr.bf16.mxu0 %v12631_v1  ;;  %v12569_v10 = vld [vmem:[%s15790_s5 + $0x2a8] sm:$0xff]  }
 0x64d   :  { %11548 = vmatprep.subr.bf16.mxu1 %v12631_v1 }
 0x64e   :  { %11525 = vmatmul.mubr.msk.bf16.vlgmr.msra.gmra.mrb[120].mxu0 %vm3315_vm9, %v8197_v29  ;;  %v12571_v29 = vld [vmem:[%s15790_s5 + $0x2b0] sm:$0xff]  }
 0x64f   :  { %11535 = vmatmul.mubr.msk.bf16.vlgmr.msra.gmra.mrb[136].mxu1 %vm3315_vm9, %v8268_v51  ;;  %11539 = vmatpush3.bf16.msra.mxu0 %v12539_v57  ;;  %v8978_v57 = vpack.c.bf16 %v8977_v54, %v8977_v54  ;;  %v12573_v51 = vld [vmem:[%s15790_s5 + $0x2b8] ss:$0 sps:$4 sm:$0x33]  }
 0x650   :  { %11549 = vmatpush3.bf16.msra.mxu1 %v12540_v26  ;;  %11540 = vmatprep.subr.bf16.mxu0 %v12631_v1  ;;  %v12572_v26 = vld [vmem:[%s15790_s5 + $0x2c4] sm:$0xff]  }
 0x651   :  { %11550 = vmatprep.subr.bf16.mxu1 %v12631_v1  ;;  %11544 = vmatprep.mubr.msk.bf16.mxu0 %vm12633_vm2, %v12631_v1 }
 0x652   :  { %11554 = vmatprep.mubr.msk.bf16.mxu1 %vm12633_vm2, %v12631_v1 }
 0x653   :  { %11541 = vmatpush3.bf16.msra.mxu0 %v12541_v5  ;;  %v12574_v5 = vld [vmem:[%s15790_s5 + $0x2cc] ss:$0 sps:$4 sm:$0x33]  }
 0x654   :  { %11551 = vmatpush3.bf16.msra.mxu1 %v12542_v45  ;;  %11542 = vmatprep.subr.bf16.mxu0 %v12631_v1  ;;  %v9075_v45 = vsel %vm6670_vm11, %v12573_v51, 0  ;;  %v9146_v50 = vsel %vm6670_vm11, %v12574_v5, 0 }
 0x655   :  { %11552 = vmatprep.subr.bf16.mxu1 %v12631_v1 }
 0x657   :  { %11543 = vmatpush3.bf16.msra.mxu0 %v8365_v55  ;;  %v9119_v55 = vld [vmem:[#allocation5 + $0x23] ss:$36 sm:$0x3] }
 0x658   :  { %11553 = vmatpush3.bf16.msra.mxu1 %v8436_v21  ;;  %11558 = vmatprep.subr.bf16.mxu0 %v12631_v1  ;;  %v9049_v21 = vpack.c.bf16 %v9048_v23, %v9048_v23  ;;  %v9120_v35 = vpack.c.bf16 %v9119_v55, %v9119_v55 }
 0x659   :  { %11568 = vmatprep.subr.bf16.mxu1 %v12631_v1 }
 0x65a   :  { %11545 = vmatmul.mubr.msk.bf16.vlgmr.msra.gmra.mrb[124].mxu0 %vm3315_vm9, %v8339_v47 }
 0x65b   :  { %11555 = vmatmul.mubr.msk.bf16.vlgmr.msra.gmra.mrb[140].mxu1 %vm3315_vm9, %v8410_v61  ;;  %11559 = vmatpush3.bf16.msra.mxu0 %v12545_v9 }
 0x65c   :  { %11569 = vmatpush3.bf16.msra.mxu1 %v12546_v27  ;;  %11560 = vmatprep.subr.bf16.mxu0 %v12631_v1 }
 0x65d   :  { %11570 = vmatprep.subr.bf16.mxu1 %v12631_v1  ;;  %11564 = vmatprep.mubr.msk.bf16.mxu0 %vm12633_vm2, %v12631_v1 }
 0x65e   :  { %11574 = vmatprep.mubr.msk.bf16.mxu1 %vm12633_vm2, %v12631_v1 }
 0x65f   :  { %11561 = vmatpush3.bf16.msra.mxu0 %v12547_v39 }
 0x660   :  { %11571 = vmatpush3.bf16.msra.mxu1 %v12548_v31  ;;  %11562 = vmatprep.subr.bf16.mxu0 %v12631_v1 }
 0x661   :  { %11572 = vmatprep.subr.bf16.mxu1 %v12631_v1 }
 0x663   :  { %11563 = vmatpush3.bf16.msra.mxu0 %v8507_v44 }
 0x664   :  { %11573 = vmatpush3.bf16.msra.mxu1 %v8578_v15  ;;  %11578 = vmatprep.subr.bf16.mxu0 %v12631_v1 }
 0x665   :  { %11588 = vmatprep.subr.bf16.mxu1 %v12631_v1 }
 0x666   :  { %11565 = vmatmul.mubr.msk.bf16.vlgmr.msra.gmra.mrb[128].mxu0 %vm3315_vm9, %v8481_v38 }
 0x667   :  { %11575 = vmatmul.mubr.msk.bf16.vlgmr.msra.gmra.mrb[144].mxu1 %vm3315_vm9, %v8552_v22  ;;  %11579 = vmatpush3.bf16.msra.mxu0 %v12551_v2 }
 0x668   :  { %11589 = vmatpush3.bf16.msra.mxu1 %v12552_v42  ;;  %11580 = vmatprep.subr.bf16.mxu0 %v12631_v1 }
 0x669   :  { %11590 = vmatprep.subr.bf16.mxu1 %v12631_v1  ;;  %11584 = vmatprep.mubr.msk.bf16.mxu0 %vm12633_vm2, %v12631_v1 }
 0x66a   :  { %11594 = vmatprep.mubr.msk.bf16.mxu1 %vm12633_vm2, %v12631_v1 }
 0x66b   :  { %11581 = vmatpush3.bf16.msra.mxu0 %v12553_v33 }
 0x66c   :  { %11591 = vmatpush3.bf16.msra.mxu1 %v12554_v37  ;;  %11582 = vmatprep.subr.bf16.mxu0 %v12631_v1 }
 0x66d   :  { %11592 = vmatprep.subr.bf16.mxu1 %v12631_v1 }
 0x66f   :  { %11583 = vmatpush3.bf16.msra.mxu0 %v8649_v56 }
 0x670   :  { %11593 = vmatpush3.bf16.msra.mxu1 %v8720_v25  ;;  %11598 = vmatprep.subr.bf16.mxu0 %v12631_v1 }
 0x671   :  { %11608 = vmatprep.subr.bf16.mxu1 %v12631_v1 }
 0x672   :  { %11585 = vmatmul.mubr.msk.bf16.vlgmr.msra.gmra.mrb[132].mxu0 %vm3315_vm9, %v8623_v43 }
 0x673   :  { %11595 = vmatmul.mubr.msk.bf16.vlgmr.msra.gmra.mrb[148].mxu1 %vm3315_vm9, %v8694_v36  ;;  %11599 = vmatpush3.bf16.msra.mxu0 %v12557_v62 }
 0x674   :  { %11609 = vmatpush3.bf16.msra.mxu1 %v12558_v4  ;;  %11600 = vmatprep.subr.bf16.mxu0 %v12631_v1 }
 0x675   :  { %11610 = vmatprep.subr.bf16.mxu1 %v12631_v1  ;;  %11604 = vmatprep.mubr.msk.bf16.mxu0 %vm12633_vm2, %v12631_v1 }
 0x676   :  { %11614 = vmatprep.mubr.msk.bf16.mxu1 %vm12633_vm2, %v12631_v1 }
 0x677   :  { %11601 = vmatpush3.bf16.msra.mxu0 %v12559_v59 }
 0x678   :  { %11611 = vmatpush3.bf16.msra.mxu1 %v12560_v12  ;;  %11602 = vmatprep.subr.bf16.mxu0 %v12631_v1 }
 0x679   :  { %11612 = vmatprep.subr.bf16.mxu1 %v12631_v1 }
 0x67b   :  { %11603 = vmatpush3.bf16.msra.mxu0 %v8791_v46 }
 0x67c   :  { %11613 = vmatpush3.bf16.msra.mxu1 %v8862_v30  ;;  %11618 = vmatprep.subr.bf16.mxu0 %v12631_v1 }
 0x67d   :  { %11628 = vmatprep.subr.bf16.mxu1 %v12631_v1 }
 0x67e   :  { %11605 = vmatmul.mubr.msk.bf16.vlgmr.msra.gmra.mrb[136].mxu0 %vm3315_vm9, %v8765_v34 }
 0x67f   :  { %11615 = vmatmul.mubr.msk.bf16.vlgmr.msra.gmra.mrb[152].mxu1 %vm3315_vm9, %v8836_v19  ;;  %11619 = vmatpush3.bf16.msra.mxu0 %v12563_v20 }
 0x680   :  { %11629 = vmatpush3.bf16.msra.mxu1 %v12564_v49  ;;  %11620 = vmatprep.subr.bf16.mxu0 %v12631_v1 }
 0x681   :  { %11630 = vmatprep.subr.bf16.mxu1 %v12631_v1  ;;  %11624 = vmatprep.mubr.msk.bf16.mxu0 %vm12633_vm2, %v12631_v1 }
 0x682   :  { %11634 = vmatprep.mubr.msk.bf16.mxu1 %vm12633_vm2, %v12631_v1 }
 0x683   :  { %11621 = vmatpush3.bf16.msra.mxu0 %v12565_v6 }
 0x684   :  { %11631 = vmatpush3.bf16.msra.mxu1 %v12566_v11  ;;  %11622 = vmatprep.subr.bf16.mxu0 %v12631_v1 }
 0x685   :  { %11632 = vmatprep.subr.bf16.mxu1 %v12631_v1 }
 0x687   :  { %11623 = vmatpush3.bf16.msra.mxu0 %v8933_v60 }
 0x688   :  { %11633 = vmatpush3.bf16.msra.mxu1 %v9004_v53  ;;  %11638 = vmatprep.subr.bf16.mxu0 %v12631_v1 }
 0x689   :  { %11648 = vmatprep.subr.bf16.mxu1 %v12631_v1 }
 0x68a   :  { %11625 = vmatmul.mubr.msk.bf16.vlgmr.msra.gmra.mrb[140].mxu0 %vm3315_vm9, %v8907_v52  ;;  %v12576_v52 = vld [vmem:[%s15792_s7 + $0x8] sm:$0xff]  }
 0x68b   :  { %11635 = vmatmul.mubr.msk.bf16.vlgmr.msra.gmra.mrb[156].mxu1 %vm3315_vm9, %v8978_v57  ;;  %11639 = vmatpush3.bf16.msra.mxu0 %v12569_v10  ;;  %v12575_v10 = vld [vmem:[%s15792_s7] sm:$0xff]  }
 0x68c   :  { %11649 = vmatpush3.bf16.msra.mxu1 %v12570_v3  ;;  %11640 = vmatprep.subr.bf16.mxu0 %v12631_v1 }
 0x68d   :  { %11650 = vmatprep.subr.bf16.mxu1 %v12631_v1  ;;  %11644 = vmatprep.mubr.msk.bf16.mxu0 %vm12633_vm2, %v12631_v1 }
 0x68e   :  { %11654 = vmatprep.mubr.msk.bf16.mxu1 %vm12633_vm2, %v12631_v1 }
 0x68f   :  { %11641 = vmatpush3.bf16.msra.mxu0 %v12571_v29 }
 0x690   :  { %11651 = vmatpush3.bf16.msra.mxu1 %v12572_v26  ;;  %11642 = vmatprep.subr.bf16.mxu0 %v12631_v1 }
 0x691   :  { %11652 = vmatprep.subr.bf16.mxu1 %v12631_v1 }
 0x693   :  { %11643 = vmatpush3.bf16.msra.mxu0 %v9075_v45 }
 0x694   :  { %11653 = vmatpush3.bf16.msra.mxu1 %v9146_v50  ;;  %11658 = vmatprep.subr.bf16.mxu0 %v12631_v1 }
 0x696   :  { %11645 = vmatmul.mubr.msk.bf16.vlgmr.msra.gmra.mrb[144].mxu0 %vm3315_vm9, %v9049_v21  ;;  %v12577_v21 = vld [vmem:[%s15792_s7 + $0x10] sm:$0xff]  }
 0x697   :  { %11655 = vmatmul.mubr.msk.bf16.vlgmr.msra.gmra.mrb[160].mxu1 %vm3315_vm9, %v9120_v35  ;;  %11674 = vmatprep.mubr.msk.bf16.mxu0 %vm12633_vm2, %v12631_v1  ;;  %v12578_v35 = vld [vmem:[%s15792_s7 + $0x18] sm:$0xff]  }
 0x698   :  { %11659 = vmatpush3.bf16.msra.mxu0 %v12575_v10 }
 0x699   :  { %11660 = vmatprep.subr.bf16.mxu0 %v12631_v1 }
 0x69c   :  { %11661 = vmatpush3.bf16.msra.mxu0 %v12576_v52 }
 0x69d   :  { %v6708_v28 = vpop.f32.mrb[76].mxu0  ;;  %11662 = vmatprep.subr.bf16.mxu0 %v12631_v1 }
 0x69e   :  { %v6769_v9 = vpop.f32.mrb[92].mxu1  ;;  %v11306_v47 = vpop.f32.mrb[77].mxu0 }
 0x69f   :  { %v6770_v27 = vadd.f32 %v6769_v9, %v6708_v28  ;;  %v11316_v61 = vpop.f32.mrb[93].mxu1  ;;  %v6711_v39 = vpop.f32.mrb[78].mxu0 }
 0x6a0   :  { %v6772_v31 = vpop.f32.mrb[94].mxu1  ;;  %v11307_v32 = vpop.f32.mrb[79].mxu0  ;;  %11663 = vmatpush3.bf16.msra.mxu0 %v12577_v21  ;;  %v12579_v61 = vld [vmem:[%s15792_s7 + $0x20] sm:$0xff]  }
 0x6a1   :  { %v11317_v8 = vpop.f32.mrb[95].mxu1  ;;  %11664 = vmatprep.subr.bf16.mxu0 %v12631_v1 }
 0x6a4   :  { %11665 = vmatpush3.bf16.msra.mxu0 %v12578_v35 }
 0x6a5   :  { %11666 = vmatprep.subr.bf16.mxu0 %v12631_v1 }
 0x6a8   :  { %11667 = vmatpush3.bf16.msra.mxu0 %v12579_v61 }
 0x6a9   :  { %v6839_v44 = vpop.f32.mrb[80].mxu0  ;;  %11668 = vmatprep.subr.bf16.mxu0 %v12631_v1 }
 0x6aa   :  { %v6845_v15 = vadd.f32 %v6839_v44, %v6770_v27  ;;  %v6910_v17 = vpop.f32.mrb[96].mxu1  ;;  %v11326_v48 = vpop.f32.mrb[81].mxu0 }
 0x6ab   :  { %v11336_v2 = vpop.f32.mrb[97].mxu1  ;;  %v6842_v38 = vpop.f32.mrb[82].mxu0 }
 0x6ac   :  { %v6916_v42 = vadd.f32 %v6910_v17, %v6845_v15  ;;  %v6913_v22 = vpop.f32.mrb[98].mxu1  ;;  %v11327_v33 = vpop.f32.mrb[83].mxu0  ;;  %v12580_v17 = vld [vmem:[%s15792_s7 + $0x28] sm:$0xff]  }
 0x6ad   :  { %v11337_v37 = vpop.f32.mrb[99].mxu1  ;;  %11669 = vmatpush3.bf16.msra.mxu0 %v12580_v17  ;;  %v12581_v22 = vld [vmem:[%s15792_s7 + $0x30] sm:$0xff]  }
 0x6ae   :  { %11670 = vmatprep.subr.bf16.mxu0 %v12631_v1 }
 0x6b1   :  { %11671 = vmatpush3.bf16.msra.mxu0 %v12581_v22 }
 0x6b2   :  { %11672 = vmatprep.subr.bf16.mxu0 %v12631_v1 }
 0x6b5   :  { %v6981_v13 = vpop.f32.mrb[84].mxu0 }
 0x6b6   :  { %v6987_v41 = vadd.f32 %v6981_v13, %v6916_v42  ;;  %v7052_v56 = vpop.f32.mrb[100].mxu1  ;;  %v11346_v25 = vpop.f32.mrb[85].mxu0 }
 0x6b7   :  { %v11356_v18 = vpop.f32.mrb[101].mxu1  ;;  %v6984_v40 = vpop.f32.mrb[86].mxu0  ;;  %v12582_v25 = vld [vmem:[%s15792_s7 + $0x38] sm:$0xff]  }
 0x6b8   :  { %v7058_v62 = vadd.f32 %v7052_v56, %v6987_v41  ;;  %v7055_v43 = vpop.f32.mrb[102].mxu1  ;;  %v11347_v4 = vpop.f32.mrb[87].mxu0  ;;  %11673 = vmatpush3.bf16.msra.mxu0 %v12582_v25 }
 0x6b9   :  { %v11357_v36 = vpop.f32.mrb[103].mxu1 }
 0x6c1   :  { %v7123_v59 = vpop.f32.mrb[88].mxu0 }
 0x6c2   :  { %v7129_v12 = vadd.f32 %v7123_v59, %v7058_v62  ;;  %v7194_v14 = vpop.f32.mrb[104].mxu1  ;;  %v11366_v24 = vpop.f32.mrb[89].mxu0 }
 0x6c3   :  { %v11376_v46 = vpop.f32.mrb[105].mxu1  ;;  %v7126_v30 = vpop.f32.mrb[90].mxu0 }
 0x6c4   :  { %v7200_v0 = vadd.f32 %v7194_v14, %v7129_v12  ;;  %v7197_v58 = vpop.f32.mrb[106].mxu1  ;;  %v11367_v20 = vpop.f32.mrb[91].mxu0 }
 0x6c5   :  { %v11377_v34 = vpop.f32.mrb[107].mxu1 }
 0x6cd   :  { %v7265_v49 = vpop.f32.mrb[92].mxu0 }
 0x6ce   :  { %v7271_v19 = vadd.f32 %v7265_v49, %v7200_v0  ;;  %v7336_v6 = vpop.f32.mrb[108].mxu1  ;;  %v11386_v11 = vpop.f32.mrb[93].mxu0 }
 0x6cf   :  { %v11396_v63 = vpop.f32.mrb[109].mxu1  ;;  %v7268_v7 = vpop.f32.mrb[94].mxu0 }
 0x6d0   :  { %v7342_v60 = vadd.f32 %v7336_v6, %v7271_v19  ;;  %v7339_v53 = vpop.f32.mrb[110].mxu1  ;;  %v11387_v16 = vpop.f32.mrb[95].mxu0 }
 0x6d1   :  { %v11397_v54 = vpop.f32.mrb[111].mxu1 }
 0x6d9   :  { %v7407_v3 = vpop.f32.mrb[96].mxu0 }
 0x6da   :  { %v7413_v57 = vadd.f32 %v7407_v3, %v7342_v60  ;;  %v7478_v29 = vpop.f32.mrb[112].mxu1  ;;  %v11406_v26 = vpop.f32.mrb[97].mxu0 }
 0x6db   :  { %v11416_v51 = vpop.f32.mrb[113].mxu1  ;;  %v7410_v5 = vpop.f32.mrb[98].mxu0 }
 0x6dc   :  { %v7484_v45 = vadd.f32 %v7478_v29, %v7413_v57  ;;  %v7481_v50 = vpop.f32.mrb[114].mxu1  ;;  %v11407_v23 = vpop.f32.mrb[99].mxu0 }
 0x6dd   :  { %v11417_v55 = vpop.f32.mrb[115].mxu1 }
 0x6e5   :  { %v7549_v28 = vpop.f32.mrb[100].mxu0 }
 0x6e6   :  { %v7555_v9 = vadd.f32 %v7549_v28, %v7484_v45  ;;  %v7620_v47 = vpop.f32.mrb[116].mxu1  ;;  %v11426_v27 = vpop.f32.mrb[101].mxu0 }
 0x6e7   :  { %v11436_v39 = vpop.f32.mrb[117].mxu1  ;;  %v7552_v31 = vpop.f32.mrb[102].mxu0 }
 0x6e8   :  { %v7626_v32 = vadd.f32 %v7620_v47, %v7555_v9  ;;  %v7623_v8 = vpop.f32.mrb[118].mxu1  ;;  %v11427_v44 = vpop.f32.mrb[103].mxu0 }
 0x6e9   :  { %v11437_v15 = vpop.f32.mrb[119].mxu1 }
 0x6f1   :  { %v7691_v48 = vpop.f32.mrb[104].mxu0 }
 0x6f2   :  { %v7697_v2 = vadd.f32 %v7691_v48, %v7626_v32  ;;  %v7762_v38 = vpop.f32.mrb[120].mxu1  ;;  %v11446_v42 = vpop.f32.mrb[105].mxu0 }
 0x6f3   :  { %v11456_v33 = vpop.f32.mrb[121].mxu1  ;;  %v7694_v37 = vpop.f32.mrb[106].mxu0 }
 0x6f4   :  { %v7768_v13 = vadd.f32 %v7762_v38, %v7697_v2  ;;  %v7765_v41 = vpop.f32.mrb[122].mxu1  ;;  %v11447_v56 = vpop.f32.mrb[107].mxu0 }
 0x6f5   :  { %v11457_v18 = vpop.f32.mrb[123].mxu1 }
 0x6fd   :  { %v7833_v40 = vpop.f32.mrb[108].mxu0 }
 0x6fe   :  { %v7839_v62 = vadd.f32 %v7833_v40, %v7768_v13  ;;  %v7904_v43 = vpop.f32.mrb[124].mxu1  ;;  %v11466_v4 = vpop.f32.mrb[109].mxu0 }
 0x6ff   :  { %v11476_v36 = vpop.f32.mrb[125].mxu1  ;;  %v7836_v59 = vpop.f32.mrb[110].mxu0 }
 0x700   :  { %v7910_v12 = vadd.f32 %v7904_v43, %v7839_v62  ;;  %v7907_v14 = vpop.f32.mrb[126].mxu1  ;;  %v11467_v24 = vpop.f32.mrb[111].mxu0 }
 0x701   :  { %v11477_v46 = vpop.f32.mrb[127].mxu1 }
 0x709   :  { %v7975_v30 = vpop.f32.mrb[112].mxu0 }
 0x70a   :  { %v7981_v0 = vadd.f32 %v7975_v30, %v7910_v12  ;;  %v8046_v58 = vpop.f32.mrb[128].mxu1  ;;  %v11486_v20 = vpop.f32.mrb[113].mxu0 }
 0x70b   :  { %v11496_v34 = vpop.f32.mrb[129].mxu1  ;;  %v7978_v49 = vpop.f32.mrb[114].mxu0 }
 0x70c   :  { %v8052_v19 = vadd.f32 %v8046_v58, %v7981_v0  ;;  %v8049_v6 = vpop.f32.mrb[130].mxu1  ;;  %v11487_v1 = vpop.f32.mrb[115].mxu0 }
 0x70d   :  { %v11497_v11 = vpop.f32.mrb[131].mxu1 }
 0x715   :  { %v8117_v63 = vpop.f32.mrb[116].mxu0 }
 0x716   :  { %v8123_v7 = vadd.f32 %v8117_v63, %v8052_v19  ;;  %v8188_v60 = vpop.f32.mrb[132].mxu1  ;;  %v11506_v53 = vpop.f32.mrb[117].mxu0 }
 0x717   :  { %v11516_v16 = vpop.f32.mrb[133].mxu1  ;;  %v8120_v54 = vpop.f32.mrb[118].mxu0 }
 0x718   :  { %v8194_v10 = vadd.f32 %v8188_v60, %v8123_v7  ;;  %v8191_v52 = vpop.f32.mrb[134].mxu1  ;;  %v11507_v3 = vpop.f32.mrb[119].mxu0 }
 0x719   :  { %v11517_v57 = vpop.f32.mrb[135].mxu1 }
 0x721   :  { %v8259_v29 = vpop.f32.mrb[120].mxu0 }
 0x722   :  { %v8265_v26 = vadd.f32 %v8259_v29, %v8194_v10  ;;  %v8330_v51 = vpop.f32.mrb[136].mxu1  ;;  %v11526_v5 = vpop.f32.mrb[121].mxu0  ;;  %v10111_v29 = vld [vmem:[%s15791_s6] ss:$0 sm:$0xff]  ;;  %s12607_s6 = scalar_lea.vmem %s9319_s0, 32 }
 0x723   :  { %v11536_v45 = vpop.f32.mrb[137].mxu1  ;;  %v8262_v50 = vpop.f32.mrb[122].mxu0  ;;  %p12608_p0 = scmp.ne.s32.totalorder %s9319_s0, %s12607_s6  ;;  %p12613_p2 = scmp.lt.s32.totalorder %s12607_s6, %s12607_s6 }
 0x724   :  { %v8336_v23 = vadd.f32 %v8330_v51, %v8265_v26  ;;  %v8333_v55 = vpop.f32.mrb[138].mxu1  ;;  %v11527_v21 = vpop.f32.mrb[123].mxu0 }
 0x725   :  { %v11537_v35 = vpop.f32.mrb[139].mxu1  ;;  %p12614_p3 = por %p12613_p2, %p12612_p1 }
 0x727   :  { %p12615_p4 = pnand %p12614_p3, %p12608_p0 }
 0x72d   :  { %v8401_v28 = vpop.f32.mrb[124].mxu0 }
 0x72e   :  { %v8407_v9 = vadd.f32 %v8401_v28, %v8336_v23  ;;  %v8472_v47 = vpop.f32.mrb[140].mxu1  ;;  %v11546_v27 = vpop.f32.mrb[125].mxu0  ;;  %v10112_v28 = vld [vmem:[%s15793_s8] ss:$0 sm:$0xff] }
 0x72f   :  { %v11556_v61 = vpop.f32.mrb[141].mxu1  ;;  %v8404_v39 = vpop.f32.mrb[126].mxu0 }
 0x730   :  { %v8478_v31 = vadd.f32 %v8472_v47, %v8407_v9  ;;  %v8475_v32 = vpop.f32.mrb[142].mxu1  ;;  %v11547_v8 = vpop.f32.mrb[127].mxu0 }
 0x731   :  { %v11557_v44 = vpop.f32.mrb[143].mxu1 }
 0x739   :  { %v8543_v15 = vpop.f32.mrb[128].mxu0 }
 0x73a   :  { %v8549_v17 = vadd.f32 %v8543_v15, %v8478_v31  ;;  %v8614_v48 = vpop.f32.mrb[144].mxu1  ;;  %v11566_v2 = vpop.f32.mrb[129].mxu0 }
 0x73b   :  { %v11576_v38 = vpop.f32.mrb[145].mxu1  ;;  %v8546_v42 = vpop.f32.mrb[130].mxu0 }
 0x73c   :  { %v8620_v22 = vadd.f32 %v8614_v48, %v8549_v17  ;;  %v8617_v33 = vpop.f32.mrb[146].mxu1  ;;  %v11567_v37 = vpop.f32.mrb[131].mxu0 }
 0x73d   :  { %v11577_v13 = vpop.f32.mrb[147].mxu1 }
 0x745   :  { %v8685_v41 = vpop.f32.mrb[132].mxu0 }
 0x746   :  { %v8691_v56 = vadd.f32 %v8685_v41, %v8620_v22  ;;  %v8756_v25 = vpop.f32.mrb[148].mxu1  ;;  %v11586_v18 = vpop.f32.mrb[133].mxu0 }
 0x747   :  { %v11596_v40 = vpop.f32.mrb[149].mxu1  ;;  %v8688_v62 = vpop.f32.mrb[134].mxu0 }
 0x748   :  { %v8762_v43 = vadd.f32 %v8756_v25, %v8691_v56  ;;  %v8759_v4 = vpop.f32.mrb[150].mxu1  ;;  %v11587_v36 = vpop.f32.mrb[135].mxu0 }
 0x749   :  { %v11597_v59 = vpop.f32.mrb[151].mxu1 }
 0x751   :  { %v8827_v12 = vpop.f32.mrb[136].mxu0 }
 0x752   :  { %v8833_v14 = vadd.f32 %v8827_v12, %v8762_v43  ;;  %v8898_v24 = vpop.f32.mrb[152].mxu1  ;;  %v11606_v46 = vpop.f32.mrb[137].mxu0 }
 0x753   :  { %v11616_v30 = vpop.f32.mrb[153].mxu1  ;;  %v8830_v0 = vpop.f32.mrb[138].mxu0 }
 0x754   :  { %v8904_v58 = vadd.f32 %v8898_v24, %v8833_v14  ;;  %v8901_v20 = vpop.f32.mrb[154].mxu1  ;;  %v11607_v34 = vpop.f32.mrb[139].mxu0 }
 0x755   :  { %v11617_v49 = vpop.f32.mrb[155].mxu1 }
 0x75d   :  { %v8969_v19 = vpop.f32.mrb[140].mxu0 }
 0x75e   :  { %v8975_v6 = vadd.f32 %v8969_v19, %v8904_v58  ;;  %v9040_v1 = vpop.f32.mrb[156].mxu1  ;;  %v11626_v11 = vpop.f32.mrb[141].mxu0 }
 0x75f   :  { %v11636_v63 = vpop.f32.mrb[157].mxu1  ;;  %v8972_v7 = vpop.f32.mrb[142].mxu0 }
 0x760   :  { %v9046_v60 = vadd.f32 %v9040_v1, %v8975_v6  ;;  %v9043_v53 = vpop.f32.mrb[158].mxu1  ;;  %v11627_v16 = vpop.f32.mrb[143].mxu0 }
 0x761   :  { %v11637_v54 = vpop.f32.mrb[159].mxu1 }
 0x769   :  { %v9111_v10 = vpop.f32.mrb[144].mxu0 }
 0x76a   :  { %v9117_v52 = vadd.f32 %v9111_v10, %v9046_v60  ;;  %v9182_v3 = vpop.f32.mrb[160].mxu1  ;;  %v11646_v57 = vpop.f32.mrb[145].mxu0 }
 0x76b   :  { %v11656_v26 = vpop.f32.mrb[161].mxu1  ;;  %v9114_v51 = vpop.f32.mrb[146].mxu0 }
 0x76c   :  { %v9188_v5 = vadd.f32 %v9182_v3, %v9117_v52  ;;  %v9185_v45 = vpop.f32.mrb[162].mxu1  ;;  %v11647_v50 = vpop.f32.mrb[147].mxu0 }
 0x76d   :  { %v11657_v23 = vpop.f32.mrb[163].mxu1 }
 0x76e   :  { %v9196_v55 = vadd.f32 %v10111_v29, %v9188_v5 }
 0x770   :  { %v9197_v21 = vmax.f32 %v9196_v55, 0.0 }
 0x772   :  { %v9198_v35 = vpack.c.bf16 %v9197_v21, %v9197_v21 }
 0x774   :  { %11675 = vmatmul.mubr.bf16.vlgmr.msra.gmra.mrb[148].mxu0 %v9198_v35 }
 0x847   :  { %v9304_v9 = vpop.f32.mrb[148].mxu0 }
 0x848   :  { %v9305_v47 = vadd.f32 %v10112_v28, %v9304_v9  ;;  %v11676_v27 = vpop.f32.mrb[149].mxu0 }
 0x849   :  { %v9307_v61 = vpop.f32.mrb[150].mxu0 }
 0x84a   :  { %v9310_v39 = vmax.f32 %v9305_v47, 0.0  ;;  %v11677_v31 = vpop.f32.mrb[151].mxu0 }
 0x84c   :  { %9311 = vst [vmem:[#allocation6] sm:$0x3] %v9310_v39 }
 0x84d   :  { %12618 = shalt.err (!%p12615_p4)
}
 0x84e   :  { %s12619_s8 = scalar_lea.hbm %s15794_s9, 32 }
 0x84f   :  { %p12620_p5 = scmp.ne.s32.totalorder %s15794_s9, %s12619_s8  ;;  %p12623_p6 = scmp.lt.u32.totalorder %s12619_s8, %s15794_s9 }
 0x851   :  { %p12625_p7 = pnand %p12623_p6, %p12620_p5 }
 0x853   :  { %12628 = shalt.err (!%p12625_p7)
}
 0x854   :  { %9321 = dma.vmem_to_hbm [thread:$0]  %s9319_s0, 32, %s15794_s9, [#allocation7]  }
 0x855   :  { %12629 = dma.done.wait [#allocation7], 32  }
 0x856   :  { %12630 = vsyncadd [#allocation7], 4294967264 }
 0x857   :  { %9325 = vsyncpa [#allocation7], 1 }

</bundles_post_ra>
